<compile_context>
chip_gen: v7x
topology: tpu7x:2x2x1
jax: 0.10.0
libtpu: 0.0.40
codegen_flags: <defaults>
</compile_context>

<pallas_src>
import functools

import jax
import jax.numpy as jnp
from jax.experimental import pallas as pl
from jax.experimental.pallas import tpu as pltpu


def _round_up(x, m):
    return (x + m - 1) // m * m


def _cdiv(a, b):
    return -(-a // b)


# --------------------------------------------------------------------------
# Pallas kernel 1: conv-as-GEMM.  bf16 x bf16 -> f32 MXU matmul, fused bias,
# plus per-M-tile BatchNorm partial sums (sum / sum-of-squares) so the conv
# output never has to be re-read for statistics.
# --------------------------------------------------------------------------
def _matmul_bias_stats_kernel(a_ref, b_ref, bias_ref, o_ref, s_ref, sq_ref,
                              *, valid_m, tile_m):
    n = o_ref.shape[1]
    y = jnp.dot(a_ref[...], b_ref[...],
                preferred_element_type=jnp.float32) + bias_ref[...]
    o_ref[...] = y.astype(o_ref.dtype)

    # Mask rows of the (possibly ragged) last tile out of the statistics.
    row = (pl.program_id(0) * tile_m
           + jax.lax.broadcasted_iota(jnp.int32, (tile_m, n), 0))
    ym = jnp.where(row < valid_m, y, 0.0)
    s = jnp.sum(ym, axis=0, keepdims=True)            # (1, N)
    sq = jnp.sum(ym * ym, axis=0, keepdims=True)      # (1, N)
    s_ref[...] = jnp.broadcast_to(s, s_ref.shape)
    sq_ref[...] = jnp.broadcast_to(sq, sq_ref.shape)


def matmul_bias_stats(a, b, bias, *, tm=512):
    """a: [M, K], b: [K, N], bias: [N] -> (y [M, N] f32, sum [N], sumsq [N]).

    1-D grid over M only (full K and N resident per step, no zero padding of
    K or N); bf16 operands, f32 accumulation; last M tile may be ragged.
    """
    M, K = a.shape
    K2, N = b.shape
    assert K == K2
    tm = min(tm, _round_up(M, 8))
    G = _cdiv(M, tm)
    kernel = functools.partial(_matmul_bias_stats_kernel,
                               valid_m=M, tile_m=tm)
    y, s, sq = pl.pallas_call(
        kernel,
        out_shape=(jax.ShapeDtypeStruct((M, N), jnp.float32),
                   jax.ShapeDtypeStruct((G * 8, N), jnp.float32),
                   jax.ShapeDtypeStruct((G * 8, N), jnp.float32)),
        grid_spec=pltpu.PrefetchScalarGridSpec(
            num_scalar_prefetch=0,
            grid=(G,),
            in_specs=[
                pl.BlockSpec((tm, K), lambda i: (i, 0)),
                pl.BlockSpec((K, N), lambda i: (0, 0)),
                pl.BlockSpec((1, N), lambda i: (0, 0)),
            ],
            out_specs=(
                pl.BlockSpec((tm, N), lambda i: (i, 0)),
                pl.BlockSpec((8, N), lambda i: (i, 0)),
                pl.BlockSpec((8, N), lambda i: (i, 0)),
            ),
        ),
        compiler_params=pltpu.CompilerParams(
            dimension_semantics=("parallel",)),
    )(a.astype(jnp.bfloat16), b.astype(jnp.bfloat16),
      bias.reshape(1, N).astype(jnp.float32))
    s_tot = s.reshape(G, 8, N)[:, 0, :].sum(axis=0)
    sq_tot = sq.reshape(G, 8, N)[:, 0, :].sum(axis=0)
    return y, s_tot, sq_tot


# --------------------------------------------------------------------------
# Pallas kernel 2: plain matmul + bias for the Linear layers (tiny M=batch).
# --------------------------------------------------------------------------
def _matmul_bias_kernel(a_ref, b_ref, bias_ref, o_ref):
    o_ref[...] = (jnp.dot(a_ref[...], b_ref[...],
                          preferred_element_type=jnp.float32)
                  + bias_ref[...]).astype(o_ref.dtype)


def linear(x, w_t, bias):
    """x: [B, K], w_t: [K, N] (pre-transposed), bias: [N] -> [B, N] f32."""
    B, K = x.shape
    K2, N = w_t.shape
    assert K == K2
    Bp = _round_up(max(B, 8), 8)                 # pad batch to 8 rows only
    xp = jnp.pad(x.astype(jnp.bfloat16), ((0, Bp - B), (0, 0)))
    out = pl.pallas_call(
        _matmul_bias_kernel,
        out_shape=jax.ShapeDtypeStruct((Bp, N), jnp.float32),
        grid_spec=pltpu.PrefetchScalarGridSpec(
            num_scalar_prefetch=0,
            grid=(1,),
            in_specs=[
                pl.BlockSpec((Bp, K), lambda i: (0, 0)),
                pl.BlockSpec((K, N), lambda i: (0, 0)),
                pl.BlockSpec((1, N), lambda i: (0, 0)),
            ],
            out_specs=pl.BlockSpec((Bp, N), lambda i: (0, 0)),
        ),
    )(xp, w_t.astype(jnp.bfloat16), bias.reshape(1, N).astype(jnp.float32))
    return out[:B]


# --------------------------------------------------------------------------
# Pallas kernel 3: fused BatchNorm(train) + ReLU + 2x2 MaxPool.
# Input block is a chunk of NHWC conv output; pooling is done in-kernel with
# strided sublane reads (no strided-slice copies in XLA).
# --------------------------------------------------------------------------
def _bn_relu_pool_kernel(x_ref, scale_ref, shift_ref, o_ref):
    rt, pw, _ = o_ref.shape
    sc = scale_ref[...]                          # (1, OC) f32
    sh = shift_ref[...]                          # (1, OC) f32

    def body(i, carry):
        def tap(r, c):
            v = x_ref[2 * i + r, pl.ds(c, pw, 2), :].astype(jnp.float32)
            return jnp.maximum(v * sc + sh, 0.0)          # BN + ReLU
        o_ref[i, :, :] = jnp.maximum(
            jnp.maximum(tap(0, 0), tap(0, 1)),
            jnp.maximum(tap(1, 0), tap(1, 1))).astype(o_ref.dtype)
        return carry

    jax.lax.fori_loop(0, rt, body, 0)


def bn_relu_pool(y4, scale, shift, *, out_dtype=jnp.bfloat16):
    """y4: [B, OH, OW, OC] f32 conv output -> [B, OH//2, OW//2, OC]."""
    B, OH, OW, OC = y4.shape
    ph, pw = OH // 2, OW // 2
    rt = min(8, ph)                              # pooled rows per grid step
    gj = _cdiv(ph, rt)
    return pl.pallas_call(
        _bn_relu_pool_kernel,
        out_shape=jax.ShapeDtypeStruct((B, ph, pw, OC), out_dtype),
        grid_spec=pltpu.PrefetchScalarGridSpec(
            num_scalar_prefetch=0,
            grid=(B, gj),
            in_specs=[
                pl.BlockSpec((None, 2 * rt, OW, OC),
                             lambda b, j: (b, j, 0, 0)),
                pl.BlockSpec((1, OC), lambda b, j: (0, 0)),
                pl.BlockSpec((1, OC), lambda b, j: (0, 0)),
            ],
            out_specs=pl.BlockSpec((None, rt, pw, OC),
                                   lambda b, j: (b, j, 0, 0)),
        ),
        compiler_params=pltpu.CompilerParams(
            dimension_semantics=("parallel", "parallel")),
    )(y4, scale.reshape(1, OC).astype(jnp.float32),
      shift.reshape(1, OC).astype(jnp.float32))


# --------------------------------------------------------------------------
# Layer glue: NHWC im2col -> matmul(+stats) -> fused BN/ReLU/pool (stays NHWC)
# --------------------------------------------------------------------------
def conv_bn_relu_pool(x_nhwc, w, b, gamma, beta, *, stride, pad, eps=1e-5):
    B, H, W, C = x_nhwc.shape
    OC, IC, KH, KW = w.shape
    assert IC == C
    xp = jnp.pad(x_nhwc.astype(jnp.bfloat16),
                 ((0, 0), (pad, pad), (pad, pad), (0, 0)))
    Hp, Wp = H + 2 * pad, W + 2 * pad
    OH = (Hp - KH) // stride + 1
    OW = (Wp - KW) // stride + 1

    # Structured im2col: one strided slice per kernel tap (no gather HLO).
    taps = []
    for kh in range(KH):
        for kw in range(KW):
            taps.append(xp[:, kh:kh + stride * (OH - 1) + 1:stride,
                           kw:kw + stride * (OW - 1) + 1:stride, :])
    patches = jnp.stack(taps, axis=3).reshape(B * OH * OW, KH * KW * C)
    wmat = jnp.transpose(w, (2, 3, 1, 0)).reshape(KH * KW * C, OC)

    # Pallas MXU matmul with fused bias and fused BN partial statistics.
    y, s, sq = matmul_bias_stats(patches, wmat, b)

    # BatchNorm (training mode): batch statistics over N*H*W, biased variance.
    count = B * OH * OW
    mean = s / count
    var = jnp.maximum(sq / count - mean * mean, 0.0)   # guard cancellation
    scale = gamma * jax.lax.rsqrt(var + eps)
    shift = beta - mean * scale

    y4 = y.reshape(B, OH, OW, OC)              # free row-major reinterpret
    return bn_relu_pool(y4, scale, shift)      # [B, OH//2, OW//2, OC] (NHWC)


def dropout(x, p, key):
    # Matches torch dropout semantics (keep-prob 1-p, scale 1/(1-p)), but
    # cannot match torch's RNG stream bitwise.
    keep = jax.random.bernoulli(key, 1.0 - p, x.shape)
    return jnp.where(keep, x / (1.0 - p), 0.0)


# --------------------------------------------------------------------------
# Parameters (deterministic synthetic init; torch-default BN affine = 1, 0).
# Linear weights are stored PRE-TRANSPOSED ([in, out]) so no per-call .T/pad.
# --------------------------------------------------------------------------
def init_params(key):
    ks = jax.random.split(key, 10)
    f32 = jnp.float32
    return {
        "w1": 0.10 * jax.random.normal(ks[0], (32, 2, 4, 4), f32),
        "b1": 0.01 * jax.random.normal(ks[1], (32,), f32),
        "g1": jnp.ones((32,), f32), "be1": jnp.zeros((32,), f32),
        "w2": 0.05 * jax.random.normal(ks[2], (64, 32, 4, 4), f32),
        "b2": 0.01 * jax.random.normal(ks[3], (64,), f32),
        "g2": jnp.ones((64,), f32), "be2": jnp.zeros((64,), f32),
        "w3": 0.05 * jax.random.normal(ks[4], (128, 64, 2, 2), f32),
        "b3": 0.01 * jax.random.normal(ks[5], (128,), f32),
        "g3": jnp.ones((128,), f32), "be3": jnp.zeros((128,), f32),
        "wl1_t": 0.02 * jax.random.normal(ks[6], (7680, 128), f32),
        "bl1": 0.01 * jax.random.normal(ks[7], (128,), f32),
        "wl2_t": 0.05 * jax.random.normal(ks[8], (128, 1), f32),
        "bl2": 0.01 * jax.random.normal(ks[9], (1,), f32),
    }


def small_cnn_forward(params, x_nchw, dropout_key):
    B = x_nchw.shape[0]
    k1, k2, k3 = jax.random.split(dropout_key, 3)
    x = jnp.transpose(x_nchw, (0, 2, 3, 1))      # NCHW -> NHWC once, up front
    x = conv_bn_relu_pool(x, params["w1"], params["b1"], params["g1"],
                          params["be1"], stride=2, pad=4)
    x = conv_bn_relu_pool(x, params["w2"], params["b2"], params["g2"],
                          params["be2"], stride=2, pad=4)
    x = conv_bn_relu_pool(x, params["w3"], params["b3"], params["g3"],
                          params["be3"], stride=1, pad=2)
    # torch flattens in NCHW order: [B, C, ph, pw] -> [B, C*ph*pw] (tiny here)
    x = jnp.transpose(x, (0, 3, 1, 2)).reshape(B, -1)       # [B, 7680]
    x = dropout(x, 0.2, k1)                                  # F.dropout default training=True
    x = linear(x, params["wl1_t"], params["bl1"])            # lin1 (Pallas)
    x = dropout(x, 0.3, k2)
    x = linear(x, params["wl2_t"], params["bl2"])            # lin2 (Pallas)
    x = dropout(x, 0.5, k3)
    return x.reshape(-1)                                     # [B]


if __name__ == "__main__":
    key = jax.random.PRNGKey(0)
    pkey, xkey, dkey = jax.random.split(key, 3)
    params = init_params(pkey)
    # Input: NCHW, 2 channels.  128x256 spatial is the smallest size whose
    # conv/pool pipeline yields exactly lin1's 7680 input features:
    # 128x256 -> 67x131 -> 33x65 -> 19x35 -> 9x17 -> 12x20 -> 6x10; 128*6*10 = 7680.
    x = jax.random.normal(xkey, (2, 2, 128, 256), jnp.float32)
    fwd = jax.jit(small_cnn_forward)
    out = jax.block_until_ready(fwd(params, x, dkey))
    assert out.shape == (2,), out.shape
    assert out.dtype == jnp.float32, out.dtype
    print("KERNEL_OK")
</pallas_src>

<mosaic_0001>
module attributes {stable_mosaic.version = 11 : i64} {
  func.func @_matmul_bias_stats_kernel(%arg0: i32, %arg1: memref<512x32xbf16, #tpu.memory_space<vmem>>, %arg2: memref<32x32xbf16, #tpu.memory_space<vmem>>, %arg3: memref<1x32xf32, #tpu.memory_space<vmem>>, %arg4: memref<512x32xf32, #tpu.memory_space<vmem>>, %arg5: memref<8x32xf32, #tpu.memory_space<vmem>>, %arg6: memref<8x32xf32, #tpu.memory_space<vmem>>) attributes {dimension_semantics = [#tpu.dimension_semantics<parallel>], iteration_bounds = array<i64: 35>, scalar_prefetch = 0 : i64, scratch_operands = 0 : i64, tpu.core_type = #tpu.core_type<tc>, window_params = [{transform_indices = @transform_0, window_bounds = array<i64: 512, 32>}, {pipeline_mode = #tpu.pipeline_mode<synchronous>, transform_indices = @transform_1, window_bounds = array<i64: 32, 32>}, {pipeline_mode = #tpu.pipeline_mode<synchronous>, transform_indices = @transform_2, window_bounds = array<i64: 1, 32>}, {transform_indices = @transform_3, window_bounds = array<i64: 512, 32>}, {transform_indices = @transform_4, window_bounds = array<i64: 8, 32>}, {transform_indices = @transform_5, window_bounds = array<i64: 8, 32>}]} {
    %c0 = arith.constant 0 : index
    %c0_0 = arith.constant 0 : index
    %0 = vector.load %arg1[%c0, %c0_0] : memref<512x32xbf16, #tpu.memory_space<vmem>>, vector<512x32xbf16>
    %c0_1 = arith.constant 0 : index
    %c0_2 = arith.constant 0 : index
    %1 = vector.load %arg2[%c0_1, %c0_2] : memref<32x32xbf16, #tpu.memory_space<vmem>>, vector<32x32xbf16>
    %cst = arith.constant dense<0.000000e+00> : vector<512x32xf32>
    %2 = tpu.matmul %0, %1, %cst {dimension_numbers = #tpu.dot_dimension_numbers<[1], [0], [0], [1], [0, 0, 1, 1], [], []>} : vector<512x32xbf16>, vector<32x32xbf16>, vector<512x32xf32> -> vector<512x32xf32>
    %c0_3 = arith.constant 0 : index
    %c0_4 = arith.constant 0 : index
    %3 = vector.load %arg3[%c0_3, %c0_4] : memref<1x32xf32, #tpu.memory_space<vmem>>, vector<1x32xf32>
    %4 = vector.broadcast %3 : vector<1x32xf32> to vector<512x32xf32>
    %5 = arith.addf %2, %4 : vector<512x32xf32>
    %c0_5 = arith.constant 0 : index
    %c0_6 = arith.constant 0 : index
    %6 = vector.load %arg4[%c0_5, %c0_6] : memref<512x32xf32, #tpu.memory_space<vmem>>, vector<512x32xf32>
    tpu.vector_store %arg4[%c0_5, %c0_6], %5 {strides = array<i32>} : memref<512x32xf32, #tpu.memory_space<vmem>>, vector<512x32xf32>,
    %c512_i32 = arith.constant 512 : i32
    %7 = arith.muli %arg0, %c512_i32 : i32
    %8 = tpu.iota {dimensions = array<i32: 0>} : vector<512x32xi32>
    %9 = vector.broadcast %7 : i32 to vector<512x32xi32>
    %10 = arith.addi %9, %8 : vector<512x32xi32>
    %c17554_i32 = arith.constant 17554 : i32
    %11 = vector.broadcast %c17554_i32 : i32 to vector<512x32xi32>
    %12 = arith.cmpi slt, %10, %11 : vector<512x32xi32>
    %cst_7 = arith.constant 0.000000e+00 : f32
    %13 = vector.broadcast %cst_7 : f32 to vector<512x32xf32>
    %14 = arith.select %12, %5, %13 : vector<512x32xi1>, vector<512x32xf32>
    %cst_8 = arith.constant dense<0.000000e+00> : vector<32xf32>
    %15 = vector.multi_reduction <add>, %14, %cst_8 [0] : vector<512x32xf32> to vector<32xf32>
    %16 = vector.shape_cast %15 : vector<32xf32> to vector<1x32xf32>
    %17 = arith.mulf %14, %14 : vector<512x32xf32>
    %cst_9 = arith.constant dense<0.000000e+00> : vector<32xf32>
    %18 = vector.multi_reduction <add>, %17, %cst_9 [0] : vector<512x32xf32> to vector<32xf32>
    %19 = vector.shape_cast %18 : vector<32xf32> to vector<1x32xf32>
    %20 = vector.shape_cast %16 : vector<1x32xf32> to vector<1x32xf32>
    %21 = vector.broadcast %20 : vector<1x32xf32> to vector<8x32xf32>
    %c0_10 = arith.constant 0 : index
    %c0_11 = arith.constant 0 : index
    %22 = vector.load %arg5[%c0_10, %c0_11] : memref<8x32xf32, #tpu.memory_space<vmem>>, vector<8x32xf32>
    tpu.vector_store %arg5[%c0_10, %c0_11], %21 {strides = array<i32>} : memref<8x32xf32, #tpu.memory_space<vmem>>, vector<8x32xf32>,
    %23 = vector.shape_cast %19 : vector<1x32xf32> to vector<1x32xf32>
    %24 = vector.broadcast %23 : vector<1x32xf32> to vector<8x32xf32>
    %c0_12 = arith.constant 0 : index
    %c0_13 = arith.constant 0 : index
    %25 = vector.load %arg6[%c0_12, %c0_13] : memref<8x32xf32, #tpu.memory_space<vmem>>, vector<8x32xf32>
    tpu.vector_store %arg6[%c0_12, %c0_13], %24 {strides = array<i32>} : memref<8x32xf32, #tpu.memory_space<vmem>>, vector<8x32xf32>,
    return
  }
  func.func @transform_0(%arg0: i32) -> (i32, i32) {
    %c0_i32 = arith.constant 0 : i32
    %c0_i32_0 = arith.constant 0 : i32
    return %arg0, %c0_i32 : i32, i32
  }
  func.func @transform_1(%arg0: i32) -> (i32, i32) {
    %c0_i32 = arith.constant 0 : i32
    %c0_i32_0 = arith.constant 0 : i32
    %c0_i32_1 = arith.constant 0 : i32
    return %c0_i32, %c0_i32_0 : i32, i32
  }
  func.func @transform_2(%arg0: i32) -> (i32, i32) {
    %c0_i32 = arith.constant 0 : i32
    %c0_i32_0 = arith.constant 0 : i32
    %c0_i32_1 = arith.constant 0 : i32
    return %c0_i32, %c0_i32_0 : i32, i32
  }
  func.func @transform_3(%arg0: i32) -> (i32, i32) {
    %c0_i32 = arith.constant 0 : i32
    %c0_i32_0 = arith.constant 0 : i32
    return %arg0, %c0_i32 : i32, i32
  }
  func.func @transform_4(%arg0: i32) -> (i32, i32) {
    %c0_i32 = arith.constant 0 : i32
    %c0_i32_0 = arith.constant 0 : i32
    return %arg0, %c0_i32 : i32, i32
  }
  func.func @transform_5(%arg0: i32) -> (i32, i32) {
    %c0_i32 = arith.constant 0 : i32
    %c0_i32_0 = arith.constant 0 : i32
    return %arg0, %c0_i32 : i32, i32
  }
}

module attributes {stable_mosaic.version = 11 : i64} {
  func.func @_bn_relu_pool_kernel(%arg0: i32, %arg1: i32, %arg2: memref<1x16x131x32xf32, #tpu.memory_space<vmem>>, %arg3: memref<1x32xf32, #tpu.memory_space<vmem>>, %arg4: memref<1x32xf32, #tpu.memory_space<vmem>>, %arg5: memref<1x8x65x32xbf16, #tpu.memory_space<vmem>>) attributes {dimension_semantics = [#tpu.dimension_semantics<parallel>, #tpu.dimension_semantics<parallel>], iteration_bounds = array<i64: 2, 5>, scalar_prefetch = 0 : i64, scratch_operands = 0 : i64, tpu.core_type = #tpu.core_type<tc>, window_params = [{transform_indices = @transform_0, window_bounds = array<i64: 1, 16, 131, 32>}, {pipeline_mode = #tpu.pipeline_mode<synchronous>, transform_indices = @transform_1, window_bounds = array<i64: 1, 32>}, {pipeline_mode = #tpu.pipeline_mode<synchronous>, transform_indices = @transform_2, window_bounds = array<i64: 1, 32>}, {transform_indices = @transform_3, window_bounds = array<i64: 1, 8, 65, 32>}]} {
    %c0 = arith.constant 0 : index
    %c0_0 = arith.constant 0 : index
    %0 = vector.load %arg3[%c0, %c0_0] : memref<1x32xf32, #tpu.memory_space<vmem>>, vector<1x32xf32>
    %c0_1 = arith.constant 0 : index
    %c0_2 = arith.constant 0 : index
    %1 = vector.load %arg4[%c0_1, %c0_2] : memref<1x32xf32, #tpu.memory_space<vmem>>, vector<1x32xf32>
    %c0_i32 = arith.constant 0 : i32
    %c8_i32 = arith.constant 8 : i32
    %2 = arith.addi %c0_i32, %c8_i32 : i32
    %c1_i32 = arith.constant 1 : i32
    scf.for %arg6 = %c0_i32 to %2 step %c1_i32  : i32 {
      %c2_i32 = arith.constant 2 : i32
      %3 = arith.muli %c2_i32, %arg6 : i32
      %c0_i32_4 = arith.constant 0 : i32
      %4 = arith.addi %3, %c0_i32_4 : i32
      %c0_5 = arith.constant 0 : index
      %5 = arith.index_cast %4 : i32 to index
      %c0_6 = arith.constant 0 : index
      %c0_7 = arith.constant 0 : index
      %6 = tpu.strided_load %arg2[%c0_5, %5, %c0_6, %c0_7] {strides = array<i32: 1, 1, 2, 1>} : memref<1x16x131x32xf32, #tpu.memory_space<vmem>>, vector<1x1x65x32xf32>
      %7 = vector.shape_cast %6 : vector<1x1x65x32xf32> to vector<65x32xf32>
      %8 = vector.broadcast %0 : vector<1x32xf32> to vector<65x32xf32>
      %9 = arith.mulf %7, %8 : vector<65x32xf32>
      %10 = vector.broadcast %1 : vector<1x32xf32> to vector<65x32xf32>
      %11 = arith.addf %9, %10 : vector<65x32xf32>
      %cst = arith.constant 0.000000e+00 : f32
      %12 = vector.broadcast %cst : f32 to vector<65x32xf32>
      %13 = arith.maximumf %11, %12 : vector<65x32xf32>
      %c2_i32_8 = arith.constant 2 : i32
      %14 = arith.muli %c2_i32_8, %arg6 : i32
      %c0_i32_9 = arith.constant 0 : i32
      %15 = arith.addi %14, %c0_i32_9 : i32
      %c0_10 = arith.constant 0 : index
      %16 = arith.index_cast %15 : i32 to index
      %c1 = arith.constant 1 : index
      %c0_11 = arith.constant 0 : index
      %17 = tpu.strided_load %arg2[%c0_10, %16, %c1, %c0_11] {strides = array<i32: 1, 1, 2, 1>} : memref<1x16x131x32xf32, #tpu.memory_space<vmem>>, vector<1x1x65x32xf32>
      %18 = vector.shape_cast %17 : vector<1x1x65x32xf32> to vector<65x32xf32>
      %19 = vector.broadcast %0 : vector<1x32xf32> to vector<65x32xf32>
      %20 = arith.mulf %18, %19 : vector<65x32xf32>
      %21 = vector.broadcast %1 : vector<1x32xf32> to vector<65x32xf32>
      %22 = arith.addf %20, %21 : vector<65x32xf32>
      %cst_12 = arith.constant 0.000000e+00 : f32
      %23 = vector.broadcast %cst_12 : f32 to vector<65x32xf32>
      %24 = arith.maximumf %22, %23 : vector<65x32xf32>
      %25 = arith.maximumf %13, %24 : vector<65x32xf32>
      %c2_i32_13 = arith.constant 2 : i32
      %26 = arith.muli %c2_i32_13, %arg6 : i32
      %c1_i32_14 = arith.constant 1 : i32
      %27 = arith.addi %26, %c1_i32_14 : i32
      %c0_15 = arith.constant 0 : index
      %28 = arith.index_cast %27 : i32 to index
      %c0_16 = arith.constant 0 : index
      %c0_17 = arith.constant 0 : index
      %29 = tpu.strided_load %arg2[%c0_15, %28, %c0_16, %c0_17] {strides = array<i32: 1, 1, 2, 1>} : memref<1x16x131x32xf32, #tpu.memory_space<vmem>>, vector<1x1x65x32xf32>
      %30 = vector.shape_cast %29 : vector<1x1x65x32xf32> to vector<65x32xf32>
      %31 = vector.broadcast %0 : vector<1x32xf32> to vector<65x32xf32>
      %32 = arith.mulf %30, %31 : vector<65x32xf32>
      %33 = vector.broadcast %1 : vector<1x32xf32> to vector<65x32xf32>
      %34 = arith.addf %32, %33 : vector<65x32xf32>
      %cst_18 = arith.constant 0.000000e+00 : f32
      %35 = vector.broadcast %cst_18 : f32 to vector<65x32xf32>
      %36 = arith.maximumf %34, %35 : vector<65x32xf32>
      %c2_i32_19 = arith.constant 2 : i32
      %37 = arith.muli %c2_i32_19, %arg6 : i32
      %c1_i32_20 = arith.constant 1 : i32
      %38 = arith.addi %37, %c1_i32_20 : i32
      %c0_21 = arith.constant 0 : index
      %39 = arith.index_cast %38 : i32 to index
      %c1_22 = arith.constant 1 : index
      %c0_23 = arith.constant 0 : index
      %40 = tpu.strided_load %arg2[%c0_21, %39, %c1_22, %c0_23] {strides = array<i32: 1, 1, 2, 1>} : memref<1x16x131x32xf32, #tpu.memory_space<vmem>>, vector<1x1x65x32xf32>
      %41 = vector.shape_cast %40 : vector<1x1x65x32xf32> to vector<65x32xf32>
      %42 = vector.broadcast %0 : vector<1x32xf32> to vector<65x32xf32>
      %43 = arith.mulf %41, %42 : vector<65x32xf32>
      %44 = vector.broadcast %1 : vector<1x32xf32> to vector<65x32xf32>
      %45 = arith.addf %43, %44 : vector<65x32xf32>
      %cst_24 = arith.constant 0.000000e+00 : f32
      %46 = vector.broadcast %cst_24 : f32 to vector<65x32xf32>
      %47 = arith.maximumf %45, %46 : vector<65x32xf32>
      %48 = arith.maximumf %36, %47 : vector<65x32xf32>
      %49 = arith.maximumf %25, %48 : vector<65x32xf32>
      %50 = arith.truncf %49 : vector<65x32xf32> to vector<65x32xbf16>
      %c0_25 = arith.constant 0 : index
      %51 = arith.index_cast %arg6 : i32 to index
      %c0_26 = arith.constant 0 : index
      %c0_27 = arith.constant 0 : index
      %52 = vector.load %arg5[%c0_25, %51, %c0_26, %c0_27] : memref<1x8x65x32xbf16, #tpu.memory_space<vmem>>, vector<1x1x65x32xbf16>
      %53 = vector.shape_cast %52 : vector<1x1x65x32xbf16> to vector<65x32xbf16>
      %54 = vector.shape_cast %50 : vector<65x32xbf16> to vector<1x1x65x32xbf16>
      tpu.vector_store %arg5[%c0_25, %51, %c0_26, %c0_27], %54 {strides = array<i32>} : memref<1x8x65x32xbf16, #tpu.memory_space<vmem>>, vector<1x1x65x32xbf16>,
    }
    %c8_i32_3 = arith.constant 8 : i32
    return
  }
  func.func @transform_0(%arg0: i32, %arg1: i32) -> (i32, i32, i32, i32) {
    %c0_i32 = arith.constant 0 : i32
    %c0_i32_0 = arith.constant 0 : i32
    %c0_i32_1 = arith.constant 0 : i32
    return %arg0, %arg1, %c0_i32, %c0_i32_0 : i32, i32, i32, i32
  }
  func.func @transform_1(%arg0: i32, %arg1: i32) -> (i32, i32) {
    %c0_i32 = arith.constant 0 : i32
    %c0_i32_0 = arith.constant 0 : i32
    %c0_i32_1 = arith.constant 0 : i32
    return %c0_i32, %c0_i32_0 : i32, i32
  }
  func.func @transform_2(%arg0: i32, %arg1: i32) -> (i32, i32) {
    %c0_i32 = arith.constant 0 : i32
    %c0_i32_0 = arith.constant 0 : i32
    %c0_i32_1 = arith.constant 0 : i32
    return %c0_i32, %c0_i32_0 : i32, i32
  }
  func.func @transform_3(%arg0: i32, %arg1: i32) -> (i32, i32, i32, i32) {
    %c0_i32 = arith.constant 0 : i32
    %c0_i32_0 = arith.constant 0 : i32
    %c0_i32_1 = arith.constant 0 : i32
    return %arg0, %arg1, %c0_i32, %c0_i32_0 : i32, i32, i32, i32
  }
}

module attributes {stable_mosaic.version = 11 : i64} {
  func.func @_matmul_bias_stats_kernel(%arg0: i32, %arg1: memref<512x512xbf16, #tpu.memory_space<vmem>>, %arg2: memref<512x64xbf16, #tpu.memory_space<vmem>>, %arg3: memref<1x64xf32, #tpu.memory_space<vmem>>, %arg4: memref<512x64xf32, #tpu.memory_space<vmem>>, %arg5: memref<8x64xf32, #tpu.memory_space<vmem>>, %arg6: memref<8x64xf32, #tpu.memory_space<vmem>>) attributes {dimension_semantics = [#tpu.dimension_semantics<parallel>], iteration_bounds = array<i64: 3>, scalar_prefetch = 0 : i64, scratch_operands = 0 : i64, tpu.core_type = #tpu.core_type<tc>, window_params = [{transform_indices = @transform_0, window_bounds = array<i64: 512, 512>}, {pipeline_mode = #tpu.pipeline_mode<synchronous>, transform_indices = @transform_1, window_bounds = array<i64: 512, 64>}, {pipeline_mode = #tpu.pipeline_mode<synchronous>, transform_indices = @transform_2, window_bounds = array<i64: 1, 64>}, {transform_indices = @transform_3, window_bounds = array<i64: 512, 64>}, {transform_indices = @transform_4, window_bounds = array<i64: 8, 64>}, {transform_indices = @transform_5, window_bounds = array<i64: 8, 64>}]} {
    %c0 = arith.constant 0 : index
    %c0_0 = arith.constant 0 : index
    %0 = vector.load %arg1[%c0, %c0_0] : memref<512x512xbf16, #tpu.memory_space<vmem>>, vector<512x512xbf16>
    %c0_1 = arith.constant 0 : index
    %c0_2 = arith.constant 0 : index
    %1 = vector.load %arg2[%c0_1, %c0_2] : memref<512x64xbf16, #tpu.memory_space<vmem>>, vector<512x64xbf16>
    %cst = arith.constant dense<0.000000e+00> : vector<512x64xf32>
    %2 = tpu.matmul %0, %1, %cst {dimension_numbers = #tpu.dot_dimension_numbers<[1], [0], [0], [1], [0, 0, 1, 1], [], []>} : vector<512x512xbf16>, vector<512x64xbf16>, vector<512x64xf32> -> vector<512x64xf32>
    %c0_3 = arith.constant 0 : index
    %c0_4 = arith.constant 0 : index
    %3 = vector.load %arg3[%c0_3, %c0_4] : memref<1x64xf32, #tpu.memory_space<vmem>>, vector<1x64xf32>
    %4 = vector.broadcast %3 : vector<1x64xf32> to vector<512x64xf32>
    %5 = arith.addf %2, %4 : vector<512x64xf32>
    %c0_5 = arith.constant 0 : index
    %c0_6 = arith.constant 0 : index
    %6 = vector.load %arg4[%c0_5, %c0_6] : memref<512x64xf32, #tpu.memory_space<vmem>>, vector<512x64xf32>
    tpu.vector_store %arg4[%c0_5, %c0_6], %5 {strides = array<i32>} : memref<512x64xf32, #tpu.memory_space<vmem>>, vector<512x64xf32>,
    %c512_i32 = arith.constant 512 : i32
    %7 = arith.muli %arg0, %c512_i32 : i32
    %8 = tpu.iota {dimensions = array<i32: 0>} : vector<512x64xi32>
    %9 = vector.broadcast %7 : i32 to vector<512x64xi32>
    %10 = arith.addi %9, %8 : vector<512x64xi32>
    %c1330_i32 = arith.constant 1330 : i32
    %11 = vector.broadcast %c1330_i32 : i32 to vector<512x64xi32>
    %12 = arith.cmpi slt, %10, %11 : vector<512x64xi32>
    %cst_7 = arith.constant 0.000000e+00 : f32
    %13 = vector.broadcast %cst_7 : f32 to vector<512x64xf32>
    %14 = arith.select %12, %5, %13 : vector<512x64xi1>, vector<512x64xf32>
    %cst_8 = arith.constant dense<0.000000e+00> : vector<64xf32>
    %15 = vector.multi_reduction <add>, %14, %cst_8 [0] : vector<512x64xf32> to vector<64xf32>
    %16 = vector.shape_cast %15 : vector<64xf32> to vector<1x64xf32>
    %17 = arith.mulf %14, %14 : vector<512x64xf32>
    %cst_9 = arith.constant dense<0.000000e+00> : vector<64xf32>
    %18 = vector.multi_reduction <add>, %17, %cst_9 [0] : vector<512x64xf32> to vector<64xf32>
    %19 = vector.shape_cast %18 : vector<64xf32> to vector<1x64xf32>
    %20 = vector.shape_cast %16 : vector<1x64xf32> to vector<1x64xf32>
    %21 = vector.broadcast %20 : vector<1x64xf32> to vector<8x64xf32>
    %c0_10 = arith.constant 0 : index
    %c0_11 = arith.constant 0 : index
    %22 = vector.load %arg5[%c0_10, %c0_11] : memref<8x64xf32, #tpu.memory_space<vmem>>, vector<8x64xf32>
    tpu.vector_store %arg5[%c0_10, %c0_11], %21 {strides = array<i32>} : memref<8x64xf32, #tpu.memory_space<vmem>>, vector<8x64xf32>,
    %23 = vector.shape_cast %19 : vector<1x64xf32> to vector<1x64xf32>
    %24 = vector.broadcast %23 : vector<1x64xf32> to vector<8x64xf32>
    %c0_12 = arith.constant 0 : index
    %c0_13 = arith.constant 0 : index
    %25 = vector.load %arg6[%c0_12, %c0_13] : memref<8x64xf32, #tpu.memory_space<vmem>>, vector<8x64xf32>
    tpu.vector_store %arg6[%c0_12, %c0_13], %24 {strides = array<i32>} : memref<8x64xf32, #tpu.memory_space<vmem>>, vector<8x64xf32>,
    return
  }
  func.func @transform_0(%arg0: i32) -> (i32, i32) {
    %c0_i32 = arith.constant 0 : i32
    %c0_i32_0 = arith.constant 0 : i32
    return %arg0, %c0_i32 : i32, i32
  }
  func.func @transform_1(%arg0: i32) -> (i32, i32) {
    %c0_i32 = arith.constant 0 : i32
    %c0_i32_0 = arith.constant 0 : i32
    %c0_i32_1 = arith.constant 0 : i32
    return %c0_i32, %c0_i32_0 : i32, i32
  }
  func.func @transform_2(%arg0: i32) -> (i32, i32) {
    %c0_i32 = arith.constant 0 : i32
    %c0_i32_0 = arith.constant 0 : i32
    %c0_i32_1 = arith.constant 0 : i32
    return %c0_i32, %c0_i32_0 : i32, i32
  }
  func.func @transform_3(%arg0: i32) -> (i32, i32) {
    %c0_i32 = arith.constant 0 : i32
    %c0_i32_0 = arith.constant 0 : i32
    return %arg0, %c0_i32 : i32, i32
  }
  func.func @transform_4(%arg0: i32) -> (i32, i32) {
    %c0_i32 = arith.constant 0 : i32
    %c0_i32_0 = arith.constant 0 : i32
    return %arg0, %c0_i32 : i32, i32
  }
  func.func @transform_5(%arg0: i32) -> (i32, i32) {
    %c0_i32 = arith.constant 0 : i32
    %c0_i32_0 = arith.constant 0 : i32
    return %arg0, %c0_i32 : i32, i32
  }
}

module attributes {stable_mosaic.version = 11 : i64} {
  func.func @_bn_relu_pool_kernel(%arg0: i32, %arg1: i32, %arg2: memref<1x16x35x64xf32, #tpu.memory_space<vmem>>, %arg3: memref<1x64xf32, #tpu.memory_space<vmem>>, %arg4: memref<1x64xf32, #tpu.memory_space<vmem>>, %arg5: memref<1x8x17x64xbf16, #tpu.memory_space<vmem>>) attributes {dimension_semantics = [#tpu.dimension_semantics<parallel>, #tpu.dimension_semantics<parallel>], iteration_bounds = array<i64: 2, 2>, scalar_prefetch = 0 : i64, scratch_operands = 0 : i64, tpu.core_type = #tpu.core_type<tc>, window_params = [{transform_indices = @transform_0, window_bounds = array<i64: 1, 16, 35, 64>}, {pipeline_mode = #tpu.pipeline_mode<synchronous>, transform_indices = @transform_1, window_bounds = array<i64: 1, 64>}, {pipeline_mode = #tpu.pipeline_mode<synchronous>, transform_indices = @transform_2, window_bounds = array<i64: 1, 64>}, {transform_indices = @transform_3, window_bounds = array<i64: 1, 8, 17, 64>}]} {
    %c0 = arith.constant 0 : index
    %c0_0 = arith.constant 0 : index
    %0 = vector.load %arg3[%c0, %c0_0] : memref<1x64xf32, #tpu.memory_space<vmem>>, vector<1x64xf32>
    %c0_1 = arith.constant 0 : index
    %c0_2 = arith.constant 0 : index
    %1 = vector.load %arg4[%c0_1, %c0_2] : memref<1x64xf32, #tpu.memory_space<vmem>>, vector<1x64xf32>
    %c0_i32 = arith.constant 0 : i32
    %c8_i32 = arith.constant 8 : i32
    %2 = arith.addi %c0_i32, %c8_i32 : i32
    %c1_i32 = arith.constant 1 : i32
    scf.for %arg6 = %c0_i32 to %2 step %c1_i32  : i32 {
      %c2_i32 = arith.constant 2 : i32
      %3 = arith.muli %c2_i32, %arg6 : i32
      %c0_i32_4 = arith.constant 0 : i32
      %4 = arith.addi %3, %c0_i32_4 : i32
      %c0_5 = arith.constant 0 : index
      %5 = arith.index_cast %4 : i32 to index
      %c0_6 = arith.constant 0 : index
      %c0_7 = arith.constant 0 : index
      %6 = tpu.strided_load %arg2[%c0_5, %5, %c0_6, %c0_7] {strides = array<i32: 1, 1, 2, 1>} : memref<1x16x35x64xf32, #tpu.memory_space<vmem>>, vector<1x1x17x64xf32>
      %7 = vector.shape_cast %6 : vector<1x1x17x64xf32> to vector<17x64xf32>
      %8 = vector.broadcast %0 : vector<1x64xf32> to vector<17x64xf32>
      %9 = arith.mulf %7, %8 : vector<17x64xf32>
      %10 = vector.broadcast %1 : vector<1x64xf32> to vector<17x64xf32>
      %11 = arith.addf %9, %10 : vector<17x64xf32>
      %cst = arith.constant 0.000000e+00 : f32
      %12 = vector.broadcast %cst : f32 to vector<17x64xf32>
      %13 = arith.maximumf %11, %12 : vector<17x64xf32>
      %c2_i32_8 = arith.constant 2 : i32
      %14 = arith.muli %c2_i32_8, %arg6 : i32
      %c0_i32_9 = arith.constant 0 : i32
      %15 = arith.addi %14, %c0_i32_9 : i32
      %c0_10 = arith.constant 0 : index
      %16 = arith.index_cast %15 : i32 to index
      %c1 = arith.constant 1 : index
      %c0_11 = arith.constant 0 : index
      %17 = tpu.strided_load %arg2[%c0_10, %16, %c1, %c0_11] {strides = array<i32: 1, 1, 2, 1>} : memref<1x16x35x64xf32, #tpu.memory_space<vmem>>, vector<1x1x17x64xf32>
      %18 = vector.shape_cast %17 : vector<1x1x17x64xf32> to vector<17x64xf32>
      %19 = vector.broadcast %0 : vector<1x64xf32> to vector<17x64xf32>
      %20 = arith.mulf %18, %19 : vector<17x64xf32>
      %21 = vector.broadcast %1 : vector<1x64xf32> to vector<17x64xf32>
      %22 = arith.addf %20, %21 : vector<17x64xf32>
      %cst_12 = arith.constant 0.000000e+00 : f32
      %23 = vector.broadcast %cst_12 : f32 to vector<17x64xf32>
      %24 = arith.maximumf %22, %23 : vector<17x64xf32>
      %25 = arith.maximumf %13, %24 : vector<17x64xf32>
      %c2_i32_13 = arith.constant 2 : i32
      %26 = arith.muli %c2_i32_13, %arg6 : i32
      %c1_i32_14 = arith.constant 1 : i32
      %27 = arith.addi %26, %c1_i32_14 : i32
      %c0_15 = arith.constant 0 : index
      %28 = arith.index_cast %27 : i32 to index
      %c0_16 = arith.constant 0 : index
      %c0_17 = arith.constant 0 : index
      %29 = tpu.strided_load %arg2[%c0_15, %28, %c0_16, %c0_17] {strides = array<i32: 1, 1, 2, 1>} : memref<1x16x35x64xf32, #tpu.memory_space<vmem>>, vector<1x1x17x64xf32>
      %30 = vector.shape_cast %29 : vector<1x1x17x64xf32> to vector<17x64xf32>
      %31 = vector.broadcast %0 : vector<1x64xf32> to vector<17x64xf32>
      %32 = arith.mulf %30, %31 : vector<17x64xf32>
      %33 = vector.broadcast %1 : vector<1x64xf32> to vector<17x64xf32>
      %34 = arith.addf %32, %33 : vector<17x64xf32>
      %cst_18 = arith.constant 0.000000e+00 : f32
      %35 = vector.broadcast %cst_18 : f32 to vector<17x64xf32>
      %36 = arith.maximumf %34, %35 : vector<17x64xf32>
      %c2_i32_19 = arith.constant 2 : i32
      %37 = arith.muli %c2_i32_19, %arg6 : i32
      %c1_i32_20 = arith.constant 1 : i32
      %38 = arith.addi %37, %c1_i32_20 : i32
      %c0_21 = arith.constant 0 : index
      %39 = arith.index_cast %38 : i32 to index
      %c1_22 = arith.constant 1 : index
      %c0_23 = arith.constant 0 : index
      %40 = tpu.strided_load %arg2[%c0_21, %39, %c1_22, %c0_23] {strides = array<i32: 1, 1, 2, 1>} : memref<1x16x35x64xf32, #tpu.memory_space<vmem>>, vector<1x1x17x64xf32>
      %41 = vector.shape_cast %40 : vector<1x1x17x64xf32> to vector<17x64xf32>
      %42 = vector.broadcast %0 : vector<1x64xf32> to vector<17x64xf32>
      %43 = arith.mulf %41, %42 : vector<17x64xf32>
      %44 = vector.broadcast %1 : vector<1x64xf32> to vector<17x64xf32>
      %45 = arith.addf %43, %44 : vector<17x64xf32>
      %cst_24 = arith.constant 0.000000e+00 : f32
      %46 = vector.broadcast %cst_24 : f32 to vector<17x64xf32>
      %47 = arith.maximumf %45, %46 : vector<17x64xf32>
      %48 = arith.maximumf %36, %47 : vector<17x64xf32>
      %49 = arith.maximumf %25, %48 : vector<17x64xf32>
      %50 = arith.truncf %49 : vector<17x64xf32> to vector<17x64xbf16>
      %c0_25 = arith.constant 0 : index
      %51 = arith.index_cast %arg6 : i32 to index
      %c0_26 = arith.constant 0 : index
      %c0_27 = arith.constant 0 : index
      %52 = vector.load %arg5[%c0_25, %51, %c0_26, %c0_27] : memref<1x8x17x64xbf16, #tpu.memory_space<vmem>>, vector<1x1x17x64xbf16>
      %53 = vector.shape_cast %52 : vector<1x1x17x64xbf16> to vector<17x64xbf16>
      %54 = vector.shape_cast %50 : vector<17x64xbf16> to vector<1x1x17x64xbf16>
      tpu.vector_store %arg5[%c0_25, %51, %c0_26, %c0_27], %54 {strides = array<i32>} : memref<1x8x17x64xbf16, #tpu.memory_space<vmem>>, vector<1x1x17x64xbf16>,
    }
    %c8_i32_3 = arith.constant 8 : i32
    return
  }
  func.func @transform_0(%arg0: i32, %arg1: i32) -> (i32, i32, i32, i32) {
    %c0_i32 = arith.constant 0 : i32
    %c0_i32_0 = arith.constant 0 : i32
    %c0_i32_1 = arith.constant 0 : i32
    return %arg0, %arg1, %c0_i32, %c0_i32_0 : i32, i32, i32, i32
  }
  func.func @transform_1(%arg0: i32, %arg1: i32) -> (i32, i32) {
    %c0_i32 = arith.constant 0 : i32
    %c0_i32_0 = arith.constant 0 : i32
    %c0_i32_1 = arith.constant 0 : i32
    return %c0_i32, %c0_i32_0 : i32, i32
  }
  func.func @transform_2(%arg0: i32, %arg1: i32) -> (i32, i32) {
    %c0_i32 = arith.constant 0 : i32
    %c0_i32_0 = arith.constant 0 : i32
    %c0_i32_1 = arith.constant 0 : i32
    return %c0_i32, %c0_i32_0 : i32, i32
  }
  func.func @transform_3(%arg0: i32, %arg1: i32) -> (i32, i32, i32, i32) {
    %c0_i32 = arith.constant 0 : i32
    %c0_i32_0 = arith.constant 0 : i32
    %c0_i32_1 = arith.constant 0 : i32
    return %arg0, %arg1, %c0_i32, %c0_i32_0 : i32, i32, i32, i32
  }
}

module attributes {stable_mosaic.version = 11 : i64} {
  func.func @_matmul_bias_stats_kernel(%arg0: i32, %arg1: memref<480x256xbf16, #tpu.memory_space<vmem>>, %arg2: memref<256x128xbf16, #tpu.memory_space<vmem>>, %arg3: memref<1x128xf32, #tpu.memory_space<vmem>>, %arg4: memref<480x128xf32, #tpu.memory_space<vmem>>, %arg5: memref<8x128xf32, #tpu.memory_space<vmem>>, %arg6: memref<8x128xf32, #tpu.memory_space<vmem>>) attributes {dimension_semantics = [#tpu.dimension_semantics<parallel>], iteration_bounds = array<i64: 1>, scalar_prefetch = 0 : i64, scratch_operands = 0 : i64, tpu.core_type = #tpu.core_type<tc>, window_params = [{transform_indices = @transform_0, window_bounds = array<i64: 480, 256>}, {pipeline_mode = #tpu.pipeline_mode<synchronous>, transform_indices = @transform_1, window_bounds = array<i64: 256, 128>}, {pipeline_mode = #tpu.pipeline_mode<synchronous>, transform_indices = @transform_2, window_bounds = array<i64: 1, 128>}, {transform_indices = @transform_3, window_bounds = array<i64: 480, 128>}, {transform_indices = @transform_4, window_bounds = array<i64: 8, 128>}, {transform_indices = @transform_5, window_bounds = array<i64: 8, 128>}]} {
    %c0 = arith.constant 0 : index
    %c0_0 = arith.constant 0 : index
    %0 = vector.load %arg1[%c0, %c0_0] : memref<480x256xbf16, #tpu.memory_space<vmem>>, vector<480x256xbf16>
    %c0_1 = arith.constant 0 : index
    %c0_2 = arith.constant 0 : index
    %1 = vector.load %arg2[%c0_1, %c0_2] : memref<256x128xbf16, #tpu.memory_space<vmem>>, vector<256x128xbf16>
    %cst = arith.constant dense<0.000000e+00> : vector<480x128xf32>
    %2 = tpu.matmul %0, %1, %cst {dimension_numbers = #tpu.dot_dimension_numbers<[1], [0], [0], [1], [0, 0, 1, 1], [], []>} : vector<480x256xbf16>, vector<256x128xbf16>, vector<480x128xf32> -> vector<480x128xf32>
    %c0_3 = arith.constant 0 : index
    %c0_4 = arith.constant 0 : index
    %3 = vector.load %arg3[%c0_3, %c0_4] : memref<1x128xf32, #tpu.memory_space<vmem>>, vector<1x128xf32>
    %4 = vector.broadcast %3 : vector<1x128xf32> to vector<480x128xf32>
    %5 = arith.addf %2, %4 : vector<480x128xf32>
    %c0_5 = arith.constant 0 : index
    %c0_6 = arith.constant 0 : index
    %6 = vector.load %arg4[%c0_5, %c0_6] : memref<480x128xf32, #tpu.memory_space<vmem>>, vector<480x128xf32>
    tpu.vector_store %arg4[%c0_5, %c0_6], %5 {strides = array<i32>} : memref<480x128xf32, #tpu.memory_space<vmem>>, vector<480x128xf32>,
    %c480_i32 = arith.constant 480 : i32
    %7 = arith.muli %arg0, %c480_i32 : i32
    %8 = tpu.iota {dimensions = array<i32: 0>} : vector<480x128xi32>
    %9 = vector.broadcast %7 : i32 to vector<480x128xi32>
    %10 = arith.addi %9, %8 : vector<480x128xi32>
    %c480_i32_7 = arith.constant 480 : i32
    %11 = vector.broadcast %c480_i32_7 : i32 to vector<480x128xi32>
    %12 = arith.cmpi slt, %10, %11 : vector<480x128xi32>
    %cst_8 = arith.constant 0.000000e+00 : f32
    %13 = vector.broadcast %cst_8 : f32 to vector<480x128xf32>
    %14 = arith.select %12, %5, %13 : vector<480x128xi1>, vector<480x128xf32>
    %cst_9 = arith.constant dense<0.000000e+00> : vector<128xf32>
    %15 = vector.multi_reduction <add>, %14, %cst_9 [0] : vector<480x128xf32> to vector<128xf32>
    %16 = vector.shape_cast %15 : vector<128xf32> to vector<1x128xf32>
    %17 = arith.mulf %14, %14 : vector<480x128xf32>
    %cst_10 = arith.constant dense<0.000000e+00> : vector<128xf32>
    %18 = vector.multi_reduction <add>, %17, %cst_10 [0] : vector<480x128xf32> to vector<128xf32>
    %19 = vector.shape_cast %18 : vector<128xf32> to vector<1x128xf32>
    %20 = vector.shape_cast %16 : vector<1x128xf32> to vector<1x128xf32>
    %21 = vector.broadcast %20 : vector<1x128xf32> to vector<8x128xf32>
    %c0_11 = arith.constant 0 : index
    %c0_12 = arith.constant 0 : index
    %22 = vector.load %arg5[%c0_11, %c0_12] : memref<8x128xf32, #tpu.memory_space<vmem>>, vector<8x128xf32>
    tpu.vector_store %arg5[%c0_11, %c0_12], %21 {strides = array<i32>} : memref<8x128xf32, #tpu.memory_space<vmem>>, vector<8x128xf32>,
    %23 = vector.shape_cast %19 : vector<1x128xf32> to vector<1x128xf32>
    %24 = vector.broadcast %23 : vector<1x128xf32> to vector<8x128xf32>
    %c0_13 = arith.constant 0 : index
    %c0_14 = arith.constant 0 : index
    %25 = vector.load %arg6[%c0_13, %c0_14] : memref<8x128xf32, #tpu.memory_space<vmem>>, vector<8x128xf32>
    tpu.vector_store %arg6[%c0_13, %c0_14], %24 {strides = array<i32>} : memref<8x128xf32, #tpu.memory_space<vmem>>, vector<8x128xf32>,
    return
  }
  func.func @transform_0(%arg0: i32) -> (i32, i32) {
    %c0_i32 = arith.constant 0 : i32
    %c0_i32_0 = arith.constant 0 : i32
    return %arg0, %c0_i32 : i32, i32
  }
  func.func @transform_1(%arg0: i32) -> (i32, i32) {
    %c0_i32 = arith.constant 0 : i32
    %c0_i32_0 = arith.constant 0 : i32
    %c0_i32_1 = arith.constant 0 : i32
    return %c0_i32, %c0_i32_0 : i32, i32
  }
  func.func @transform_2(%arg0: i32) -> (i32, i32) {
    %c0_i32 = arith.constant 0 : i32
    %c0_i32_0 = arith.constant 0 : i32
    %c0_i32_1 = arith.constant 0 : i32
    return %c0_i32, %c0_i32_0 : i32, i32
  }
  func.func @transform_3(%arg0: i32) -> (i32, i32) {
    %c0_i32 = arith.constant 0 : i32
    %c0_i32_0 = arith.constant 0 : i32
    return %arg0, %c0_i32 : i32, i32
  }
  func.func @transform_4(%arg0: i32) -> (i32, i32) {
    %c0_i32 = arith.constant 0 : i32
    %c0_i32_0 = arith.constant 0 : i32
    return %arg0, %c0_i32 : i32, i32
  }
  func.func @transform_5(%arg0: i32) -> (i32, i32) {
    %c0_i32 = arith.constant 0 : i32
    %c0_i32_0 = arith.constant 0 : i32
    return %arg0, %c0_i32 : i32, i32
  }
}

module attributes {stable_mosaic.version = 11 : i64} {
  func.func @_bn_relu_pool_kernel(%arg0: i32, %arg1: i32, %arg2: memref<1x12x20x128xf32, #tpu.memory_space<vmem>>, %arg3: memref<1x128xf32, #tpu.memory_space<vmem>>, %arg4: memref<1x128xf32, #tpu.memory_space<vmem>>, %arg5: memref<1x6x10x128xbf16, #tpu.memory_space<vmem>>) attributes {dimension_semantics = [#tpu.dimension_semantics<parallel>, #tpu.dimension_semantics<parallel>], iteration_bounds = array<i64: 2, 1>, scalar_prefetch = 0 : i64, scratch_operands = 0 : i64, tpu.core_type = #tpu.core_type<tc>, window_params = [{transform_indices = @transform_0, window_bounds = array<i64: 1, 12, 20, 128>}, {pipeline_mode = #tpu.pipeline_mode<synchronous>, transform_indices = @transform_1, window_bounds = array<i64: 1, 128>}, {pipeline_mode = #tpu.pipeline_mode<synchronous>, transform_indices = @transform_2, window_bounds = array<i64: 1, 128>}, {transform_indices = @transform_3, window_bounds = array<i64: 1, 6, 10, 128>}]} {
    %c0 = arith.constant 0 : index
    %c0_0 = arith.constant 0 : index
    %0 = vector.load %arg3[%c0, %c0_0] : memref<1x128xf32, #tpu.memory_space<vmem>>, vector<1x128xf32>
    %c0_1 = arith.constant 0 : index
    %c0_2 = arith.constant 0 : index
    %1 = vector.load %arg4[%c0_1, %c0_2] : memref<1x128xf32, #tpu.memory_space<vmem>>, vector<1x128xf32>
    %c0_i32 = arith.constant 0 : i32
    %c6_i32 = arith.constant 6 : i32
    %2 = arith.addi %c0_i32, %c6_i32 : i32
    %c1_i32 = arith.constant 1 : i32
    scf.for %arg6 = %c0_i32 to %2 step %c1_i32  : i32 {
      %c2_i32 = arith.constant 2 : i32
      %3 = arith.muli %c2_i32, %arg6 : i32
      %c0_i32_4 = arith.constant 0 : i32
      %4 = arith.addi %3, %c0_i32_4 : i32
      %c0_5 = arith.constant 0 : index
      %5 = arith.index_cast %4 : i32 to index
      %c0_6 = arith.constant 0 : index
      %c0_7 = arith.constant 0 : index
      %6 = tpu.strided_load %arg2[%c0_5, %5, %c0_6, %c0_7] {strides = array<i32: 1, 1, 2, 1>} : memref<1x12x20x128xf32, #tpu.memory_space<vmem>>, vector<1x1x10x128xf32>
      %7 = vector.shape_cast %6 : vector<1x1x10x128xf32> to vector<10x128xf32>
      %8 = vector.broadcast %0 : vector<1x128xf32> to vector<10x128xf32>
      %9 = arith.mulf %7, %8 : vector<10x128xf32>
      %10 = vector.broadcast %1 : vector<1x128xf32> to vector<10x128xf32>
      %11 = arith.addf %9, %10 : vector<10x128xf32>
      %cst = arith.constant 0.000000e+00 : f32
      %12 = vector.broadcast %cst : f32 to vector<10x128xf32>
      %13 = arith.maximumf %11, %12 : vector<10x128xf32>
      %c2_i32_8 = arith.constant 2 : i32
      %14 = arith.muli %c2_i32_8, %arg6 : i32
      %c0_i32_9 = arith.constant 0 : i32
      %15 = arith.addi %14, %c0_i32_9 : i32
      %c0_10 = arith.constant 0 : index
      %16 = arith.index_cast %15 : i32 to index
      %c1 = arith.constant 1 : index
      %c0_11 = arith.constant 0 : index
      %17 = tpu.strided_load %arg2[%c0_10, %16, %c1, %c0_11] {strides = array<i32: 1, 1, 2, 1>} : memref<1x12x20x128xf32, #tpu.memory_space<vmem>>, vector<1x1x10x128xf32>
      %18 = vector.shape_cast %17 : vector<1x1x10x128xf32> to vector<10x128xf32>
      %19 = vector.broadcast %0 : vector<1x128xf32> to vector<10x128xf32>
      %20 = arith.mulf %18, %19 : vector<10x128xf32>
      %21 = vector.broadcast %1 : vector<1x128xf32> to vector<10x128xf32>
      %22 = arith.addf %20, %21 : vector<10x128xf32>
      %cst_12 = arith.constant 0.000000e+00 : f32
      %23 = vector.broadcast %cst_12 : f32 to vector<10x128xf32>
      %24 = arith.maximumf %22, %23 : vector<10x128xf32>
      %25 = arith.maximumf %13, %24 : vector<10x128xf32>
      %c2_i32_13 = arith.constant 2 : i32
      %26 = arith.muli %c2_i32_13, %arg6 : i32
      %c1_i32_14 = arith.constant 1 : i32
      %27 = arith.addi %26, %c1_i32_14 : i32
      %c0_15 = arith.constant 0 : index
      %28 = arith.index_cast %27 : i32 to index
      %c0_16 = arith.constant 0 : index
      %c0_17 = arith.constant 0 : index
      %29 = tpu.strided_load %arg2[%c0_15, %28, %c0_16, %c0_17] {strides = array<i32: 1, 1, 2, 1>} : memref<1x12x20x128xf32, #tpu.memory_space<vmem>>, vector<1x1x10x128xf32>
      %30 = vector.shape_cast %29 : vector<1x1x10x128xf32> to vector<10x128xf32>
      %31 = vector.broadcast %0 : vector<1x128xf32> to vector<10x128xf32>
      %32 = arith.mulf %30, %31 : vector<10x128xf32>
      %33 = vector.broadcast %1 : vector<1x128xf32> to vector<10x128xf32>
      %34 = arith.addf %32, %33 : vector<10x128xf32>
      %cst_18 = arith.constant 0.000000e+00 : f32
      %35 = vector.broadcast %cst_18 : f32 to vector<10x128xf32>
      %36 = arith.maximumf %34, %35 : vector<10x128xf32>
      %c2_i32_19 = arith.constant 2 : i32
      %37 = arith.muli %c2_i32_19, %arg6 : i32
      %c1_i32_20 = arith.constant 1 : i32
      %38 = arith.addi %37, %c1_i32_20 : i32
      %c0_21 = arith.constant 0 : index
      %39 = arith.index_cast %38 : i32 to index
      %c1_22 = arith.constant 1 : index
      %c0_23 = arith.constant 0 : index
      %40 = tpu.strided_load %arg2[%c0_21, %39, %c1_22, %c0_23] {strides = array<i32: 1, 1, 2, 1>} : memref<1x12x20x128xf32, #tpu.memory_space<vmem>>, vector<1x1x10x128xf32>
      %41 = vector.shape_cast %40 : vector<1x1x10x128xf32> to vector<10x128xf32>
      %42 = vector.broadcast %0 : vector<1x128xf32> to vector<10x128xf32>
      %43 = arith.mulf %41, %42 : vector<10x128xf32>
      %44 = vector.broadcast %1 : vector<1x128xf32> to vector<10x128xf32>
      %45 = arith.addf %43, %44 : vector<10x128xf32>
      %cst_24 = arith.constant 0.000000e+00 : f32
      %46 = vector.broadcast %cst_24 : f32 to vector<10x128xf32>
      %47 = arith.maximumf %45, %46 : vector<10x128xf32>
      %48 = arith.maximumf %36, %47 : vector<10x128xf32>
      %49 = arith.maximumf %25, %48 : vector<10x128xf32>
      %50 = arith.truncf %49 : vector<10x128xf32> to vector<10x128xbf16>
      %c0_25 = arith.constant 0 : index
      %51 = arith.index_cast %arg6 : i32 to index
      %c0_26 = arith.constant 0 : index
      %c0_27 = arith.constant 0 : index
      %52 = vector.load %arg5[%c0_25, %51, %c0_26, %c0_27] : memref<1x6x10x128xbf16, #tpu.memory_space<vmem>>, vector<1x1x10x128xbf16>
      %53 = vector.shape_cast %52 : vector<1x1x10x128xbf16> to vector<10x128xbf16>
      %54 = vector.shape_cast %50 : vector<10x128xbf16> to vector<1x1x10x128xbf16>
      tpu.vector_store %arg5[%c0_25, %51, %c0_26, %c0_27], %54 {strides = array<i32>} : memref<1x6x10x128xbf16, #tpu.memory_space<vmem>>, vector<1x1x10x128xbf16>,
    }
    %c6_i32_3 = arith.constant 6 : i32
    return
  }
  func.func @transform_0(%arg0: i32, %arg1: i32) -> (i32, i32, i32, i32) {
    %c0_i32 = arith.constant 0 : i32
    %c0_i32_0 = arith.constant 0 : i32
    %c0_i32_1 = arith.constant 0 : i32
    return %arg0, %arg1, %c0_i32, %c0_i32_0 : i32, i32, i32, i32
  }
  func.func @transform_1(%arg0: i32, %arg1: i32) -> (i32, i32) {
    %c0_i32 = arith.constant 0 : i32
    %c0_i32_0 = arith.constant 0 : i32
    %c0_i32_1 = arith.constant 0 : i32
    return %c0_i32, %c0_i32_0 : i32, i32
  }
  func.func @transform_2(%arg0: i32, %arg1: i32) -> (i32, i32) {
    %c0_i32 = arith.constant 0 : i32
    %c0_i32_0 = arith.constant 0 : i32
    %c0_i32_1 = arith.constant 0 : i32
    return %c0_i32, %c0_i32_0 : i32, i32
  }
  func.func @transform_3(%arg0: i32, %arg1: i32) -> (i32, i32, i32, i32) {
    %c0_i32 = arith.constant 0 : i32
    %c0_i32_0 = arith.constant 0 : i32
    %c0_i32_1 = arith.constant 0 : i32
    return %arg0, %arg1, %c0_i32, %c0_i32_0 : i32, i32, i32, i32
  }
}

module attributes {stable_mosaic.version = 11 : i64} {
  func.func @_matmul_bias_kernel(%arg0: i32, %arg1: memref<8x7680xbf16, #tpu.memory_space<vmem>>, %arg2: memref<7680x128xbf16, #tpu.memory_space<vmem>>, %arg3: memref<1x128xf32, #tpu.memory_space<vmem>>, %arg4: memref<8x128xf32, #tpu.memory_space<vmem>>) attributes {dimension_semantics = [#tpu.dimension_semantics<arbitrary>], iteration_bounds = array<i64: 1>, scalar_prefetch = 0 : i64, scratch_operands = 0 : i64, tpu.core_type = #tpu.core_type<tc>, window_params = [{pipeline_mode = #tpu.pipeline_mode<synchronous>, transform_indices = @transform_0, window_bounds = array<i64: 8, 7680>}, {pipeline_mode = #tpu.pipeline_mode<synchronous>, transform_indices = @transform_1, window_bounds = array<i64: 7680, 128>}, {pipeline_mode = #tpu.pipeline_mode<synchronous>, transform_indices = @transform_2, window_bounds = array<i64: 1, 128>}, {pipeline_mode = #tpu.pipeline_mode<synchronous>, transform_indices = @transform_3, window_bounds = array<i64: 8, 128>}]} {
    %c0 = arith.constant 0 : index
    %c0_0 = arith.constant 0 : index
    %0 = vector.load %arg1[%c0, %c0_0] : memref<8x7680xbf16, #tpu.memory_space<vmem>>, vector<8x7680xbf16>
    %c0_1 = arith.constant 0 : index
    %c0_2 = arith.constant 0 : index
    %1 = vector.load %arg2[%c0_1, %c0_2] : memref<7680x128xbf16, #tpu.memory_space<vmem>>, vector<7680x128xbf16>
    %cst = arith.constant dense<0.000000e+00> : vector<8x128xf32>
    %2 = tpu.matmul %0, %1, %cst {dimension_numbers = #tpu.dot_dimension_numbers<[1], [0], [0], [1], [0, 0, 1, 1], [], []>} : vector<8x7680xbf16>, vector<7680x128xbf16>, vector<8x128xf32> -> vector<8x128xf32>
    %c0_3 = arith.constant 0 : index
    %c0_4 = arith.constant 0 : index
    %3 = vector.load %arg3[%c0_3, %c0_4] : memref<1x128xf32, #tpu.memory_space<vmem>>, vector<1x128xf32>
    %4 = vector.broadcast %3 : vector<1x128xf32> to vector<8x128xf32>
    %5 = arith.addf %2, %4 : vector<8x128xf32>
    %c0_5 = arith.constant 0 : index
    %c0_6 = arith.constant 0 : index
    %6 = vector.load %arg4[%c0_5, %c0_6] : memref<8x128xf32, #tpu.memory_space<vmem>>, vector<8x128xf32>
    tpu.vector_store %arg4[%c0_5, %c0_6], %5 {strides = array<i32>} : memref<8x128xf32, #tpu.memory_space<vmem>>, vector<8x128xf32>,
    return
  }
  func.func @transform_0(%arg0: i32) -> (i32, i32) {
    %c0_i32 = arith.constant 0 : i32
    %c0_i32_0 = arith.constant 0 : i32
    %c0_i32_1 = arith.constant 0 : i32
    return %c0_i32, %c0_i32_0 : i32, i32
  }
  func.func @transform_1(%arg0: i32) -> (i32, i32) {
    %c0_i32 = arith.constant 0 : i32
    %c0_i32_0 = arith.constant 0 : i32
    %c0_i32_1 = arith.constant 0 : i32
    return %c0_i32, %c0_i32_0 : i32, i32
  }
  func.func @transform_2(%arg0: i32) -> (i32, i32) {
    %c0_i32 = arith.constant 0 : i32
    %c0_i32_0 = arith.constant 0 : i32
    %c0_i32_1 = arith.constant 0 : i32
    return %c0_i32, %c0_i32_0 : i32, i32
  }
  func.func @transform_3(%arg0: i32) -> (i32, i32) {
    %c0_i32 = arith.constant 0 : i32
    %c0_i32_0 = arith.constant 0 : i32
    %c0_i32_1 = arith.constant 0 : i32
    return %c0_i32, %c0_i32_0 : i32, i32
  }
}

module attributes {stable_mosaic.version = 11 : i64} {
  func.func @_matmul_bias_kernel(%arg0: i32, %arg1: memref<8x128xbf16, #tpu.memory_space<vmem>>, %arg2: memref<128x1xbf16, #tpu.memory_space<vmem>>, %arg3: memref<1x1xf32, #tpu.memory_space<vmem>>, %arg4: memref<8x1xf32, #tpu.memory_space<vmem>>) attributes {dimension_semantics = [#tpu.dimension_semantics<arbitrary>], iteration_bounds = array<i64: 1>, scalar_prefetch = 0 : i64, scratch_operands = 0 : i64, tpu.core_type = #tpu.core_type<tc>, window_params = [{pipeline_mode = #tpu.pipeline_mode<synchronous>, transform_indices = @transform_0, window_bounds = array<i64: 8, 128>}, {pipeline_mode = #tpu.pipeline_mode<synchronous>, transform_indices = @transform_1, window_bounds = array<i64: 128, 1>}, {pipeline_mode = #tpu.pipeline_mode<synchronous>, transform_indices = @transform_2, window_bounds = array<i64: 1, 1>}, {pipeline_mode = #tpu.pipeline_mode<synchronous>, transform_indices = @transform_3, window_bounds = array<i64: 8, 1>}]} {
    %c0 = arith.constant 0 : index
    %c0_0 = arith.constant 0 : index
    %0 = vector.load %arg1[%c0, %c0_0] : memref<8x128xbf16, #tpu.memory_space<vmem>>, vector<8x128xbf16>
    %c0_1 = arith.constant 0 : index
    %c0_2 = arith.constant 0 : index
    %1 = vector.load %arg2[%c0_1, %c0_2] : memref<128x1xbf16, #tpu.memory_space<vmem>>, vector<128x1xbf16>
    %cst = arith.constant dense<0.000000e+00> : vector<8x1xf32>
    %2 = tpu.matmul %0, %1, %cst {dimension_numbers = #tpu.dot_dimension_numbers<[1], [0], [0], [1], [0, 0, 1, 1], [], []>} : vector<8x128xbf16>, vector<128x1xbf16>, vector<8x1xf32> -> vector<8x1xf32>
    %c0_3 = arith.constant 0 : index
    %c0_4 = arith.constant 0 : index
    %3 = vector.load %arg3[%c0_3, %c0_4] : memref<1x1xf32, #tpu.memory_space<vmem>>, vector<1x1xf32>
    %4 = vector.broadcast %3 : vector<1x1xf32> to vector<8x1xf32>
    %5 = arith.addf %2, %4 : vector<8x1xf32>
    %c0_5 = arith.constant 0 : index
    %c0_6 = arith.constant 0 : index
    %6 = vector.load %arg4[%c0_5, %c0_6] : memref<8x1xf32, #tpu.memory_space<vmem>>, vector<8x1xf32>
    tpu.vector_store %arg4[%c0_5, %c0_6], %5 {strides = array<i32>} : memref<8x1xf32, #tpu.memory_space<vmem>>, vector<8x1xf32>,
    return
  }
  func.func @transform_0(%arg0: i32) -> (i32, i32) {
    %c0_i32 = arith.constant 0 : i32
    %c0_i32_0 = arith.constant 0 : i32
    %c0_i32_1 = arith.constant 0 : i32
    return %c0_i32, %c0_i32_0 : i32, i32
  }
  func.func @transform_1(%arg0: i32) -> (i32, i32) {
    %c0_i32 = arith.constant 0 : i32
    %c0_i32_0 = arith.constant 0 : i32
    %c0_i32_1 = arith.constant 0 : i32
    return %c0_i32, %c0_i32_0 : i32, i32
  }
  func.func @transform_2(%arg0: i32) -> (i32, i32) {
    %c0_i32 = arith.constant 0 : i32
    %c0_i32_0 = arith.constant 0 : i32
    %c0_i32_1 = arith.constant 0 : i32
    return %c0_i32, %c0_i32_0 : i32, i32
  }
  func.func @transform_3(%arg0: i32) -> (i32, i32) {
    %c0_i32 = arith.constant 0 : i32
    %c0_i32_0 = arith.constant 0 : i32
    %c0_i32_1 = arith.constant 0 : i32
    return %c0_i32, %c0_i32_0 : i32, i32
  }
}

</mosaic_0001>

<bundles_post_ra>
// kernel: small_cnn_forward.10
= control target key start
LH: loop header
LB: loop body
LE: loop exit
PB: predicated region body
PF: predicated region fallthrough
CT: control target
= control target key end

     0   :  { %s2529_s18 = smov 0   ;;  %s2531_s19 = smov 0   ;;  %s3836_s0 = inlined_call_operand.vmem [shape: bf16[17554,32], index: 0, kind: input, shape index: {}]   ;;  %s3837_s1 = inlined_call_operand.vmem [shape: bf16[32,32], index: 1, kind: input, shape index: {}]   ;;  %s3838_s2 = inlined_call_operand.vmem [shape: f32[1,32], index: 2, kind: input, shape index: {}]   ;;  %s3839_s3 = inlined_call_operand.vmem [shape: f32[17554,32], index: 3, kind: output, shape index: {0}]   ;;  %s3840_s4 = inlined_call_operand.vmem [shape: f32[280,32], index: 4, kind: output, shape index: {1}]   ;;  %s3841_s5 = inlined_call_operand.vmem [shape: f32[280,32], index: 5, kind: output, shape index: {2}]  }
   0x1   :  { %s2533_s20 = smov 0  }
   0x2 LB: > { %s2542_s21 = sadd.s32 4294967295, %s2465_s20   ;;  %s2544_s22 = sadd.s32 1, %s2465_s20   ;;  %s2465_s20 = sphi %s2533_s20, %s3866_s20   ;;  %s2461_s19 = sphi %s2531_s19, %s3865_s19   ;;  %s2457_s18 = sphi %s2529_s18, %s3864_s18  }
   0x3   : > { %s88_s23 = ssub.s32 %s2465_s20, %s2544_s22  ;;  %s91_s24 = sadd.s32 1, %s2461_s19 }
   0x4   : > { %p89_p0 = scmp.eq.s32.totalorder %s88_s23, 0  ;;  %p101_p1 = scmp.ne.s32.totalorder %s2461_s19, %s2457_s18 }
   0x5   : > { %p102_p2 = scmp.eq.s32.totalorder %s2542_s21, 34  ;;  %p2088_p3 = scmp.ge.s32.totalorder %s2465_s20, 1 }
   0x6   : > { %s2552_s25 = scalar_select %p89_p0, %s2461_s19, %s91_s24  }
   0x7   : > { %p2554_p4 = por %p102_p2, %p101_p1  ;;  %p201_p5 = scmp.lt.s32.totalorder %s2465_s20, 36 }
   0x9   : > { %p202_p6 = pnand %p2088_p3, %p201_p5 }
   0xb   : > { %205 = sbr.rel (%p202_p6) target bundleno = 469 (0x1d5), region = 32 }
  0x12   : > { %v2376_v0 = vld [vmem:[%s3837_s1] sm:$0xff]   ;;  %s2562_s29 = sshll.u32 %s2542_s21, 6  ;;  %v2377_v1 = vld [vmem:[%s3837_s1 + $0x8] sm:$0xff]   ;;  %vm515_vm0 = vcmask 261120   ;;  %v966_v34 = vlaneseq  ;;  %s2161_s12 = sshll.u32 %s2542_s21, 9 }
  0x13   : > { %p245_p7 = scmp.lt.s32.totalorder %s2562_s29, 2194  ;;  %2216 = vmatprep.subr.bf16.mxu0 %v2376_v0  ;;  %2284 = vmatprep.subr.bf16.mxu1 %v2376_v0  ;;  %v2645_v38 = vstv %s2161_s12  ;;  %s225_s13 = sand.u32 1, %s2457_s18  }
  0x14   : > { %2217 = vmatpush3.bf16.msra.mxu0 %v2376_v0  ;;  %2286 = vmatpush3.bf16.msra.mxu1 %v2376_v0  ;;  %v2638_v35 = vshrl.u32 %v966_v34, 7  ;;  %s2724_s14 = sshll.u32 %s225_s13, 9  ;;  %p259_p8 = scmp.lt.s32.totalorder %s2542_s21, 34 }
  0x15   : > { %s246_s7 = scalar_select %p245_p7, %s2562_s29, 2194  ;;  %2218 = vmatprep.subr.bf16.mxu0 %v2377_v1  ;;  %2285 = vmatprep.subr.bf16.mxu1 %v2377_v1 }
  0x16   : > { %v969_v36 = vadd.s32 16, %v2638_v35  ;;  %v970_v37 = vadd.s32 24, %v2638_v35  ;;  %v968_v39 = vadd.s32 8, %v2638_v35  ;;  %v973_v40 = vadd.s32 48, %v2638_v35  ;;  %s2784_s17 = scalar_lea.vmem [#allocation2], %s2724_s14   ;;  %s1572_s9 = ssub.s32 (%p2554_p4), 2195, %s2562_s29 }
  0x17   : > { %s2091_s8 = sshll.u32 %s246_s7, 2  ;;  %v971_v41 = vadd.s32 32, %v2638_v35  ;;  %v974_v42 = vadd.s32 56, %v2638_v35  ;;  %v972_v43 = vadd.s32 40, %v2638_v35  ;;  %v977_v44 = vadd.s32 80, %v2638_v35  ;;  %s3637_s13 = scalar_lea.vmem (%p2554_p4), %s3839_s3, %s2161_s12  }
  0x18   : > { %s2572_s11 = scalar_lea.vmem %s3836_s0, %s2091_s8  ;;  %2219 = vmatpush3.bf16.msra.mxu0 %v2377_v1  ;;  %2287 = vmatpush3.bf16.msra.mxu1 %v2377_v1  ;;  %v975_v45 = vadd.s32 64, %v2638_v35  ;;  %v2655_v46 = vadd.s32 %v2645_v38, %v969_v36  ;;  %v2659_v47 = vadd.s32 %v2645_v38, %v2638_v35  ;;  %v2662_v48 = vadd.s32 %v2645_v38, %v970_v37  ;;  %p1573_p9 = scmp.lt.s32.totalorder (%p2554_p4), %s1572_s9, 64 }
  0x19   : > { %v2378_v2 = vld [vmem:[%s2572_s11] sm:$0xff]   ;;  %v2379_v3 = vld [vmem:[%s2572_s11 + $0x8] sm:$0xff]   ;;  %v2380_v4 = vld [vmem:[%s2572_s11 + $0x10] sm:$0xff]   ;;  %v978_v49 = vadd.s32 88, %v2638_v35  ;;  %v2666_v50 = vadd.s32 %v2645_v38, %v968_v39  ;;  %v2669_v51 = vadd.s32 %v2645_v38, %v973_v40  ;;  %v976_v52 = vadd.s32 72, %v2638_v35  ;;  %s260_s23 = scalar_select %p259_p8, %s2542_s21, 34 }
  0x1a   : > { %2220 = vmatprep.mubr.msk.bf16.mxu0 %vm515_vm0, %v2378_v2  ;;  %v2381_v5 = vld [vmem:[%s2572_s11 + $0x18] sm:$0xff]   ;;  %v2382_v6 = vld [vmem:[%s2572_s11 + $0x20] sm:$0xff]   ;;  %v2383_v7 = vld [vmem:[%s2572_s11 + $0x28] sm:$0xff]   ;;  %v981_v53 = vadd.s32 112, %v2638_v35  ;;  %v2674_v54 = vadd.s32 %v2645_v38, %v971_v41  ;;  %v979_v55 = vadd.s32 96, %v2638_v35  ;;  %v982_v56 = vadd.s32 120, %v2638_v35 }
  0x1b   : > { %2221 = vmatmul.mubr.msk.bf16.vlgmr.msra.gmra.mrb[0].mxu0 %vm515_vm0, %v2379_v3  ;;  %v2384_v8 = vld [vmem:[%s2572_s11 + $0x30] sm:$0xff]   ;;  %v2394_v9 = vld [vmem:[%s2572_s11 + $0x80] sm:$0xff]   ;;  %v2395_v10 = vld [vmem:[%s2572_s11 + $0x88] sm:$0xff]   ;;  %v980_v57 = vadd.s32 104, %v2638_v35  ;;  %v2680_v58 = vadd.s32 %v2645_v38, %v974_v42  ;;  %v2683_v59 = vadd.s32 %v2645_v38, %v972_v43  ;;  %v2686_v60 = vadd.s32 %v2645_v38, %v977_v44  ;;  %s2092_s24 = sshll.u32 %s260_s23, 3 }
  0x1c   : > { %2224 = vmatprep.mubr.msk.bf16.mxu0 %vm515_vm0, %v2380_v4  ;;  %2252 = vmatprep.mubr.msk.bf16.mxu1 %vm515_vm0, %v2394_v9  ;;  %v2396_v11 = vld [vmem:[%s2572_s11 + $0x90] sm:$0xff]   ;;  %v2385_v12 = vld [vmem:[%s2572_s11 + $0x38] sm:$0xff]   ;;  %v2386_v13 = vld [vmem:[%s2572_s11 + $0x40] sm:$0xff]   ;;  %v2689_v61 = vadd.s32 %v2645_v38, %v975_v45  ;;  %vm1098_vm1 = vcmp.lt.s32.totalorder %v2655_v46, 17554  ;;  %vm1096_vm2 = vcmp.lt.s32.totalorder %v2659_v47, 17554  ;;  %v2694_v62 = vadd.s32 %v2645_v38, %v978_v49  ;;  %s262_s30 = scalar_lea.vmem %s3840_s4, %s2092_s24  ;;  %s266_s8 = scalar_lea.vmem %s3841_s5, %s2092_s24 }
  0x1d   : > { %2253 = vmatmul.mubr.msk.bf16.vlgmr.msra.gmra.mrb[0].mxu1 %vm515_vm0, %v2395_v10  ;;  %v2397_v14 = vld [vmem:[%s2572_s11 + $0x98] sm:$0xff]   ;;  %v2398_v15 = vld [vmem:[%s2572_s11 + $0xa0] sm:$0xff]   ;;  %v2387_v16 = vld [vmem:[%s2572_s11 + $0x48] sm:$0xff]   ;;  %v985_v63 = vadd.s32 144, %v2638_v35  ;;  %v983_v0 = vadd.s32 128, %v2638_v35  ;;  %v986_v1 = vadd.s32 152, %v2638_v35  ;;  %v2702_v2 = vadd.s32 %v2645_v38, %v976_v52 }
  0x1e   : > { %2256 = vmatprep.mubr.msk.bf16.mxu1 %vm515_vm0, %v2396_v11  ;;  %v2399_v17 = vld [vmem:[%s2572_s11 + $0xa8] sm:$0xff]   ;;  %v2388_v18 = vld [vmem:[%s2572_s11 + $0x50] sm:$0xff]   ;;  %v2389_v20 = vld [vmem:[%s2572_s11 + $0x58] sm:$0xff]   ;;  %vm1099_vm3 = vcmp.lt.s32.totalorder %v2662_v48, 17554  ;;  %v2705_v3 = vadd.s32 %v2645_v38, %v981_v53  ;;  %v984_v4 = vadd.s32 136, %v2638_v35  ;;  %vm1097_vm4 = vcmp.lt.s32.totalorder %v2666_v50, 17554 }
  0x1f   : > { %v2400_v19 = vld [vmem:[%s2572_s11 + $0xb0] sm:$0xff]   ;;  %v2401_v21 = vld [vmem:[%s2572_s11 + $0xb8] sm:$0xff]   ;;  %v2390_v22 = vld [vmem:[%s2572_s11 + $0x60] sm:$0xff]   ;;  %v987_v9 = vadd.s32 160, %v2638_v35  ;;  %v990_v10 = vadd.s32 184, %v2638_v35  ;;  %v988_v11 = vadd.s32 168, %v2638_v35 }
  0x20   : > { %v2402_v23 = vld [vmem:[%s2572_s11 + $0xc0] sm:$0xff]   ;;  %v2391_v24 = vld [vmem:[%s2572_s11 + $0x68] sm:$0xff]   ;;  %v2392_v26 = vld [vmem:[%s2572_s11 + $0x70] sm:$0xff]   ;;  %vm1100_vm5 = vcmp.lt.s32.totalorder %v2674_v54, 17554  ;;  %v1001_v36 = vadd.s32 272, %v2638_v35  ;;  %v999_v37 = vadd.s32 256, %v2638_v35 }
  0x21   : > { %v2403_v25 = vld [vmem:[%s2572_s11 + $0xc8] sm:$0xff]   ;;  %v2404_v27 = vld [vmem:[%s2572_s11 + $0xd0] sm:$0xff]   ;;  %v2393_v28 = vld [vmem:[%s2572_s11 + $0x78] sm:$0xff]   ;;  %vm1102_vm6 = vcmp.lt.s32.totalorder %v2669_v51, 17554  ;;  %v1002_v43 = vadd.s32 280, %v2638_v35  ;;  %vm1103_vm7 = vcmp.lt.s32.totalorder %v2680_v58, 17554 }
  0x22   : > { %v2405_v29 = vld [vmem:[%s2572_s11 + $0xd8] sm:$0xff]   ;;  %v2406_v30 = vld [vmem:[%s2572_s11 + $0xe0] sm:$0xff]   ;;  %v2407_v31 = vld [vmem:[%s2572_s11 + $0xe8] sm:$0xff]   ;;  %v2814_v46 = vadd.s32 %v2645_v38, %v999_v37  ;;  %vm1101_vm8 = vcmp.lt.s32.totalorder %v2683_v59, 17554  ;;  %v1005_v48 = vadd.s32 304, %v2638_v35  ;;  %vm1104_vm9 = vcmp.lt.s32.totalorder %v2689_v61, 17554 }
  0x23   : > { %2225 = vmatmul.mubr.msk.bf16.gmra.mrb[4].mxu0 %vm515_vm0, %v2381_v5  ;;  %v2408_v32 = vld [vmem:[%s2572_s11 + $0xf0] sm:$0xff]   ;;  %v2409_v33 = vld [vmem:[%s2572_s11 + $0xf8] sm:$0xff]   ;;  %v989_v5 = vadd.s32 176, %v2638_v35  ;;  %vm1106_vm10 = vcmp.lt.s32.totalorder %v2686_v60, 17554  ;;  %vm1107_vm11 = vcmp.lt.s32.totalorder %v2694_v62, 17554  ;;  %vm1105_vm12 = vcmp.lt.s32.totalorder %v2702_v2, 17554 }
  0x24   : > { %2228 = vmatprep.mubr.msk.bf16.mxu0 %vm515_vm0, %v2382_v6  ;;  %v2711_v6 = vadd.s32 %v2645_v38, %v979_v55  ;;  %vm1110_vm14 = vcmp.lt.s32.totalorder %v2705_v3, 17554 }
  0x25   : > { %2257 = vmatmul.mubr.msk.bf16.gmra.mrb[4].mxu1 %vm515_vm0, %v2397_v14  ;;  %v2727_v14 = vadd.s32 %v2645_v38, %v985_v63  ;;  %v1000_v63 = vadd.s32 264, %v2638_v35 }
  0x26   : > { %2260 = vmatprep.mubr.msk.bf16.mxu1 %vm515_vm0, %v2398_v15  ;;  %v2730_v15 = vadd.s32 %v2645_v38, %v983_v0  ;;  %vm1108_vm13 = vcmp.lt.s32.totalorder %v2711_v6, 17554 }
  0x2b   : > { %2229 = vmatmul.mubr.msk.bf16.gmra.mrb[8].mxu0 %vm515_vm0, %v2383_v7  ;;  %v2714_v7 = vadd.s32 %v2645_v38, %v982_v56 }
  0x2c   : > { %2232 = vmatprep.mubr.msk.bf16.mxu0 %vm515_vm0, %v2384_v8  ;;  %v2717_v8 = vadd.s32 %v2645_v38, %v980_v57 }
  0x2d   : > { %2261 = vmatmul.mubr.msk.bf16.gmra.mrb[8].mxu1 %vm515_vm0, %v2399_v17  ;;  %v994_v17 = vadd.s32 216, %v2638_v35 }
  0x2e   : > { %2264 = vmatprep.mubr.msk.bf16.mxu1 %vm515_vm0, %v2400_v19  ;;  %v2742_v19 = vadd.s32 %v2645_v38, %v984_v4  ;;  %v2811_v4 = vadd.s32 %v2645_v38, %v1001_v36  ;;  %vm1109_vm15 = vcmp.lt.s32.totalorder %v2717_v8, 17554 }
  0x2f   : > { %v2770_v34 = vadd.s32 %v2645_v38, %v994_v17 }
  0x33   : > { %2233 = vmatmul.mubr.msk.bf16.gmra.mrb[12].mxu0 %vm515_vm0, %v2385_v12  ;;  %v993_v12 = vadd.s32 208, %v2638_v35 }
  0x34   : > { %2236 = vmatprep.mubr.msk.bf16.mxu0 %vm515_vm0, %v2386_v13  ;;  %v991_v13 = vadd.s32 192, %v2638_v35 }
  0x35   : > { %2265 = vmatmul.mubr.msk.bf16.gmra.mrb[12].mxu1 %vm515_vm0, %v2401_v21  ;;  %v992_v21 = vadd.s32 200, %v2638_v35 }
  0x36   : > { %2268 = vmatprep.mubr.msk.bf16.mxu1 %vm515_vm0, %v2402_v23  ;;  %v2750_v23 = vadd.s32 %v2645_v38, %v987_v9  ;;  %v1003_v9 = vadd.s32 288, %v2638_v35 }
  0x37   : > { %v2777_v41 = vadd.s32 %v2645_v38, %v992_v21 }
  0x3b   : > { %2237 = vmatmul.mubr.msk.bf16.gmra.mrb[16].mxu0 %vm515_vm0, %v2387_v16  ;;  %v2733_v16 = vadd.s32 %v2645_v38, %v986_v1 }
  0x3c   : > { %2240 = vmatprep.mubr.msk.bf16.mxu0 %vm515_vm0, %v2388_v18  ;;  %v2739_v18 = vld [vmem:[%s3838_s2] ss:$0 sm:$0xff] }
  0x3d   : > { %2269 = vmatmul.mubr.msk.bf16.gmra.mrb[16].mxu1 %vm515_vm0, %v2403_v25  ;;  %v998_v25 = vadd.s32 248, %v2638_v35 }
  0x3e   : > { %2272 = vmatprep.mubr.msk.bf16.mxu1 %vm515_vm0, %v2404_v27 }
  0x3f   : > { %v2793_v52 = vadd.s32 %v2645_v38, %v998_v25 }
  0x43   : > { %2241 = vmatmul.mubr.msk.bf16.gmra.mrb[20].mxu0 %vm515_vm0, %v2389_v20  ;;  %v2745_v20 = vadd.s32 %v2645_v38, %v989_v5  ;;  %v2823_v5 = vadd.s32 %v2645_v38, %v1002_v43  ;;  %v1004_v43 = vadd.s32 296, %v2638_v35 }
  0x44   : > { %2244 = vmatprep.mubr.msk.bf16.mxu0 %vm515_vm0, %v2390_v22  ;;  %v997_v22 = vadd.s32 240, %v2638_v35 }
  0x45   : > { %2273 = vmatmul.mubr.msk.bf16.gmra.mrb[20].mxu1 %vm515_vm0, %v2405_v29  ;;  %v2759_v29 = vadd.s32 %v2645_v38, %v988_v11  ;;  %v2868_v54 = vadd.s32 %v2645_v38, %v1004_v43 }
  0x46   : > { %2276 = vmatprep.mubr.msk.bf16.mxu1 %vm515_vm0, %v2406_v30  ;;  %v2762_v30 = vadd.s32 %v2645_v38, %v993_v12  ;;  %v2780_v42 = vadd.s32 %v2645_v38, %v997_v22  ;;  %v2830_v22 = vadd.s32 %v2645_v38, %v1000_v63 }
  0x4b   : > { %2245 = vmatmul.mubr.msk.bf16.gmra.mrb[24].mxu0 %vm515_vm0, %v2391_v24  ;;  %v995_v24 = vadd.s32 224, %v2638_v35 }
  0x4c   : > { %2248 = vmatprep.mubr.msk.bf16.mxu0 %vm515_vm0, %v2392_v26  ;;  %v996_v26 = vadd.s32 232, %v2638_v35 }
  0x4d   : > { %2277 = vmatmul.mubr.msk.bf16.gmra.mrb[24].mxu1 %vm515_vm0, %v2407_v31  ;;  %v2765_v31 = vadd.s32 %v2645_v38, %v991_v13  ;;  %v2790_v49 = vadd.s32 %v2645_v38, %v995_v24  ;;  %v1006_v24 = vadd.s32 312, %v2638_v35 }
  0x4e   : > { %2280 = vmatprep.mubr.msk.bf16.mxu1 %vm515_vm0, %v2408_v32  ;;  %v2796_v53 = vadd.s32 %v2645_v38, %v996_v26 }
  0x53   : > { %2249 = vmatmul.mubr.msk.bf16.gmra.mrb[28].mxu0 %vm515_vm0, %v2393_v28  ;;  %v2756_v28 = vadd.s32 %v2645_v38, %v990_v10 }
  0x55   : > { %2281 = vmatmul.mubr.msk.bf16.gmra.mrb[28].mxu1 %vm515_vm0, %v2409_v33 }
  0xee   : > { %v2222_v27 = vpop.f32.mrb[0].mxu0 }
  0xef   : > { %v655_v32 = vadd.f32 %v2222_v27, %v2739_v18  ;;  %v646_v33 = vpop.f32.mrb[1].mxu0 }
  0xf0   : > { %v647_v39 = vadd.f32 %v2739_v18, %v646_v33  ;;  %v2223_v40 = vpop.f32.mrb[2].mxu0 }
  0xf1   : > { %903 = vst.msk [vmem:[%s2784_s17 + $0x10] sm:$0xff] %vm515_vm0, %v655_v32  ;;  %v658_v44 = vadd.f32 %v2223_v40, %v2739_v18  ;;  %v649_v45 = vpop.f32.mrb[3].mxu0  ;;  %v1162_v55 = vsel %vm1098_vm1, %v655_v32, 0.0  ;;  %vm1111_vm1 = vcmp.lt.s32.totalorder %v2714_v7, 17554  ;;  %v1014_v7 = vadd.s32 376, %v2638_v35 }
  0xf2   : > { %901 = vst.msk [vmem:[%s2784_s17] sm:$0xff] %vm515_vm0, %v647_v39  ;;  %v1160_v56 = vsel %vm1096_vm2, %v647_v39, 0.0  ;;  %v650_v57 = vadd.f32 %v2739_v18, %v649_v45  ;;  %v1359_v10 = vmul.f32 %v1162_v55, %v1162_v55  ;;  %v1227_v25 = vsel %vm515_vm0, %v1162_v55, 0.0 }
  0xf3   : > { %v1357_v0 = vmul.f32 %v1160_v56, %v1160_v56  ;;  %904 = vst.msk [vmem:[%s2784_s17 + $0x18] sm:$0xff] %vm515_vm0, %v658_v44  ;;  %v1163_v1 = vsel %vm1099_vm3, %v658_v44, 0.0  ;;  %v1224_v11 = vsel %vm515_vm0, %v1160_v56, 0.0  ;;  %v2846_v56 = vadd.s32 %v2645_v38, %v1005_v48 }
  0xf4   : > { %902 = vst.msk [vmem:[%s2784_s17 + $0x8] sm:$0xff] %vm515_vm0, %v650_v57  ;;  %v1161_v47 = vsel %vm1097_vm4, %v650_v57, 0.0  ;;  %v1360_v17 = vmul.f32 %v1163_v1, %v1163_v1  ;;  %v1424_v44 = vsel %vm515_vm0, %v1359_v10, 0.0  ;;  %v2849_v57 = vadd.s32 %v2645_v38, %v1003_v9 }
  0xf5   : > { %v1225_v12 = vsel %vm515_vm0, %v1161_v47, 0.0  ;;  %v1358_v13 = vmul.f32 %v1161_v47, %v1161_v47  ;;  %v1421_v26 = vsel %vm515_vm0, %v1357_v0, 0.0  ;;  %v1229_v63 = vsel %vm515_vm0, %v1163_v1, 0.0 }
  0xf6   : > { %v1226_v50 = vadd.f32 %v1225_v12, %v1224_v11  ;;  %v2226_v21 = vpop.f32.mrb[4].mxu0  ;;  %v1426_v0 = vsel %vm515_vm0, %v1360_v17, 0.0  ;;  %v1009_v17 = vadd.s32 336, %v2638_v35  ;;  %vm1112_vm2 = vcmp.lt.s32.totalorder %v2730_v15, 17554 }
  0xf7   : > { %v1422_v27 = vsel %vm515_vm0, %v1358_v13, 0.0  ;;  %v671_v32 = vadd.f32 %v2226_v21, %v2739_v18  ;;  %v662_v33 = vpop.f32.mrb[5].mxu0  ;;  %v2865_v13 = vadd.s32 %v2645_v38, %v1006_v24  ;;  %v2876_v24 = vadd.s32 328, %v2638_v35 }
  0xf8   : > { %v1228_v36 = vadd.f32 %v1227_v25, %v1226_v50  ;;  %v1423_v37 = vadd.f32 %v1422_v27, %v1421_v26  ;;  %v663_v39 = vadd.f32 %v2739_v18, %v662_v33  ;;  %v2227_v40 = vpop.f32.mrb[6].mxu0  ;;  %v1007_v25 = vadd.s32 320, %v2638_v35  ;;  %v2254_v33 = vpop.f32.mrb[0].mxu1 }
  0xf9   : > { %907 = vst.msk [vmem:[%s2784_s17 + $0x30] sm:$0xff] %vm515_vm0, %v671_v32  ;;  %v674_v45 = vadd.f32 %v2227_v40, %v2739_v18  ;;  %v665_v55 = vpop.f32.mrb[7].mxu0  ;;  %v1166_v11 = vsel %vm1102_vm6, %v671_v32, 0.0  ;;  %vm1114_vm3 = vcmp.lt.s32.totalorder %v2727_v14, 17554  ;;  %vm1113_vm4 = vcmp.lt.s32.totalorder %v2742_v19, 17554 }
  0xfa   : > { %v1425_v47 = vadd.f32 %v1424_v44, %v1423_v37  ;;  %905 = vst.msk [vmem:[%s2784_s17 + $0x20] sm:$0xff] %vm515_vm0, %v663_v39  ;;  %v1164_v10 = vsel %vm1100_vm5, %v663_v39, 0.0  ;;  %v1230_v48 = vadd.f32 %v1229_v63, %v1228_v36  ;;  %v666_v21 = vadd.f32 %v2739_v18, %v665_v55  ;;  %v774_v55 = vpop.f32.mrb[1].mxu1 }
  0xfb   : > { %v1231_v12 = vsel %vm515_vm0, %v1164_v10, 0.0  ;;  %v1361_v9 = vmul.f32 %v1164_v10, %v1164_v10  ;;  %908 = vst.msk [vmem:[%s2784_s17 + $0x38] sm:$0xff] %vm515_vm0, %v674_v45  ;;  %v1363_v26 = vmul.f32 %v1166_v11, %v1166_v11  ;;  %v1010_v36 = vadd.s32 344, %v2638_v35 }
  0xfc   : > { %v1427_v1 = vadd.f32 %v1426_v0, %v1425_v47  ;;  %v1232_v51 = vadd.f32 %v1231_v12, %v1230_v48  ;;  %v1167_v37 = vsel %vm1103_vm7, %v674_v45, 0.0  ;;  %906 = vst.msk [vmem:[%s2784_s17 + $0x28] sm:$0xff] %vm515_vm0, %v666_v21  ;;  %v1165_v39 = vsel %vm1101_vm8, %v666_v21, 0.0  ;;  %v2895_v47 = vpop.f32.mrb[2].mxu1 }
  0xfd   : > { %v1428_v50 = vsel %vm515_vm0, %v1361_v9, 0.0  ;;  %v2887_v44 = vadd.f32 %v2254_v33, %v2739_v18  ;;  %v1233_v63 = vsel %vm515_vm0, %v1165_v39, 0.0  ;;  %v1362_v58 = vmul.f32 %v1165_v39, %v1165_v39  ;;  %v2904_v9 = vpop.f32.mrb[3].mxu1 }
  0xfe   : > { %v1429_v27 = vadd.f32 %v1428_v50, %v1427_v1  ;;  %v2230_v32 = vpop.f32.mrb[8].mxu0  ;;  %v2893_v59 = vadd.f32 %v2739_v18, %v774_v55  ;;  %v1234_v10 = vadd.f32 %v1233_v63, %v1232_v51  ;;  %v2907_v1 = vadd.s32 %v2645_v38, %v1009_v17 }
  0xff   : > { %v687_v40 = vadd.f32 %v2230_v32, %v2739_v18  ;;  %v678_v43 = vpop.f32.mrb[9].mxu0  ;;  %935 = vst.msk [vmem:[%s2784_s17 + $0x110] sm:$0xff] %vm515_vm0, %v2887_v44  ;;  %v2910_v50 = vadd.s32 %v2645_v38, %v1007_v25  ;;  %v1235_v51 = vsel %vm515_vm0, %v1166_v11, 0.0  ;;  %v1364_v21 = vmul.f32 %v1167_v37, %v1167_v37 }
 0x100   : > { %v679_v45 = vadd.f32 %v2739_v18, %v678_v43  ;;  %v2231_v0 = vpop.f32.mrb[10].mxu0  ;;  %3847 = vst [vmem:[#allocation3_spill] sm:$0xff] %v2907_v1  ;;  %v1430_v32 = vsel %vm515_vm0, %v1362_v58, 0.0  ;;  %933 = vst.msk [vmem:[%s2784_s17 + $0x100] sm:$0xff] %vm515_vm0, %v2893_v59  ;;  %v1236_v39 = vadd.f32 %v1235_v51, %v1234_v10  ;;  %v1432_v11 = vsel %vm515_vm0, %v1363_v26, 0.0 }
 0x101   : > { %911 = vst.msk [vmem:[%s2784_s17 + $0x50] sm:$0xff] %vm515_vm0, %v687_v40  ;;  %v690_v48 = vadd.f32 %v2231_v0, %v2739_v18  ;;  %v681_v12 = vpop.f32.mrb[11].mxu0  ;;  %v1431_v43 = vadd.f32 %v1430_v32, %v1429_v27  ;;  %v1170_v17 = vsel %vm1106_vm10, %v687_v40, 0.0  ;;  %v1237_v55 = vsel %vm515_vm0, %v1167_v37, 0.0 }
 0x102   : > { %909 = vst.msk [vmem:[%s2784_s17 + $0x40] sm:$0xff] %vm515_vm0, %v679_v45  ;;  %v1168_v33 = vsel %vm1104_vm9, %v679_v45, 0.0  ;;  %v682_v61 = vadd.f32 %v2739_v18, %v681_v12  ;;  %v1238_v45 = vadd.f32 %v1237_v55, %v1236_v39  ;;  %v2933_v27 = vadd.s32 %v2645_v38, %v1010_v36  ;;  %v2941_v12 = vpop.f32.mrb[4].mxu1 }
 0x103   : > { %v1365_v25 = vmul.f32 %v1168_v33, %v1168_v33  ;;  %912 = vst.msk [vmem:[%s2784_s17 + $0x58] sm:$0xff] %vm515_vm0, %v690_v48  ;;  %v1239_v63 = vsel %vm515_vm0, %v1168_v33, 0.0  ;;  %v1433_v58 = vadd.f32 %v1432_v11, %v1431_v43  ;;  %v1171_v60 = vsel %vm1107_vm11, %v690_v48, 0.0 }
 0x104   : > { %3848 = vst [vmem:[#allocation4_spill] sm:$0xff] %v2933_v27  ;;  %v1434_v40 = vsel %vm515_vm0, %v1364_v21, 0.0  ;;  %v1367_v0 = vmul.f32 %v1170_v17, %v1170_v17  ;;  %910 = vst.msk [vmem:[%s2784_s17 + $0x48] sm:$0xff] %vm515_vm0, %v682_v61  ;;  %v1169_v37 = vsel %vm1105_vm12, %v682_v61, 0.0  ;;  %v1240_v51 = vadd.f32 %v1239_v63, %v1238_v45  ;;  %v2945_v21 = vpop.f32.mrb[5].mxu1 }
 0x105   : > { %v1436_v26 = vsel %vm515_vm0, %v1365_v25, 0.0  ;;  %v1435_v32 = vadd.f32 %v1434_v40, %v1433_v58  ;;  %v1241_v62 = vsel %vm515_vm0, %v1169_v37, 0.0  ;;  %v1366_v48 = vmul.f32 %v1169_v37, %v1169_v37  ;;  %v2949_v25 = vpop.f32.mrb[6].mxu1 }
 0x106   : > { %v2234_v10 = vpop.f32.mrb[12].mxu0  ;;  %v1368_v33 = vmul.f32 %v1171_v60, %v1171_v60  ;;  %v2953_v11 = vadd.s32 %v2645_v38, %v2876_v24  ;;  %v1242_v63 = vadd.f32 %v1241_v62, %v1240_v51  ;;  %v2959_v40 = vpop.f32.mrb[7].mxu1  ;;  %v1243_v37 = vsel %vm515_vm0, %v1170_v17, 0.0 }
 0x107   : > { %v694_v36 = vpop.f32.mrb[13].mxu0  ;;  %v703_v39 = vadd.f32 %v2234_v10, %v2739_v18  ;;  %v1437_v55 = vadd.f32 %v1436_v26, %v1435_v32  ;;  %v1438_v61 = vsel %vm515_vm0, %v1366_v48, 0.0  ;;  %vm1115_vm5 = vcmp.lt.s32.totalorder %v2733_v16, 17554 }
 0x108   : > { %v695_v2 = vadd.f32 %v2739_v18, %v694_v36  ;;  %v2235_v43 = vpop.f32.mrb[14].mxu0  ;;  %3849 = vst [vmem:[#allocation5_spill] sm:$0xff] %v2953_v11  ;;  %v2971_v10 = vadd.s32 368, %v2638_v35  ;;  %v1440_v51 = vsel %vm515_vm0, %v1367_v0, 0.0  ;;  %v1244_v32 = vadd.f32 %v1243_v37, %v1242_v63  ;;  %v2990_v37 = vpop.f32.mrb[8].mxu1 }
 0x109   : > { %v706_v58 = vadd.f32 %v2235_v43, %v2739_v18  ;;  %v697_v45 = vpop.f32.mrb[15].mxu0  ;;  %915 = vst.msk [vmem:[%s2784_s17 + $0x70] sm:$0xff] %vm515_vm0, %v703_v39  ;;  %v1439_v62 = vadd.f32 %v1438_v61, %v1437_v55  ;;  %v1174_v17 = vsel %vm1110_vm14, %v703_v39, 0.0  ;;  %v1245_v48 = vsel %vm515_vm0, %v1171_v60, 0.0 }
 0x10a   : > { %913 = vst.msk [vmem:[%s2784_s17 + $0x60] sm:$0xff] %vm515_vm0, %v695_v2  ;;  %v1172_v24 = vsel %vm1108_vm13, %v695_v2, 0.0  ;;  %v698_v26 = vadd.f32 %v2739_v18, %v697_v45  ;;  %v1442_v43 = vsel %vm515_vm0, %v1368_v33, 0.0  ;;  %v1246_v63 = vadd.f32 %v1245_v48, %v1244_v32  ;;  %v2996_v32 = vpop.f32.mrb[9].mxu1 }
 0x10b   : > { %916 = vst.msk [vmem:[%s2784_s17 + $0x78] sm:$0xff] %vm515_vm0, %v706_v58  ;;  %v1247_v6 = vsel %vm515_vm0, %v1172_v24, 0.0  ;;  %v1369_v36 = vmul.f32 %v1172_v24, %v1172_v24  ;;  %v1441_v0 = vadd.f32 %v1440_v51, %v1439_v62  ;;  %v2986_v55 = vadd.s32 352, %v2638_v35 }
 0x10c   : > { %914 = vst.msk [vmem:[%s2784_s17 + $0x68] sm:$0xff] %vm515_vm0, %v698_v26  ;;  %v1173_v2 = vsel %vm1109_vm15, %v698_v26, 0.0  ;;  %v1371_v3 = vmul.f32 %v1174_v17, %v1174_v17  ;;  %v1248_v24 = vadd.f32 %v1247_v6, %v1246_v63  ;;  %v1175_v33 = vsel %vm1111_vm1, %v706_v58, 0.0 }
 0x10d   : > { %v1444_v39 = vsel %vm515_vm0, %v1369_v36, 0.0  ;;  %v1249_v60 = vsel %vm515_vm0, %v1173_v2, 0.0  ;;  %v1370_v61 = vmul.f32 %v1173_v2, %v1173_v2  ;;  %v1443_v8 = vadd.f32 %v1442_v43, %v1441_v0  ;;  %v3004_v2 = vpop.f32.mrb[10].mxu1 }
 0x10e   : > { %v2238_v45 = vpop.f32.mrb[16].mxu0  ;;  %vm1116_vm6 = vcmp.lt.s32.totalorder %v2750_v23, 17554  ;;  %v3002_v6 = vadd.f32 %v2895_v47, %v2739_v18  ;;  %v1250_v43 = vadd.f32 %v1249_v60, %v1248_v24  ;;  %vm1117_vm7 = vcmp.lt.s32.totalorder %v2759_v29, 17554 }
 0x10f   : > { %v719_v26 = vadd.f32 %v2238_v45, %v2739_v18  ;;  %v710_v51 = vpop.f32.mrb[17].mxu0  ;;  %v1446_v62 = vsel %vm515_vm0, %v1370_v61, 0.0  ;;  %v1445_v58 = vadd.f32 %v1444_v39, %v1443_v8  ;;  %v3011_v61 = vpop.f32.mrb[11].mxu1  ;;  %v1012_v47 = vadd.s32 360, %v2638_v35 }
 0x110   : > { %v711_v48 = vadd.f32 %v2739_v18, %v710_v51  ;;  %v2239_v36 = vpop.f32.mrb[18].mxu0  ;;  %v1251_v45 = vsel %vm515_vm0, %v1174_v17, 0.0  ;;  %v1372_v51 = vmul.f32 %v1175_v33, %v1175_v33  ;;  %vm1118_vm8 = vcmp.lt.s32.totalorder %v2745_v20, 17554  ;;  %936 = vst.msk [vmem:[%s2784_s17 + $0x118] sm:$0xff] %vm515_vm0, %v3002_v6 }
 0x111   : > { %919 = vst.msk [vmem:[%s2784_s17 + $0x90] sm:$0xff] %vm515_vm0, %v719_v26  ;;  %v722_v0 = vadd.f32 %v2239_v36, %v2739_v18  ;;  %v713_v63 = vpop.f32.mrb[19].mxu0  ;;  %vm1119_vm9 = vcmp.lt.s32.totalorder %v2756_v28, 17554  ;;  %v1448_v24 = vsel %vm515_vm0, %v1371_v3, 0.0  ;;  %v1252_v8 = vadd.f32 %v1251_v45, %v1250_v43  ;;  %v3045_v45 = vpop.f32.mrb[12].mxu1 }
 0x112   : > { %917 = vst.msk [vmem:[%s2784_s17 + $0x80] sm:$0xff] %vm515_vm0, %v711_v48  ;;  %v1176_v39 = vsel %vm1112_vm2, %v711_v48, 0.0  ;;  %v714_v60 = vadd.f32 %v2739_v18, %v713_v63  ;;  %v1447_v17 = vadd.f32 %v1446_v62, %v1445_v58  ;;  %v1253_v27 = vsel %vm515_vm0, %v1175_v33, 0.0 }
 0x113   : > { %v1373_v36 = vmul.f32 %v1176_v39, %v1176_v39  ;;  %920 = vst.msk [vmem:[%s2784_s17 + $0x98] sm:$0xff] %vm515_vm0, %v722_v0  ;;  %v1178_v15 = vsel %vm1114_vm3, %v719_v26, 0.0  ;;  %v1255_v48 = vsel %vm515_vm0, %v1176_v39, 0.0  ;;  %v1254_v11 = vadd.f32 %v1253_v27, %v1252_v8 }
 0x114   : > { %918 = vst.msk [vmem:[%s2784_s17 + $0x88] sm:$0xff] %vm515_vm0, %v714_v60  ;;  %v1177_v63 = vsel %vm1113_vm4, %v714_v60, 0.0  ;;  %v1449_v1 = vadd.f32 %v1448_v24, %v1447_v17  ;;  %v1179_v3 = vsel %vm1115_vm5, %v722_v0, 0.0  ;;  %v3040_v62 = vadd.s32 %v2645_v38, %v2971_v10  ;;  %v3049_v10 = vpop.f32.mrb[13].mxu1 }
 0x115   : > { %v1450_v33 = vsel %vm515_vm0, %v1372_v51, 0.0  ;;  %v1452_v14 = vsel %vm515_vm0, %v1373_v36, 0.0  ;;  %v1257_v26 = vsel %vm515_vm0, %v1177_v63, 0.0  ;;  %v1374_v58 = vmul.f32 %v1177_v63, %v1177_v63 }
 0x116   : > { %v2242_v43 = vpop.f32.mrb[20].mxu0  ;;  %v1375_v19 = vmul.f32 %v1178_v15, %v1178_v15  ;;  %v1256_v27 = vadd.f32 %v1255_v48, %v1254_v11  ;;  %v1451_v39 = vadd.f32 %v1450_v33, %v1449_v1  ;;  %vm1120_vm10 = vcmp.lt.s32.totalorder %v2765_v31, 17554  ;;  %v3057_v11 = vpop.f32.mrb[14].mxu1 }
 0x117   : > { %v735_v16 = vadd.f32 %v2242_v43, %v2739_v18  ;;  %v726_v0 = vpop.f32.mrb[21].mxu0  ;;  %v1376_v51 = vmul.f32 %v1179_v3, %v1179_v3  ;;  %v1454_v60 = vsel %vm515_vm0, %v1374_v58, 0.0  ;;  %v3055_v17 = vadd.s32 %v2645_v38, %v2986_v55  ;;  %v3066_v58 = vpop.f32.mrb[15].mxu1 }
 0x118   : > { %v727_v24 = vadd.f32 %v2739_v18, %v726_v0  ;;  %v2243_v8 = vpop.f32.mrb[22].mxu0  ;;  %v1453_v1 = vadd.f32 %v1452_v14, %v1451_v39  ;;  %v1258_v36 = vadd.f32 %v1257_v26, %v1256_v27  ;;  %vm1121_vm11 = vcmp.lt.s32.totalorder %v2777_v41, 17554  ;;  %v3099_v29 = vpop.f32.mrb[16].mxu1 }
 0x119   : > { %923 = vst.msk [vmem:[%s2784_s17 + $0xb0] sm:$0xff] %vm515_vm0, %v735_v16  ;;  %v738_v48 = vadd.f32 %v2243_v8, %v2739_v18  ;;  %v729_v63 = vpop.f32.mrb[23].mxu0  ;;  %v3064_v33 = vadd.s32 %v2645_v38, %v1014_v7  ;;  %v1259_v55 = vsel %vm515_vm0, %v1178_v15, 0.0  ;;  %vm1122_vm12 = vcmp.lt.s32.totalorder %v2762_v30, 17554 }
 0x11a   : > { %921 = vst.msk [vmem:[%s2784_s17 + $0xa0] sm:$0xff] %vm515_vm0, %v727_v24  ;;  %v1180_v14 = vsel %vm1116_vm6, %v727_v24, 0.0  ;;  %v730_v26 = vadd.f32 %v2739_v18, %v729_v63  ;;  %v3076_v43 = vadd.s32 %v2645_v38, %v1012_v47  ;;  %v1456_v7 = vsel %vm515_vm0, %v1375_v19, 0.0 }
 0x11b   : > { %3850 = vst [vmem:[#allocation6_spill] sm:$0xff] %v3064_v33  ;;  %v1260_v27 = vadd.f32 %v1259_v55, %v1258_v36  ;;  %v1455_v39 = vadd.f32 %v1454_v60, %v1453_v1  ;;  %v1377_v0 = vmul.f32 %v1180_v14, %v1180_v14  ;;  %924 = vst.msk [vmem:[%s2784_s17 + $0xb8] sm:$0xff] %vm515_vm0, %v738_v48  ;;  %vm1123_vm13 = vcmp.lt.s32.totalorder %v2770_v34, 17554 }
 0x11c   : > { %v1261_v15 = vsel %vm515_vm0, %v1179_v3, 0.0  ;;  %v1458_v23 = vsel %vm515_vm0, %v1376_v51, 0.0  ;;  %v1263_v24 = vsel %vm515_vm0, %v1180_v14, 0.0  ;;  %922 = vst.msk [vmem:[%s2784_s17 + $0xa8] sm:$0xff] %vm515_vm0, %v730_v26  ;;  %v1181_v47 = vsel %vm1117_vm7, %v730_v26, 0.0  ;;  %v3107_v26 = vpop.f32.mrb[17].mxu1 }
 0x11d   : > { %v1457_v8 = vadd.f32 %v1456_v7, %v1455_v39  ;;  %v1182_v19 = vsel %vm1118_vm8, %v735_v16, 0.0  ;;  %v1262_v60 = vadd.f32 %v1261_v15, %v1260_v27  ;;  %v1183_v1 = vsel %vm1119_vm9, %v738_v48, 0.0  ;;  %v3116_v15 = vpop.f32.mrb[18].mxu1 }
 0x11e   : > { %v1460_v36 = vsel %vm515_vm0, %v1377_v0, 0.0  ;;  %v1265_v3 = vsel %vm515_vm0, %v1181_v47, 0.0  ;;  %v1378_v51 = vmul.f32 %v1181_v47, %v1181_v47  ;;  %v2246_v63 = vpop.f32.mrb[24].mxu0  ;;  %v3097_v55 = vadd.f32 %v2739_v18, %v2904_v9  ;;  %3851 = vst [vmem:[#allocation7_spill] sm:$0xff] %v3116_v15 }
 0x11f   : > { %v1264_v14 = vadd.f32 %v1263_v24, %v1262_v60  ;;  %v1459_v20 = vadd.f32 %v1458_v23, %v1457_v8  ;;  %v751_v16 = vadd.f32 %v2246_v63, %v2739_v18  ;;  %v742_v28 = vpop.f32.mrb[25].mxu0  ;;  %vm1124_vm14 = vcmp.lt.s32.totalorder %v2790_v49, 17554  ;;  %v3125_v60 = vpop.f32.mrb[19].mxu1 }
 0x120   : > { %v3105_v48 = vadd.f32 %v2941_v12, %v2739_v18  ;;  %v1379_v7 = vmul.f32 %v1182_v19, %v1182_v19  ;;  %v1462_v9 = vsel %vm515_vm0, %v1378_v51, 0.0  ;;  %v743_v27 = vadd.f32 %v2739_v18, %v742_v28  ;;  %v2247_v39 = vpop.f32.mrb[26].mxu0  ;;  %934 = vst.msk [vmem:[%s2784_s17 + $0x108] sm:$0xff] %vm515_vm0, %v3097_v55  ;;  %3852 = vst [vmem:[#allocation8_spill] sm:$0xff] %v3125_v60  ;;  %v3155_v15 = vpop.f32.mrb[20].mxu1 }
 0x121   : > { %vm1128_vm15 = vcmp.lt.s32.totalorder %v2814_v46, 17554  ;;  %v1017_v0 = vadd.s32 400, %v2638_v35  ;;  %v1461_v12 = vadd.f32 %v1460_v36, %v1459_v20  ;;  %v1380_v23 = vmul.f32 %v1183_v1, %v1183_v1  ;;  %927 = vst.msk [vmem:[%s2784_s17 + $0xd0] sm:$0xff] %vm515_vm0, %v751_v16  ;;  %v745_v8 = vpop.f32.mrb[27].mxu0 }
 0x122   : > { %v1266_v24 = vadd.f32 %v1265_v3, %v1264_v14  ;;  %v754_v47 = vadd.f32 %v2247_v39, %v2739_v18  ;;  %vm1125_vm1 = vcmp.lt.s32.totalorder %v2796_v53, 17554  ;;  %939 = vst.msk [vmem:[%s2784_s17 + $0x130] sm:$0xff] %vm515_vm0, %v3105_v48  ;;  %v1267_v51 = vsel %vm515_vm0, %v1182_v19, 0.0  ;;  %925 = vst.msk [vmem:[%s2784_s17 + $0xc0] sm:$0xff] %vm515_vm0, %v743_v27 }
 0x123   : > { %v1184_v36 = vsel %vm1120_vm10, %v743_v27, 0.0  ;;  %v746_v3 = vadd.f32 %v2739_v18, %v745_v8  ;;  %vm1126_vm2 = vcmp.lt.s32.totalorder %v2780_v42, 17554  ;;  %v1015_v63 = vadd.s32 384, %v2638_v35 }
 0x124   : > { %v1268_v14 = vadd.f32 %v1267_v51, %v1266_v24  ;;  %v1463_v20 = vadd.f32 %v1462_v9, %v1461_v12  ;;  %v1381_v28 = vmul.f32 %v1184_v36, %v1184_v36  ;;  %928 = vst.msk [vmem:[%s2784_s17 + $0xd8] sm:$0xff] %vm515_vm0, %v754_v47  ;;  %vm1127_vm3 = vcmp.lt.s32.totalorder %v2793_v52, 17554 }
 0x125   : > { %v3139_v19 = vadd.s32 408, %v2638_v35  ;;  %v1464_v39 = vsel %vm515_vm0, %v1379_v7, 0.0  ;;  %v1269_v31 = vsel %vm515_vm0, %v1183_v1, 0.0  ;;  %v1271_v27 = vsel %vm515_vm0, %v1184_v36, 0.0  ;;  %926 = vst.msk [vmem:[%s2784_s17 + $0xc8] sm:$0xff] %vm515_vm0, %v746_v3 }
 0x126   : > { %v1185_v24 = vsel %vm1121_vm11, %v746_v3, 0.0  ;;  %v1466_v9 = vsel %vm515_vm0, %v1380_v23, 0.0  ;;  %v1465_v12 = vadd.f32 %v1464_v39, %v1463_v20  ;;  %v1186_v8 = vsel %vm1122_vm12, %v751_v16, 0.0  ;;  %v2250_v60 = vpop.f32.mrb[28].mxu0  ;;  %v3159_v16 = vpop.f32.mrb[21].mxu1 }
 0x127   : > { %v1270_v51 = vadd.f32 %v1269_v31, %v1268_v14  ;;  %v1468_v33 = vsel %vm515_vm0, %v1381_v28, 0.0  ;;  %v1187_v7 = vsel %vm1123_vm13, %v754_v47, 0.0  ;;  %v1273_v1 = vsel %vm515_vm0, %v1185_v24, 0.0  ;;  %v758_v20 = vpop.f32.mrb[29].mxu0  ;;  %v3167_v31 = vpop.f32.mrb[22].mxu1 }
 0x128   : > { %v1382_v36 = vmul.f32 %v1185_v24, %v1185_v24  ;;  %v1467_v3 = vadd.f32 %v1466_v9, %v1465_v12  ;;  %v767_v23 = vadd.f32 %v2250_v60, %v2739_v18  ;;  %v1016_v30 = vadd.s32 392, %v2638_v35  ;;  %v2251_v28 = vpop.f32.mrb[30].mxu0 }
 0x129   : > { %v1272_v41 = vadd.f32 %v1271_v27, %v1270_v51  ;;  %v1383_v14 = vmul.f32 %v1186_v8, %v1186_v8  ;;  %v759_v47 = vadd.f32 %v2739_v18, %v758_v20  ;;  %vm1129_vm4 = vcmp.lt.s32.totalorder %v2830_v22, 17554  ;;  %v761_v12 = vpop.f32.mrb[31].mxu0  ;;  %v3173_v51 = vpop.f32.mrb[23].mxu1 }
 0x12a   : > { %v1470_v34 = vsel %vm515_vm0, %v1382_v36, 0.0  ;;  %v3165_v39 = vadd.s32 %v2645_v38, %v1017_v0  ;;  %v1469_v60 = vadd.f32 %v1468_v33, %v1467_v3  ;;  %v1384_v27 = vmul.f32 %v1187_v7, %v1187_v7  ;;  %931 = vst.msk [vmem:[%s2784_s17 + $0xf0] sm:$0xff] %vm515_vm0, %v767_v23 }
 0x12b   : > { %v1274_v24 = vadd.f32 %v1273_v1, %v1272_v41  ;;  %v770_v9 = vadd.f32 %v2251_v28, %v2739_v18  ;;  %vm1130_vm5 = vcmp.lt.s32.totalorder %v2811_v4, 17554  ;;  %v1275_v36 = vsel %vm515_vm0, %v1186_v8, 0.0  ;;  %929 = vst.msk [vmem:[%s2784_s17 + $0xe0] sm:$0xff] %vm515_vm0, %v759_v47 }
 0x12c   : > { %v1188_v33 = vsel %vm1124_vm14, %v759_v47, 0.0  ;;  %v762_v0 = vadd.f32 %v2739_v18, %v761_v12  ;;  %v3182_v1 = vadd.s32 %v2645_v38, %v1015_v63  ;;  %v1471_v3 = vadd.f32 %v1470_v34, %v1469_v60 }
 0x12d   : > { %v1276_v41 = vadd.f32 %v1275_v36, %v1274_v24  ;;  %v1385_v20 = vmul.f32 %v1188_v33, %v1188_v33  ;;  %932 = vst.msk [vmem:[%s2784_s17 + $0xf8] sm:$0xff] %vm515_vm0, %v770_v9  ;;  %v1192_v28 = vsel %vm1128_vm15, %v2893_v59, 0.0  ;;  %vm1131_vm6 = vcmp.lt.s32.totalorder %v2823_v5, 17554  ;;  %v3205_v36 = vpop.f32.mrb[24].mxu1 }
 0x12e   : > { %v1472_v8 = vsel %vm515_vm0, %v1383_v14, 0.0  ;;  %v1277_v49 = vsel %vm515_vm0, %v1187_v7, 0.0  ;;  %v1279_v47 = vsel %vm515_vm0, %v1188_v33, 0.0  ;;  %930 = vst.msk [vmem:[%s2784_s17 + $0xe8] sm:$0xff] %vm515_vm0, %v762_v0  ;;  %v1189_v63 = vsel %vm1125_vm1, %v762_v0, 0.0 }
 0x12f   : > { %vm1132_vm7 = vcmp.lt.s32.totalorder %v2849_v57, 17554  ;;  %v1474_v34 = vsel %vm515_vm0, %v1384_v27, 0.0  ;;  %v1473_v60 = vadd.f32 %v1472_v8, %v1471_v3  ;;  %v1190_v46 = vsel %vm1126_vm2, %v767_v23, 0.0  ;;  %v3213_v23 = vpop.f32.mrb[25].mxu1 }
 0x130   : > { %v1278_v59 = vadd.f32 %v1277_v49, %v1276_v41  ;;  %v1476_v14 = vsel %vm515_vm0, %v1385_v20, 0.0  ;;  %v1191_v7 = vsel %vm1127_vm3, %v770_v9, 0.0  ;;  %v1281_v24 = vsel %vm515_vm0, %v1189_v63, 0.0 }
 0x131   : > { %v1386_v12 = vmul.f32 %v1189_v63, %v1189_v63  ;;  %v1475_v33 = vadd.f32 %v1474_v34, %v1473_v60  ;;  %v791_v27 = vadd.f32 %v2739_v18, %v2945_v21  ;;  %v3211_v42 = vadd.f32 %v2949_v25, %v2739_v18  ;;  %v3226_v25 = vpop.f32.mrb[26].mxu1 }
 0x132   : > { %v1280_v53 = vadd.f32 %v1279_v47, %v1278_v59  ;;  %v1387_v52 = vmul.f32 %v1190_v46, %v1190_v46  ;;  %vm1134_vm8 = vcmp.lt.s32.totalorder %v2846_v56, 17554  ;;  %v3219_v0 = vadd.f32 %v2739_v18, %v2959_v40  ;;  %v3236_v40 = vpop.f32.mrb[27].mxu1 }
 0x133   : > { %v1478_v9 = vsel %vm515_vm0, %v1386_v12, 0.0  ;;  %vm1133_vm9 = vcmp.lt.s32.totalorder %v2868_v54, 17554  ;;  %v3224_v21 = vadd.s32 %v2645_v38, %v3139_v19  ;;  %v1477_v41 = vadd.f32 %v1476_v14, %v1475_v33  ;;  %937 = vst.msk [vmem:[%s2784_s17 + $0x120] sm:$0xff] %vm515_vm0, %v791_v27  ;;  %940 = vst.msk [vmem:[%s2784_s17 + $0x138] sm:$0xff] %vm515_vm0, %v3211_v42  ;;  %v3273_v33 = vpop.f32.mrb[28].mxu1 }
 0x134   : > { %v1282_v3 = vadd.f32 %v1281_v24, %v1280_v53  ;;  %v1389_v20 = vmul.f32 %v1192_v28, %v1192_v28  ;;  %v3234_v8 = vadd.s32 %v2645_v38, %v1016_v30  ;;  %v1283_v49 = vsel %vm515_vm0, %v1190_v46, 0.0  ;;  %938 = vst.msk [vmem:[%s2784_s17 + $0x128] sm:$0xff] %vm515_vm0, %v3219_v0  ;;  %v3283_v5 = vpop.f32.mrb[29].mxu1 }
 0x135   : > { %v1388_v47 = vmul.f32 %v1191_v7, %v1191_v7  ;;  %v1021_v19 = vadd.s32 432, %v2638_v35  ;;  %v1019_v63 = vadd.s32 416, %v2638_v35  ;;  %v1479_v60 = vadd.f32 %v1478_v9, %v1477_v41 }
 0x136   : > { %v1284_v34 = vadd.f32 %v1283_v49, %v1282_v3  ;;  %v1193_v30 = vsel %vm1129_vm4, %v3097_v55, 0.0  ;;  %v3249_v59 = vadd.f32 %v2990_v37, %v2739_v18  ;;  %v1480_v46 = vsel %vm515_vm0, %v1387_v52, 0.0  ;;  %v3853_v3 = vld [vmem:[#allocation5_spill] sm:$0xff] }
 0x137   : > { %v1285_v14 = vsel %vm515_vm0, %v1191_v7, 0.0  ;;  %v1194_v24 = vsel %vm1130_vm5, %v2887_v44, 0.0  ;;  %v1287_v12 = vsel %vm515_vm0, %v1192_v28, 0.0  ;;  %vm1135_vm10 = vcmp.lt.s32.totalorder %v2865_v13, 17554 }
 0x138   : > { %vm1136_vm11 = vcmp.lt.s32.totalorder %v2910_v50, 17554  ;;  %v1481_v22 = vadd.f32 %v1480_v46, %v1479_v60  ;;  %v1286_v55 = vadd.f32 %v1285_v14, %v1284_v34  ;;  %v1484_v37 = vsel %vm515_vm0, %v1389_v20, 0.0  ;;  %943 = vst.msk [vmem:[%s2784_s17 + $0x150] sm:$0xff] %vm515_vm0, %v3249_v59  ;;  %v3294_v20 = vpop.f32.mrb[30].mxu1  ;;  %v3854_v14 = vld [vmem:[#allocation3_spill] sm:$0xff] }
 0x139   : > { %v807_v7 = vadd.f32 %v2739_v18, %v2996_v32  ;;  %v1482_v4 = vsel %vm515_vm0, %v1388_v47, 0.0  ;;  %v1195_v44 = vsel %vm1131_vm6, %v3002_v6, 0.0  ;;  %v1390_v28 = vmul.f32 %v1193_v30, %v1193_v30  ;;  %v3300_v60 = vpop.f32.mrb[31].mxu1 }
 0x13a   : > { %v3271_v53 = vadd.f32 %v3004_v2, %v2739_v18  ;;  %v1288_v52 = vadd.f32 %v1287_v12, %v1286_v55  ;;  %v1483_v9 = vadd.f32 %v1482_v4, %v1481_v22  ;;  %v1196_v41 = vsel %vm1132_vm7, %v791_v27, 0.0 }
 0x13b   : > { %941 = vst.msk [vmem:[%s2784_s17 + $0x140] sm:$0xff] %vm515_vm0, %v807_v7  ;;  %v3281_v32 = vadd.f32 %v2739_v18, %v3011_v61  ;;  %v1391_v6 = vmul.f32 %v1194_v24, %v1194_v24  ;;  %v1289_v2 = vsel %vm515_vm0, %v1193_v30, 0.0  ;;  %vm1137_vm12 = vcmp.lt.s32.totalorder %v3853_v3, 17554 }
 0x13c   : > { %944 = vst.msk [vmem:[%s2784_s17 + $0x158] sm:$0xff] %vm515_vm0, %v3271_v53  ;;  %v1022_v57 = vadd.s32 440, %v2638_v35  ;;  %v3292_v27 = vadd.s32 424, %v2638_v35  ;;  %v1291_v61 = vsel %vm515_vm0, %v1194_v24, 0.0  ;;  %v1485_v49 = vadd.f32 %v1484_v37, %v1483_v9 }
 0x13d   : > { %v1392_v47 = vmul.f32 %v1195_v44, %v1195_v44  ;;  %v1290_v34 = vadd.f32 %v1289_v2, %v1288_v52  ;;  %942 = vst.msk [vmem:[%s2784_s17 + $0x148] sm:$0xff] %vm515_vm0, %v3281_v32  ;;  %v1486_v30 = vsel %vm515_vm0, %v1390_v28, 0.0  ;;  %v1393_v46 = vmul.f32 %v1196_v41, %v1196_v41  ;;  %v3855_v28 = vld [vmem:[#allocation4_spill] sm:$0xff] }
 0x13e   : > { %vm1138_vm13 = vcmp.lt.s32.totalorder %v3854_v14, 17554  ;;  %v3306_v12 = vadd.f32 %v3045_v45, %v2739_v18  ;;  %v3310_v24 = vadd.f32 %v2739_v18, %v3049_v10  ;;  %v1487_v55 = vadd.f32 %v1486_v30, %v1485_v49  ;;  %v3856_v30 = vld [vmem:[#allocation7_spill] sm:$0xff] }
 0x13f   : > { %v1292_v22 = vadd.f32 %v1291_v61, %v1290_v34  ;;  %v1198_v37 = vsel %vm1134_vm8, %v3105_v48, 0.0  ;;  %v1197_v4 = vsel %vm1133_vm9, %v3219_v0, 0.0  ;;  %vm1139_vm14 = vcmp.lt.s32.totalorder %v3855_v28, 17554 }
 0x140   : > { %v1488_v45 = vsel %vm515_vm0, %v1391_v6, 0.0  ;;  %v1293_v52 = vsel %vm515_vm0, %v1195_v44, 0.0  ;;  %v1295_v10 = vsel %vm515_vm0, %v1196_v41, 0.0  ;;  %947 = vst.msk [vmem:[%s2784_s17 + $0x170] sm:$0xff] %vm515_vm0, %v3306_v12  ;;  %945 = vst.msk [vmem:[%s2784_s17 + $0x160] sm:$0xff] %vm515_vm0, %v3310_v24  ;;  %vm1140_vm15 = vcmp.lt.s32.totalorder %v3055_v17, 17554 }
 0x141   : > { %v3331_v56 = vadd.f32 %v3057_v11, %v2739_v18  ;;  %v1489_v54 = vadd.f32 %v1488_v45, %v1487_v55  ;;  %v1294_v48 = vadd.f32 %v1293_v52, %v1292_v22  ;;  %v3334_v0 = vadd.s32 %v2645_v38, %v1021_v19 }
 0x142   : > { %v3337_v44 = vadd.s32 %v2645_v38, %v1019_v63  ;;  %v1490_v9 = vsel %vm515_vm0, %v1392_v47, 0.0  ;;  %v1299_v41 = vsel %vm515_vm0, %v1198_v37, 0.0  ;;  %v1492_v6 = vsel %vm515_vm0, %v1393_v46, 0.0 }
 0x143   : > { %v1394_v2 = vmul.f32 %v1197_v4, %v1197_v4  ;;  %948 = vst.msk [vmem:[%s2784_s17 + $0x178] sm:$0xff] %vm515_vm0, %v3331_v56  ;;  %v1296_v11 = vadd.f32 %v1295_v10, %v1294_v48  ;;  %v1491_v61 = vadd.f32 %v1490_v9, %v1489_v54  ;;  %v1199_v19 = vsel %vm1135_vm10, %v3211_v42, 0.0  ;;  %v3858_v48 = vld [vmem:[#allocation6_spill] sm:$0xff] }
 0x144   : > { %v1200_v63 = vsel %vm1136_vm11, %v807_v7, 0.0  ;;  %vm1142_vm1 = vcmp.lt.s32.totalorder %v3040_v62, 17554  ;;  %v1395_v49 = vmul.f32 %v1198_v37, %v1198_v37  ;;  %v1297_v47 = vsel %vm515_vm0, %v1197_v4, 0.0 }
 0x145   : > { %v826_v34 = vadd.f32 %v2739_v18, %v3066_v58  ;;  %vm1141_vm2 = vcmp.lt.s32.totalorder %v3076_v43, 17554  ;;  %v3357_v13 = vadd.f32 %v3099_v29, %v2739_v18  ;;  %v1493_v42 = vadd.f32 %v1492_v6, %v1491_v61  ;;  %v3857_v29 = vld [vmem:[#allocation8_spill] sm:$0xff] }
 0x146   : > { %v1298_v50 = vadd.f32 %v1297_v47, %v1296_v11  ;;  %v3361_v7 = vadd.f32 %v2739_v18, %v3107_v26  ;;  %v3365_v46 = vadd.f32 %v3856_v30, %v2739_v18  ;;  %v1396_v22 = vmul.f32 %v1199_v19, %v1199_v19 }
 0x147   : > { %v1494_v58 = vsel %vm515_vm0, %v1394_v2, 0.0  ;;  %v1397_v55 = vmul.f32 %v1200_v63, %v1200_v63  ;;  %946 = vst.msk [vmem:[%s2784_s17 + $0x168] sm:$0xff] %vm515_vm0, %v826_v34  ;;  %951 = vst.msk [vmem:[%s2784_s17 + $0x190] sm:$0xff] %vm515_vm0, %v3357_v13  ;;  %v3375_v37 = vadd.f32 %v2739_v18, %v3857_v29  ;;  %v1201_v45 = vsel %vm1137_vm12, %v3281_v32, 0.0 }
 0x148   : > { %v1300_v26 = vadd.f32 %v1299_v41, %v1298_v50  ;;  %v1495_v4 = vadd.f32 %v1494_v58, %v1493_v42  ;;  %949 = vst.msk [vmem:[%s2784_s17 + $0x180] sm:$0xff] %vm515_vm0, %v3361_v7  ;;  %952 = vst.msk [vmem:[%s2784_s17 + $0x198] sm:$0xff] %vm515_vm0, %v3365_v46  ;;  %v3387_v52 = vadd.s32 %v2645_v38, %v1022_v57  ;;  %v1496_v10 = vsel %vm515_vm0, %v1395_v49, 0.0 }
 0x149   : > { %v1301_v18 = vsel %vm515_vm0, %v1199_v19, 0.0  ;;  %v1303_v54 = vsel %vm515_vm0, %v1200_v63, 0.0  ;;  %vm1143_vm3 = vcmp.lt.s32.totalorder %v3858_v48, 17554  ;;  %vm1144_vm4 = vcmp.lt.s32.totalorder %v3182_v1, 17554  ;;  %950 = vst.msk [vmem:[%s2784_s17 + $0x188] sm:$0xff] %vm515_vm0, %v3375_v37 }
 0x14a   : > { %v3399_v32 = vadd.s32 %v2645_v38, %v3292_v27  ;;  %v1497_v3 = vadd.f32 %v1496_v10, %v1495_v4  ;;  %v1202_v57 = vsel %vm1138_vm13, %v3249_v59, 0.0  ;;  %v1302_v9 = vadd.f32 %v1301_v18, %v1300_v26  ;;  %v3416_v59 = vld [vmem:[%s3838_s2] ss:$0 sm:$0xff] }
 0x14b   : > { %v1025_v41 = vadd.s32 464, %v2638_v35  ;;  %v1498_v6 = vsel %vm515_vm0, %v1396_v22, 0.0  ;;  %v1500_v2 = vsel %vm515_vm0, %v1397_v55, 0.0  ;;  %v1203_v11 = vsel %vm1139_vm14, %v3271_v53, 0.0 }
 0x14c   : > { %v1398_v61 = vmul.f32 %v1201_v45, %v1201_v45  ;;  %v1304_v27 = vadd.f32 %v1303_v54, %v1302_v9  ;;  %v1499_v19 = vadd.f32 %v1498_v6, %v1497_v3  ;;  %v1204_v14 = vsel %vm1140_vm15, %v3310_v24, 0.0 }
 0x14d   : > { %v3420_v63 = vadd.f32 %v3416_v59, %v3155_v15  ;;  %v1307_v28 = vsel %vm515_vm0, %v1202_v57, 0.0  ;;  %v1399_v53 = vmul.f32 %v1202_v57, %v1202_v57  ;;  %v1305_v49 = vsel %vm515_vm0, %v1201_v45, 0.0 }
 0x14e   : > { %vm1145_vm5 = vcmp.lt.s32.totalorder %v3234_v8, 17554  ;;  %v1023_v17 = vadd.s32 448, %v2638_v35  ;;  %v1501_v24 = vadd.f32 %v1500_v2, %v1499_v19  ;;  %v1400_v47 = vmul.f32 %v1203_v11, %v1203_v11 }
 0x14f   : > { %v1306_v42 = vadd.f32 %v1305_v49, %v1304_v27  ;;  %vm1146_vm6 = vcmp.lt.s32.totalorder %v3165_v39, 17554  ;;  %955 = vst.msk [vmem:[%s2784_s17 + $0x1b0] sm:$0xff] %vm515_vm0, %v3420_v63  ;;  %v3432_v15 = vadd.f32 %v3416_v59, %v3159_v16  ;;  %v1502_v50 = vsel %vm515_vm0, %v1398_v61, 0.0 }
 0x150   : > { %v1206_v30 = vsel %vm1142_vm1, %v3306_v12, 0.0  ;;  %v1401_v22 = vmul.f32 %v1204_v14, %v1204_v14  ;;  %v3440_v58 = vadd.f32 %v3416_v59, %v3167_v31  ;;  %v1503_v29 = vadd.f32 %v1502_v50, %v1501_v24 }
 0x151   : > { %v1308_v55 = vadd.f32 %v1307_v28, %v1306_v42  ;;  %v1205_v26 = vsel %vm1141_vm2, %v826_v34, 0.0  ;;  %953 = vst.msk [vmem:[%s2784_s17 + $0x1a0] sm:$0xff] %vm515_vm0, %v3432_v15  ;;  %v3449_v16 = vadd.f32 %v3416_v59, %v3173_v51  ;;  %v1504_v62 = vsel %vm515_vm0, %v1399_v53, 0.0 }
 0x152   : > { %v1309_v12 = vsel %vm515_vm0, %v1203_v11, 0.0  ;;  %v1311_v31 = vsel %vm515_vm0, %v1204_v14, 0.0  ;;  %vm1147_vm7 = vcmp.lt.s32.totalorder %v3224_v21, 17554  ;;  %vm1148_vm8 = vcmp.lt.s32.totalorder %v3337_v44, 17554  ;;  %956 = vst.msk [vmem:[%s2784_s17 + $0x1b8] sm:$0xff] %vm515_vm0, %v3440_v58 }
 0x153   : > { %v1026_v43 = vadd.s32 472, %v2638_v35  ;;  %v1506_v34 = vsel %vm515_vm0, %v1400_v47, 0.0  ;;  %v1505_v51 = vadd.f32 %v1504_v62, %v1503_v29  ;;  %v1403_v4 = vmul.f32 %v1206_v30, %v1206_v30  ;;  %954 = vst.msk [vmem:[%s2784_s17 + $0x1a8] sm:$0xff] %vm515_vm0, %v3449_v16 }
 0x154   : > { %v1310_v45 = vadd.f32 %v1309_v12, %v1308_v55  ;;  %v1508_v10 = vsel %vm515_vm0, %v1401_v22, 0.0  ;;  %v1402_v18 = vmul.f32 %v1205_v26, %v1205_v26  ;;  %v3467_v54 = vadd.f32 %v3416_v59, %v3205_v36 }
 0x155   : > { %v3471_v3 = vadd.f32 %v3416_v59, %v3213_v23  ;;  %v1507_v9 = vadd.f32 %v1506_v34, %v1505_v51  ;;  %v1207_v6 = vsel %vm1143_vm3, %v3331_v56, 0.0  ;;  %v1208_v2 = vsel %vm1144_vm4, %v3361_v7, 0.0 }
 0x156   : > { %v1312_v57 = vadd.f32 %v1311_v31, %v1310_v45  ;;  %v1313_v11 = vsel %vm515_vm0, %v1205_v26, 0.0  ;;  %959 = vst.msk [vmem:[%s2784_s17 + $0x1d0] sm:$0xff] %vm515_vm0, %v3467_v54  ;;  %v3484_v36 = vadd.s32 %v2645_v38, %v1025_v41  ;;  %v3491_v23 = vadd.f32 %v3416_v59, %v3226_v25 }
 0x157   : > { %957 = vst.msk [vmem:[%s2784_s17 + $0x1c0] sm:$0xff] %vm515_vm0, %v3471_v3  ;;  %v1024_v56 = vadd.s32 456, %v2638_v35  ;;  %v1315_v1 = vsel %vm515_vm0, %v1206_v30, 0.0  ;;  %v1509_v7 = vadd.f32 %v1508_v10, %v1507_v9  ;;  %v3496_v61 = vadd.s32 %v2645_v38, %v1023_v17 }
 0x158   : > { %v1314_v48 = vadd.f32 %v1313_v11, %v1312_v57  ;;  %v1512_v27 = vsel %vm515_vm0, %v1403_v4, 0.0  ;;  %v1404_v41 = vmul.f32 %v1207_v6, %v1207_v6  ;;  %v1510_v19 = vsel %vm515_vm0, %v1402_v18, 0.0  ;;  %960 = vst.msk [vmem:[%s2784_s17 + $0x1d8] sm:$0xff] %vm515_vm0, %v3491_v23 }
 0x159   : > { %v1405_v14 = vmul.f32 %v1208_v2, %v1208_v2  ;;  %vm1150_vm9 = vcmp.lt.s32.totalorder %v3334_v0, 17554  ;;  %v1317_v25 = vsel %vm515_vm0, %v1207_v6, 0.0  ;;  %v1511_v53 = vadd.f32 %v1510_v19, %v1509_v7 }
 0x15a   : > { %v1316_v28 = vadd.f32 %v1315_v1, %v1314_v48  ;;  %v1209_v49 = vsel %vm1145_vm5, %v3375_v37, 0.0  ;;  %v1210_v17 = vsel %vm1146_vm6, %v3357_v13, 0.0  ;;  %v1319_v24 = vsel %vm515_vm0, %v1208_v2, 0.0 }
 0x15b   : > { %v3514_v47 = vadd.f32 %v3416_v59, %v3236_v40  ;;  %v3518_v42 = vadd.f32 %v3416_v59, %v3273_v33  ;;  %v1513_v50 = vadd.f32 %v1512_v27, %v1511_v53  ;;  %v3522_v8 = vadd.f32 %v3416_v59, %v3283_v5 }
 0x15c   : > { %v1318_v30 = vadd.f32 %v1317_v25, %v1316_v28  ;;  %v3526_v39 = vadd.f32 %v3416_v59, %v3294_v20  ;;  %v1514_v13 = vsel %vm515_vm0, %v1404_v41, 0.0  ;;  %v1516_v40 = vsel %vm515_vm0, %v1405_v14, 0.0 }
 0x15d   : > { %v1406_v37 = vmul.f32 %v1209_v49, %v1209_v49  ;;  %958 = vst.msk [vmem:[%s2784_s17 + $0x1c8] sm:$0xff] %vm515_vm0, %v3514_v47  ;;  %963 = vst.msk [vmem:[%s2784_s17 + $0x1f0] sm:$0xff] %vm515_vm0, %v3518_v42  ;;  %v3538_v33 = vadd.f32 %v3416_v59, %v3300_v60  ;;  %v1515_v22 = vadd.f32 %v1514_v13, %v1513_v50  ;;  %v1211_v20 = vsel %vm1147_vm7, %v3365_v46, 0.0 }
 0x15e   : > { %v1320_v5 = vadd.f32 %v1319_v24, %v1318_v30  ;;  %v1212_v55 = vsel %vm1148_vm8, %v3432_v15, 0.0  ;;  %961 = vst.msk [vmem:[%s2784_s17 + $0x1e0] sm:$0xff] %vm515_vm0, %v3522_v8  ;;  %964 = vst.msk [vmem:[%s2784_s17 + $0x1f8] sm:$0xff] %vm515_vm0, %v3526_v39  ;;  %v1407_v29 = vmul.f32 %v1210_v17, %v1210_v17  ;;  %v1321_v60 = vsel %vm515_vm0, %v1209_v49, 0.0 }
 0x15f   : > { %vm1151_vm10 = vcmp.lt.s32.totalorder %v3387_v52, 17554  ;;  %vm1149_vm11 = vcmp.lt.s32.totalorder %v3399_v32, 17554  ;;  %962 = vst.msk [vmem:[%s2784_s17 + $0x1e8] sm:$0xff] %vm515_vm0, %v3538_v33  ;;  %v1517_v21 = vadd.f32 %v1516_v40, %v1515_v22  ;;  %v1091_v44 = vadd.s32 %v2645_v38, %v1026_v43 }
 0x160   : > { %v1322_v46 = vadd.f32 %v1321_v60, %v1320_v5  ;;  %v1089_v59 = vadd.s32 %v2645_v38, %v1024_v56  ;;  %v1323_v15 = vsel %vm515_vm0, %v1210_v17, 0.0  ;;  %v1408_v26 = vmul.f32 %v1211_v20, %v1211_v20 }
 0x161   : > { %v1518_v62 = vsel %vm515_vm0, %v1406_v37, 0.0  ;;  %v1409_v12 = vmul.f32 %v1212_v55, %v1212_v55  ;;  %vm1154_vm12 = vcmp.lt.s32.totalorder %v3484_v36, 17554  ;;  %v1213_v32 = vsel %vm1149_vm11, %v3449_v16, 0.0 }
 0x162   : > { %v1324_v31 = vadd.f32 %v1323_v15, %v1322_v46  ;;  %v1519_v34 = vadd.f32 %v1518_v62, %v1517_v21  ;;  %vm1152_vm13 = vcmp.lt.s32.totalorder %v3496_v61, 17554  ;;  %v1520_v51 = vsel %vm515_vm0, %v1407_v29, 0.0 }
 0x163   : > { %v1325_v43 = vsel %vm515_vm0, %v1211_v20, 0.0  ;;  %v1327_v4 = vsel %vm515_vm0, %v1212_v55, 0.0  ;;  %v1027_v45 = vadd.s32 480, %v2638_v35  ;;  %v1214_v18 = vsel %vm1150_vm9, %v3420_v63, 0.0 }
 0x164   : > { %v1521_v10 = vadd.f32 %v1520_v51, %v1519_v34  ;;  %v1326_v57 = vadd.f32 %v1325_v43, %v1324_v31  ;;  %vm1155_vm14 = vcmp.lt.s32.totalorder %v1091_v44, 17554  ;;  %v1522_v9 = vsel %vm515_vm0, %v1408_v26, 0.0 }
 0x165   : > { %v1524_v16 = vsel %vm515_vm0, %v1409_v12, 0.0  ;;  %v1410_v6 = vmul.f32 %v1213_v32, %v1213_v32  ;;  %v1028_v2 = vadd.s32 488, %v2638_v35  ;;  %v1215_v1 = vsel %vm1151_vm10, %v3440_v58, 0.0 }
 0x166   : > { %v1328_v11 = vadd.f32 %v1327_v4, %v1326_v57  ;;  %v1523_v56 = vadd.f32 %v1522_v9, %v1521_v10  ;;  %v1216_v0 = vsel %vm1152_vm13, %v3471_v3, 0.0  ;;  %v1411_v63 = vmul.f32 %v1214_v18, %v1214_v18 }
 0x167   : > { %v1329_v7 = vsel %vm515_vm0, %v1213_v32, 0.0  ;;  %vm1153_vm15 = vcmp.lt.s32.totalorder %v1089_v59, 17554  ;;  %v1092_v48 = vadd.s32 %v2645_v38, %v1027_v45  ;;  %v1029_v19 = vadd.s32 496, %v2638_v35 }
 0x168   : > { %v1525_v27 = vadd.f32 %v1524_v16, %v1523_v56  ;;  %v1330_v41 = vadd.f32 %v1329_v7, %v1328_v11  ;;  %v1030_v14 = vadd.s32 504, %v2638_v35  ;;  %v1331_v25 = vsel %vm515_vm0, %v1214_v18, 0.0 }
 0x169   : > { %v1412_v52 = vmul.f32 %v1215_v1, %v1215_v1  ;;  %v1526_v58 = vsel %vm515_vm0, %v1410_v6, 0.0  ;;  %v1413_v28 = vmul.f32 %v1216_v0, %v1216_v0  ;;  %v1217_v53 = vsel %vm1153_vm15, %v3514_v47, 0.0 }
 0x16a   : > { %v1332_v61 = vadd.f32 %v1331_v25, %v1330_v41  ;;  %v1527_v3 = vadd.f32 %v1526_v58, %v1525_v27  ;;  %v1093_v49 = vadd.s32 %v2645_v38, %v1028_v2  ;;  %v1528_v17 = vsel %vm515_vm0, %v1411_v63, 0.0 }
 0x16b   : > { %v1333_v24 = vsel %vm515_vm0, %v1215_v1, 0.0  ;;  %v1335_v50 = vsel %vm515_vm0, %v1216_v0, 0.0  ;;  %vm1156_vm1 = vcmp.lt.s32.totalorder %v1092_v48, 17554  ;;  %v1218_v30 = vsel %vm1154_vm12, %v3467_v54, 0.0 }
 0x16c   : > { %v1529_v35 = vadd.f32 %v1528_v17, %v1527_v3  ;;  %v1334_v13 = vadd.f32 %v1333_v24, %v1332_v61  ;;  %v1094_v40 = vadd.s32 %v2645_v38, %v1029_v19  ;;  %v1530_v37 = vsel %vm515_vm0, %v1412_v52, 0.0 }
 0x16d   : > { %v1532_v47 = vsel %vm515_vm0, %v1413_v28, 0.0  ;;  %v1414_v5 = vmul.f32 %v1217_v53, %v1217_v53  ;;  %v1219_v55 = vsel %vm1155_vm14, %v3491_v23, 0.0  ;;  %v1220_v29 = vsel %vm1156_vm1, %v3522_v8, 0.0 }
 0x16e   : > { %v1336_v22 = vadd.f32 %v1335_v50, %v1334_v13  ;;  %v1531_v20 = vadd.f32 %v1530_v37, %v1529_v35  ;;  %v1415_v60 = vmul.f32 %v1218_v30, %v1218_v30  ;;  %v1337_v21 = vsel %vm515_vm0, %v1217_v53, 0.0 }
 0x16f   : > { %v1095_v54 = vadd.s32 %v2645_v38, %v1030_v14  ;;  %vm1157_vm2 = vcmp.lt.s32.totalorder %v1093_v49, 17554  ;;  %vm1158_vm3 = vcmp.lt.s32.totalorder %v1094_v40, 17554  ;;  %v1339_v59 = vsel %vm515_vm0, %v1218_v30, 0.0 }
 0x170   : > { %v1533_v36 = vadd.f32 %v1532_v47, %v1531_v20  ;;  %v1338_v46 = vadd.f32 %v1337_v21, %v1336_v22  ;;  %v1416_v15 = vmul.f32 %v1219_v55, %v1219_v55  ;;  %v1534_v26 = vsel %vm515_vm0, %v1414_v5, 0.0 }
 0x171   : > { %v1417_v62 = vmul.f32 %v1220_v29, %v1220_v29  ;;  %v1221_v23 = vsel %vm1157_vm2, %v3538_v33, 0.0  ;;  %v1536_v8 = vsel %vm515_vm0, %v1415_v60, 0.0  ;;  %v1341_v31 = vsel %vm515_vm0, %v1219_v55, 0.0 }
 0x172   : > { %v1340_v12 = vadd.f32 %v1339_v59, %v1338_v46  ;;  %v1535_v44 = vadd.f32 %v1534_v26, %v1533_v36  ;;  %v1343_v38 = vsel %vm515_vm0, %v1220_v29, 0.0  ;;  %vm1159_vm4 = vcmp.lt.s32.totalorder %v1095_v54, 17554 }
 0x173   : > { %v1222_v32 = vsel %vm1158_vm3, %v3518_v42, 0.0  ;;  %v1538_v43 = vsel %vm515_vm0, %v1416_v15, 0.0  ;;  %v1540_v4 = vsel %vm515_vm0, %v1417_v62, 0.0  ;;  %v1418_v45 = vmul.f32 %v1221_v23, %v1221_v23 }
 0x174   : > { %v1537_v34 = vadd.f32 %v1536_v8, %v1535_v44  ;;  %v1342_v51 = vadd.f32 %v1341_v31, %v1340_v12  ;;  %v1223_v33 = vsel %vm1159_vm4, %v3526_v39, 0.0  ;;  %v1419_v57 = vmul.f32 %v1222_v32, %v1222_v32 }
 0x175   : > { %v1345_v9 = vsel %vm515_vm0, %v1221_v23, 0.0  ;;  %v1347_v2 = vsel %vm515_vm0, %v1222_v32, 0.0  ;;  %v1420_v42 = vmul.f32 %v1223_v33, %v1223_v33  ;;  %v1542_v11 = vsel %vm515_vm0, %v1418_v45, 0.0 }
 0x176   : > { %v1344_v10 = vadd.f32 %v1343_v38, %v1342_v51  ;;  %v1539_v18 = vadd.f32 %v1538_v43, %v1537_v34  ;;  %v1544_v0 = vsel %vm515_vm0, %v1419_v57, 0.0  ;;  %v1349_v63 = vsel %vm515_vm0, %v1223_v33, 0.0 }
 0x177   : > { %v1546_v48 = vsel %vm515_vm0, %v1420_v42, 0.0 }
 0x178   : > { %v1541_v16 = vadd.f32 %v1540_v4, %v1539_v18  ;;  %v1346_v6 = vadd.f32 %v1345_v9, %v1344_v10 }
 0x17a   : > { %v1348_v56 = vadd.f32 %v1347_v2, %v1346_v6  ;;  %v1543_v1 = vadd.f32 %v1542_v11, %v1541_v16 }
 0x17c   : > { %v1350_v7 = vadd.f32 %v1349_v63, %v1348_v56  ;;  %v1545_v39 = vadd.f32 %v1544_v0, %v1543_v1 }
 0x17e   : > { %v1351_v27 = vrot.slane %v1350_v7, 4  ;;  %v1547_v41 = vadd.f32 %v1546_v48, %v1545_v39 }
 0x180   : > { %v1352_v19 = vadd.f32 %v1351_v27, %v1350_v7  ;;  %v1548_v14 = vrot.slane %v1547_v41, 4 }
 0x182   : > { %v1353_v25 = vrot.slane %v1352_v19, 2  ;;  %v1549_v52 = vadd.f32 %v1548_v14, %v1547_v41 }
 0x184   : > { %v1354_v58 = vadd.f32 %v1353_v25, %v1352_v19  ;;  %v1550_v28 = vrot.slane %v1549_v52, 2 }
 0x186   : > { %v1355_v61 = vrot.slane %v1354_v58, 1  ;;  %v1551_v3 = vadd.f32 %v1550_v28, %v1549_v52  ;;  %1570 = sbr.rel (!%p2554_p4) target bundleno = 469 (0x1d5), region = 36 }
 0x188   : > { %v1356_v53 = vadd.f32 %v1355_v61, %v1354_v58  ;;  %v1552_v49 = vrot.slane %v1551_v3, 1 }
 0x18a   : > { %v1553_v17 = vadd.f32 %v1552_v49, %v1551_v3  ;;  %1554 = vst.msk [vmem:[%s262_s30] sm:$0xff] %vm515_vm0, %v1356_v53 }
 0x18c   : > { %1555 = vst.msk [vmem:[%s266_s8] sm:$0xff] %vm515_vm0, %v1553_v17 }
 0x18d   : > { %s3868_s9 = smov (!%p1573_p9, %s1572_s9), 64 }
 0x18e   : > { %s2164_s14 = sshll.u32 %s3868_s9, 7 }
 0x18f   : > { %p2167_p10 = scmp.eq.s32.totalorder %s2164_s14, 0 }
 0x190   : > { %s3643_s15 = sshrl.u32 (!%p2167_p10), %s3868_s9, 6 }
 0x191   : > { %1581 = sbr.rel (%p2167_p10) target bundleno = 469 (0x1d5), region = 40  ;;  %p2168_p11 = scmp.le.s32.totalorder (!%p2167_p10), %s3643_s15, 0 }
 0x198   : > { %2023 = sbr.rel (%p2168_p11) target bundleno = 448 (0x1c0), region = 140  ;;  %s3859_s21 = smov (!%p2168_p11), %s3637_s13 }
 0x199   : > { %s3860_s26 = smov (!%p2168_p11), %s2784_s17  ;;  %s3652_s29 = smov (!%p2168_p11), 0  }
 0x19a   : > { %s3654_s12 = smov (!%p2168_p11), 0  }
 0x19f LB: >> { %v1769_v24 = vld [vmem:[%s2473_s26] sm:$0xff]  ;;  %v1771_v50 = vld [vmem:[%s2473_s26 + $0x8] sm:$0xff]  ;;  %v1773_v35 = vld [vmem:[%s2473_s26 + $0x10] sm:$0xff]  ;;  %s1897_s16 = sadd.s32 1, %s2477_s29  ;;  %s1763_s12 = sadd.s32 1, %s2481_s12   ;;  %s2481_s12 = sphi %s3654_s12, %s1763_s12   ;;  %s2477_s29 = sphi %s3652_s29, %s3863_s29   ;;  %s2473_s26 = sphi %s3860_s26, %s3862_s26   ;;  %s2469_s21 = sphi %s3859_s21, %s3861_s21  }
 0x1a0   : >> { %1770 = vst [vmem:[%s2469_s21] sm:$0xff] %v1769_v24  ;;  %1772 = vst [vmem:[%s2469_s21 + $0x8] sm:$0xff] %v1771_v50  ;;  %v1775_v30 = vld [vmem:[%s2473_s26 + $0x18] sm:$0xff]  ;;  %v1777_v13 = vld [vmem:[%s2473_s26 + $0x20] sm:$0xff]  ;;  %p1898_p12 = scmp.ge.s32.totalorder %s1897_s16, %s3643_s15  ;;  %p1762_p13 = scmp.ge.s32.totalorder %s1763_s12, %s3643_s15 }
 0x1a1   : >> { %1774 = vst [vmem:[%s2469_s21 + $0x10] sm:$0xff] %v1773_v35  ;;  %v1779_v40 = vld [vmem:[%s2473_s26 + $0x28] sm:$0xff]  ;;  %1776 = vst [vmem:[%s2469_s21 + $0x18] sm:$0xff] %v1775_v30  ;;  %v1781_v37 = vld [vmem:[%s2473_s26 + $0x30] sm:$0xff] }
 0x1a2   : >> { %1778 = vst [vmem:[%s2469_s21 + $0x20] sm:$0xff] %v1777_v13  ;;  %1780 = vst [vmem:[%s2469_s21 + $0x28] sm:$0xff] %v1779_v40  ;;  %v1783_v47 = vld [vmem:[%s2473_s26 + $0x38] sm:$0xff]  ;;  %v1785_v5 = vld [vmem:[%s2473_s26 + $0x40] sm:$0xff]  ;;  %s3870_s16 = smov (%p1898_p12, %s1897_s16), 0 }
 0x1a3   : >> { %1782 = vst [vmem:[%s2469_s21 + $0x30] sm:$0xff] %v1781_v37  ;;  %1784 = vst [vmem:[%s2469_s21 + $0x38] sm:$0xff] %v1783_v47  ;;  %v1787_v22 = vld [vmem:[%s2473_s26 + $0x48] sm:$0xff]  ;;  %v1789_v20 = vld [vmem:[%s2473_s26 + $0x50] sm:$0xff]  ;;  %s2169_s18 = sshll.u32 %s3870_s16, 9  ;;  %s3863_s29 = smov %s3870_s16 }
 0x1a4   : >> { %1786 = vst [vmem:[%s2469_s21 + $0x40] sm:$0xff] %v1785_v5  ;;  %v1791_v55 = vld [vmem:[%s2473_s26 + $0x58] sm:$0xff]  ;;  %1788 = vst [vmem:[%s2469_s21 + $0x48] sm:$0xff] %v1787_v22  ;;  %v1793_v29 = vld [vmem:[%s2473_s26 + $0x60] sm:$0xff]  ;;  %s3710_s20 = scalar_lea.vmem %s2784_s17, %s2169_s18 [#allocation2]   ;;  %s3713_s23 = scalar_lea.vmem %s3637_s13, %s2169_s18  }
 0x1a5   : >> { %1790 = vst [vmem:[%s2469_s21 + $0x50] sm:$0xff] %v1789_v20  ;;  %1792 = vst [vmem:[%s2469_s21 + $0x58] sm:$0xff] %v1791_v55  ;;  %v1795_v60 = vld [vmem:[%s2473_s26 + $0x68] sm:$0xff]  ;;  %v1797_v21 = vld [vmem:[%s2473_s26 + $0x70] sm:$0xff] }
 0x1a6   : >> { %1794 = vst [vmem:[%s2469_s21 + $0x60] sm:$0xff] %v1793_v29  ;;  %1796 = vst [vmem:[%s2469_s21 + $0x68] sm:$0xff] %v1795_v60  ;;  %v1799_v54 = vld [vmem:[%s2473_s26 + $0x78] sm:$0xff]  ;;  %v1801_v36 = vld [vmem:[%s2473_s26 + $0x80] sm:$0xff] }
 0x1a7   : >> { %1798 = vst [vmem:[%s2469_s21 + $0x70] sm:$0xff] %v1797_v21  ;;  %v1803_v46 = vld [vmem:[%s2473_s26 + $0x88] sm:$0xff]  ;;  %1800 = vst [vmem:[%s2469_s21 + $0x78] sm:$0xff] %v1799_v54  ;;  %v1805_v59 = vld [vmem:[%s2473_s26 + $0x90] sm:$0xff] }
 0x1a8   : >> { %1802 = vst [vmem:[%s2469_s21 + $0x80] sm:$0xff] %v1801_v36  ;;  %1804 = vst [vmem:[%s2469_s21 + $0x88] sm:$0xff] %v1803_v46  ;;  %v1807_v15 = vld [vmem:[%s2473_s26 + $0x98] sm:$0xff]  ;;  %v1809_v26 = vld [vmem:[%s2473_s26 + $0xa0] sm:$0xff] }
 0x1a9   : >> { %1806 = vst [vmem:[%s2469_s21 + $0x90] sm:$0xff] %v1805_v59  ;;  %1808 = vst [vmem:[%s2469_s21 + $0x98] sm:$0xff] %v1807_v15  ;;  %v1811_v62 = vld [vmem:[%s2473_s26 + $0xa8] sm:$0xff]  ;;  %v1813_v12 = vld [vmem:[%s2473_s26 + $0xb0] sm:$0xff] }
 0x1aa   : >> { %1810 = vst [vmem:[%s2469_s21 + $0xa0] sm:$0xff] %v1809_v26  ;;  %v1815_v44 = vld [vmem:[%s2473_s26 + $0xb8] sm:$0xff]  ;;  %1812 = vst [vmem:[%s2469_s21 + $0xa8] sm:$0xff] %v1811_v62  ;;  %v1817_v23 = vld [vmem:[%s2473_s26 + $0xc0] sm:$0xff] }
 0x1ab   : >> { %1814 = vst [vmem:[%s2469_s21 + $0xb0] sm:$0xff] %v1813_v12  ;;  %1816 = vst [vmem:[%s2469_s21 + $0xb8] sm:$0xff] %v1815_v44  ;;  %v1819_v8 = vld [vmem:[%s2473_s26 + $0xc8] sm:$0xff]  ;;  %v1821_v31 = vld [vmem:[%s2473_s26 + $0xd0] sm:$0xff] }
 0x1ac   : >> { %1818 = vst [vmem:[%s2469_s21 + $0xc0] sm:$0xff] %v1817_v23  ;;  %1820 = vst [vmem:[%s2469_s21 + $0xc8] sm:$0xff] %v1819_v8  ;;  %v1823_v38 = vld [vmem:[%s2473_s26 + $0xd8] sm:$0xff]  ;;  %v1825_v34 = vld [vmem:[%s2473_s26 + $0xe0] sm:$0xff] }
 0x1ad   : >> { %1822 = vst [vmem:[%s2469_s21 + $0xd0] sm:$0xff] %v1821_v31  ;;  %v1827_v32 = vld [vmem:[%s2473_s26 + $0xe8] sm:$0xff]  ;;  %1824 = vst [vmem:[%s2469_s21 + $0xd8] sm:$0xff] %v1823_v38  ;;  %v1829_v51 = vld [vmem:[%s2473_s26 + $0xf0] sm:$0xff] }
 0x1ae   : >> { %1826 = vst [vmem:[%s2469_s21 + $0xe0] sm:$0xff] %v1825_v34  ;;  %1828 = vst [vmem:[%s2469_s21 + $0xe8] sm:$0xff] %v1827_v32  ;;  %v1831_v43 = vld [vmem:[%s2473_s26 + $0xf8] sm:$0xff]  ;;  %v1833_v4 = vld [vmem:[%s2473_s26 + $0x100] sm:$0xff] }
 0x1af   : >> { %1830 = vst [vmem:[%s2469_s21 + $0xf0] sm:$0xff] %v1829_v51  ;;  %1832 = vst [vmem:[%s2469_s21 + $0xf8] sm:$0xff] %v1831_v43  ;;  %v1835_v45 = vld [vmem:[%s2473_s26 + $0x108] sm:$0xff]  ;;  %v1837_v10 = vld [vmem:[%s2473_s26 + $0x110] sm:$0xff] }
 0x1b0   : >> { %1834 = vst [vmem:[%s2469_s21 + $0x100] sm:$0xff] %v1833_v4  ;;  %v1839_v18 = vld [vmem:[%s2473_s26 + $0x118] sm:$0xff]  ;;  %1836 = vst [vmem:[%s2469_s21 + $0x108] sm:$0xff] %v1835_v45  ;;  %v1841_v33 = vld [vmem:[%s2473_s26 + $0x120] sm:$0xff] }
 0x1b1   : >> { %1838 = vst [vmem:[%s2469_s21 + $0x110] sm:$0xff] %v1837_v10  ;;  %1840 = vst [vmem:[%s2469_s21 + $0x118] sm:$0xff] %v1839_v18  ;;  %v1843_v57 = vld [vmem:[%s2473_s26 + $0x128] sm:$0xff]  ;;  %v1845_v9 = vld [vmem:[%s2473_s26 + $0x130] sm:$0xff] }
 0x1b2   : >> { %1842 = vst [vmem:[%s2469_s21 + $0x120] sm:$0xff] %v1841_v33  ;;  %1844 = vst [vmem:[%s2469_s21 + $0x128] sm:$0xff] %v1843_v57  ;;  %v1847_v16 = vld [vmem:[%s2473_s26 + $0x138] sm:$0xff]  ;;  %v1849_v6 = vld [vmem:[%s2473_s26 + $0x140] sm:$0xff] }
 0x1b3   : >> { %1846 = vst [vmem:[%s2469_s21 + $0x130] sm:$0xff] %v1845_v9  ;;  %v1851_v2 = vld [vmem:[%s2473_s26 + $0x148] sm:$0xff]  ;;  %1848 = vst [vmem:[%s2469_s21 + $0x138] sm:$0xff] %v1847_v16  ;;  %v1853_v42 = vld [vmem:[%s2473_s26 + $0x150] sm:$0xff] }
 0x1b4   : >> { %1850 = vst [vmem:[%s2469_s21 + $0x140] sm:$0xff] %v1849_v6  ;;  %1852 = vst [vmem:[%s2469_s21 + $0x148] sm:$0xff] %v1851_v2  ;;  %v1855_v11 = vld [vmem:[%s2473_s26 + $0x158] sm:$0xff]  ;;  %v1857_v56 = vld [vmem:[%s2473_s26 + $0x160] sm:$0xff] }
 0x1b5   : >> { %1854 = vst [vmem:[%s2469_s21 + $0x150] sm:$0xff] %v1853_v42  ;;  %1856 = vst [vmem:[%s2469_s21 + $0x158] sm:$0xff] %v1855_v11  ;;  %v1859_v1 = vld [vmem:[%s2473_s26 + $0x168] sm:$0xff]  ;;  %v1861_v0 = vld [vmem:[%s2473_s26 + $0x170] sm:$0xff] }
 0x1b6   : >> { %1858 = vst [vmem:[%s2469_s21 + $0x160] sm:$0xff] %v1857_v56  ;;  %v1863_v63 = vld [vmem:[%s2473_s26 + $0x178] sm:$0xff]  ;;  %1860 = vst [vmem:[%s2469_s21 + $0x168] sm:$0xff] %v1859_v1  ;;  %v1865_v7 = vld [vmem:[%s2473_s26 + $0x180] sm:$0xff] }
 0x1b7   : >> { %1862 = vst [vmem:[%s2469_s21 + $0x170] sm:$0xff] %v1861_v0  ;;  %1864 = vst [vmem:[%s2469_s21 + $0x178] sm:$0xff] %v1863_v63  ;;  %v1867_v39 = vld [vmem:[%s2473_s26 + $0x188] sm:$0xff]  ;;  %v1869_v48 = vld [vmem:[%s2473_s26 + $0x190] sm:$0xff] }
 0x1b8   : >> { %1866 = vst [vmem:[%s2469_s21 + $0x180] sm:$0xff] %v1865_v7  ;;  %1868 = vst [vmem:[%s2469_s21 + $0x188] sm:$0xff] %v1867_v39  ;;  %v1871_v27 = vld [vmem:[%s2473_s26 + $0x198] sm:$0xff]  ;;  %v1873_v41 = vld [vmem:[%s2473_s26 + $0x1a0] sm:$0xff] }
 0x1b9   : >> { %1870 = vst [vmem:[%s2469_s21 + $0x190] sm:$0xff] %v1869_v48  ;;  %v1875_v19 = vld [vmem:[%s2473_s26 + $0x1a8] sm:$0xff]  ;;  %1872 = vst [vmem:[%s2469_s21 + $0x198] sm:$0xff] %v1871_v27  ;;  %v1877_v14 = vld [vmem:[%s2473_s26 + $0x1b0] sm:$0xff]  ;;  %1765 = sbr.rel (!%p1762_p13) target bundleno = 415 (0x19f), region = 146 }
 0x1ba   : >> { %1874 = vst [vmem:[%s2469_s21 + $0x1a0] sm:$0xff] %v1873_v41  ;;  %1876 = vst [vmem:[%s2469_s21 + $0x1a8] sm:$0xff] %v1875_v19  ;;  %v1879_v25 = vld [vmem:[%s2473_s26 + $0x1b8] sm:$0xff]  ;;  %v1881_v52 = vld [vmem:[%s2473_s26 + $0x1c0] sm:$0xff] }
 0x1bb   : >> { %1878 = vst [vmem:[%s2469_s21 + $0x1b0] sm:$0xff] %v1877_v14  ;;  %1880 = vst [vmem:[%s2469_s21 + $0x1b8] sm:$0xff] %v1879_v25  ;;  %v1883_v58 = vld [vmem:[%s2473_s26 + $0x1c8] sm:$0xff]  ;;  %v1885_v28 = vld [vmem:[%s2473_s26 + $0x1d0] sm:$0xff] }
 0x1bc   : >> { %1882 = vst [vmem:[%s2469_s21 + $0x1c0] sm:$0xff] %v1881_v52  ;;  %v1887_v61 = vld [vmem:[%s2473_s26 + $0x1d8] sm:$0xff]  ;;  %1884 = vst [vmem:[%s2469_s21 + $0x1c8] sm:$0xff] %v1883_v58  ;;  %v1889_v3 = vld [vmem:[%s2473_s26 + $0x1e0] sm:$0xff] }
 0x1bd   : >> { %1886 = vst [vmem:[%s2469_s21 + $0x1d0] sm:$0xff] %v1885_v28  ;;  %1888 = vst [vmem:[%s2469_s21 + $0x1d8] sm:$0xff] %v1887_v61  ;;  %v1891_v53 = vld [vmem:[%s2473_s26 + $0x1e8] sm:$0xff]  ;;  %v1893_v49 = vld [vmem:[%s2473_s26 + $0x1f0] sm:$0xff] }
 0x1be   : >> { %1890 = vst [vmem:[%s2469_s21 + $0x1e0] sm:$0xff] %v1889_v3  ;;  %1892 = vst [vmem:[%s2469_s21 + $0x1e8] sm:$0xff] %v1891_v53  ;;  %v1895_v17 = vld [vmem:[%s2473_s26 + $0x1f8] sm:$0xff]  ;;  %s3862_s26 = smov %s3710_s20 }
 0x1bf   : >> { %1894 = vst [vmem:[%s2469_s21 + $0x1f0] sm:$0xff] %v1893_v49  ;;  %1896 = vst [vmem:[%s2469_s21 + $0x1f8] sm:$0xff] %v1895_v17  ;;  %s3861_s21 = smov %s3713_s23 }
 0x1c0 PF: > { %s3818_s24 = sand.u32 63, %s3868_s9   ;;  %s2180_s27 = sshll.u32 %s3643_s15, 9 }
 0x1c1   : > { %s1908_s28 = scalar_lea.vmem %s2784_s17, %s2180_s27 [#allocation2]   ;;  %s1910_s30 = scalar_lea.vmem %s3637_s13, %s2180_s27  }
 0x1c2   : > { %p2174_p0 = scmp.le.s32.totalorder %s3818_s24, 0 }
 0x1c3   : > { %s2483_s6 = smov (!%p2174_p0), %s1910_s30   ;;  %s2487_s7 = smov (!%p2174_p0), %s1908_s28  }
 0x1c4   : > { %2037 = sbr.rel (%p2174_p0) target bundleno = 469 (0x1d5), region = 151  ;;  %s2491_s8 = smov (!%p2174_p0), 0  }
 0x1c5   : > { %s2495_s10 = smov (!%p2174_p0), 0  }
 0x1cb LB: >> { %v1920_v24 = vld [vmem:[%s2489_s7] sm:$0xff]  ;;  %s1922_s9 = sadd.s32 1, %s2493_s8  ;;  %s1914_s10 = sadd.s32 1, %s2497_s10   ;;  %s2497_s10 = sphi %s2495_s10, %s1914_s10   ;;  %s2493_s8 = sphi %s2491_s8, %s2492_s8   ;;  %s2489_s7 = sphi %s2487_s7, %s1927_s7   ;;  %s2485_s6 = sphi %s2483_s6, %s1928_s6  }
 0x1cc   : >> { %1921 = vst [vmem:[%s2485_s6] sm:$0xff] %v1920_v24  ;;  %p1923_p1 = scmp.ge.s32.totalorder %s1922_s9, %s3818_s24  ;;  %p1913_p2 = scmp.ge.s32.totalorder %s1914_s10, %s3818_s24 }
 0x1ce   : >> { %s3872_s9 = smov (%p1923_p1, %s1922_s9), 0  ;;  %1916 = sbr.rel (!%p1913_p2) target bundleno = 459 (0x1cb), region = 157 }
 0x1cf   : >> { %s2175_s17 = sshll.u32 %s3872_s9, 3  ;;  %s2492_s8 = smov %s3872_s9  }
 0x1d0   : >> { %s1927_s7 = scalar_lea.vmem %s1908_s28, %s2175_s17 [#allocation2]   ;;  %s1928_s6 = scalar_lea.vmem %s1910_s30, %s2175_s17  }
 0x1d5 PF: > { %p13_p3 = scmp.ge.s32.totalorder %s2544_s22, 37   ;;  %s3864_s18 = smov %s2461_s19 }
 0x1d6   : > { %s3865_s19 = smov %s2552_s25  ;;  %s3866_s20 = smov %s2544_s22 }
 0x1d7   :  { %15 = sbr.rel (!%p13_p3) target bundleno = 2 (0x2), region = 168 }

// kernel: small_cnn_forward.11
= control target key start
LH: loop header
LB: loop body
LE: loop exit
PB: predicated region body
PF: predicated region fallthrough
CT: control target
= control target key end

     0   :  { %s1408_s12 = smov 0   ;;  %s1410_s13 = smov 0   ;;  %s1844_s0 = inlined_call_operand.vmem [shape: f32[2,67,131,32], index: 0, kind: input, shape index: {}]   ;;  %s1845_s1 = inlined_call_operand.vmem [shape: f32[1,32], index: 1, kind: input, shape index: {}]   ;;  %s1846_s2 = inlined_call_operand.vmem [shape: f32[1,32], index: 2, kind: input, shape index: {}]   ;;  %s1847_s3 = inlined_call_operand.vmem [shape: bf16[2,33,65,32], index: 3, kind: output, shape index: {}]  }
   0x1   :  { %s1412_s14 = smov 0   ;;  %s1414_s15 = smov 0  }
   0x2   :  { %s1416_s16 = smov 0   ;;  %s1418_s17 = smov 0  }
   0x3   :  { %s1420_s18 = smov 0  }
   0x4 LB: > { %s22_s19 = sadd.s32 1, %s1342_s16  ;;  %s25_s20 = sadd.s32 1, %s1346_s17  ;;  %s1350_s18 = sphi %s1420_s18, %s13_s18   ;;  %s1346_s17 = sphi %s1418_s17, %s1857_s17   ;;  %s1342_s16 = sphi %s1416_s16, %s1856_s16   ;;  %s1338_s15 = sphi %s1414_s15, %s1855_s15   ;;  %s1334_s14 = sphi %s1412_s14, %s1854_s14   ;;  %s1330_s13 = sphi %s1410_s13, %s1853_s13   ;;  %s1326_s12 = sphi %s1408_s12, %s1852_s12  }
   0x5   : > { %p23_p0 = scmp.ge.s32.totalorder %s22_s19, 5  ;;  %s1039_s21 = sadd.s32 4294967295, %s1350_s18  }
   0x6   : > { %p114_p1 = scmp.ne.s32.totalorder %s1330_s13, %s1326_s12  ;;  %p115_p2 = scmp.eq.s32.totalorder %s1039_s21, 9 }
   0x7   : > { %s1859_s19 = smov (%p23_p0, %s22_s19), 0  ;;  %s1861_s20 = smov (!%p23_p0, %s25_s20), %s1346_s17 }
   0x8   : > { %s100_s22 = ssub.s32 %s1342_s16, %s1859_s19  ;;  %p27_p3 = scmp.ge.s32.totalorder %s1861_s20, 2 }
   0x9   : > { %p1043_p4 = scmp.ge.s32.totalorder %s1350_s18, 1  ;;  %p1454_p5 = por %p115_p2, %p114_p1 }
   0xa   : > { %p169_p6 = scmp.lt.s32.totalorder %s1350_s18, 11  ;;  %s1863_s20 = smov (%p27_p3, %s1861_s20), 0 }
   0xb   : > { %s99_s24 = ssub.s32 %s1346_s17, %s1863_s20  ;;  %s104_s26 = sadd.s32 1, %s1330_s13 }
   0xc   : > { %p170_p7 = pnand %p1043_p4, %p169_p6  ;;  %s101_s25 = sor.u32 %s100_s22, %s99_s24 }
   0xd   : > { %p102_p8 = scmp.eq.s32.totalorder %s101_s25, 0  ;;  %s199_s28 = sand.u32 (!%p170_p7), 1, %s1326_s12   ;;  %v1472_v0 = vld [vmem:[%s1845_s1] ss:$0 sm:$0xff] (!%p170_p7) }
   0xe   : > { %173 = sbr.rel (%p170_p7) target bundleno = 178 (0xb2), region = 32  ;;  %s1044_s29 = sshll.u32 (!%p170_p7), %s1334_s14, 4  ;;  %v1477_v1 = vld [vmem:[%s1846_s2] ss:$0 sm:$0xff] (!%p170_p7) }
   0xf   : > { %s1465_s27 = scalar_select %p102_p8, %s1330_s13, %s104_s26  }
  0x10   : > { %s1127_s7 = smul.u32 (!%p170_p7), 288, %s199_s28  ;;  %p208_p9 = scmp.lt.s32.totalorder (!%p170_p7), %s1338_s15, 1 }
  0x11   : > { %p210_p10 = scmp.lt.s32.totalorder (!%p170_p7), %s1044_s29, 66  ;;  %s1488_s26 = smov (!%p170_p7), 0  }
  0x12   : > { %s1486_s25 = scalar_lea.vmem (!%p170_p7), [#allocation2], %s1127_s7  }
  0x15   : > { %s209_s8 = scalar_select %p208_p9, %s1338_s15, 1 }
  0x16   : > { %s1865_s29 = smov (!%p210_p10, %s1044_s29), 66 }
  0x17   : > { %s1129_s9 = smul.u32 1139, %s209_s8 }
  0x18   : > { %s1128_s10 = smul.u32 17, %s1865_s29 }
  0x1a   : > { %s214_s11 = sadd.s32 %s1129_s9, %s1128_s10 }
  0x1b   : > { %s1045_s12 = sshll.u32 %s214_s11, 3 }
  0x1c   : > { %s1484_s24 = scalar_lea.vmem %s1844_s0, %s1045_s12 }
  0x1d LB: >> { %s1047_s28 = smul.u32 272, %s1354_s26  ;;  %vm500_vm0 = vcmask 257024   ;;  %vm509_vm1 = vcmask 253952   ;;  %vm510_vm2 = vsmask.f32 256  ;;  %s1354_s26 = sphi %s1488_s26, %s236_s26  }
  0x1e   : >> { %s1124_s30 = smul.u32 36, %s1354_s26  ;;  %vm511_vm3 = vmand %vm509_vm1, %vm510_vm2  ;;  %s236_s26 = sadd.s32 1, %s1354_s26  }
  0x1f   : >> { %s1495_s29 = scalar_lea.vmem %s1484_s24, %s1047_s28  ;;  %p233_p11 = scmp.ge.s32.totalorder %s236_s26, 8  }
  0x20   : >> { %v240_v2 = vld [vmem:[%s1495_s29] ss:$2 sm:$0xff]  ;;  %v1058_v3 = vld [vmem:[%s1495_s29 + $0x1] ss:$2 sm:$0xff]  ;;  %v1048_v9 = vld [vmem:[%s1495_s29 + $0x10] ss:$2 sm:$0xff]  ;;  %s1546_s4 = scalar_lea.vmem %s1486_s25, %s1124_s30 [#allocation2] }
  0x21   : >> { %v1069_v4 = vld [vmem:[%s1495_s29 + $0x88] ss:$2 sm:$0xff]  ;;  %v263_v5 = vmul.f32 %v1472_v0, %v240_v2  ;;  %v314_v6 = vmul.f32 %v1058_v3, %v1472_v0  ;;  %v1078_v8 = vld [vmem:[%s1495_s29 + $0x89] ss:$2 sm:$0xff]  ;;  %v264_v12 = vmul.f32 %v1472_v0, %v1048_v9  ;;  %v1070_v14 = vld [vmem:[%s1495_s29 + $0x98] ss:$2 sm:$0xff] }
  0x22   : >> { %v370_v7 = vmul.f32 %v1069_v4, %v1472_v0  ;;  %v1059_v10 = vld [vmem:[%s1495_s29 + $0x11] ss:$2 sm:$0xff]  ;;  %v415_v11 = vmul.f32 %v1078_v8, %v1472_v0  ;;  %v371_v19 = vmul.f32 %v1070_v14, %v1472_v0  ;;  %v1049_v24 = vld [vmem:[%s1495_s29 + $0x20] ss:$2 sm:$0xff]  ;;  %v1060_v25 = vld [vmem:[%s1495_s29 + $0x21] ss:$2 sm:$0xff] }
  0x23   : >> { %v315_v13 = vmul.f32 %v1059_v10, %v1472_v0  ;;  %v1079_v15 = vld [vmem:[%s1495_s29 + $0x99] ss:$2 sm:$0xff]  ;;  %v278_v16 = vadd.f32 %v1477_v1, %v263_v5  ;;  %v323_v17 = vadd.f32 %v1477_v1, %v314_v6  ;;  %v279_v21 = vadd.f32 %v1477_v1, %v264_v12  ;;  %v1071_v26 = vld [vmem:[%s1495_s29 + $0xa8] ss:$2 sm:$0xff]  ;;  %v1080_v31 = vld [vmem:[%s1495_s29 + $0xa9] ss:$2 sm:$0xff] }
  0x24   : >> { %v379_v18 = vadd.f32 %v1477_v1, %v370_v7  ;;  %v424_v20 = vadd.f32 %v1477_v1, %v415_v11  ;;  %v416_v23 = vmul.f32 %v1079_v15, %v1472_v0  ;;  %v380_v30 = vadd.f32 %v1477_v1, %v371_v19  ;;  %v1050_v36 = vld [vmem:[%s1495_s29 + $0x30] ss:$2 sm:$0xff]  ;;  %v1061_v41 = vld [vmem:[%s1495_s29 + $0x31] ss:$2 sm:$0xff]  ;;  %v1051_v60 = vld [vmem:[%s1495_s29 + $0x40] ss:$2 sm:$0xff] }
  0x25   : >> { %v324_v22 = vadd.f32 %v1477_v1, %v315_v13  ;;  %v287_v27 = vmax.f32 %v278_v16, 0.0  ;;  %v332_v28 = vmax.f32 %v323_v17, 0.0  ;;  %v288_v33 = vmax.f32 %v279_v21, 0.0  ;;  %v1072_v54 = vld [vmem:[%s1495_s29 + $0xb8] ss:$2 sm:$0xff] }
  0x26   : >> { %v388_v29 = vmax.f32 %v379_v18, 0.0  ;;  %v433_v32 = vmax.f32 %v424_v20, 0.0  ;;  %v425_v35 = vadd.f32 %v1477_v1, %v416_v23  ;;  %v389_v38 = vmax.f32 %v380_v30, 0.0  ;;  %v1081_v59 = vld [vmem:[%s1495_s29 + $0xb9] ss:$2 sm:$0xff] }
  0x27   : >> { %v333_v34 = vmax.f32 %v324_v22, 0.0  ;;  %v341_v37 = vmax.f32 %v287_v27, %v332_v28  ;;  %v265_v39 = vmul.f32 %v1472_v0, %v1049_v24  ;;  %v316_v40 = vmul.f32 %v1060_v25, %v1472_v0  ;;  %v1062_v3 = vld [vmem:[%s1495_s29 + $0x41] ss:$2 sm:$0xff]  ;;  %v1073_v4 = vld [vmem:[%s1495_s29 + $0xc8] ss:$2 sm:$0xff] }
  0x28   : >> { %v442_v42 = vmax.f32 %v388_v29, %v433_v32  ;;  %v434_v44 = vmax.f32 %v425_v35, 0.0  ;;  %v372_v45 = vmul.f32 %v1071_v26, %v1472_v0  ;;  %v417_v48 = vmul.f32 %v1080_v31, %v1472_v0  ;;  %v1082_v9 = vld [vmem:[%s1495_s29 + $0xc9] ss:$2 sm:$0xff]  ;;  %v1052_v18 = vld [vmem:[%s1495_s29 + $0x50] ss:$2 sm:$0xff] }
  0x29   : >> { %v342_v43 = vmax.f32 %v288_v33, %v333_v34  ;;  %v280_v46 = vadd.f32 %v1477_v1, %v265_v39  ;;  %v325_v47 = vadd.f32 %v1477_v1, %v316_v40  ;;  %v266_v49 = vmul.f32 %v1472_v0, %v1050_v36  ;;  %v1063_v23 = vld [vmem:[%s1495_s29 + $0x51] ss:$2 sm:$0xff]  ;;  %v1074_v28 = vld [vmem:[%s1495_s29 + $0xd8] ss:$2 sm:$0xff] }
  0x2a   : >> { %v451_v50 = vmax.f32 %v341_v37, %v442_v42  ;;  %v443_v51 = vmax.f32 %v389_v38, %v434_v44  ;;  %v381_v52 = vadd.f32 %v1477_v1, %v372_v45  ;;  %v317_v53 = vmul.f32 %v1061_v41, %v1472_v0  ;;  %v1083_v33 = vld [vmem:[%s1495_s29 + $0xd9] ss:$2 sm:$0xff]  ;;  %v1053_v34 = vld [vmem:[%s1495_s29 + $0x60] ss:$2 sm:$0xff] }
  0x2b   : >> { %v289_v55 = vmax.f32 %v280_v46, 0.0  ;;  %v334_v56 = vmax.f32 %v325_v47, 0.0  ;;  %v426_v57 = vadd.f32 %v1477_v1, %v417_v48  ;;  %v281_v58 = vadd.f32 %v1477_v1, %v266_v49  ;;  %v1075_v48 = vld [vmem:[%s1495_s29 + $0xe8] ss:$2 sm:$0xff] }
  0x2c   : >> { %v1115_v61 = vpack.c.bf16 %v451_v50, %v451_v50  ;;  %v452_v62 = vmax.f32 %v342_v43, %v443_v51  ;;  %v390_v63 = vmax.f32 %v381_v52, 0.0  ;;  %v326_v2 = vadd.f32 %v1477_v1, %v317_v53  ;;  %v1064_v43 = vld [vmem:[%s1495_s29 + $0x61] ss:$2 sm:$0xff] }
  0x2d   : >> { %v343_v5 = vmax.f32 %v289_v55, %v334_v56  ;;  %v435_v6 = vmax.f32 %v426_v57, 0.0  ;;  %v290_v7 = vmax.f32 %v281_v58, 0.0  ;;  %v373_v8 = vmul.f32 %v1072_v54, %v1472_v0  ;;  %v1084_v57 = vld [vmem:[%s1495_s29 + $0xe9] ss:$2 sm:$0xff]  ;;  %v1054_v58 = vld [vmem:[%s1495_s29 + $0x70] ss:$2 sm:$0xff] }
  0x2e   : >> { %501 = vst.msk [vmem:[%s1546_s4] sm:$0xf] %vm500_vm0, %v1115_v61  ;;  %v1116_v10 = vpack.c.bf16 %v452_v62, %v452_v62  ;;  %v335_v11 = vmax.f32 %v326_v2, 0.0  ;;  %v418_v12 = vmul.f32 %v1081_v59, %v1472_v0  ;;  %v267_v13 = vmul.f32 %v1472_v0, %v1051_v60  ;;  %v1076_v2 = vld [vmem:[%s1495_s29 + $0xf8] ss:$2 sm:$0xff] }
  0x2f   : >> { %v444_v14 = vmax.f32 %v390_v63, %v435_v6  ;;  %v382_v15 = vadd.f32 %v1477_v1, %v373_v8  ;;  %v318_v16 = vmul.f32 %v1062_v3, %v1472_v0  ;;  %v374_v17 = vmul.f32 %v1073_v4, %v1472_v0  ;;  %v1065_v63 = vld [vmem:[%s1495_s29 + $0x71] ss:$2 sm:$0xff] }
  0x30   : >> { %502 = vst.msk [vmem:[%s1546_s4 + $0x4] sm:$0xf] %vm500_vm0, %v1116_v10  ;;  %v344_v19 = vmax.f32 %v290_v7, %v335_v11  ;;  %v427_v20 = vadd.f32 %v1477_v1, %v418_v12  ;;  %v282_v21 = vadd.f32 %v1477_v1, %v267_v13  ;;  %v419_v22 = vmul.f32 %v1082_v9, %v1472_v0  ;;  %v1085_v7 = vld [vmem:[%s1495_s29 + $0xf9] ss:$2 sm:$0xff] }
  0x31   : >> { %v453_v24 = vmax.f32 %v343_v5, %v444_v14  ;;  %v391_v25 = vmax.f32 %v382_v15, 0.0  ;;  %v327_v26 = vadd.f32 %v1477_v1, %v318_v16  ;;  %v383_v27 = vadd.f32 %v1477_v1, %v374_v17  ;;  %v1055_v16 = vld [vmem:[%s1495_s29 + $0x80] ss:$2 sm:$0x1] }
  0x32   : >> { %v436_v29 = vmax.f32 %v427_v20, 0.0  ;;  %v291_v30 = vmax.f32 %v282_v21, 0.0  ;;  %v428_v31 = vadd.f32 %v1477_v1, %v419_v22  ;;  %v268_v32 = vmul.f32 %v1472_v0, %v1052_v18  ;;  %v1066_v21 = vld [vmem:[%s1495_s29 + $0x81] ss:$2 sm:$0x1] }
  0x33   : >> { %v1117_v35 = vpack.c.bf16 %v453_v24, %v453_v24  ;;  %v336_v36 = vmax.f32 %v327_v26, 0.0  ;;  %v392_v37 = vmax.f32 %v383_v27, 0.0  ;;  %v319_v38 = vmul.f32 %v1063_v23, %v1472_v0  ;;  %v1077_v26 = vld [vmem:[%s1495_s29 + $0x108] ss:$2 sm:$0x1] }
  0x34   : >> { %v445_v39 = vmax.f32 %v391_v25, %v436_v29  ;;  %v437_v40 = vmax.f32 %v428_v31, 0.0  ;;  %v283_v41 = vadd.f32 %v1477_v1, %v268_v32  ;;  %v375_v42 = vmul.f32 %v1074_v28, %v1472_v0  ;;  %v1086_v31 = vld [vmem:[%s1495_s29 + $0x109] ss:$2 sm:$0x1] }
  0x35   : >> { %503 = vst.msk [vmem:[%s1546_s4 + $0x8] sm:$0xf] %vm500_vm0, %v1117_v35  ;;  %v345_v44 = vmax.f32 %v291_v30, %v336_v36  ;;  %v328_v45 = vadd.f32 %v1477_v1, %v319_v38  ;;  %v420_v46 = vmul.f32 %v1083_v33, %v1472_v0  ;;  %v269_v47 = vmul.f32 %v1472_v0, %v1053_v34 }
  0x36   : >> { %v454_v49 = vmax.f32 %v344_v19, %v445_v39  ;;  %v446_v50 = vmax.f32 %v392_v37, %v437_v40  ;;  %v292_v51 = vmax.f32 %v283_v41, 0.0  ;;  %v384_v52 = vadd.f32 %v1477_v1, %v375_v42 }
  0x37   : >> { %v337_v53 = vmax.f32 %v328_v45, 0.0  ;;  %v429_v54 = vadd.f32 %v1477_v1, %v420_v46  ;;  %v284_v55 = vadd.f32 %v1477_v1, %v269_v47  ;;  %v320_v56 = vmul.f32 %v1064_v43, %v1472_v0 }
  0x38   : >> { %v1118_v59 = vpack.c.bf16 %v454_v49, %v454_v49  ;;  %v455_v60 = vmax.f32 %v345_v44, %v446_v50  ;;  %v393_v61 = vmax.f32 %v384_v52, 0.0  ;;  %v376_v62 = vmul.f32 %v1075_v48, %v1472_v0 }
  0x39   : >> { %v346_v3 = vmax.f32 %v292_v51, %v337_v53  ;;  %v438_v4 = vmax.f32 %v429_v54, 0.0  ;;  %v293_v5 = vmax.f32 %v284_v55, 0.0  ;;  %v329_v6 = vadd.f32 %v1477_v1, %v320_v56 }
  0x3a   : >> { %504 = vst.msk [vmem:[%s1546_s4 + $0xc] sm:$0xf] %vm500_vm0, %v1118_v59  ;;  %v1119_v8 = vpack.c.bf16 %v455_v60, %v455_v60  ;;  %v385_v9 = vadd.f32 %v1477_v1, %v376_v62  ;;  %v421_v10 = vmul.f32 %v1084_v57, %v1472_v0  ;;  %v270_v11 = vmul.f32 %v1472_v0, %v1054_v58  ;;  %v512_v57 = vld [vmem:[%s1546_s4 + $0x20] sm:$0x1] }
  0x3b   : >> { %v447_v12 = vmax.f32 %v393_v61, %v438_v4  ;;  %v338_v13 = vmax.f32 %v329_v6, 0.0  ;;  %v321_v14 = vmul.f32 %v1065_v63, %v1472_v0  ;;  %v377_v15 = vmul.f32 %v1076_v2, %v1472_v0 }
  0x3c   : >> { %505 = vst.msk [vmem:[%s1546_s4 + $0x10] sm:$0xf] %vm500_vm0, %v1119_v8  ;;  %v394_v17 = vmax.f32 %v385_v9, 0.0  ;;  %v430_v18 = vadd.f32 %v1477_v1, %v421_v10  ;;  %v285_v19 = vadd.f32 %v1477_v1, %v270_v11  ;;  %v422_v20 = vmul.f32 %v1085_v7, %v1472_v0 }
  0x3d   : >> { %v456_v22 = vmax.f32 %v346_v3, %v447_v12  ;;  %v347_v23 = vmax.f32 %v293_v5, %v338_v13  ;;  %v330_v24 = vadd.f32 %v1477_v1, %v321_v14  ;;  %v386_v25 = vadd.f32 %v1477_v1, %v377_v15 }
  0x3e   : >> { %v439_v27 = vmax.f32 %v430_v18, 0.0  ;;  %v294_v28 = vmax.f32 %v285_v19, 0.0  ;;  %v431_v29 = vadd.f32 %v1477_v1, %v422_v20  ;;  %v271_v30 = vmul.f32 %v1472_v0, %v1055_v16 }
  0x3f   : >> { %v1120_v32 = vpack.c.bf16 %v456_v22, %v456_v22  ;;  %v339_v33 = vmax.f32 %v330_v24, 0.0  ;;  %v395_v34 = vmax.f32 %v386_v25, 0.0  ;;  %v322_v35 = vmul.f32 %v1066_v21, %v1472_v0 }
  0x40   : >> { %v448_v36 = vmax.f32 %v394_v17, %v439_v27  ;;  %v440_v37 = vmax.f32 %v431_v29, 0.0  ;;  %v286_v38 = vadd.f32 %v1477_v1, %v271_v30  ;;  %v378_v39 = vmul.f32 %v1077_v26, %v1472_v0 }
  0x41   : >> { %506 = vst.msk [vmem:[%s1546_s4 + $0x14] sm:$0xf] %vm500_vm0, %v1120_v32  ;;  %v348_v40 = vmax.f32 %v294_v28, %v339_v33  ;;  %v331_v41 = vadd.f32 %v1477_v1, %v322_v35  ;;  %v423_v42 = vmul.f32 %v1086_v31, %v1472_v0 }
  0x42   : >> { %v457_v43 = vmax.f32 %v347_v23, %v448_v36  ;;  %v449_v44 = vmax.f32 %v395_v34, %v440_v37  ;;  %v295_v45 = vmax.f32 %v286_v38, 0.0  ;;  %v387_v46 = vadd.f32 %v1477_v1, %v378_v39 }
  0x43   : >> { %v340_v47 = vmax.f32 %v331_v41, 0.0  ;;  %v432_v48 = vadd.f32 %v1477_v1, %v423_v42 }
  0x44   : >> { %v1121_v49 = vpack.c.bf16 %v457_v43, %v457_v43  ;;  %v458_v50 = vmax.f32 %v348_v40, %v449_v44  ;;  %v396_v51 = vmax.f32 %v387_v46, 0.0 }
  0x45   : >> { %v349_v52 = vmax.f32 %v295_v45, %v340_v47  ;;  %v441_v53 = vmax.f32 %v432_v48, 0.0 }
  0x46   : >> { %507 = vst.msk [vmem:[%s1546_s4 + $0x18] sm:$0xf] %vm500_vm0, %v1121_v49  ;;  %v1122_v54 = vpack.c.bf16 %v458_v50, %v458_v50 }
  0x47   : >> { %v450_v55 = vmax.f32 %v396_v51, %v441_v53 }
  0x48   : >> { %508 = vst.msk [vmem:[%s1546_s4 + $0x1c] sm:$0xf] %vm500_vm0, %v1122_v54  ;;  %235 = sbr.rel (!%p233_p11) target bundleno = 29 (0x1d), region = 162 }
  0x49   : >> { %v459_v56 = vmax.f32 %v349_v52, %v450_v55 }
  0x4b   : >> { %v1123_v58 = vpack.c.bf16 %v459_v56, %v459_v56 }
  0x4d   : >> { %v513_v59 = vsel %vm511_vm3, %v1123_v58, %v512_v57 }
  0x4e   : >> { %514 = vst [vmem:[%s1546_s4 + $0x20] sm:$0x1] %v513_v59 }
  0x4f   : > { %521 = sbr.rel (!%p1454_p5) target bundleno = 178 (0xb2), region = 43  ;;  %s1097_s5 = sshll.u32 (%p1454_p5), %s1334_s14, 3 }
  0x50   : > { %s1130_s6 = smul.u32 (%p1454_p5), 72, %s1334_s14  ;;  %s523_s7 = ssub.s32 (%p1454_p5), 33, %s1097_s5 }
  0x51   : > { %s1131_s8 = smul.u32 (%p1454_p5), 297, %s1338_s15  ;;  %p524_p12 = scmp.lt.s32.totalorder (%p1454_p5), %s523_s7, 8 }
  0x53   : > { %s531_s9 = sadd.s32 (%p1454_p5), %s1131_s8, %s1130_s6 }
  0x54   : > { %s1102_s10 = sshll.u32 (%p1454_p5), %s531_s9, 2 }
  0x55   : > { %s1641_s23 = scalar_lea.vmem (%p1454_p5), %s1847_s3, %s1102_s10  }
  0x56   : > { %s1867_s7 = smov (!%p524_p12, %s523_s7), 8 }
  0x57   : > { %s1099_s11 = smul.u32 576, %s1867_s7 }
  0x58   : > { %s534_s22 = smul.u32 9, %s1867_s7 }
  0x59   : > { %p1103_p13 = scmp.eq.s32.totalorder %s1099_s11, 0 }
  0x5a   : > { %s1646_s14 = sshrl.u32 (!%p1103_p13), %s534_s22, 6 }
  0x5b   : > { %537 = sbr.rel (%p1103_p13) target bundleno = 178 (0xb2), region = 47  ;;  %p1104_p0 = scmp.le.s32.totalorder (!%p1103_p13), %s1646_s14, 0 }
  0x62   : > { %984 = sbr.rel (%p1104_p0) target bundleno = 157 (0x9d), region = 167  ;;  %s1849_s15 = smov (!%p1104_p0), %s1641_s23 }
  0x63   : > { %s1850_s24 = smov (!%p1104_p0), %s1486_s25  ;;  %s1655_s26 = smov (!%p1104_p0), 0  }
  0x64   : > { %s1657_s28 = smov (!%p1104_p0), 0  }
  0x69 LB: >> { %v553_v0 = vld [vmem:[%s1362_s24] sm:$0xf]  ;;  %v555_v1 = vld [vmem:[%s1362_s24 + $0x4] sm:$0xf]  ;;  %v557_v60 = vld [vmem:[%s1362_s24 + $0x8] sm:$0xf]  ;;  %s1370_s28 = sphi %s1657_s28, %s547_s28   ;;  %s1366_s26 = sphi %s1655_s26, %s1851_s26   ;;  %s1362_s24 = sphi %s1850_s24, %s686_s24   ;;  %s1358_s15 = sphi %s1849_s15, %s687_s15  }
  0x6a   : >> { %554 = vst [vmem:[%s1358_s15] sm:$0xf] %v553_v0  ;;  %556 = vst [vmem:[%s1358_s15 + $0x4] sm:$0xf] %v555_v1  ;;  %v559_v61 = vld [vmem:[%s1362_s24 + $0xc] sm:$0xf]  ;;  %s681_s29 = sadd.s32 1, %s1366_s26 }
  0x6b   : >> { %558 = vst [vmem:[%s1358_s15 + $0x8] sm:$0xf] %v557_v60  ;;  %v561_v62 = vld [vmem:[%s1362_s24 + $0x10] sm:$0xf]  ;;  %v563_v63 = vld [vmem:[%s1362_s24 + $0x14] sm:$0xf]  ;;  %p682_p1 = scmp.ge.s32.totalorder %s681_s29, %s1646_s14 }
  0x6c   : >> { %560 = vst [vmem:[%s1358_s15 + $0xc] sm:$0xf] %v559_v61  ;;  %562 = vst [vmem:[%s1358_s15 + $0x10] sm:$0xf] %v561_v62  ;;  %v565_v2 = vld [vmem:[%s1362_s24 + $0x18] sm:$0xf] }
  0x6d   : >> { %564 = vst [vmem:[%s1358_s15 + $0x14] sm:$0xf] %v563_v63  ;;  %v567_v3 = vld [vmem:[%s1362_s24 + $0x1c] sm:$0xf]  ;;  %v569_v4 = vld [vmem:[%s1362_s24 + $0x20] sm:$0xf] }
  0x6e   : >> { %566 = vst [vmem:[%s1358_s15 + $0x18] sm:$0xf] %v565_v2  ;;  %568 = vst [vmem:[%s1358_s15 + $0x1c] sm:$0xf] %v567_v3  ;;  %v571_v5 = vld [vmem:[%s1362_s24 + $0x24] sm:$0xf] }
  0x6f   : >> { %570 = vst [vmem:[%s1358_s15 + $0x20] sm:$0xf] %v569_v4  ;;  %v573_v6 = vld [vmem:[%s1362_s24 + $0x28] sm:$0xf]  ;;  %v575_v7 = vld [vmem:[%s1362_s24 + $0x2c] sm:$0xf] }
  0x70   : >> { %572 = vst [vmem:[%s1358_s15 + $0x24] sm:$0xf] %v571_v5  ;;  %574 = vst [vmem:[%s1358_s15 + $0x28] sm:$0xf] %v573_v6  ;;  %v577_v8 = vld [vmem:[%s1362_s24 + $0x30] sm:$0xf] }
  0x71   : >> { %576 = vst [vmem:[%s1358_s15 + $0x2c] sm:$0xf] %v575_v7  ;;  %v579_v9 = vld [vmem:[%s1362_s24 + $0x34] sm:$0xf]  ;;  %v581_v10 = vld [vmem:[%s1362_s24 + $0x38] sm:$0xf] }
  0x72   : >> { %578 = vst [vmem:[%s1358_s15 + $0x30] sm:$0xf] %v577_v8  ;;  %580 = vst [vmem:[%s1358_s15 + $0x34] sm:$0xf] %v579_v9  ;;  %v583_v11 = vld [vmem:[%s1362_s24 + $0x3c] sm:$0xf] }
  0x73   : >> { %582 = vst [vmem:[%s1358_s15 + $0x38] sm:$0xf] %v581_v10  ;;  %v585_v12 = vld [vmem:[%s1362_s24 + $0x40] sm:$0xf]  ;;  %v587_v13 = vld [vmem:[%s1362_s24 + $0x44] sm:$0xf] }
  0x74   : >> { %584 = vst [vmem:[%s1358_s15 + $0x3c] sm:$0xf] %v583_v11  ;;  %586 = vst [vmem:[%s1358_s15 + $0x40] sm:$0xf] %v585_v12  ;;  %v589_v14 = vld [vmem:[%s1362_s24 + $0x48] sm:$0xf] }
  0x75   : >> { %588 = vst [vmem:[%s1358_s15 + $0x44] sm:$0xf] %v587_v13  ;;  %v591_v15 = vld [vmem:[%s1362_s24 + $0x4c] sm:$0xf]  ;;  %v593_v16 = vld [vmem:[%s1362_s24 + $0x50] sm:$0xf] }
  0x76   : >> { %590 = vst [vmem:[%s1358_s15 + $0x48] sm:$0xf] %v589_v14  ;;  %592 = vst [vmem:[%s1358_s15 + $0x4c] sm:$0xf] %v591_v15  ;;  %v595_v17 = vld [vmem:[%s1362_s24 + $0x54] sm:$0xf] }
  0x77   : >> { %594 = vst [vmem:[%s1358_s15 + $0x50] sm:$0xf] %v593_v16  ;;  %v597_v18 = vld [vmem:[%s1362_s24 + $0x58] sm:$0xf]  ;;  %v599_v19 = vld [vmem:[%s1362_s24 + $0x5c] sm:$0xf] }
  0x78   : >> { %596 = vst [vmem:[%s1358_s15 + $0x54] sm:$0xf] %v595_v17  ;;  %598 = vst [vmem:[%s1358_s15 + $0x58] sm:$0xf] %v597_v18  ;;  %v601_v20 = vld [vmem:[%s1362_s24 + $0x60] sm:$0xf] }
  0x79   : >> { %600 = vst [vmem:[%s1358_s15 + $0x5c] sm:$0xf] %v599_v19  ;;  %v603_v21 = vld [vmem:[%s1362_s24 + $0x64] sm:$0xf]  ;;  %v605_v22 = vld [vmem:[%s1362_s24 + $0x68] sm:$0xf] }
  0x7a   : >> { %602 = vst [vmem:[%s1358_s15 + $0x60] sm:$0xf] %v601_v20  ;;  %604 = vst [vmem:[%s1358_s15 + $0x64] sm:$0xf] %v603_v21  ;;  %v607_v23 = vld [vmem:[%s1362_s24 + $0x6c] sm:$0xf] }
  0x7b   : >> { %606 = vst [vmem:[%s1358_s15 + $0x68] sm:$0xf] %v605_v22  ;;  %v609_v24 = vld [vmem:[%s1362_s24 + $0x70] sm:$0xf]  ;;  %v611_v25 = vld [vmem:[%s1362_s24 + $0x74] sm:$0xf] }
  0x7c   : >> { %608 = vst [vmem:[%s1358_s15 + $0x6c] sm:$0xf] %v607_v23  ;;  %610 = vst [vmem:[%s1358_s15 + $0x70] sm:$0xf] %v609_v24  ;;  %v613_v26 = vld [vmem:[%s1362_s24 + $0x78] sm:$0xf] }
  0x7d   : >> { %612 = vst [vmem:[%s1358_s15 + $0x74] sm:$0xf] %v611_v25  ;;  %v615_v27 = vld [vmem:[%s1362_s24 + $0x7c] sm:$0xf]  ;;  %v617_v28 = vld [vmem:[%s1362_s24 + $0x80] sm:$0xf] }
  0x7e   : >> { %614 = vst [vmem:[%s1358_s15 + $0x78] sm:$0xf] %v613_v26  ;;  %616 = vst [vmem:[%s1358_s15 + $0x7c] sm:$0xf] %v615_v27  ;;  %v619_v29 = vld [vmem:[%s1362_s24 + $0x84] sm:$0xf] }
  0x7f   : >> { %618 = vst [vmem:[%s1358_s15 + $0x80] sm:$0xf] %v617_v28  ;;  %v621_v30 = vld [vmem:[%s1362_s24 + $0x88] sm:$0xf]  ;;  %v623_v31 = vld [vmem:[%s1362_s24 + $0x8c] sm:$0xf] }
  0x80   : >> { %620 = vst [vmem:[%s1358_s15 + $0x84] sm:$0xf] %v619_v29  ;;  %622 = vst [vmem:[%s1358_s15 + $0x88] sm:$0xf] %v621_v30  ;;  %v625_v32 = vld [vmem:[%s1362_s24 + $0x90] sm:$0xf] }
  0x81   : >> { %624 = vst [vmem:[%s1358_s15 + $0x8c] sm:$0xf] %v623_v31  ;;  %v627_v33 = vld [vmem:[%s1362_s24 + $0x94] sm:$0xf]  ;;  %v629_v34 = vld [vmem:[%s1362_s24 + $0x98] sm:$0xf] }
  0x82   : >> { %626 = vst [vmem:[%s1358_s15 + $0x90] sm:$0xf] %v625_v32  ;;  %628 = vst [vmem:[%s1358_s15 + $0x94] sm:$0xf] %v627_v33  ;;  %v631_v35 = vld [vmem:[%s1362_s24 + $0x9c] sm:$0xf] }
  0x83   : >> { %630 = vst [vmem:[%s1358_s15 + $0x98] sm:$0xf] %v629_v34  ;;  %v633_v36 = vld [vmem:[%s1362_s24 + $0xa0] sm:$0xf]  ;;  %v635_v37 = vld [vmem:[%s1362_s24 + $0xa4] sm:$0xf] }
  0x84   : >> { %632 = vst [vmem:[%s1358_s15 + $0x9c] sm:$0xf] %v631_v35  ;;  %634 = vst [vmem:[%s1358_s15 + $0xa0] sm:$0xf] %v633_v36  ;;  %v637_v38 = vld [vmem:[%s1362_s24 + $0xa8] sm:$0xf] }
  0x85   : >> { %636 = vst [vmem:[%s1358_s15 + $0xa4] sm:$0xf] %v635_v37  ;;  %v639_v39 = vld [vmem:[%s1362_s24 + $0xac] sm:$0xf]  ;;  %v641_v40 = vld [vmem:[%s1362_s24 + $0xb0] sm:$0xf] }
  0x86   : >> { %638 = vst [vmem:[%s1358_s15 + $0xa8] sm:$0xf] %v637_v38  ;;  %640 = vst [vmem:[%s1358_s15 + $0xac] sm:$0xf] %v639_v39  ;;  %v643_v41 = vld [vmem:[%s1362_s24 + $0xb4] sm:$0xf] }
  0x87   : >> { %642 = vst [vmem:[%s1358_s15 + $0xb0] sm:$0xf] %v641_v40  ;;  %v645_v42 = vld [vmem:[%s1362_s24 + $0xb8] sm:$0xf]  ;;  %v647_v43 = vld [vmem:[%s1362_s24 + $0xbc] sm:$0xf] }
  0x88   : >> { %644 = vst [vmem:[%s1358_s15 + $0xb4] sm:$0xf] %v643_v41  ;;  %646 = vst [vmem:[%s1358_s15 + $0xb8] sm:$0xf] %v645_v42  ;;  %v649_v44 = vld [vmem:[%s1362_s24 + $0xc0] sm:$0xf] }
  0x89   : >> { %648 = vst [vmem:[%s1358_s15 + $0xbc] sm:$0xf] %v647_v43  ;;  %v651_v45 = vld [vmem:[%s1362_s24 + $0xc4] sm:$0xf]  ;;  %v653_v46 = vld [vmem:[%s1362_s24 + $0xc8] sm:$0xf] }
  0x8a   : >> { %650 = vst [vmem:[%s1358_s15 + $0xc0] sm:$0xf] %v649_v44  ;;  %652 = vst [vmem:[%s1358_s15 + $0xc4] sm:$0xf] %v651_v45  ;;  %v655_v47 = vld [vmem:[%s1362_s24 + $0xcc] sm:$0xf] }
  0x8b   : >> { %654 = vst [vmem:[%s1358_s15 + $0xc8] sm:$0xf] %v653_v46  ;;  %v657_v48 = vld [vmem:[%s1362_s24 + $0xd0] sm:$0xf]  ;;  %v659_v49 = vld [vmem:[%s1362_s24 + $0xd4] sm:$0xf] }
  0x8c   : >> { %656 = vst [vmem:[%s1358_s15 + $0xcc] sm:$0xf] %v655_v47  ;;  %658 = vst [vmem:[%s1358_s15 + $0xd0] sm:$0xf] %v657_v48  ;;  %v661_v50 = vld [vmem:[%s1362_s24 + $0xd8] sm:$0xf] }
  0x8d   : >> { %660 = vst [vmem:[%s1358_s15 + $0xd4] sm:$0xf] %v659_v49  ;;  %v663_v51 = vld [vmem:[%s1362_s24 + $0xdc] sm:$0xf]  ;;  %v665_v52 = vld [vmem:[%s1362_s24 + $0xe0] sm:$0xf] }
  0x8e   : >> { %662 = vst [vmem:[%s1358_s15 + $0xd8] sm:$0xf] %v661_v50  ;;  %664 = vst [vmem:[%s1358_s15 + $0xdc] sm:$0xf] %v663_v51  ;;  %v667_v53 = vld [vmem:[%s1362_s24 + $0xe4] sm:$0xf] }
  0x8f   : >> { %666 = vst [vmem:[%s1358_s15 + $0xe0] sm:$0xf] %v665_v52  ;;  %v669_v54 = vld [vmem:[%s1362_s24 + $0xe8] sm:$0xf]  ;;  %v671_v55 = vld [vmem:[%s1362_s24 + $0xec] sm:$0xf] }
  0x90   : >> { %668 = vst [vmem:[%s1358_s15 + $0xe4] sm:$0xf] %v667_v53  ;;  %670 = vst [vmem:[%s1358_s15 + $0xe8] sm:$0xf] %v669_v54  ;;  %v673_v56 = vld [vmem:[%s1362_s24 + $0xf0] sm:$0xf] }
  0x91   : >> { %672 = vst [vmem:[%s1358_s15 + $0xec] sm:$0xf] %v671_v55  ;;  %v675_v57 = vld [vmem:[%s1362_s24 + $0xf4] sm:$0xf]  ;;  %v677_v58 = vld [vmem:[%s1362_s24 + $0xf8] sm:$0xf] }
  0x92   : >> { %674 = vst [vmem:[%s1358_s15 + $0xf0] sm:$0xf] %v673_v56  ;;  %676 = vst [vmem:[%s1358_s15 + $0xf4] sm:$0xf] %v675_v57  ;;  %v679_v59 = vld [vmem:[%s1362_s24 + $0xfc] sm:$0xf] }
  0x93   : >> { %678 = vst [vmem:[%s1358_s15 + $0xf8] sm:$0xf] %v677_v58  ;;  %680 = vst [vmem:[%s1358_s15 + $0xfc] sm:$0xf] %v679_v59  ;;  %s1869_s29 = smov (%p682_p1, %s681_s29), 0  ;;  %s547_s28 = sadd.s32 1, %s1370_s28  }
  0x94   : >> { %s1105_s30 = sshll.u32 %s1869_s29, 8  ;;  %p546_p2 = scmp.ge.s32.totalorder %s547_s28, %s1646_s14 }
  0x95   : >> { %s686_s24 = scalar_lea.vmem %s1486_s25, %s1105_s30 [#allocation2]   ;;  %s687_s15 = scalar_lea.vmem %s1641_s23, %s1105_s30  }
  0x96   : >> { %s1851_s26 = smov %s1869_s29  ;;  %549 = sbr.rel (!%p546_p2) target bundleno = 105 (0x69), region = 173 }
  0x9d PF: > { %s1815_s4 = sand.u32 63, %s534_s22   ;;  %s1125_s5 = sshll.u32 %s1646_s14, 8 }
  0x9e   : > { %s692_s6 = scalar_lea.vmem %s1486_s25, %s1125_s5 [#allocation2]   ;;  %s694_s8 = scalar_lea.vmem %s1641_s23, %s1125_s5  }
  0x9f   : > { %p1110_p3 = scmp.le.s32.totalorder %s1815_s4, 0 }
  0xa0   : > { %s1372_s9 = smov (!%p1110_p3), %s694_s8   ;;  %s1376_s10 = smov (!%p1110_p3), %s692_s6  }
  0xa1   : > { %998 = sbr.rel (%p1110_p3) target bundleno = 178 (0xb2), region = 178  ;;  %s1380_s11 = smov (!%p1110_p3), 0  }
  0xa2   : > { %s1384_s12 = smov (!%p1110_p3), 0  }
  0xa8 LB: >> { %v704_v0 = vld [vmem:[%s1378_s10] sm:$0xf]  ;;  %s706_s7 = sadd.s32 1, %s1382_s11  ;;  %s698_s12 = sadd.s32 1, %s1386_s12   ;;  %s1386_s12 = sphi %s1384_s12, %s698_s12   ;;  %s1382_s11 = sphi %s1380_s11, %s1381_s11   ;;  %s1378_s10 = sphi %s1376_s10, %s711_s10   ;;  %s1374_s9 = sphi %s1372_s9, %s712_s9  }
  0xa9   : >> { %705 = vst [vmem:[%s1374_s9] sm:$0xf] %v704_v0  ;;  %p707_p4 = scmp.ge.s32.totalorder %s706_s7, %s1815_s4  ;;  %p697_p5 = scmp.ge.s32.totalorder %s698_s12, %s1815_s4 }
  0xab   : >> { %s1871_s7 = smov (%p707_p4, %s706_s7), 0  ;;  %700 = sbr.rel (!%p697_p5) target bundleno = 168 (0xa8), region = 184 }
  0xac   : >> { %s1111_s25 = sshll.u32 %s1871_s7, 2  ;;  %s1381_s11 = smov %s1871_s7  }
  0xad   : >> { %s711_s10 = scalar_lea.vmem %s692_s6, %s1111_s25 [#allocation2]   ;;  %s712_s9 = scalar_lea.vmem %s694_s8, %s1111_s25  }
  0xb2 PF: > { %s13_s18 = sadd.s32 1, %s1350_s18   ;;  %s1852_s12 = smov %s1330_s13 }
  0xb3   : > { %p10_p6 = scmp.ge.s32.totalorder %s13_s18, 12   ;;  %s1853_s13 = smov %s1465_s27 }
  0xb4   : > { %s1854_s14 = smov %s1342_s16  ;;  %s1855_s15 = smov %s1346_s17 }
  0xb5   : > { %s1856_s16 = smov %s1859_s19  ;;  %s1857_s17 = smov %s1863_s20 }
  0xb6   :  { %12 = sbr.rel (!%p10_p6) target bundleno = 4 (0x4), region = 195 }

// kernel: small_cnn_forward.12
= control target key start
LH: loop header
LB: loop body
LE: loop exit
PB: predicated region body
PF: predicated region fallthrough
CT: control target
= control target key end

     0   :  { %s3825_s18 = smov 0   ;;  %s3827_s19 = smov 0   ;;  %s4808_s0 = inlined_call_operand.vmem [shape: bf16[1330,512], index: 0, kind: input, shape index: {}]   ;;  %s4809_s1 = inlined_call_operand.vmem [shape: bf16[512,64], index: 1, kind: input, shape index: {}]   ;;  %s4810_s2 = inlined_call_operand.vmem [shape: f32[1,64], index: 2, kind: input, shape index: {}]   ;;  %s4811_s3 = inlined_call_operand.vmem [shape: f32[1330,64], index: 3, kind: output, shape index: {0}]   ;;  %s4812_s4 = inlined_call_operand.vmem [shape: f32[24,64], index: 4, kind: output, shape index: {1}]   ;;  %s4813_s5 = inlined_call_operand.vmem [shape: f32[24,64], index: 5, kind: output, shape index: {2}]  }
   0x1   :  { %s3829_s20 = smov 0  }
   0x2 LB: > { %s3838_s21 = sadd.s32 4294967295, %s3760_s20   ;;  %s3840_s22 = sadd.s32 1, %s3760_s20   ;;  %s3760_s20 = sphi %s3829_s20, %s4822_s20   ;;  %s3756_s19 = sphi %s3827_s19, %s4821_s19   ;;  %s3752_s18 = sphi %s3825_s18, %s4820_s18  }
   0x3   : > { %s88_s23 = ssub.s32 %s3760_s20, %s3840_s22  ;;  %s91_s24 = sadd.s32 1, %s3756_s19 }
   0x4   : > { %p89_p0 = scmp.eq.s32.totalorder %s88_s23, 0  ;;  %p101_p1 = scmp.ne.s32.totalorder %s3756_s19, %s3752_s18 }
   0x5   : > { %p102_p2 = scmp.eq.s32.totalorder %s3838_s21, 2  ;;  %p3073_p3 = scmp.ge.s32.totalorder %s3760_s20, 1 }
   0x6   : > { %s3848_s25 = scalar_select %p89_p0, %s3756_s19, %s91_s24  }
   0x7   : > { %p3850_p4 = por %p102_p2, %p101_p1  ;;  %p204_p5 = scmp.lt.s32.totalorder %s3760_s20, 4 }
   0x9   : > { %p205_p6 = pnand %p3073_p3, %p204_p5 }
   0xa   : > { %v3480_v0 = vld [vmem:[%s4809_s1] sm:$0xff] (!%p205_p6)   ;;  %v3794_v1 = vmov (!%p205_p6), 0   ;;  %v3482_v3 = vld [vmem:[%s4809_s1 + $0x8] sm:$0xff] (!%p205_p6)   ;;  %v3484_v5 = vld [vmem:[%s4809_s1 + $0x10] sm:$0xff] (!%p205_p6)   ;;  %s3895_s28 = sshll.u32 (!%p205_p6), %s3838_s21, 6  ;;  %s3241_s20 = sshll.u32 (!%p205_p6), %s3838_s21, 9 }
   0xb   : > { %208 = sbr.rel (%p205_p6) target bundleno = 632 (0x278), region = 32  ;;  %1307 = vmatprep.subr.bf16.mxu1 (!%p205_p6), %v3794_v1  ;;  %1596 = vmatprep.subr.bf16.mxu0 (!%p205_p6), %v3794_v1  ;;  %v3481_v2 = vld [vmem:[%s4809_s1 + $0x80] sm:$0xff] (!%p205_p6)   ;;  %v3483_v4 = vld [vmem:[%s4809_s1 + $0x88] sm:$0xff] (!%p205_p6)   ;;  %v3485_v6 = vld [vmem:[%s4809_s1 + $0x90] sm:$0xff] (!%p205_p6)   ;;  %p251_p7 = scmp.lt.s32.totalorder (!%p205_p6), %s3895_s28, 166  ;;  %vm1885_vm0 = vcmask (!%p205_p6), 523264  }
   0xc   : > { %1308 = vmatpush1.bf16.msra.mxu1 (!%p205_p6), %v3480_v0  ;;  %1597 = vmatpush1.bf16.msra.mxu0 (!%p205_p6), %v3481_v2  ;;  %v3486_v7 = vld [vmem:[%s4809_s1 + $0x18] sm:$0xff] (!%p205_p6)   ;;  %v3488_v9 = vld [vmem:[%s4809_s1 + $0x20] sm:$0xff] (!%p205_p6)   ;;  %v3490_v11 = vld [vmem:[%s4809_s1 + $0x28] sm:$0xff] (!%p205_p6)   ;;  %s230_s23 = sand.u32 (!%p205_p6), 1, %s3752_s18   ;;  %p267_p8 = scmp.lt.s32.totalorder (!%p205_p6), %s3838_s21, 2 }
   0xd   : > { %1309 = vmatprep.subr.bf16.mxu1 (!%p205_p6), %v3794_v1  ;;  %1598 = vmatprep.subr.bf16.mxu0 (!%p205_p6), %v3794_v1  ;;  %v3487_v8 = vld [vmem:[%s4809_s1 + $0x98] sm:$0xff] (!%p205_p6)   ;;  %v3489_v10 = vld [vmem:[%s4809_s1 + $0xa0] sm:$0xff] (!%p205_p6)   ;;  %v3491_v12 = vld [vmem:[%s4809_s1 + $0xa8] sm:$0xff] (!%p205_p6)   ;;  %s3074_s30 = sshll.u32 (!%p205_p6), %s230_s23, 9 }
   0xe   : > { %v3492_v13 = vld [vmem:[%s4809_s1 + $0x30] sm:$0xff] (!%p205_p6)   ;;  %v3494_v15 = vld [vmem:[%s4809_s1 + $0x38] sm:$0xff] (!%p205_p6)   ;;  %v3496_v17 = vld [vmem:[%s4809_s1 + $0x40] sm:$0xff] (!%p205_p6)   ;;  %s4127_s18 = scalar_lea.vmem (!%p205_p6), [#allocation2], %s3074_s30  }
   0xf   : > { %v3493_v14 = vld [vmem:[%s4809_s1 + $0xb0] sm:$0xff] (!%p205_p6)   ;;  %v3495_v16 = vld [vmem:[%s4809_s1 + $0xb8] sm:$0xff] (!%p205_p6)   ;;  %v3497_v18 = vld [vmem:[%s4809_s1 + $0xc0] sm:$0xff] (!%p205_p6)  }
  0x10   : > { %1310 = vmatpush1.bf16.msra.mxu1 (!%p205_p6), %v3482_v3  ;;  %1599 = vmatpush1.bf16.msra.mxu0 (!%p205_p6), %v3483_v4  ;;  %v3498_v20 = vld [vmem:[%s4809_s1 + $0x48] sm:$0xff] (!%p205_p6)   ;;  %v3500_v23 = vld [vmem:[%s4809_s1 + $0x50] sm:$0xff] (!%p205_p6)   ;;  %v3502_v25 = vld [vmem:[%s4809_s1 + $0x58] sm:$0xff] (!%p205_p6)  }
  0x11   : > { %1311 = vmatprep.subr.bf16.mxu1 (!%p205_p6), %v3794_v1  ;;  %1600 = vmatprep.subr.bf16.mxu0 (!%p205_p6), %v3794_v1  ;;  %v3499_v22 = vld [vmem:[%s4809_s1 + $0xc8] sm:$0xff] (!%p205_p6)   ;;  %v3501_v24 = vld [vmem:[%s4809_s1 + $0xd0] sm:$0xff] (!%p205_p6)   ;;  %v3503_v26 = vld [vmem:[%s4809_s1 + $0xd8] sm:$0xff] (!%p205_p6)  }
  0x12   : > { %s252_s12 = scalar_select %p251_p7, %s3895_s28, 166  ;;  %v3504_v27 = vld [vmem:[%s4809_s1 + $0x60] sm:$0xff]   ;;  %v3506_v29 = vld [vmem:[%s4809_s1 + $0x68] sm:$0xff]   ;;  %v3508_v31 = vld [vmem:[%s4809_s1 + $0x70] sm:$0xff]  }
  0x13   : > { %v3505_v28 = vld [vmem:[%s4809_s1 + $0xe0] sm:$0xff]   ;;  %v3507_v30 = vld [vmem:[%s4809_s1 + $0xe8] sm:$0xff]   ;;  %v3509_v32 = vld [vmem:[%s4809_s1 + $0xf0] sm:$0xff]   ;;  %s268_s9 = scalar_select %p267_p8, %s3838_s21, 2 }
  0x14   : > { %1312 = vmatpush1.bf16.msra.mxu1 %v3484_v5  ;;  %1601 = vmatpush1.bf16.msra.mxu0 %v3485_v6  ;;  %s3259_s17 = sshll.u32 %s252_s12, 4  ;;  %v3510_v33 = vld [vmem:[%s4809_s1 + $0x78] sm:$0xff]   ;;  %s4609_s27 = scalar_lea.vmem (%p3850_p4), %s4811_s3, %s3241_s20  }
  0x15   : > { %1313 = vmatprep.subr.bf16.mxu1 %v3794_v1  ;;  %1602 = vmatprep.subr.bf16.mxu0 %v3794_v1  ;;  %s3929_s29 = scalar_lea.vmem %s4808_s0, %s3259_s17  ;;  %v3511_v34 = vld [vmem:[%s4809_s1 + $0xf8] sm:$0xff]   ;;  %s3078_s10 = sshll.u32 %s268_s9, 3 }
  0x16   : > { %v3514_v19 = vld [vmem:[%s3929_s29 + $0x4] ss:$16 sps:$4 sm:$0xff]   ;;  %v3517_v21 = vld [vmem:[%s3929_s29 + $0xc] ss:$16 sps:$4 sm:$0xff]   ;;  %v3512_v35 = vld [vmem:[%s3929_s29] ss:$16 sps:$4 sm:$0xff]   ;;  %s270_s13 = scalar_lea.vmem %s4812_s4, %s3078_s10  ;;  %s274_s16 = scalar_lea.vmem %s4813_s5, %s3078_s10 }
  0x17   : > { %1339 = vmatprep.mubr.bf16.mxu1 %v3514_v19  ;;  %1628 = vmatprep.mubr.bf16.mxu0 %v3517_v21  ;;  %v3515_v36 = vld [vmem:[%s3929_s29 + $0x8] ss:$16 sps:$4 sm:$0xff]   ;;  %v3518_v37 = vld [vmem:[%s3929_s29 + $0x24] ss:$16 sps:$4 sm:$0xff]   ;;  %v3520_v38 = vld [vmem:[%s3929_s29 + $0x2c] ss:$16 sps:$4 sm:$0xff]  }
  0x18   : > { %1314 = vmatpush1.bf16.msra.mxu1 %v3486_v7  ;;  %1603 = vmatpush1.bf16.msra.mxu0 %v3487_v8  ;;  %v3522_v39 = vld [vmem:[%s3929_s29 + $0x20] ss:$16 sps:$4 sm:$0xff]   ;;  %v3523_v40 = vld [vmem:[%s3929_s29 + $0x28] ss:$16 sps:$4 sm:$0xff]   ;;  %v3524_v41 = vld [vmem:[%s3929_s29 + $0x44] ss:$16 sps:$4 sm:$0xff]  }
  0x19   : > { %1315 = vmatprep.subr.bf16.mxu1 %v3794_v1  ;;  %1604 = vmatprep.subr.bf16.mxu0 %v3794_v1  ;;  %v3526_v42 = vld [vmem:[%s3929_s29 + $0x4c] ss:$16 sps:$4 sm:$0xff]   ;;  %v3528_v43 = vld [vmem:[%s3929_s29 + $0x40] ss:$16 sps:$4 sm:$0xff]   ;;  %v3529_v44 = vld [vmem:[%s3929_s29 + $0x48] ss:$16 sps:$4 sm:$0xff]  }
  0x1a   : > { %v3530_v45 = vld [vmem:[%s3929_s29 + $0x64] ss:$16 sps:$4 sm:$0xff]   ;;  %v3532_v46 = vld [vmem:[%s3929_s29 + $0x6c] ss:$16 sps:$4 sm:$0xff]   ;;  %v3534_v47 = vld [vmem:[%s3929_s29 + $0x60] ss:$16 sps:$4 sm:$0xff]  }
  0x1b   : > { %v3535_v48 = vld [vmem:[%s3929_s29 + $0x68] ss:$16 sps:$4 sm:$0xff]   ;;  %v3536_v49 = vld [vmem:[%s3929_s29 + $0x84] ss:$16 sps:$4 sm:$0xff]   ;;  %v3538_v50 = vld [vmem:[%s3929_s29 + $0x8c] ss:$16 sps:$4 sm:$0xff]  }
  0x1c   : > { %1316 = vmatpush1.bf16.msra.mxu1 %v3488_v9  ;;  %1605 = vmatpush1.bf16.msra.mxu0 %v3489_v10  ;;  %v3540_v51 = vld [vmem:[%s3929_s29 + $0x80] ss:$16 sps:$4 sm:$0xff]   ;;  %v3541_v52 = vld [vmem:[%s3929_s29 + $0x88] ss:$16 sps:$4 sm:$0xff]   ;;  %v3542_v53 = vld [vmem:[%s3929_s29 + $0xa4] ss:$16 sps:$4 sm:$0xff]  }
  0x1d   : > { %1317 = vmatprep.subr.bf16.mxu1 %v3794_v1  ;;  %1606 = vmatprep.subr.bf16.mxu0 %v3794_v1  ;;  %v3544_v54 = vld [vmem:[%s3929_s29 + $0xac] ss:$16 sps:$4 sm:$0xff]   ;;  %v3546_v55 = vld [vmem:[%s3929_s29 + $0xa0] ss:$16 sps:$4 sm:$0xff]   ;;  %v3547_v56 = vld [vmem:[%s3929_s29 + $0xa8] ss:$16 sps:$4 sm:$0xff]  }
  0x1e   : > { %v3548_v57 = vld [vmem:[%s3929_s29 + $0xc4] ss:$16 sps:$4 sm:$0xff]   ;;  %v3550_v58 = vld [vmem:[%s3929_s29 + $0xcc] ss:$16 sps:$4 sm:$0xff]   ;;  %v3552_v59 = vld [vmem:[%s3929_s29 + $0xc0] ss:$16 sps:$4 sm:$0xff]  }
  0x1f   : > { %v3553_v60 = vld [vmem:[%s3929_s29 + $0xc8] ss:$16 sps:$4 sm:$0xff]   ;;  %v3554_v61 = vld [vmem:[%s3929_s29 + $0xe4] ss:$16 sps:$4 sm:$0xff]   ;;  %v3556_v62 = vld [vmem:[%s3929_s29 + $0xec] ss:$16 sps:$4 sm:$0xff]  }
  0x20   : > { %1318 = vmatpush1.bf16.msra.mxu1 %v3490_v11  ;;  %1607 = vmatpush1.bf16.msra.mxu0 %v3491_v12  ;;  %v3558_v63 = vld [vmem:[%s3929_s29 + $0xe0] ss:$16 sps:$4 sm:$0xff]   ;;  %v3559_v0 = vld [vmem:[%s3929_s29 + $0xe8] ss:$16 sps:$4 sm:$0xff]   ;;  %v3562_v2 = vld [vmem:[%s3929_s29 + $0x10c] ss:$16 sps:$4 sm:$0xff]  }
  0x21   : > { %1319 = vmatprep.subr.bf16.mxu1 %v3794_v1  ;;  %1608 = vmatprep.subr.bf16.mxu0 %v3794_v1  ;;  %v3564_v3 = vld [vmem:[%s3929_s29 + $0x100] ss:$16 sps:$4 sm:$0xff]   ;;  %v3565_v4 = vld [vmem:[%s3929_s29 + $0x108] ss:$16 sps:$4 sm:$0xff]   ;;  %v3566_v5 = vld [vmem:[%s3929_s29 + $0x124] ss:$16 sps:$4 sm:$0xff]  }
  0x22   : > { %v3568_v6 = vld [vmem:[%s3929_s29 + $0x12c] ss:$16 sps:$4 sm:$0xff]   ;;  %v3570_v7 = vld [vmem:[%s3929_s29 + $0x120] ss:$16 sps:$4 sm:$0xff]   ;;  %v3571_v8 = vld [vmem:[%s3929_s29 + $0x128] ss:$16 sps:$4 sm:$0xff]  }
  0x23   : > { %v3572_v9 = vld [vmem:[%s3929_s29 + $0x144] ss:$16 sps:$4 sm:$0xff]   ;;  %v3574_v10 = vld [vmem:[%s3929_s29 + $0x14c] ss:$16 sps:$4 sm:$0xff]   ;;  %v3576_v11 = vld [vmem:[%s3929_s29 + $0x140] ss:$16 sps:$4 sm:$0xff]  }
  0x24   : > { %1320 = vmatpush1.bf16.msra.mxu1 %v3492_v13  ;;  %1609 = vmatpush1.bf16.msra.mxu0 %v3493_v14  ;;  %v3577_v12 = vld [vmem:[%s3929_s29 + $0x148] ss:$16 sps:$4 sm:$0xff]   ;;  %v3578_v13 = vld [vmem:[%s3929_s29 + $0x164] ss:$16 sps:$4 sm:$0xff]   ;;  %v3580_v14 = vld [vmem:[%s3929_s29 + $0x16c] ss:$16 sps:$4 sm:$0xff]  }
  0x25   : > { %1321 = vmatprep.subr.bf16.mxu1 %v3794_v1  ;;  %1610 = vmatprep.subr.bf16.mxu0 %v3794_v1  ;;  %v3588_v19 = vld [vmem:[%s3929_s29 + $0x180] ss:$16 sps:$4 sm:$0xff]   ;;  %v3590_v21 = vld [vmem:[%s3929_s29 + $0x1a4] ss:$16 sps:$4 sm:$0xff]   ;;  %s2557_s17 = ssub.s32 (%p3850_p4), 167, %s3895_s28 }
  0x26   : > { %p2558_p9 = scmp.lt.s32.totalorder (%p3850_p4), %s2557_s17, 64 }
  0x28   : > { %1322 = vmatpush1.bf16.msra.mxu1 %v3494_v15  ;;  %1611 = vmatpush1.bf16.msra.mxu0 %v3495_v16  ;;  %v3582_v15 = vld [vmem:[%s3929_s29 + $0x160] ss:$16 sps:$4 sm:$0xff]   ;;  %v3583_v16 = vld [vmem:[%s3929_s29 + $0x168] ss:$16 sps:$4 sm:$0xff]  }
  0x29   : > { %1323 = vmatprep.subr.bf16.mxu1 %v3794_v1  ;;  %1612 = vmatprep.subr.bf16.mxu0 %v3794_v1 }
  0x2c   : > { %1324 = vmatpush1.bf16.msra.mxu1 %v3496_v17  ;;  %1613 = vmatpush1.bf16.msra.mxu0 %v3497_v18  ;;  %v3584_v17 = vld [vmem:[%s3929_s29 + $0x184] ss:$16 sps:$4 sm:$0xff]   ;;  %v3586_v18 = vld [vmem:[%s3929_s29 + $0x18c] ss:$16 sps:$4 sm:$0xff]  }
  0x2d   : > { %1325 = vmatprep.subr.bf16.mxu1 %v3794_v1  ;;  %1614 = vmatprep.subr.bf16.mxu0 %v3794_v1 }
  0x30   : > { %1326 = vmatpush1.bf16.msra.mxu1 %v3498_v20  ;;  %1615 = vmatpush1.bf16.msra.mxu0 %v3499_v22  ;;  %v3589_v20 = vld [vmem:[%s3929_s29 + $0x188] ss:$16 sps:$4 sm:$0xff]   ;;  %v3592_v22 = vld [vmem:[%s3929_s29 + $0x1ac] ss:$16 sps:$4 sm:$0xff]  }
  0x31   : > { %1327 = vmatprep.subr.bf16.mxu1 %v3794_v1  ;;  %1616 = vmatprep.subr.bf16.mxu0 %v3794_v1 }
  0x34   : > { %1328 = vmatpush1.bf16.msra.mxu1 %v3500_v23  ;;  %1617 = vmatpush1.bf16.msra.mxu0 %v3501_v24  ;;  %v3594_v23 = vld [vmem:[%s3929_s29 + $0x1a0] ss:$16 sps:$4 sm:$0xff]   ;;  %v3595_v24 = vld [vmem:[%s3929_s29 + $0x1a8] ss:$16 sps:$4 sm:$0xff]  }
  0x35   : > { %1329 = vmatprep.subr.bf16.mxu1 %v3794_v1  ;;  %1618 = vmatprep.subr.bf16.mxu0 %v3794_v1 }
  0x38   : > { %1330 = vmatpush1.bf16.msra.mxu1 %v3502_v25  ;;  %1619 = vmatpush1.bf16.msra.mxu0 %v3503_v26  ;;  %v3596_v25 = vld [vmem:[%s3929_s29 + $0x1c4] ss:$16 sps:$4 sm:$0xff]   ;;  %v3598_v26 = vld [vmem:[%s3929_s29 + $0x1cc] ss:$16 sps:$4 sm:$0xff]  }
  0x39   : > { %1331 = vmatprep.subr.bf16.mxu1 %v3794_v1  ;;  %1620 = vmatprep.subr.bf16.mxu0 %v3794_v1 }
  0x3c   : > { %1332 = vmatpush1.bf16.msra.mxu1 %v3504_v27  ;;  %1621 = vmatpush1.bf16.msra.mxu0 %v3505_v28  ;;  %v3600_v27 = vld [vmem:[%s3929_s29 + $0x1c0] ss:$16 sps:$4 sm:$0xff]   ;;  %v3601_v28 = vld [vmem:[%s3929_s29 + $0x1c8] ss:$16 sps:$4 sm:$0xff]  }
  0x3d   : > { %1333 = vmatprep.subr.bf16.mxu1 %v3794_v1  ;;  %1622 = vmatprep.subr.bf16.mxu0 %v3794_v1 }
  0x40   : > { %1334 = vmatpush1.bf16.msra.mxu1 %v3506_v29  ;;  %1623 = vmatpush1.bf16.msra.mxu0 %v3507_v30  ;;  %v3602_v29 = vld [vmem:[%s3929_s29 + $0x1e4] ss:$16 sps:$4 sm:$0xff]   ;;  %v3604_v30 = vld [vmem:[%s3929_s29 + $0x1ec] ss:$16 sps:$4 sm:$0xff]  }
  0x41   : > { %1335 = vmatprep.subr.bf16.mxu1 %v3794_v1  ;;  %1624 = vmatprep.subr.bf16.mxu0 %v3794_v1 }
  0x44   : > { %1336 = vmatpush1.bf16.msra.mxu1 %v3508_v31  ;;  %1625 = vmatpush1.bf16.msra.mxu0 %v3509_v32  ;;  %v3606_v31 = vld [vmem:[%s3929_s29 + $0x1e0] ss:$16 sps:$4 sm:$0xff]   ;;  %v3607_v32 = vld [vmem:[%s3929_s29 + $0x1e8] ss:$16 sps:$4 sm:$0xff]  }
  0x45   : > { %1337 = vmatprep.subr.bf16.mxu1 %v3794_v1  ;;  %1626 = vmatprep.subr.bf16.mxu0 %v3794_v1  ;;  %v3560_v1 = vld [vmem:[%s3929_s29 + $0x104] ss:$16 sps:$4 sm:$0xff]  }
  0x48   : > { %1338 = vmatpush1.bf16.msra.mxu1 %v3510_v33  ;;  %1627 = vmatpush1.bf16.msra.mxu0 %v3511_v34  ;;  %v3608_v33 = vld [vmem:[%s3929_s29 + $0x204] ss:$16 sps:$4 sm:$0xff]   ;;  %v3610_v34 = vld [vmem:[%s3929_s29 + $0x20c] ss:$16 sps:$4 sm:$0xff]  }
  0x4b   : > { %1340 = vmatmul.mubr.bf16.vlgmr.msra.gmra.mrb[0].mxu1 %v3512_v35  ;;  %1629 = vmatmul.mubr.bf16.vlgmr.msra.gmra.mrb[0].mxu0 %v3515_v36  ;;  %v3612_v35 = vld [vmem:[%s3929_s29 + $0x200] ss:$16 sps:$4 sm:$0xff]   ;;  %v3613_v36 = vld [vmem:[%s3929_s29 + $0x208] ss:$16 sps:$4 sm:$0xff]  }
  0x4c   : > { %1347 = vmatprep.mubr.bf16.mxu1 %v3518_v37  ;;  %1636 = vmatprep.mubr.bf16.mxu0 %v3520_v38  ;;  %v3614_v37 = vld [vmem:[%s3929_s29 + $0x224] ss:$16 sps:$4 sm:$0xff]   ;;  %v3616_v38 = vld [vmem:[%s3929_s29 + $0x22c] ss:$16 sps:$4 sm:$0xff]  }
  0x53   : > { %1348 = vmatmul.mubr.bf16.gmra.mrb[4].mxu1 %v3522_v39  ;;  %1637 = vmatmul.mubr.bf16.gmra.mrb[4].mxu0 %v3523_v40  ;;  %v3618_v39 = vld [vmem:[%s3929_s29 + $0x220] ss:$16 sps:$4 sm:$0xff]   ;;  %v3619_v40 = vld [vmem:[%s3929_s29 + $0x228] ss:$16 sps:$4 sm:$0xff]  }
  0x54   : > { %1355 = vmatprep.mubr.bf16.mxu1 %v3524_v41  ;;  %1644 = vmatprep.mubr.bf16.mxu0 %v3526_v42  ;;  %v3620_v41 = vld [vmem:[%s3929_s29 + $0x244] ss:$16 sps:$4 sm:$0xff]   ;;  %v3622_v42 = vld [vmem:[%s3929_s29 + $0x24c] ss:$16 sps:$4 sm:$0xff]  }
  0x5b   : > { %1356 = vmatmul.mubr.bf16.gmra.mrb[8].mxu1 %v3528_v43  ;;  %1645 = vmatmul.mubr.bf16.gmra.mrb[8].mxu0 %v3529_v44  ;;  %v3624_v43 = vld [vmem:[%s3929_s29 + $0x240] ss:$16 sps:$4 sm:$0xff]   ;;  %v3625_v44 = vld [vmem:[%s3929_s29 + $0x248] ss:$16 sps:$4 sm:$0xff]  }
  0x5c   : > { %1363 = vmatprep.mubr.bf16.mxu1 %v3530_v45  ;;  %1652 = vmatprep.mubr.bf16.mxu0 %v3532_v46  ;;  %v3626_v45 = vld [vmem:[%s3929_s29 + $0x264] ss:$16 sps:$4 sm:$0xff]   ;;  %v3628_v46 = vld [vmem:[%s3929_s29 + $0x26c] ss:$16 sps:$4 sm:$0xff]  }
  0x63   : > { %1364 = vmatmul.mubr.bf16.gmra.mrb[12].mxu1 %v3534_v47  ;;  %1653 = vmatmul.mubr.bf16.gmra.mrb[12].mxu0 %v3535_v48  ;;  %v3630_v47 = vld [vmem:[%s3929_s29 + $0x260] ss:$16 sps:$4 sm:$0xff]   ;;  %v3631_v48 = vld [vmem:[%s3929_s29 + $0x268] ss:$16 sps:$4 sm:$0xff]  }
  0x64   : > { %1371 = vmatprep.mubr.bf16.mxu1 %v3536_v49  ;;  %1660 = vmatprep.mubr.bf16.mxu0 %v3538_v50  ;;  %v3632_v49 = vld [vmem:[%s3929_s29 + $0x284] ss:$16 sps:$4 sm:$0xff]   ;;  %v3634_v50 = vld [vmem:[%s3929_s29 + $0x28c] ss:$16 sps:$4 sm:$0xff]  }
  0x6b   : > { %1372 = vmatmul.mubr.bf16.gmra.mrb[16].mxu1 %v3540_v51  ;;  %1661 = vmatmul.mubr.bf16.gmra.mrb[16].mxu0 %v3541_v52  ;;  %v3636_v51 = vld [vmem:[%s3929_s29 + $0x280] ss:$16 sps:$4 sm:$0xff]   ;;  %v3637_v52 = vld [vmem:[%s3929_s29 + $0x288] ss:$16 sps:$4 sm:$0xff]  }
  0x6c   : > { %1379 = vmatprep.mubr.bf16.mxu1 %v3542_v53  ;;  %1668 = vmatprep.mubr.bf16.mxu0 %v3544_v54  ;;  %v3638_v53 = vld [vmem:[%s3929_s29 + $0x2a4] ss:$16 sps:$4 sm:$0xff]   ;;  %v3640_v54 = vld [vmem:[%s3929_s29 + $0x2ac] ss:$16 sps:$4 sm:$0xff]  }
  0x73   : > { %1380 = vmatmul.mubr.bf16.gmra.mrb[20].mxu1 %v3546_v55  ;;  %1669 = vmatmul.mubr.bf16.gmra.mrb[20].mxu0 %v3547_v56  ;;  %v3642_v55 = vld [vmem:[%s3929_s29 + $0x2a0] ss:$16 sps:$4 sm:$0xff]   ;;  %v3643_v56 = vld [vmem:[%s3929_s29 + $0x2a8] ss:$16 sps:$4 sm:$0xff]  }
  0x74   : > { %1387 = vmatprep.mubr.bf16.mxu1 %v3548_v57  ;;  %1676 = vmatprep.mubr.bf16.mxu0 %v3550_v58  ;;  %v3644_v57 = vld [vmem:[%s3929_s29 + $0x2c4] ss:$16 sps:$4 sm:$0xff]   ;;  %v3646_v58 = vld [vmem:[%s3929_s29 + $0x2cc] ss:$16 sps:$4 sm:$0xff]  }
  0x7b   : > { %1388 = vmatmul.mubr.bf16.gmra.mrb[24].mxu1 %v3552_v59  ;;  %1677 = vmatmul.mubr.bf16.gmra.mrb[24].mxu0 %v3553_v60  ;;  %v3648_v59 = vld [vmem:[%s3929_s29 + $0x2c0] ss:$16 sps:$4 sm:$0xff]   ;;  %v3649_v60 = vld [vmem:[%s3929_s29 + $0x2c8] ss:$16 sps:$4 sm:$0xff]  }
  0x7c   : > { %1395 = vmatprep.mubr.bf16.mxu1 %v3554_v61  ;;  %1684 = vmatprep.mubr.bf16.mxu0 %v3556_v62  ;;  %v3650_v61 = vld [vmem:[%s3929_s29 + $0x2e4] ss:$16 sps:$4 sm:$0xff]   ;;  %v3652_v62 = vld [vmem:[%s3929_s29 + $0x2ec] ss:$16 sps:$4 sm:$0xff]  }
  0x83   : > { %1396 = vmatmul.mubr.bf16.gmra.mrb[28].mxu1 %v3558_v63  ;;  %1685 = vmatmul.mubr.bf16.gmra.mrb[28].mxu0 %v3559_v0  ;;  %v3654_v63 = vld [vmem:[%s3929_s29 + $0x2e0] ss:$16 sps:$4 sm:$0xff]   ;;  %v3655_v0 = vld [vmem:[%s3929_s29 + $0x2e8] ss:$16 sps:$4 sm:$0xff]  }
  0x84   : > { %1403 = vmatprep.mubr.bf16.mxu1 %v3560_v1  ;;  %1692 = vmatprep.mubr.bf16.mxu0 %v3562_v2  ;;  %v3656_v1 = vld [vmem:[%s3929_s29 + $0x304] ss:$16 sps:$4 sm:$0xff]   ;;  %v3658_v2 = vld [vmem:[%s3929_s29 + $0x30c] ss:$16 sps:$4 sm:$0xff]  }
  0x8b   : > { %1404 = vmatmul.mubr.bf16.gmra.mrb[32].mxu1 %v3564_v3  ;;  %1693 = vmatmul.mubr.bf16.gmra.mrb[32].mxu0 %v3565_v4  ;;  %v3660_v3 = vld [vmem:[%s3929_s29 + $0x300] ss:$16 sps:$4 sm:$0xff]   ;;  %v3661_v4 = vld [vmem:[%s3929_s29 + $0x308] ss:$16 sps:$4 sm:$0xff]  }
  0x8c   : > { %1411 = vmatprep.mubr.bf16.mxu1 %v3566_v5  ;;  %1700 = vmatprep.mubr.bf16.mxu0 %v3568_v6  ;;  %v3662_v5 = vld [vmem:[%s3929_s29 + $0x324] ss:$16 sps:$4 sm:$0xff]   ;;  %v3664_v6 = vld [vmem:[%s3929_s29 + $0x32c] ss:$16 sps:$4 sm:$0xff]  }
  0x93   : > { %1412 = vmatmul.mubr.bf16.gmra.mrb[36].mxu1 %v3570_v7  ;;  %1701 = vmatmul.mubr.bf16.gmra.mrb[36].mxu0 %v3571_v8  ;;  %v3666_v7 = vld [vmem:[%s3929_s29 + $0x320] ss:$16 sps:$4 sm:$0xff]   ;;  %v3667_v8 = vld [vmem:[%s3929_s29 + $0x328] ss:$16 sps:$4 sm:$0xff]  }
  0x94   : > { %1419 = vmatprep.mubr.bf16.mxu1 %v3572_v9  ;;  %1708 = vmatprep.mubr.bf16.mxu0 %v3574_v10  ;;  %v3668_v9 = vld [vmem:[%s3929_s29 + $0x344] ss:$16 sps:$4 sm:$0xff]   ;;  %v3670_v10 = vld [vmem:[%s3929_s29 + $0x34c] ss:$16 sps:$4 sm:$0xff]  }
  0x9b   : > { %1420 = vmatmul.mubr.bf16.gmra.mrb[40].mxu1 %v3576_v11  ;;  %1709 = vmatmul.mubr.bf16.gmra.mrb[40].mxu0 %v3577_v12  ;;  %v1951_v11 = vlaneseq }
  0x9c   : > { %1427 = vmatprep.mubr.bf16.mxu1 %v3578_v13  ;;  %1716 = vmatprep.mubr.bf16.mxu0 %v3580_v14  ;;  %v3672_v13 = vld [vmem:[%s3929_s29 + $0x340] ss:$16 sps:$4 sm:$0xff]   ;;  %v3673_v14 = vld [vmem:[%s3929_s29 + $0x348] ss:$16 sps:$4 sm:$0xff]  }
  0x9d   : > { %v4099_v12 = vshrl.u32 %v1951_v11, 7 }
  0xa3   : > { %1428 = vmatmul.mubr.bf16.gmra.mrb[44].mxu1 %v3582_v15  ;;  %1717 = vmatmul.mubr.bf16.gmra.mrb[44].mxu0 %v3583_v16  ;;  %v3674_v15 = vld [vmem:[%s3929_s29 + $0x364] ss:$16 sps:$4 sm:$0xff]   ;;  %v4107_v16 = vstv %s3241_s20 }
  0xa4   : > { %1435 = vmatprep.mubr.bf16.mxu1 %v3584_v17  ;;  %1724 = vmatprep.mubr.bf16.mxu0 %v3586_v18  ;;  %v3676_v17 = vld [vmem:[%s3929_s29 + $0x36c] ss:$16 sps:$4 sm:$0xff]   ;;  %v1953_v18 = vadd.s32 8, %v4099_v12 }
  0xab   : > { %1436 = vmatmul.mubr.bf16.gmra.mrb[48].mxu1 %v3588_v19  ;;  %1725 = vmatmul.mubr.bf16.gmra.mrb[48].mxu0 %v3589_v20  ;;  %v4114_v19 = vld [vmem:[%s4810_s2] ss:$0 sm:$0xff]  ;;  %v2017_v20 = vadd.s32 %v4107_v16, %v4099_v12 }
  0xac   : > { %1443 = vmatprep.mubr.bf16.mxu1 %v3590_v21  ;;  %1732 = vmatprep.mubr.bf16.mxu0 %v3592_v22  ;;  %v2018_v22 = vadd.s32 %v4107_v16, %v1953_v18 }
  0xad   : > { %vm2081_vm1 = vcmp.lt.s32.totalorder %v2017_v20, 1330  ;;  %v3690_v20 = vld [vmem:[%s3929_s29 + $0x3a0] ss:$16 sps:$4 sm:$0xff]  }
  0xae   : > { %vm2082_vm2 = vcmp.lt.s32.totalorder %v2018_v22, 1330 }
  0xb3   : > { %1444 = vmatmul.mubr.bf16.gmra.mrb[52].mxu1 %v3594_v23  ;;  %1733 = vmatmul.mubr.bf16.gmra.mrb[52].mxu0 %v3595_v24  ;;  %v3678_v23 = vld [vmem:[%s3929_s29 + $0x360] ss:$16 sps:$4 sm:$0xff]  }
  0xb4   : > { %1451 = vmatprep.mubr.bf16.mxu1 %v3596_v25  ;;  %1740 = vmatprep.mubr.bf16.mxu0 %v3598_v26 }
  0xbb   : > { %1452 = vmatmul.mubr.bf16.gmra.mrb[56].mxu1 %v3600_v27  ;;  %1741 = vmatmul.mubr.bf16.gmra.mrb[56].mxu0 %v3601_v28  ;;  %v3679_v27 = vld [vmem:[%s3929_s29 + $0x368] ss:$16 sps:$4 sm:$0xff]   ;;  %v1954_v28 = vadd.s32 16, %v4099_v12 }
  0xbc   : > { %1459 = vmatprep.mubr.bf16.mxu1 %v3602_v29  ;;  %1748 = vmatprep.mubr.bf16.mxu0 %v3604_v30 }
  0xc3   : > { %1460 = vmatmul.mubr.bf16.gmra.mrb[60].mxu1 %v3606_v31  ;;  %1749 = vmatmul.mubr.bf16.gmra.mrb[60].mxu0 %v3607_v32  ;;  %v3680_v31 = vld [vmem:[%s3929_s29 + $0x384] ss:$16 sps:$4 sm:$0xff]  }
  0xc4   : > { %1467 = vmatprep.mubr.bf16.mxu1 %v3608_v33  ;;  %1756 = vmatprep.mubr.bf16.mxu0 %v3610_v34 }
  0xcb   : > { %1468 = vmatmul.mubr.bf16.gmra.mrb[64].mxu1 %v3612_v35  ;;  %1757 = vmatmul.mubr.bf16.gmra.mrb[64].mxu0 %v3613_v36  ;;  %v3682_v36 = vld [vmem:[%s3929_s29 + $0x38c] ss:$16 sps:$4 sm:$0xff]  }
  0xcc   : > { %1475 = vmatprep.mubr.bf16.mxu1 %v3614_v37  ;;  %1764 = vmatprep.mubr.bf16.mxu0 %v3616_v38  ;;  %v1955_v38 = vadd.s32 24, %v4099_v12 }
  0xd3   : > { %1476 = vmatmul.mubr.bf16.gmra.mrb[68].mxu1 %v3618_v39  ;;  %1765 = vmatmul.mubr.bf16.gmra.mrb[68].mxu0 %v3619_v40 }
  0xd4   : > { %1483 = vmatprep.mubr.bf16.mxu1 %v3620_v41  ;;  %1772 = vmatprep.mubr.bf16.mxu0 %v3622_v42  ;;  %v2019_v41 = vadd.s32 %v4107_v16, %v1954_v28 }
  0xd6   : > { %vm2083_vm3 = vcmp.lt.s32.totalorder %v2019_v41, 1330 }
  0xdb   : > { %1484 = vmatmul.mubr.bf16.gmra.mrb[72].mxu1 %v3624_v43  ;;  %1773 = vmatmul.mubr.bf16.gmra.mrb[72].mxu0 %v3625_v44 }
  0xdc   : > { %1491 = vmatprep.mubr.bf16.mxu1 %v3626_v45  ;;  %1780 = vmatprep.mubr.bf16.mxu0 %v3628_v46 }
  0xe3   : > { %1492 = vmatmul.mubr.bf16.gmra.mrb[76].mxu1 %v3630_v47  ;;  %1781 = vmatmul.mubr.bf16.gmra.mrb[76].mxu0 %v3631_v48  ;;  %v2020_v48 = vadd.s32 %v4107_v16, %v1955_v38 }
  0xe4   : > { %1499 = vmatprep.mubr.bf16.mxu1 %v3632_v49  ;;  %1788 = vmatprep.mubr.bf16.mxu0 %v3634_v50  ;;  %v3684_v49 = vld [vmem:[%s3929_s29 + $0x380] ss:$16 sps:$4 sm:$0xff]  }
  0xe5   : > { %vm2084_vm4 = vcmp.lt.s32.totalorder %v2020_v48, 1330 }
  0xeb   : > { %1500 = vmatmul.mubr.bf16.gmra.mrb[80].mxu1 %v3636_v51  ;;  %1789 = vmatmul.mubr.bf16.gmra.mrb[80].mxu0 %v3637_v52 }
  0xec   : > { %1507 = vmatprep.mubr.bf16.mxu1 %v3638_v53  ;;  %1796 = vmatprep.mubr.bf16.mxu0 %v3640_v54  ;;  %v3685_v54 = vld [vmem:[%s3929_s29 + $0x388] ss:$16 sps:$4 sm:$0xff]  }
  0xf3   : > { %1508 = vmatmul.mubr.bf16.gmra.mrb[84].mxu1 %v3642_v55  ;;  %1797 = vmatmul.mubr.bf16.gmra.mrb[84].mxu0 %v3643_v56  ;;  %v1956_v55 = vadd.s32 32, %v4099_v12 }
  0xf4   : > { %1515 = vmatprep.mubr.bf16.mxu1 %v3644_v57  ;;  %1804 = vmatprep.mubr.bf16.mxu0 %v3646_v58 }
  0xfb   : > { %1516 = vmatmul.mubr.bf16.gmra.mrb[88].mxu1 %v3648_v59  ;;  %1805 = vmatmul.mubr.bf16.gmra.mrb[88].mxu0 %v3649_v60  ;;  %v3686_v60 = vld [vmem:[%s3929_s29 + $0x3a4] ss:$16 sps:$4 sm:$0xff]  }
  0xfc   : > { %1523 = vmatprep.mubr.bf16.mxu1 %v3650_v61  ;;  %1812 = vmatprep.mubr.bf16.mxu0 %v3652_v62 }
 0x103   : > { %1524 = vmatmul.mubr.bf16.gmra.mrb[92].mxu1 %v3654_v63  ;;  %1813 = vmatmul.mubr.bf16.gmra.mrb[92].mxu0 %v3655_v0 }
 0x104   : > { %1531 = vmatprep.mubr.bf16.mxu1 %v3656_v1  ;;  %1820 = vmatprep.mubr.bf16.mxu0 %v3658_v2  ;;  %v3688_v2 = vld [vmem:[%s3929_s29 + $0x3ac] ss:$16 sps:$4 sm:$0xff]  }
 0x10b   : > { %1532 = vmatmul.mubr.bf16.gmra.mrb[96].mxu1 %v3660_v3  ;;  %1821 = vmatmul.mubr.bf16.gmra.mrb[96].mxu0 %v3661_v4  ;;  %v1957_v4 = vadd.s32 40, %v4099_v12 }
 0x10c   : > { %1539 = vmatprep.mubr.bf16.mxu1 %v3662_v5  ;;  %1828 = vmatprep.mubr.bf16.mxu0 %v3664_v6 }
 0x10d   : > { %v2022_v18 = vadd.s32 %v4107_v16, %v1957_v4 }
 0x10f   : > { %vm2086_vm6 = vcmp.lt.s32.totalorder %v2022_v18, 1330 }
 0x113   : > { %1540 = vmatmul.mubr.bf16.gmra.mrb[100].mxu1 %v3666_v7  ;;  %1829 = vmatmul.mubr.bf16.gmra.mrb[100].mxu0 %v3667_v8 }
 0x114   : > { %1547 = vmatprep.mubr.bf16.mxu1 %v3668_v9  ;;  %1836 = vmatprep.mubr.bf16.mxu0 %v3670_v10  ;;  %v2021_v9 = vadd.s32 %v4107_v16, %v1956_v55 }
 0x116   : > { %vm2085_vm5 = vcmp.lt.s32.totalorder %v2021_v9, 1330 }
 0x11b   : > { %1548 = vmatmul.mubr.bf16.gmra.mrb[104].mxu1 %v3672_v13  ;;  %1837 = vmatmul.mubr.bf16.gmra.mrb[104].mxu0 %v3673_v14 }
 0x11c   : > { %1555 = vmatprep.mubr.bf16.mxu1 %v3674_v15  ;;  %1844 = vmatprep.mubr.bf16.mxu0 %v3676_v17 }
 0x11e   : > { %v1341_v21 = vpop.f32.mrb[0].mxu1  ;;  %v1630_v25 = vpop.f32.mrb[0].mxu0 }
 0x11f   : > { %v1342_v24 = vadd.f32 %v4114_v19, %v1341_v21  ;;  %v1343_v26 = vpop.f32.mrb[1].mxu1  ;;  %v1632_v29 = vpop.f32.mrb[1].mxu0 }
 0x120   : > { %v1344_v30 = vpop.f32.mrb[2].mxu1  ;;  %v1633_v34 = vpop.f32.mrb[2].mxu0  ;;  %v3691_v26 = vld [vmem:[%s3929_s29 + $0x3a8] ss:$16 sps:$4 sm:$0xff]  }
 0x121   : > { %v1631_v32 = vadd.f32 %v1630_v25, %v1342_v24  ;;  %v1345_v33 = vadd.f32 %v4114_v19, %v1344_v30  ;;  %v1346_v35 = vpop.f32.mrb[3].mxu1  ;;  %v1635_v37 = vpop.f32.mrb[3].mxu0 }
 0x122   : > { %v3694_v37 = vld [vmem:[%s3929_s29 + $0x3cc] ss:$16 sps:$4 sm:$0xff]  }
 0x123   : > { %1886 = vst.msk [vmem:[%s4127_s18] sm:$0xff] %vm1885_vm0, %v1631_v32  ;;  %v2145_v39 = vsel %vm2081_vm1, %v1631_v32, 0.0  ;;  %v1634_v40 = vadd.f32 %v1633_v34, %v1345_v33  ;;  %1556 = vmatmul.mubr.bf16.gmra.mrb[108].mxu1 %v3678_v23  ;;  %1845 = vmatmul.mubr.bf16.gmra.mrb[108].mxu0 %v3679_v27  ;;  %v1958_v27 = vadd.s32 48, %v4099_v12 }
 0x124   : > { %v2342_v42 = vmul.f32 %v2145_v39, %v2145_v39  ;;  %1563 = vmatprep.mubr.bf16.mxu1 %v3680_v31  ;;  %1852 = vmatprep.mubr.bf16.mxu0 %v3682_v36  ;;  %v2209_v44 = vsel %vm1885_vm0, %v2145_v39, 0.0  ;;  %v3692_v31 = vld [vmem:[%s3929_s29 + $0x3c4] ss:$16 sps:$4 sm:$0xff]   ;;  %v1959_v39 = vadd.s32 56, %v4099_v12 }
 0x125   : > { %1887 = vst.msk [vmem:[%s4127_s18 + $0x8] sm:$0xff] %vm1885_vm0, %v1634_v40  ;;  %v2146_v43 = vsel %vm2082_vm2, %v1634_v40, 0.0 }
 0x126   : > { %v2210_v45 = vsel %vm1885_vm0, %v2146_v43, 0.0  ;;  %v2343_v46 = vmul.f32 %v2146_v43, %v2146_v43  ;;  %v1349_v47 = vpop.f32.mrb[4].mxu1  ;;  %v1638_v52 = vpop.f32.mrb[4].mxu0  ;;  %v2406_v56 = vsel %vm1885_vm0, %v2342_v42, 0.0  ;;  %v2023_v42 = vadd.s32 %v4107_v16, %v1958_v27 }
 0x127   : > { %v2211_v50 = vadd.f32 %v2210_v45, %v2209_v44  ;;  %v1350_v51 = vadd.f32 %v4114_v19, %v1349_v47  ;;  %v1351_v53 = vpop.f32.mrb[5].mxu1  ;;  %v1640_v58 = vpop.f32.mrb[5].mxu0 }
 0x128   : > { %v2407_v57 = vsel %vm1885_vm0, %v2343_v46, 0.0  ;;  %v1352_v59 = vpop.f32.mrb[6].mxu1  ;;  %v1641_v0 = vpop.f32.mrb[6].mxu0  ;;  %vm2087_vm7 = vcmp.lt.s32.totalorder %v2023_v42, 1330  ;;  %v3697_v58 = vld [vmem:[%s3929_s29 + $0x3c8] ss:$16 sps:$4 sm:$0xff]  }
 0x129   : > { %v2408_v61 = vadd.f32 %v2407_v57, %v2406_v56  ;;  %v1639_v62 = vadd.f32 %v1638_v52, %v1350_v51  ;;  %v1353_v63 = vadd.f32 %v4114_v19, %v1352_v59  ;;  %v1354_v1 = vpop.f32.mrb[7].mxu1  ;;  %v1643_v3 = vpop.f32.mrb[7].mxu0  ;;  %v2024_v51 = vadd.s32 %v4107_v16, %v1959_v39  ;;  %v3696_v52 = vld [vmem:[%s3929_s29 + $0x3c0] ss:$16 sps:$4 sm:$0xff]  }
 0x12b   : > { %1888 = vst.msk [vmem:[%s4127_s18 + $0x10] sm:$0xff] %vm1885_vm0, %v1639_v62  ;;  %v2147_v5 = vsel %vm2083_vm3, %v1639_v62, 0.0  ;;  %v1642_v6 = vadd.f32 %v1641_v0, %v1353_v63  ;;  %1564 = vmatmul.mubr.bf16.gmra.mrb[112].mxu1 %v3684_v49  ;;  %1853 = vmatmul.mubr.bf16.gmra.mrb[112].mxu0 %v3685_v54  ;;  %v1960_v62 = vadd.s32 64, %v4099_v12  ;;  %v3698_v63 = vld [vmem:[%s3929_s29 + $0x3e4] ss:$16 sps:$4 sm:$0xff]   ;;  %vm2088_vm8 = vcmp.lt.s32.totalorder %v2024_v51, 1330 }
 0x12c   : > { %v2212_v7 = vsel %vm1885_vm0, %v2147_v5, 0.0  ;;  %v2344_v8 = vmul.f32 %v2147_v5, %v2147_v5  ;;  %1571 = vmatprep.mubr.bf16.mxu1 %v3686_v60  ;;  %1860 = vmatprep.mubr.bf16.mxu0 %v3688_v2  ;;  %v3700_v5 = vld [vmem:[%s3929_s29 + $0x3ec] ss:$16 sps:$4 sm:$0xff]  }
 0x12d   : > { %v2213_v10 = vadd.f32 %v2212_v7, %v2211_v50  ;;  %1889 = vst.msk [vmem:[%s4127_s18 + $0x18] sm:$0xff] %vm1885_vm0, %v1642_v6  ;;  %v2148_v11 = vsel %vm2084_vm4, %v1642_v6, 0.0  ;;  %v1961_v7 = vadd.s32 72, %v4099_v12 }
 0x12e   : > { %v2409_v13 = vsel %vm1885_vm0, %v2344_v8, 0.0  ;;  %v2214_v14 = vsel %vm1885_vm0, %v2148_v11, 0.0  ;;  %v2345_v15 = vmul.f32 %v2148_v11, %v2148_v11  ;;  %v1357_v17 = vpop.f32.mrb[8].mxu1  ;;  %v1646_v24 = vpop.f32.mrb[8].mxu0 }
 0x12f   : > { %v2410_v21 = vadd.f32 %v2409_v13, %v2408_v61  ;;  %v2215_v22 = vadd.f32 %v2214_v14, %v2213_v10  ;;  %v1358_v23 = vadd.f32 %v4114_v19, %v1357_v17  ;;  %v1359_v25 = vpop.f32.mrb[9].mxu1  ;;  %v1648_v29 = vpop.f32.mrb[9].mxu0  ;;  %v2025_v13 = vadd.s32 %v4107_v16, %v1960_v62 }
 0x130   : > { %v2411_v28 = vsel %vm1885_vm0, %v2345_v15, 0.0  ;;  %v1360_v30 = vpop.f32.mrb[10].mxu1  ;;  %v1649_v35 = vpop.f32.mrb[10].mxu0  ;;  %v3703_v29 = vld [vmem:[%s3929_s29 + $0x3e8] ss:$16 sps:$4 sm:$0xff]  }
 0x131   : > { %v2412_v32 = vadd.f32 %v2411_v28, %v2410_v21  ;;  %v1647_v33 = vadd.f32 %v1646_v24, %v1358_v23  ;;  %v1361_v34 = vadd.f32 %v4114_v19, %v1360_v30  ;;  %v1362_v36 = vpop.f32.mrb[11].mxu1  ;;  %v1651_v38 = vpop.f32.mrb[11].mxu0  ;;  %v3702_v28 = vld [vmem:[%s3929_s29 + $0x3e0] ss:$16 sps:$4 sm:$0xff]   ;;  %vm2089_vm9 = vcmp.lt.s32.totalorder %v2025_v13, 1330 }
 0x133   : > { %1890 = vst.msk [vmem:[%s4127_s18 + $0x20] sm:$0xff] %vm1885_vm0, %v1647_v33  ;;  %v2149_v40 = vsel %vm2085_vm5, %v1647_v33, 0.0  ;;  %v1650_v41 = vadd.f32 %v1649_v35, %v1361_v34  ;;  %1572 = vmatmul.mubr.bf16.gmra.mrb[116].mxu1 %v3690_v20  ;;  %1861 = vmatmul.mubr.bf16.gmra.mrb[116].mxu0 %v3691_v26  ;;  %v1962_v33 = vadd.s32 80, %v4099_v12 }
 0x134   : > { %v2216_v43 = vsel %vm1885_vm0, %v2149_v40, 0.0  ;;  %v2346_v44 = vmul.f32 %v2149_v40, %v2149_v40  ;;  %1579 = vmatprep.mubr.bf16.mxu1 %v3692_v31  ;;  %1868 = vmatprep.mubr.bf16.mxu0 %v3694_v37  ;;  %v1963_v40 = vadd.s32 88, %v4099_v12 }
 0x135   : > { %v2217_v45 = vadd.f32 %v2216_v43, %v2215_v22  ;;  %1891 = vst.msk [vmem:[%s4127_s18 + $0x28] sm:$0xff] %vm1885_vm0, %v1650_v41  ;;  %v2150_v46 = vsel %vm2086_vm6, %v1650_v41, 0.0  ;;  %v2026_v22 = vadd.s32 %v4107_v16, %v1961_v7 }
 0x136   : > { %v2413_v47 = vsel %vm1885_vm0, %v2346_v44, 0.0  ;;  %v2218_v48 = vsel %vm1885_vm0, %v2150_v46, 0.0  ;;  %v2347_v49 = vmul.f32 %v2150_v46, %v2150_v46  ;;  %v1365_v50 = vpop.f32.mrb[12].mxu1  ;;  %v1654_v56 = vpop.f32.mrb[12].mxu0 }
 0x137   : > { %v2414_v53 = vadd.f32 %v2413_v47, %v2412_v32  ;;  %v2219_v54 = vadd.f32 %v2218_v48, %v2217_v45  ;;  %v1366_v55 = vadd.f32 %v4114_v19, %v1365_v50  ;;  %v1367_v57 = vpop.f32.mrb[13].mxu1  ;;  %v1656_v60 = vpop.f32.mrb[13].mxu0  ;;  %vm2090_vm10 = vcmp.lt.s32.totalorder %v2026_v22, 1330 }
 0x138   : > { %v2415_v59 = vsel %vm1885_vm0, %v2347_v49, 0.0  ;;  %v1368_v61 = vpop.f32.mrb[14].mxu1  ;;  %v1657_v3 = vpop.f32.mrb[14].mxu0  ;;  %v2027_v45 = vadd.s32 %v4107_v16, %v1962_v33 }
 0x139   : > { %v2416_v0 = vadd.f32 %v2415_v59, %v2414_v53  ;;  %v1655_v1 = vadd.f32 %v1654_v56, %v1366_v55  ;;  %v1369_v2 = vadd.f32 %v4114_v19, %v1368_v61  ;;  %v1370_v4 = vpop.f32.mrb[15].mxu1  ;;  %v1659_v6 = vpop.f32.mrb[15].mxu0  ;;  %v1964_v61 = vadd.s32 96, %v4099_v12 }
 0x13a   : > { %vm2091_vm11 = vcmp.lt.s32.totalorder %v2027_v45, 1330  ;;  %v1965_v4 = vadd.s32 104, %v4099_v12 }
 0x13b   : > { %1892 = vst.msk [vmem:[%s4127_s18 + $0x30] sm:$0xff] %vm1885_vm0, %v1655_v1  ;;  %v2151_v8 = vsel %vm2087_vm7, %v1655_v1, 0.0  ;;  %v1658_v9 = vadd.f32 %v1657_v3, %v1369_v2  ;;  %1580 = vmatmul.mubr.bf16.gmra.mrb[120].mxu1 %v3696_v52  ;;  %1869 = vmatmul.mubr.bf16.gmra.mrb[120].mxu0 %v3697_v58  ;;  %v2028_v52 = vadd.s32 %v4107_v16, %v1963_v40 }
 0x13c   : > { %v2220_v10 = vsel %vm1885_vm0, %v2151_v8, 0.0  ;;  %v2348_v11 = vmul.f32 %v2151_v8, %v2151_v8  ;;  %1587 = vmatprep.mubr.bf16.mxu1 %v3698_v63  ;;  %1876 = vmatprep.mubr.bf16.mxu0 %v3700_v5 }
 0x13d   : > { %v2221_v14 = vadd.f32 %v2220_v10, %v2219_v54  ;;  %1893 = vst.msk [vmem:[%s4127_s18 + $0x38] sm:$0xff] %vm1885_vm0, %v1658_v9  ;;  %v2152_v15 = vsel %vm2088_vm8, %v1658_v9, 0.0  ;;  %vm2092_vm12 = vcmp.lt.s32.totalorder %v2028_v52, 1330  ;;  %v2029_v9 = vadd.s32 %v4107_v16, %v1964_v61 }
 0x13e   : > { %v2417_v17 = vsel %vm1885_vm0, %v2348_v11, 0.0  ;;  %v2222_v18 = vsel %vm1885_vm0, %v2152_v15, 0.0  ;;  %v2349_v20 = vmul.f32 %v2152_v15, %v2152_v15  ;;  %v1373_v21 = vpop.f32.mrb[16].mxu1  ;;  %v1662_v26 = vpop.f32.mrb[16].mxu0 }
 0x13f   : > { %v2418_v23 = vadd.f32 %v2417_v17, %v2416_v0  ;;  %v2223_v24 = vadd.f32 %v2222_v18, %v2221_v14  ;;  %v1374_v25 = vadd.f32 %v4114_v19, %v1373_v21  ;;  %v1375_v27 = vpop.f32.mrb[17].mxu1  ;;  %v1664_v31 = vpop.f32.mrb[17].mxu0  ;;  %v2030_v18 = vadd.s32 %v4107_v16, %v1965_v4 }
 0x140   : > { %v2419_v30 = vsel %vm1885_vm0, %v2349_v20, 0.0  ;;  %v1376_v32 = vpop.f32.mrb[18].mxu1  ;;  %v1665_v37 = vpop.f32.mrb[18].mxu0  ;;  %vm2093_vm13 = vcmp.lt.s32.totalorder %v2029_v9, 1330 }
 0x141   : > { %v2420_v34 = vadd.f32 %v2419_v30, %v2418_v23  ;;  %v1663_v35 = vadd.f32 %v1662_v26, %v1374_v25  ;;  %v1377_v36 = vadd.f32 %v4114_v19, %v1376_v32  ;;  %v1378_v38 = vpop.f32.mrb[19].mxu1  ;;  %v1667_v39 = vpop.f32.mrb[19].mxu0  ;;  %vm2094_vm14 = vcmp.lt.s32.totalorder %v2030_v18, 1330 }
 0x143   : > { %1894 = vst.msk [vmem:[%s4127_s18 + $0x40] sm:$0xff] %vm1885_vm0, %v1663_v35  ;;  %v2153_v41 = vsel %vm2089_vm9, %v1663_v35, 0.0  ;;  %v1666_v42 = vadd.f32 %v1665_v37, %v1377_v36  ;;  %1588 = vmatmul.mubr.bf16.gmra.mrb[124].mxu1 %v3702_v28  ;;  %1877 = vmatmul.mubr.bf16.gmra.mrb[124].mxu0 %v3703_v29  ;;  %v1966_v28 = vadd.s32 112, %v4099_v12  ;;  %v1967_v35 = vadd.s32 120, %v4099_v12 }
 0x144   : > { %v2224_v43 = vsel %vm1885_vm0, %v2153_v41, 0.0  ;;  %v2350_v44 = vmul.f32 %v2153_v41, %v2153_v41 }
 0x145   : > { %v2225_v46 = vadd.f32 %v2224_v43, %v2223_v24  ;;  %1895 = vst.msk [vmem:[%s4127_s18 + $0x48] sm:$0xff] %vm1885_vm0, %v1666_v42  ;;  %v2154_v47 = vsel %vm2090_vm10, %v1666_v42, 0.0  ;;  %v2031_v40 = vadd.s32 %v4107_v16, %v1966_v28 }
 0x146   : > { %v2421_v48 = vsel %vm1885_vm0, %v2350_v44, 0.0  ;;  %v2226_v49 = vsel %vm1885_vm0, %v2154_v47, 0.0  ;;  %v2351_v50 = vmul.f32 %v2154_v47, %v2154_v47  ;;  %v1381_v51 = vpop.f32.mrb[20].mxu1  ;;  %v1670_v56 = vpop.f32.mrb[20].mxu0  ;;  %v2032_v47 = vadd.s32 %v4107_v16, %v1967_v35 }
 0x147   : > { %v2422_v53 = vadd.f32 %v2421_v48, %v2420_v34  ;;  %v2227_v54 = vadd.f32 %v2226_v49, %v2225_v46  ;;  %v1382_v55 = vadd.f32 %v4114_v19, %v1381_v51  ;;  %v1383_v57 = vpop.f32.mrb[21].mxu1  ;;  %v1672_v59 = vpop.f32.mrb[21].mxu0  ;;  %vm2095_vm15 = vcmp.lt.s32.totalorder %v2031_v40, 1330 }
 0x148   : > { %v2423_v58 = vsel %vm1885_vm0, %v2351_v50, 0.0  ;;  %v1384_v60 = vpop.f32.mrb[22].mxu1  ;;  %v1673_v1 = vpop.f32.mrb[22].mxu0  ;;  %vm2096_vm1 = vcmp.lt.s32.totalorder %v2032_v47, 1330 }
 0x149   : > { %v2424_v62 = vadd.f32 %v2423_v58, %v2422_v53  ;;  %v1671_v63 = vadd.f32 %v1670_v56, %v1382_v55  ;;  %v1385_v0 = vadd.f32 %v4114_v19, %v1384_v60  ;;  %v1386_v2 = vpop.f32.mrb[23].mxu1  ;;  %v1675_v3 = vpop.f32.mrb[23].mxu0  ;;  %v1968_v56 = vadd.s32 128, %v4099_v12 }
 0x14b   : > { %1896 = vst.msk [vmem:[%s4127_s18 + $0x50] sm:$0xff] %vm1885_vm0, %v1671_v63  ;;  %v2155_v5 = vsel %vm2091_vm11, %v1671_v63, 0.0  ;;  %v1674_v6 = vadd.f32 %v1673_v1, %v1385_v0  ;;  %v1969_v63 = vadd.s32 136, %v4099_v12  ;;  %v2033_v4 = vadd.s32 %v4107_v16, %v1968_v56 }
 0x14c   : > { %v2228_v7 = vsel %vm1885_vm0, %v2155_v5, 0.0  ;;  %v2352_v8 = vmul.f32 %v2155_v5, %v2155_v5 }
 0x14d   : > { %v2229_v10 = vadd.f32 %v2228_v7, %v2227_v54  ;;  %1897 = vst.msk [vmem:[%s4127_s18 + $0x58] sm:$0xff] %vm1885_vm0, %v1674_v6  ;;  %v2156_v11 = vsel %vm2092_vm12, %v1674_v6, 0.0  ;;  %vm2097_vm2 = vcmp.lt.s32.totalorder %v2033_v4, 1330 }
 0x14e   : > { %v2425_v13 = vsel %vm1885_vm0, %v2352_v8, 0.0  ;;  %v2230_v14 = vsel %vm1885_vm0, %v2156_v11, 0.0  ;;  %v2353_v15 = vmul.f32 %v2156_v11, %v2156_v11  ;;  %v1389_v17 = vpop.f32.mrb[24].mxu1  ;;  %v1678_v23 = vpop.f32.mrb[24].mxu0  ;;  %v2034_v11 = vadd.s32 %v4107_v16, %v1969_v63 }
 0x14f   : > { %v2426_v20 = vadd.f32 %v2425_v13, %v2424_v62  ;;  %v2231_v21 = vadd.f32 %v2230_v14, %v2229_v10  ;;  %v1390_v22 = vadd.f32 %v4114_v19, %v1389_v17  ;;  %v1391_v24 = vpop.f32.mrb[25].mxu1  ;;  %v1680_v26 = vpop.f32.mrb[25].mxu0 }
 0x150   : > { %v2427_v25 = vsel %vm1885_vm0, %v2353_v15, 0.0  ;;  %v1392_v27 = vpop.f32.mrb[26].mxu1  ;;  %v1681_v32 = vpop.f32.mrb[26].mxu0  ;;  %vm2098_vm3 = vcmp.lt.s32.totalorder %v2034_v11, 1330 }
 0x151   : > { %v2428_v29 = vadd.f32 %v2427_v25, %v2426_v20  ;;  %v1679_v30 = vadd.f32 %v1678_v23, %v1390_v22  ;;  %v1393_v31 = vadd.f32 %v4114_v19, %v1392_v27  ;;  %v1394_v33 = vpop.f32.mrb[27].mxu1  ;;  %v1683_v34 = vpop.f32.mrb[27].mxu0  ;;  %v1970_v23 = vadd.s32 144, %v4099_v12 }
 0x153   : > { %1898 = vst.msk [vmem:[%s4127_s18 + $0x60] sm:$0xff] %vm1885_vm0, %v1679_v30  ;;  %v2157_v36 = vsel %vm2093_vm13, %v1679_v30, 0.0  ;;  %v1682_v37 = vadd.f32 %v1681_v32, %v1393_v31  ;;  %v1971_v30 = vadd.s32 152, %v4099_v12  ;;  %v2035_v35 = vadd.s32 %v4107_v16, %v1970_v23 }
 0x154   : > { %v2232_v38 = vsel %vm1885_vm0, %v2157_v36, 0.0  ;;  %v2354_v39 = vmul.f32 %v2157_v36, %v2157_v36 }
 0x155   : > { %v2233_v41 = vadd.f32 %v2232_v38, %v2231_v21  ;;  %1899 = vst.msk [vmem:[%s4127_s18 + $0x68] sm:$0xff] %vm1885_vm0, %v1682_v37  ;;  %v2158_v42 = vsel %vm2094_vm14, %v1682_v37, 0.0  ;;  %vm2099_vm4 = vcmp.lt.s32.totalorder %v2035_v35, 1330 }
 0x156   : > { %v2429_v43 = vsel %vm1885_vm0, %v2354_v39, 0.0  ;;  %v2234_v44 = vsel %vm1885_vm0, %v2158_v42, 0.0  ;;  %v2355_v45 = vmul.f32 %v2158_v42, %v2158_v42  ;;  %v1397_v46 = vpop.f32.mrb[28].mxu1  ;;  %v1686_v51 = vpop.f32.mrb[28].mxu0  ;;  %v2036_v42 = vadd.s32 %v4107_v16, %v1971_v30 }
 0x157   : > { %v2430_v48 = vadd.f32 %v2429_v43, %v2428_v29  ;;  %v2235_v49 = vadd.f32 %v2234_v44, %v2233_v41  ;;  %v1398_v50 = vadd.f32 %v4114_v19, %v1397_v46  ;;  %v1399_v52 = vpop.f32.mrb[29].mxu1  ;;  %v1688_v54 = vpop.f32.mrb[29].mxu0 }
 0x158   : > { %v2431_v53 = vsel %vm1885_vm0, %v2355_v45, 0.0  ;;  %v1400_v55 = vpop.f32.mrb[30].mxu1  ;;  %v1689_v60 = vpop.f32.mrb[30].mxu0  ;;  %vm2100_vm5 = vcmp.lt.s32.totalorder %v2036_v42, 1330 }
 0x159   : > { %v2432_v57 = vadd.f32 %v2431_v53, %v2430_v48  ;;  %v1687_v58 = vadd.f32 %v1686_v51, %v1398_v50  ;;  %v1401_v59 = vadd.f32 %v4114_v19, %v1400_v55  ;;  %v1402_v61 = vpop.f32.mrb[31].mxu1  ;;  %v1691_v62 = vpop.f32.mrb[31].mxu0  ;;  %v1972_v51 = vadd.s32 160, %v4099_v12 }
 0x15b   : > { %1900 = vst.msk [vmem:[%s4127_s18 + $0x70] sm:$0xff] %vm1885_vm0, %v1687_v58  ;;  %v2159_v0 = vsel %vm2095_vm15, %v1687_v58, 0.0  ;;  %v1690_v1 = vadd.f32 %v1689_v60, %v1401_v59  ;;  %v1973_v58 = vadd.s32 168, %v4099_v12  ;;  %v2037_v63 = vadd.s32 %v4107_v16, %v1972_v51 }
 0x15c   : > { %v2236_v2 = vsel %vm1885_vm0, %v2159_v0, 0.0  ;;  %v2356_v3 = vmul.f32 %v2159_v0, %v2159_v0 }
 0x15d   : > { %v2237_v5 = vadd.f32 %v2236_v2, %v2235_v49  ;;  %1901 = vst.msk [vmem:[%s4127_s18 + $0x78] sm:$0xff] %vm1885_vm0, %v1690_v1  ;;  %v2160_v6 = vsel %vm2096_vm1, %v1690_v1, 0.0  ;;  %vm2101_vm6 = vcmp.lt.s32.totalorder %v2037_v63, 1330 }
 0x15e   : > { %v2433_v7 = vsel %vm1885_vm0, %v2356_v3, 0.0  ;;  %v2238_v8 = vsel %vm1885_vm0, %v2160_v6, 0.0  ;;  %v2357_v9 = vmul.f32 %v2160_v6, %v2160_v6  ;;  %v1405_v10 = vpop.f32.mrb[32].mxu1  ;;  %v1694_v17 = vpop.f32.mrb[32].mxu0  ;;  %v2038_v6 = vadd.s32 %v4107_v16, %v1973_v58 }
 0x15f   : > { %v2434_v13 = vadd.f32 %v2433_v7, %v2432_v57  ;;  %v2239_v14 = vadd.f32 %v2238_v8, %v2237_v5  ;;  %v1406_v15 = vadd.f32 %v4114_v19, %v1405_v10  ;;  %v1407_v18 = vpop.f32.mrb[33].mxu1  ;;  %v1696_v21 = vpop.f32.mrb[33].mxu0 }
 0x160   : > { %v2435_v20 = vsel %vm1885_vm0, %v2357_v9, 0.0  ;;  %v1408_v22 = vpop.f32.mrb[34].mxu1  ;;  %v1697_v27 = vpop.f32.mrb[34].mxu0  ;;  %vm2102_vm7 = vcmp.lt.s32.totalorder %v2038_v6, 1330 }
 0x161   : > { %v2436_v24 = vadd.f32 %v2435_v20, %v2434_v13  ;;  %v1695_v25 = vadd.f32 %v1694_v17, %v1406_v15  ;;  %v1409_v26 = vadd.f32 %v4114_v19, %v1408_v22  ;;  %v1410_v28 = vpop.f32.mrb[35].mxu1  ;;  %v1699_v29 = vpop.f32.mrb[35].mxu0  ;;  %v1974_v17 = vadd.s32 176, %v4099_v12 }
 0x163   : > { %1902 = vst.msk [vmem:[%s4127_s18 + $0x80] sm:$0xff] %vm1885_vm0, %v1695_v25  ;;  %v2161_v31 = vsel %vm2097_vm2, %v1695_v25, 0.0  ;;  %v1698_v32 = vadd.f32 %v1697_v27, %v1409_v26  ;;  %v1975_v25 = vadd.s32 184, %v4099_v12  ;;  %v2039_v30 = vadd.s32 %v4107_v16, %v1974_v17 }
 0x164   : > { %v2240_v33 = vsel %vm1885_vm0, %v2161_v31, 0.0  ;;  %v2358_v34 = vmul.f32 %v2161_v31, %v2161_v31 }
 0x165   : > { %v2241_v36 = vadd.f32 %v2240_v33, %v2239_v14  ;;  %1903 = vst.msk [vmem:[%s4127_s18 + $0x88] sm:$0xff] %vm1885_vm0, %v1698_v32  ;;  %v2162_v37 = vsel %vm2098_vm3, %v1698_v32, 0.0  ;;  %vm2103_vm8 = vcmp.lt.s32.totalorder %v2039_v30, 1330 }
 0x166   : > { %v2437_v38 = vsel %vm1885_vm0, %v2358_v34, 0.0  ;;  %v2242_v39 = vsel %vm1885_vm0, %v2162_v37, 0.0  ;;  %v2359_v40 = vmul.f32 %v2162_v37, %v2162_v37  ;;  %v1413_v41 = vpop.f32.mrb[36].mxu1  ;;  %v1702_v46 = vpop.f32.mrb[36].mxu0  ;;  %v2040_v37 = vadd.s32 %v4107_v16, %v1975_v25 }
 0x167   : > { %v2438_v43 = vadd.f32 %v2437_v38, %v2436_v24  ;;  %v2243_v44 = vadd.f32 %v2242_v39, %v2241_v36  ;;  %v1414_v45 = vadd.f32 %v4114_v19, %v1413_v41  ;;  %v1415_v47 = vpop.f32.mrb[37].mxu1  ;;  %v1704_v49 = vpop.f32.mrb[37].mxu0 }
 0x168   : > { %v2439_v48 = vsel %vm1885_vm0, %v2359_v40, 0.0  ;;  %v1416_v50 = vpop.f32.mrb[38].mxu1  ;;  %v1705_v55 = vpop.f32.mrb[38].mxu0  ;;  %vm2104_vm9 = vcmp.lt.s32.totalorder %v2040_v37, 1330 }
 0x169   : > { %v2440_v52 = vadd.f32 %v2439_v48, %v2438_v43  ;;  %v1703_v53 = vadd.f32 %v1702_v46, %v1414_v45  ;;  %v1417_v54 = vadd.f32 %v4114_v19, %v1416_v50  ;;  %v1418_v56 = vpop.f32.mrb[39].mxu1  ;;  %v1707_v57 = vpop.f32.mrb[39].mxu0  ;;  %v1976_v46 = vadd.s32 192, %v4099_v12 }
 0x16b   : > { %1904 = vst.msk [vmem:[%s4127_s18 + $0x90] sm:$0xff] %vm1885_vm0, %v1703_v53  ;;  %v2163_v59 = vsel %vm2099_vm4, %v1703_v53, 0.0  ;;  %v1706_v60 = vadd.f32 %v1705_v55, %v1417_v54  ;;  %v1977_v53 = vadd.s32 200, %v4099_v12  ;;  %v2041_v58 = vadd.s32 %v4107_v16, %v1976_v46 }
 0x16c   : > { %v2244_v61 = vsel %vm1885_vm0, %v2163_v59, 0.0  ;;  %v2360_v62 = vmul.f32 %v2163_v59, %v2163_v59 }
 0x16d   : > { %v2245_v0 = vadd.f32 %v2244_v61, %v2243_v44  ;;  %1905 = vst.msk [vmem:[%s4127_s18 + $0x98] sm:$0xff] %vm1885_vm0, %v1706_v60  ;;  %v2164_v1 = vsel %vm2100_vm5, %v1706_v60, 0.0  ;;  %vm2105_vm10 = vcmp.lt.s32.totalorder %v2041_v58, 1330 }
 0x16e   : > { %v2441_v2 = vsel %vm1885_vm0, %v2360_v62, 0.0  ;;  %v2246_v3 = vsel %vm1885_vm0, %v2164_v1, 0.0  ;;  %v2361_v4 = vmul.f32 %v2164_v1, %v2164_v1  ;;  %v1421_v5 = vpop.f32.mrb[40].mxu1  ;;  %v1710_v10 = vpop.f32.mrb[40].mxu0  ;;  %v2042_v1 = vadd.s32 %v4107_v16, %v1977_v53 }
 0x16f   : > { %v2442_v7 = vadd.f32 %v2441_v2, %v2440_v52  ;;  %v2247_v8 = vadd.f32 %v2246_v3, %v2245_v0  ;;  %v1422_v9 = vadd.f32 %v4114_v19, %v1421_v5  ;;  %v1423_v11 = vpop.f32.mrb[41].mxu1  ;;  %v1712_v14 = vpop.f32.mrb[41].mxu0 }
 0x170   : > { %v2443_v13 = vsel %vm1885_vm0, %v2361_v4, 0.0  ;;  %v1424_v15 = vpop.f32.mrb[42].mxu1  ;;  %v1713_v22 = vpop.f32.mrb[42].mxu0  ;;  %vm2106_vm11 = vcmp.lt.s32.totalorder %v2042_v1, 1330 }
 0x171   : > { %v2444_v18 = vadd.f32 %v2443_v13, %v2442_v7  ;;  %v1711_v20 = vadd.f32 %v1710_v10, %v1422_v9  ;;  %v1425_v21 = vadd.f32 %v4114_v19, %v1424_v15  ;;  %v1426_v23 = vpop.f32.mrb[43].mxu1  ;;  %v1715_v24 = vpop.f32.mrb[43].mxu0  ;;  %v1978_v10 = vadd.s32 208, %v4099_v12 }
 0x173   : > { %1906 = vst.msk [vmem:[%s4127_s18 + $0xa0] sm:$0xff] %vm1885_vm0, %v1711_v20  ;;  %v2165_v26 = vsel %vm2101_vm6, %v1711_v20, 0.0  ;;  %v1714_v27 = vadd.f32 %v1713_v22, %v1425_v21  ;;  %v1979_v20 = vadd.s32 216, %v4099_v12  ;;  %v2043_v25 = vadd.s32 %v4107_v16, %v1978_v10 }
 0x174   : > { %v2248_v28 = vsel %vm1885_vm0, %v2165_v26, 0.0  ;;  %v2362_v29 = vmul.f32 %v2165_v26, %v2165_v26 }
 0x175   : > { %v2249_v31 = vadd.f32 %v2248_v28, %v2247_v8  ;;  %1907 = vst.msk [vmem:[%s4127_s18 + $0xa8] sm:$0xff] %vm1885_vm0, %v1714_v27  ;;  %v2166_v32 = vsel %vm2102_vm7, %v1714_v27, 0.0  ;;  %vm2107_vm12 = vcmp.lt.s32.totalorder %v2043_v25, 1330 }
 0x176   : > { %v2445_v33 = vsel %vm1885_vm0, %v2362_v29, 0.0  ;;  %v2250_v34 = vsel %vm1885_vm0, %v2166_v32, 0.0  ;;  %v2363_v35 = vmul.f32 %v2166_v32, %v2166_v32  ;;  %v1429_v36 = vpop.f32.mrb[44].mxu1  ;;  %v1718_v41 = vpop.f32.mrb[44].mxu0  ;;  %v2044_v32 = vadd.s32 %v4107_v16, %v1979_v20 }
 0x177   : > { %v2446_v38 = vadd.f32 %v2445_v33, %v2444_v18  ;;  %v2251_v39 = vadd.f32 %v2250_v34, %v2249_v31  ;;  %v1430_v40 = vadd.f32 %v4114_v19, %v1429_v36  ;;  %v1431_v42 = vpop.f32.mrb[45].mxu1  ;;  %v1720_v44 = vpop.f32.mrb[45].mxu0 }
 0x178   : > { %v2447_v43 = vsel %vm1885_vm0, %v2363_v35, 0.0  ;;  %v1432_v45 = vpop.f32.mrb[46].mxu1  ;;  %v1721_v50 = vpop.f32.mrb[46].mxu0  ;;  %vm2108_vm13 = vcmp.lt.s32.totalorder %v2044_v32, 1330 }
 0x179   : > { %v2448_v47 = vadd.f32 %v2447_v43, %v2446_v38  ;;  %v1719_v48 = vadd.f32 %v1718_v41, %v1430_v40  ;;  %v1433_v49 = vadd.f32 %v4114_v19, %v1432_v45  ;;  %v1434_v51 = vpop.f32.mrb[47].mxu1  ;;  %v1723_v52 = vpop.f32.mrb[47].mxu0  ;;  %v1980_v41 = vadd.s32 224, %v4099_v12 }
 0x17b   : > { %1908 = vst.msk [vmem:[%s4127_s18 + $0xb0] sm:$0xff] %vm1885_vm0, %v1719_v48  ;;  %v2167_v54 = vsel %vm2103_vm8, %v1719_v48, 0.0  ;;  %v1722_v55 = vadd.f32 %v1721_v50, %v1433_v49  ;;  %v1981_v48 = vadd.s32 232, %v4099_v12  ;;  %v2045_v53 = vadd.s32 %v4107_v16, %v1980_v41 }
 0x17c   : > { %v2252_v56 = vsel %vm1885_vm0, %v2167_v54, 0.0  ;;  %v2364_v57 = vmul.f32 %v2167_v54, %v2167_v54 }
 0x17d   : > { %v2253_v59 = vadd.f32 %v2252_v56, %v2251_v39  ;;  %1909 = vst.msk [vmem:[%s4127_s18 + $0xb8] sm:$0xff] %vm1885_vm0, %v1722_v55  ;;  %v2168_v60 = vsel %vm2104_vm9, %v1722_v55, 0.0  ;;  %vm2109_vm14 = vcmp.lt.s32.totalorder %v2045_v53, 1330 }
 0x17e   : > { %v2449_v61 = vsel %vm1885_vm0, %v2364_v57, 0.0  ;;  %v2254_v62 = vsel %vm1885_vm0, %v2168_v60, 0.0  ;;  %v2365_v63 = vmul.f32 %v2168_v60, %v2168_v60  ;;  %v1437_v0 = vpop.f32.mrb[48].mxu1  ;;  %v1726_v5 = vpop.f32.mrb[48].mxu0  ;;  %v2046_v60 = vadd.s32 %v4107_v16, %v1981_v48 }
 0x17f   : > { %v2450_v2 = vadd.f32 %v2449_v61, %v2448_v47  ;;  %v2255_v3 = vadd.f32 %v2254_v62, %v2253_v59  ;;  %v1438_v4 = vadd.f32 %v4114_v19, %v1437_v0  ;;  %v1439_v6 = vpop.f32.mrb[49].mxu1  ;;  %v1728_v8 = vpop.f32.mrb[49].mxu0 }
 0x180   : > { %v2451_v7 = vsel %vm1885_vm0, %v2365_v63, 0.0  ;;  %v1440_v9 = vpop.f32.mrb[50].mxu1  ;;  %v1729_v15 = vpop.f32.mrb[50].mxu0  ;;  %vm2110_vm15 = vcmp.lt.s32.totalorder %v2046_v60, 1330 }
 0x181   : > { %v2452_v11 = vadd.f32 %v2451_v7, %v2450_v2  ;;  %v1727_v13 = vadd.f32 %v1726_v5, %v1438_v4  ;;  %v1441_v14 = vadd.f32 %v4114_v19, %v1440_v9  ;;  %v1442_v17 = vpop.f32.mrb[51].mxu1  ;;  %v1731_v18 = vpop.f32.mrb[51].mxu0  ;;  %v1982_v5 = vadd.s32 240, %v4099_v12 }
 0x183   : > { %1910 = vst.msk [vmem:[%s4127_s18 + $0xc0] sm:$0xff] %vm1885_vm0, %v1727_v13  ;;  %v2169_v21 = vsel %vm2105_vm10, %v1727_v13, 0.0  ;;  %v1730_v22 = vadd.f32 %v1729_v15, %v1441_v14  ;;  %v1983_v13 = vadd.s32 248, %v4099_v12  ;;  %v2047_v20 = vadd.s32 %v4107_v16, %v1982_v5 }
 0x184   : > { %v2256_v23 = vsel %vm1885_vm0, %v2169_v21, 0.0  ;;  %v2366_v24 = vmul.f32 %v2169_v21, %v2169_v21 }
 0x185   : > { %v2257_v26 = vadd.f32 %v2256_v23, %v2255_v3  ;;  %1911 = vst.msk [vmem:[%s4127_s18 + $0xc8] sm:$0xff] %vm1885_vm0, %v1730_v22  ;;  %v2170_v27 = vsel %vm2106_vm11, %v1730_v22, 0.0  ;;  %vm2111_vm1 = vcmp.lt.s32.totalorder %v2047_v20, 1330 }
 0x186   : > { %v2453_v28 = vsel %vm1885_vm0, %v2366_v24, 0.0  ;;  %v2258_v29 = vsel %vm1885_vm0, %v2170_v27, 0.0  ;;  %v2367_v30 = vmul.f32 %v2170_v27, %v2170_v27  ;;  %v1445_v31 = vpop.f32.mrb[52].mxu1  ;;  %v1734_v36 = vpop.f32.mrb[52].mxu0 }
 0x187   : > { %v2454_v33 = vadd.f32 %v2453_v28, %v2452_v11  ;;  %v2259_v34 = vadd.f32 %v2258_v29, %v2257_v26  ;;  %v1446_v35 = vadd.f32 %v4114_v19, %v1445_v31  ;;  %v1447_v37 = vpop.f32.mrb[53].mxu1  ;;  %v1736_v39 = vpop.f32.mrb[53].mxu0  ;;  %v2048_v26 = vadd.s32 %v4107_v16, %v1983_v13  ;;  %v4353_v29 = vld [vmem:[%s4810_s2] ss:$0 sm:$0xff] }
 0x188   : > { %v2455_v38 = vsel %vm1885_vm0, %v2367_v30, 0.0  ;;  %v1448_v40 = vpop.f32.mrb[54].mxu1  ;;  %v1737_v45 = vpop.f32.mrb[54].mxu0 }
 0x189   : > { %v2456_v42 = vadd.f32 %v2455_v38, %v2454_v33  ;;  %v1735_v43 = vadd.f32 %v1734_v36, %v1446_v35  ;;  %v1449_v44 = vadd.f32 %v4114_v19, %v1448_v40  ;;  %v1450_v46 = vpop.f32.mrb[55].mxu1  ;;  %v1739_v47 = vpop.f32.mrb[55].mxu0  ;;  %v1984_v36 = vadd.s32 256, %v4099_v12 }
 0x18a   : > { %vm2112_vm2 = vcmp.lt.s32.totalorder %v2048_v26, 1330 }
 0x18b   : > { %1912 = vst.msk [vmem:[%s4127_s18 + $0xd0] sm:$0xff] %vm1885_vm0, %v1735_v43  ;;  %v2171_v49 = vsel %vm2107_vm12, %v1735_v43, 0.0  ;;  %v1738_v50 = vadd.f32 %v1737_v45, %v1449_v44  ;;  %v1985_v43 = vadd.s32 264, %v4099_v12  ;;  %v2049_v48 = vadd.s32 %v4107_v16, %v1984_v36 }
 0x18c   : > { %v2260_v51 = vsel %vm1885_vm0, %v2171_v49, 0.0  ;;  %v2368_v52 = vmul.f32 %v2171_v49, %v2171_v49 }
 0x18d   : > { %v2261_v54 = vadd.f32 %v2260_v51, %v2259_v34  ;;  %1913 = vst.msk [vmem:[%s4127_s18 + $0xd8] sm:$0xff] %vm1885_vm0, %v1738_v50  ;;  %v2172_v55 = vsel %vm2108_vm13, %v1738_v50, 0.0  ;;  %vm2113_vm3 = vcmp.lt.s32.totalorder %v2049_v48, 1330 }
 0x18e   : > { %v2457_v56 = vsel %vm1885_vm0, %v2368_v52, 0.0  ;;  %v2262_v57 = vsel %vm1885_vm0, %v2172_v55, 0.0  ;;  %v2369_v58 = vmul.f32 %v2172_v55, %v2172_v55  ;;  %v1453_v59 = vpop.f32.mrb[56].mxu1  ;;  %v1742_v0 = vpop.f32.mrb[56].mxu0  ;;  %v2050_v55 = vadd.s32 %v4107_v16, %v1985_v43 }
 0x18f   : > { %v2458_v61 = vadd.f32 %v2457_v56, %v2456_v42  ;;  %v2263_v62 = vadd.f32 %v2262_v57, %v2261_v54  ;;  %v1454_v63 = vadd.f32 %v4114_v19, %v1453_v59  ;;  %v1455_v1 = vpop.f32.mrb[57].mxu1  ;;  %v1744_v3 = vpop.f32.mrb[57].mxu0 }
 0x190   : > { %v2459_v2 = vsel %vm1885_vm0, %v2369_v58, 0.0  ;;  %v1456_v4 = vpop.f32.mrb[58].mxu1  ;;  %v1745_v9 = vpop.f32.mrb[58].mxu0  ;;  %vm2114_vm4 = vcmp.lt.s32.totalorder %v2050_v55, 1330 }
 0x191   : > { %v2460_v6 = vadd.f32 %v2459_v2, %v2458_v61  ;;  %v1743_v7 = vadd.f32 %v1742_v0, %v1454_v63  ;;  %v1457_v8 = vadd.f32 %v4114_v19, %v1456_v4  ;;  %v1458_v10 = vpop.f32.mrb[59].mxu1  ;;  %v1747_v11 = vpop.f32.mrb[59].mxu0  ;;  %v1986_v0 = vadd.s32 272, %v4099_v12 }
 0x193   : > { %1914 = vst.msk [vmem:[%s4127_s18 + $0xe0] sm:$0xff] %vm1885_vm0, %v1743_v7  ;;  %v2173_v14 = vsel %vm2109_vm14, %v1743_v7, 0.0  ;;  %v1746_v15 = vadd.f32 %v1745_v9, %v1457_v8  ;;  %v1987_v7 = vadd.s32 280, %v4099_v12  ;;  %v2051_v13 = vadd.s32 %v4107_v16, %v1986_v0 }
 0x194   : > { %v2264_v17 = vsel %vm1885_vm0, %v2173_v14, 0.0  ;;  %v2370_v18 = vmul.f32 %v2173_v14, %v2173_v14 }
 0x195   : > { %v2265_v21 = vadd.f32 %v2264_v17, %v2263_v62  ;;  %1915 = vst.msk [vmem:[%s4127_s18 + $0xe8] sm:$0xff] %vm1885_vm0, %v1746_v15  ;;  %v2174_v22 = vsel %vm2110_vm15, %v1746_v15, 0.0  ;;  %vm2115_vm5 = vcmp.lt.s32.totalorder %v2051_v13, 1330 }
 0x196   : > { %v2461_v19 = vsel %vm1885_vm0, %v2370_v18, 0.0  ;;  %v2266_v23 = vsel %vm1885_vm0, %v2174_v22, 0.0  ;;  %v2371_v24 = vmul.f32 %v2174_v22, %v2174_v22  ;;  %v1461_v25 = vpop.f32.mrb[60].mxu1  ;;  %v1750_v31 = vpop.f32.mrb[60].mxu0  ;;  %v2052_v22 = vadd.s32 %v4107_v16, %v1987_v7 }
 0x197   : > { %v2462_v27 = vadd.f32 %v2461_v19, %v2460_v6  ;;  %v2267_v28 = vadd.f32 %v2266_v23, %v2265_v21  ;;  %v1462_v30 = vadd.f32 %v4353_v29, %v1461_v25  ;;  %v1463_v32 = vpop.f32.mrb[61].mxu1  ;;  %v1752_v34 = vpop.f32.mrb[61].mxu0 }
 0x198   : > { %v2463_v33 = vsel %vm1885_vm0, %v2371_v24, 0.0  ;;  %v1464_v35 = vpop.f32.mrb[62].mxu1  ;;  %v1753_v40 = vpop.f32.mrb[62].mxu0  ;;  %vm2116_vm6 = vcmp.lt.s32.totalorder %v2052_v22, 1330 }
 0x199   : > { %v2464_v37 = vadd.f32 %v2463_v33, %v2462_v27  ;;  %v1751_v38 = vadd.f32 %v1750_v31, %v1462_v30  ;;  %v1465_v39 = vadd.f32 %v4353_v29, %v1464_v35  ;;  %v1466_v41 = vpop.f32.mrb[63].mxu1  ;;  %v1755_v42 = vpop.f32.mrb[63].mxu0  ;;  %v1988_v31 = vadd.s32 288, %v4099_v12 }
 0x19b   : > { %1916 = vst.msk [vmem:[%s4127_s18 + $0xf0] sm:$0xff] %vm1885_vm0, %v1751_v38  ;;  %v2175_v44 = vsel %vm2111_vm1, %v1751_v38, 0.0  ;;  %v1754_v45 = vadd.f32 %v1753_v40, %v1465_v39  ;;  %v1989_v38 = vadd.s32 296, %v4099_v12  ;;  %v2053_v43 = vadd.s32 %v4107_v16, %v1988_v31 }
 0x19c   : > { %v2268_v46 = vsel %vm1885_vm0, %v2175_v44, 0.0  ;;  %v2372_v47 = vmul.f32 %v2175_v44, %v2175_v44 }
 0x19d   : > { %v2269_v49 = vadd.f32 %v2268_v46, %v2267_v28  ;;  %1917 = vst.msk [vmem:[%s4127_s18 + $0xf8] sm:$0xff] %vm1885_vm0, %v1754_v45  ;;  %v2176_v50 = vsel %vm2112_vm2, %v1754_v45, 0.0  ;;  %vm2117_vm7 = vcmp.lt.s32.totalorder %v2053_v43, 1330 }
 0x19e   : > { %v2465_v51 = vsel %vm1885_vm0, %v2372_v47, 0.0  ;;  %v2270_v52 = vsel %vm1885_vm0, %v2176_v50, 0.0  ;;  %v2373_v53 = vmul.f32 %v2176_v50, %v2176_v50  ;;  %v1469_v54 = vpop.f32.mrb[64].mxu1  ;;  %v1758_v59 = vpop.f32.mrb[64].mxu0  ;;  %v2054_v50 = vadd.s32 %v4107_v16, %v1989_v38 }
 0x19f   : > { %v2466_v56 = vadd.f32 %v2465_v51, %v2464_v37  ;;  %v2271_v57 = vadd.f32 %v2270_v52, %v2269_v49  ;;  %v1470_v58 = vadd.f32 %v4353_v29, %v1469_v54  ;;  %v1471_v60 = vpop.f32.mrb[65].mxu1  ;;  %v1760_v62 = vpop.f32.mrb[65].mxu0 }
 0x1a0   : > { %v2467_v61 = vsel %vm1885_vm0, %v2373_v53, 0.0  ;;  %v1472_v63 = vpop.f32.mrb[66].mxu1  ;;  %v1761_v4 = vpop.f32.mrb[66].mxu0  ;;  %vm2118_vm8 = vcmp.lt.s32.totalorder %v2054_v50, 1330 }
 0x1a1   : > { %v2468_v1 = vadd.f32 %v2467_v61, %v2466_v56  ;;  %v1759_v2 = vadd.f32 %v1758_v59, %v1470_v58  ;;  %v1473_v3 = vadd.f32 %v4353_v29, %v1472_v63  ;;  %v1474_v5 = vpop.f32.mrb[67].mxu1  ;;  %v1763_v6 = vpop.f32.mrb[67].mxu0  ;;  %v1990_v59 = vadd.s32 304, %v4099_v12 }
 0x1a3   : > { %1918 = vst.msk [vmem:[%s4127_s18 + $0x100] sm:$0xff] %vm1885_vm0, %v1759_v2  ;;  %v2177_v8 = vsel %vm2113_vm3, %v1759_v2, 0.0  ;;  %v1762_v9 = vadd.f32 %v1761_v4, %v1473_v3  ;;  %v1991_v2 = vadd.s32 312, %v4099_v12  ;;  %v2055_v7 = vadd.s32 %v4107_v16, %v1990_v59 }
 0x1a4   : > { %v2272_v10 = vsel %vm1885_vm0, %v2177_v8, 0.0  ;;  %v2374_v11 = vmul.f32 %v2177_v8, %v2177_v8 }
 0x1a5   : > { %v2273_v14 = vadd.f32 %v2272_v10, %v2271_v57  ;;  %1919 = vst.msk [vmem:[%s4127_s18 + $0x108] sm:$0xff] %vm1885_vm0, %v1762_v9  ;;  %v2178_v15 = vsel %vm2114_vm4, %v1762_v9, 0.0  ;;  %vm2119_vm9 = vcmp.lt.s32.totalorder %v2055_v7, 1330 }
 0x1a6   : > { %v2469_v17 = vsel %vm1885_vm0, %v2374_v11, 0.0  ;;  %v2274_v18 = vsel %vm1885_vm0, %v2178_v15, 0.0  ;;  %v2375_v20 = vmul.f32 %v2178_v15, %v2178_v15  ;;  %v1477_v21 = vpop.f32.mrb[68].mxu1  ;;  %v1766_v25 = vpop.f32.mrb[68].mxu0  ;;  %v2056_v15 = vadd.s32 %v4107_v16, %v1991_v2 }
 0x1a7   : > { %v2470_v19 = vadd.f32 %v2469_v17, %v2468_v1  ;;  %v2275_v23 = vadd.f32 %v2274_v18, %v2273_v14  ;;  %v1478_v24 = vadd.f32 %v4353_v29, %v1477_v21  ;;  %v1479_v26 = vpop.f32.mrb[69].mxu1  ;;  %v1768_v28 = vpop.f32.mrb[69].mxu0 }
 0x1a8   : > { %v2471_v27 = vsel %vm1885_vm0, %v2375_v20, 0.0  ;;  %v1480_v30 = vpop.f32.mrb[70].mxu1  ;;  %v1769_v35 = vpop.f32.mrb[70].mxu0  ;;  %vm2120_vm10 = vcmp.lt.s32.totalorder %v2056_v15, 1330 }
 0x1a9   : > { %v2472_v32 = vadd.f32 %v2471_v27, %v2470_v19  ;;  %v1767_v33 = vadd.f32 %v1766_v25, %v1478_v24  ;;  %v1481_v34 = vadd.f32 %v4353_v29, %v1480_v30  ;;  %v1482_v36 = vpop.f32.mrb[71].mxu1  ;;  %v1771_v37 = vpop.f32.mrb[71].mxu0  ;;  %v1992_v25 = vadd.s32 320, %v4099_v12 }
 0x1ab   : > { %1920 = vst.msk [vmem:[%s4127_s18 + $0x110] sm:$0xff] %vm1885_vm0, %v1767_v33  ;;  %v2179_v39 = vsel %vm2115_vm5, %v1767_v33, 0.0  ;;  %v1770_v40 = vadd.f32 %v1769_v35, %v1481_v34  ;;  %v1993_v33 = vadd.s32 328, %v4099_v12  ;;  %v2057_v38 = vadd.s32 %v4107_v16, %v1992_v25 }
 0x1ac   : > { %v2276_v41 = vsel %vm1885_vm0, %v2179_v39, 0.0  ;;  %v2376_v42 = vmul.f32 %v2179_v39, %v2179_v39 }
 0x1ad   : > { %v2277_v44 = vadd.f32 %v2276_v41, %v2275_v23  ;;  %1921 = vst.msk [vmem:[%s4127_s18 + $0x118] sm:$0xff] %vm1885_vm0, %v1770_v40  ;;  %v2180_v45 = vsel %vm2116_vm6, %v1770_v40, 0.0  ;;  %vm2121_vm11 = vcmp.lt.s32.totalorder %v2057_v38, 1330 }
 0x1ae   : > { %v2473_v46 = vsel %vm1885_vm0, %v2376_v42, 0.0  ;;  %v2278_v47 = vsel %vm1885_vm0, %v2180_v45, 0.0  ;;  %v2377_v48 = vmul.f32 %v2180_v45, %v2180_v45  ;;  %v1485_v49 = vpop.f32.mrb[72].mxu1  ;;  %v1774_v54 = vpop.f32.mrb[72].mxu0  ;;  %v2058_v45 = vadd.s32 %v4107_v16, %v1993_v33 }
 0x1af   : > { %v2474_v51 = vadd.f32 %v2473_v46, %v2472_v32  ;;  %v2279_v52 = vadd.f32 %v2278_v47, %v2277_v44  ;;  %v1486_v53 = vadd.f32 %v4353_v29, %v1485_v49  ;;  %v1487_v55 = vpop.f32.mrb[73].mxu1  ;;  %v1776_v57 = vpop.f32.mrb[73].mxu0 }
 0x1b0   : > { %v2475_v56 = vsel %vm1885_vm0, %v2377_v48, 0.0  ;;  %v1488_v58 = vpop.f32.mrb[74].mxu1  ;;  %v1777_v63 = vpop.f32.mrb[74].mxu0  ;;  %vm2122_vm12 = vcmp.lt.s32.totalorder %v2058_v45, 1330 }
 0x1b1   : > { %v2476_v60 = vadd.f32 %v2475_v56, %v2474_v51  ;;  %v1775_v61 = vadd.f32 %v1774_v54, %v1486_v53  ;;  %v1489_v62 = vadd.f32 %v4353_v29, %v1488_v58  ;;  %v1490_v0 = vpop.f32.mrb[75].mxu1  ;;  %v1779_v1 = vpop.f32.mrb[75].mxu0  ;;  %v1994_v54 = vadd.s32 336, %v4099_v12 }
 0x1b3   : > { %1922 = vst.msk [vmem:[%s4127_s18 + $0x120] sm:$0xff] %vm1885_vm0, %v1775_v61  ;;  %v2181_v3 = vsel %vm2117_vm7, %v1775_v61, 0.0  ;;  %v1778_v4 = vadd.f32 %v1777_v63, %v1489_v62  ;;  %v1995_v61 = vadd.s32 344, %v4099_v12  ;;  %v2059_v2 = vadd.s32 %v4107_v16, %v1994_v54 }
 0x1b4   : > { %v2280_v5 = vsel %vm1885_vm0, %v2181_v3, 0.0  ;;  %v2378_v6 = vmul.f32 %v2181_v3, %v2181_v3 }
 0x1b5   : > { %v2281_v8 = vadd.f32 %v2280_v5, %v2279_v52  ;;  %1923 = vst.msk [vmem:[%s4127_s18 + $0x128] sm:$0xff] %vm1885_vm0, %v1778_v4  ;;  %v2182_v9 = vsel %vm2118_vm8, %v1778_v4, 0.0  ;;  %vm2123_vm13 = vcmp.lt.s32.totalorder %v2059_v2, 1330 }
 0x1b6   : > { %v2477_v10 = vsel %vm1885_vm0, %v2378_v6, 0.0  ;;  %v2282_v11 = vsel %vm1885_vm0, %v2182_v9, 0.0  ;;  %v2379_v13 = vmul.f32 %v2182_v9, %v2182_v9  ;;  %v1493_v14 = vpop.f32.mrb[76].mxu1  ;;  %v1782_v21 = vpop.f32.mrb[76].mxu0  ;;  %v2060_v9 = vadd.s32 %v4107_v16, %v1995_v61 }
 0x1b7   : > { %v2478_v17 = vadd.f32 %v2477_v10, %v2476_v60  ;;  %v2283_v18 = vadd.f32 %v2282_v11, %v2281_v8  ;;  %v1494_v20 = vadd.f32 %v4353_v29, %v1493_v14  ;;  %v1495_v22 = vpop.f32.mrb[77].mxu1  ;;  %v1784_v23 = vpop.f32.mrb[77].mxu0 }
 0x1b8   : > { %v2479_v19 = vsel %vm1885_vm0, %v2379_v13, 0.0  ;;  %v1496_v24 = vpop.f32.mrb[78].mxu1  ;;  %v1785_v30 = vpop.f32.mrb[78].mxu0  ;;  %vm2124_vm14 = vcmp.lt.s32.totalorder %v2060_v9, 1330 }
 0x1b9   : > { %v2480_v26 = vadd.f32 %v2479_v19, %v2478_v17  ;;  %v1783_v27 = vadd.f32 %v1782_v21, %v1494_v20  ;;  %v1497_v28 = vadd.f32 %v4353_v29, %v1496_v24  ;;  %v1498_v31 = vpop.f32.mrb[79].mxu1  ;;  %v1787_v32 = vpop.f32.mrb[79].mxu0  ;;  %v1996_v21 = vadd.s32 352, %v4099_v12 }
 0x1bb   : > { %1924 = vst.msk [vmem:[%s4127_s18 + $0x130] sm:$0xff] %vm1885_vm0, %v1783_v27  ;;  %v2183_v34 = vsel %vm2119_vm9, %v1783_v27, 0.0  ;;  %v1786_v35 = vadd.f32 %v1785_v30, %v1497_v28  ;;  %v1997_v27 = vadd.s32 360, %v4099_v12  ;;  %v2061_v33 = vadd.s32 %v4107_v16, %v1996_v21 }
 0x1bc   : > { %v2284_v36 = vsel %vm1885_vm0, %v2183_v34, 0.0  ;;  %v2380_v37 = vmul.f32 %v2183_v34, %v2183_v34 }
 0x1bd   : > { %v2285_v39 = vadd.f32 %v2284_v36, %v2283_v18  ;;  %1925 = vst.msk [vmem:[%s4127_s18 + $0x138] sm:$0xff] %vm1885_vm0, %v1786_v35  ;;  %v2184_v40 = vsel %vm2120_vm10, %v1786_v35, 0.0  ;;  %vm2125_vm15 = vcmp.lt.s32.totalorder %v2061_v33, 1330 }
 0x1be   : > { %v2481_v41 = vsel %vm1885_vm0, %v2380_v37, 0.0  ;;  %v2286_v42 = vsel %vm1885_vm0, %v2184_v40, 0.0  ;;  %v2381_v43 = vmul.f32 %v2184_v40, %v2184_v40  ;;  %v1501_v44 = vpop.f32.mrb[80].mxu1  ;;  %v1790_v49 = vpop.f32.mrb[80].mxu0  ;;  %v2062_v40 = vadd.s32 %v4107_v16, %v1997_v27 }
 0x1bf   : > { %v2482_v46 = vadd.f32 %v2481_v41, %v2480_v26  ;;  %v2287_v47 = vadd.f32 %v2286_v42, %v2285_v39  ;;  %v1502_v48 = vadd.f32 %v4353_v29, %v1501_v44  ;;  %v1503_v50 = vpop.f32.mrb[81].mxu1  ;;  %v1792_v52 = vpop.f32.mrb[81].mxu0 }
 0x1c0   : > { %v2483_v51 = vsel %vm1885_vm0, %v2381_v43, 0.0  ;;  %v1504_v53 = vpop.f32.mrb[82].mxu1  ;;  %v1793_v58 = vpop.f32.mrb[82].mxu0  ;;  %vm2126_vm1 = vcmp.lt.s32.totalorder %v2062_v40, 1330 }
 0x1c1   : > { %v2484_v55 = vadd.f32 %v2483_v51, %v2482_v46  ;;  %v1791_v56 = vadd.f32 %v1790_v49, %v1502_v48  ;;  %v1505_v57 = vadd.f32 %v4353_v29, %v1504_v53  ;;  %v1506_v59 = vpop.f32.mrb[83].mxu1  ;;  %v1795_v60 = vpop.f32.mrb[83].mxu0  ;;  %v1998_v49 = vadd.s32 368, %v4099_v12 }
 0x1c3   : > { %1926 = vst.msk [vmem:[%s4127_s18 + $0x140] sm:$0xff] %vm1885_vm0, %v1791_v56  ;;  %v2185_v62 = vsel %vm2121_vm11, %v1791_v56, 0.0  ;;  %v1794_v63 = vadd.f32 %v1793_v58, %v1505_v57  ;;  %v1999_v56 = vadd.s32 376, %v4099_v12  ;;  %v2063_v61 = vadd.s32 %v4107_v16, %v1998_v49 }
 0x1c4   : > { %v2288_v0 = vsel %vm1885_vm0, %v2185_v62, 0.0  ;;  %v2382_v1 = vmul.f32 %v2185_v62, %v2185_v62 }
 0x1c5   : > { %v2289_v3 = vadd.f32 %v2288_v0, %v2287_v47  ;;  %1927 = vst.msk [vmem:[%s4127_s18 + $0x148] sm:$0xff] %vm1885_vm0, %v1794_v63  ;;  %v2186_v4 = vsel %vm2122_vm12, %v1794_v63, 0.0  ;;  %vm2127_vm2 = vcmp.lt.s32.totalorder %v2063_v61, 1330 }
 0x1c6   : > { %v2485_v5 = vsel %vm1885_vm0, %v2382_v1, 0.0  ;;  %v2290_v6 = vsel %vm1885_vm0, %v2186_v4, 0.0  ;;  %v2383_v7 = vmul.f32 %v2186_v4, %v2186_v4  ;;  %v1509_v8 = vpop.f32.mrb[84].mxu1  ;;  %v1798_v14 = vpop.f32.mrb[84].mxu0  ;;  %v2064_v4 = vadd.s32 %v4107_v16, %v1999_v56 }
 0x1c7   : > { %v2486_v10 = vadd.f32 %v2485_v5, %v2484_v55  ;;  %v2291_v11 = vadd.f32 %v2290_v6, %v2289_v3  ;;  %v1510_v13 = vadd.f32 %v4353_v29, %v1509_v8  ;;  %v1511_v15 = vpop.f32.mrb[85].mxu1  ;;  %v1800_v18 = vpop.f32.mrb[85].mxu0 }
 0x1c8   : > { %v2487_v17 = vsel %vm1885_vm0, %v2383_v7, 0.0  ;;  %v1512_v20 = vpop.f32.mrb[86].mxu1  ;;  %v1801_v24 = vpop.f32.mrb[86].mxu0  ;;  %vm2128_vm3 = vcmp.lt.s32.totalorder %v2064_v4, 1330 }
 0x1c9   : > { %v2488_v22 = vadd.f32 %v2487_v17, %v2486_v10  ;;  %v1799_v19 = vadd.f32 %v1798_v14, %v1510_v13  ;;  %v1513_v23 = vadd.f32 %v4353_v29, %v1512_v20  ;;  %v1514_v25 = vpop.f32.mrb[87].mxu1  ;;  %v1803_v26 = vpop.f32.mrb[87].mxu0  ;;  %v2000_v14 = vadd.s32 384, %v4099_v12 }
 0x1cb   : > { %1928 = vst.msk [vmem:[%s4127_s18 + $0x150] sm:$0xff] %vm1885_vm0, %v1799_v19  ;;  %v2187_v28 = vsel %vm2123_vm13, %v1799_v19, 0.0  ;;  %v1802_v30 = vadd.f32 %v1801_v24, %v1513_v23  ;;  %v2001_v19 = vadd.s32 392, %v4099_v12  ;;  %v2065_v27 = vadd.s32 %v4107_v16, %v2000_v14 }
 0x1cc   : > { %v2292_v31 = vsel %vm1885_vm0, %v2187_v28, 0.0  ;;  %v2384_v32 = vmul.f32 %v2187_v28, %v2187_v28 }
 0x1cd   : > { %v2293_v34 = vadd.f32 %v2292_v31, %v2291_v11  ;;  %1929 = vst.msk [vmem:[%s4127_s18 + $0x158] sm:$0xff] %vm1885_vm0, %v1802_v30  ;;  %v2188_v35 = vsel %vm2124_vm14, %v1802_v30, 0.0  ;;  %vm2129_vm4 = vcmp.lt.s32.totalorder %v2065_v27, 1330 }
 0x1ce   : > { %v2489_v36 = vsel %vm1885_vm0, %v2384_v32, 0.0  ;;  %v2294_v37 = vsel %vm1885_vm0, %v2188_v35, 0.0  ;;  %v2385_v38 = vmul.f32 %v2188_v35, %v2188_v35  ;;  %v1517_v39 = vpop.f32.mrb[88].mxu1  ;;  %v1806_v44 = vpop.f32.mrb[88].mxu0  ;;  %v2066_v35 = vadd.s32 %v4107_v16, %v2001_v19 }
 0x1cf   : > { %v2490_v41 = vadd.f32 %v2489_v36, %v2488_v22  ;;  %v2295_v42 = vadd.f32 %v2294_v37, %v2293_v34  ;;  %v1518_v43 = vadd.f32 %v4353_v29, %v1517_v39  ;;  %v1519_v45 = vpop.f32.mrb[89].mxu1  ;;  %v1808_v47 = vpop.f32.mrb[89].mxu0 }
 0x1d0   : > { %v2491_v46 = vsel %vm1885_vm0, %v2385_v38, 0.0  ;;  %v1520_v48 = vpop.f32.mrb[90].mxu1  ;;  %v1809_v53 = vpop.f32.mrb[90].mxu0  ;;  %vm2130_vm5 = vcmp.lt.s32.totalorder %v2066_v35, 1330 }
 0x1d1   : > { %v2492_v50 = vadd.f32 %v2491_v46, %v2490_v41  ;;  %v1807_v51 = vadd.f32 %v1806_v44, %v1518_v43  ;;  %v1521_v52 = vadd.f32 %v4353_v29, %v1520_v48  ;;  %v1522_v54 = vpop.f32.mrb[91].mxu1  ;;  %v1811_v55 = vpop.f32.mrb[91].mxu0  ;;  %v2002_v44 = vadd.s32 400, %v4099_v12 }
 0x1d3   : > { %1930 = vst.msk [vmem:[%s4127_s18 + $0x160] sm:$0xff] %vm1885_vm0, %v1807_v51  ;;  %v2189_v57 = vsel %vm2125_vm15, %v1807_v51, 0.0  ;;  %v1810_v58 = vadd.f32 %v1809_v53, %v1521_v52  ;;  %v2003_v51 = vadd.s32 408, %v4099_v12  ;;  %v2067_v56 = vadd.s32 %v4107_v16, %v2002_v44 }
 0x1d4   : > { %v2296_v59 = vsel %vm1885_vm0, %v2189_v57, 0.0  ;;  %v2386_v60 = vmul.f32 %v2189_v57, %v2189_v57 }
 0x1d5   : > { %v2297_v62 = vadd.f32 %v2296_v59, %v2295_v42  ;;  %1931 = vst.msk [vmem:[%s4127_s18 + $0x168] sm:$0xff] %vm1885_vm0, %v1810_v58  ;;  %v2190_v63 = vsel %vm2126_vm1, %v1810_v58, 0.0  ;;  %vm2131_vm6 = vcmp.lt.s32.totalorder %v2067_v56, 1330 }
 0x1d6   : > { %v2493_v0 = vsel %vm1885_vm0, %v2386_v60, 0.0  ;;  %v2298_v1 = vsel %vm1885_vm0, %v2190_v63, 0.0  ;;  %v2387_v2 = vmul.f32 %v2190_v63, %v2190_v63  ;;  %v1525_v3 = vpop.f32.mrb[92].mxu1  ;;  %v1814_v8 = vpop.f32.mrb[92].mxu0  ;;  %v2068_v63 = vadd.s32 %v4107_v16, %v2003_v51 }
 0x1d7   : > { %v2494_v5 = vadd.f32 %v2493_v0, %v2492_v50  ;;  %v2299_v6 = vadd.f32 %v2298_v1, %v2297_v62  ;;  %v1526_v7 = vadd.f32 %v4353_v29, %v1525_v3  ;;  %v1527_v9 = vpop.f32.mrb[93].mxu1  ;;  %v1816_v11 = vpop.f32.mrb[93].mxu0 }
 0x1d8   : > { %v2495_v10 = vsel %vm1885_vm0, %v2387_v2, 0.0  ;;  %v1528_v13 = vpop.f32.mrb[94].mxu1  ;;  %v1817_v20 = vpop.f32.mrb[94].mxu0  ;;  %vm2132_vm7 = vcmp.lt.s32.totalorder %v2068_v63, 1330 }
 0x1d9   : > { %v2496_v15 = vadd.f32 %v2495_v10, %v2494_v5  ;;  %v1815_v17 = vadd.f32 %v1814_v8, %v1526_v7  ;;  %v1529_v18 = vadd.f32 %v4353_v29, %v1528_v13  ;;  %v1530_v21 = vpop.f32.mrb[95].mxu1  ;;  %v1819_v22 = vpop.f32.mrb[95].mxu0  ;;  %v2004_v8 = vadd.s32 416, %v4099_v12 }
 0x1db   : > { %1932 = vst.msk [vmem:[%s4127_s18 + $0x170] sm:$0xff] %vm1885_vm0, %v1815_v17  ;;  %v2191_v23 = vsel %vm2127_vm2, %v1815_v17, 0.0  ;;  %v1818_v24 = vadd.f32 %v1817_v20, %v1529_v18  ;;  %v2005_v17 = vadd.s32 424, %v4099_v12  ;;  %v2069_v19 = vadd.s32 %v4107_v16, %v2004_v8 }
 0x1dc   : > { %v2300_v25 = vsel %vm1885_vm0, %v2191_v23, 0.0  ;;  %v2388_v26 = vmul.f32 %v2191_v23, %v2191_v23 }
 0x1dd   : > { %v2301_v28 = vadd.f32 %v2300_v25, %v2299_v6  ;;  %1933 = vst.msk [vmem:[%s4127_s18 + $0x178] sm:$0xff] %vm1885_vm0, %v1818_v24  ;;  %v2192_v30 = vsel %vm2128_vm3, %v1818_v24, 0.0  ;;  %vm2133_vm8 = vcmp.lt.s32.totalorder %v2069_v19, 1330 }
 0x1de   : > { %v2497_v31 = vsel %vm1885_vm0, %v2388_v26, 0.0  ;;  %v2302_v32 = vsel %vm1885_vm0, %v2192_v30, 0.0  ;;  %v2389_v33 = vmul.f32 %v2192_v30, %v2192_v30  ;;  %v1533_v34 = vpop.f32.mrb[96].mxu1  ;;  %v1822_v39 = vpop.f32.mrb[96].mxu0  ;;  %v2070_v30 = vadd.s32 %v4107_v16, %v2005_v17 }
 0x1df   : > { %v2498_v36 = vadd.f32 %v2497_v31, %v2496_v15  ;;  %v2303_v37 = vadd.f32 %v2302_v32, %v2301_v28  ;;  %v1534_v38 = vadd.f32 %v4353_v29, %v1533_v34  ;;  %v1535_v40 = vpop.f32.mrb[97].mxu1  ;;  %v1824_v42 = vpop.f32.mrb[97].mxu0 }
 0x1e0   : > { %v2499_v41 = vsel %vm1885_vm0, %v2389_v33, 0.0  ;;  %v1536_v43 = vpop.f32.mrb[98].mxu1  ;;  %v1825_v48 = vpop.f32.mrb[98].mxu0  ;;  %vm2134_vm9 = vcmp.lt.s32.totalorder %v2070_v30, 1330 }
 0x1e1   : > { %v2500_v45 = vadd.f32 %v2499_v41, %v2498_v36  ;;  %v1823_v46 = vadd.f32 %v1822_v39, %v1534_v38  ;;  %v1537_v47 = vadd.f32 %v4353_v29, %v1536_v43  ;;  %v1538_v49 = vpop.f32.mrb[99].mxu1  ;;  %v1827_v50 = vpop.f32.mrb[99].mxu0  ;;  %v2006_v39 = vadd.s32 432, %v4099_v12 }
 0x1e3   : > { %1934 = vst.msk [vmem:[%s4127_s18 + $0x180] sm:$0xff] %vm1885_vm0, %v1823_v46  ;;  %v2193_v52 = vsel %vm2129_vm4, %v1823_v46, 0.0  ;;  %v1826_v53 = vadd.f32 %v1825_v48, %v1537_v47  ;;  %v2007_v46 = vadd.s32 440, %v4099_v12  ;;  %v2071_v51 = vadd.s32 %v4107_v16, %v2006_v39 }
 0x1e4   : > { %v2304_v54 = vsel %vm1885_vm0, %v2193_v52, 0.0  ;;  %v2390_v55 = vmul.f32 %v2193_v52, %v2193_v52 }
 0x1e5   : > { %v2305_v57 = vadd.f32 %v2304_v54, %v2303_v37  ;;  %1935 = vst.msk [vmem:[%s4127_s18 + $0x188] sm:$0xff] %vm1885_vm0, %v1826_v53  ;;  %v2194_v58 = vsel %vm2130_vm5, %v1826_v53, 0.0  ;;  %vm2135_vm10 = vcmp.lt.s32.totalorder %v2071_v51, 1330 }
 0x1e6   : > { %v2501_v59 = vsel %vm1885_vm0, %v2390_v55, 0.0  ;;  %v2306_v60 = vsel %vm1885_vm0, %v2194_v58, 0.0  ;;  %v2391_v61 = vmul.f32 %v2194_v58, %v2194_v58  ;;  %v1541_v62 = vpop.f32.mrb[100].mxu1  ;;  %v1830_v3 = vpop.f32.mrb[100].mxu0  ;;  %v2072_v58 = vadd.s32 %v4107_v16, %v2007_v46 }
 0x1e7   : > { %v2502_v0 = vadd.f32 %v2501_v59, %v2500_v45  ;;  %v2307_v1 = vadd.f32 %v2306_v60, %v2305_v57  ;;  %v1542_v2 = vadd.f32 %v4353_v29, %v1541_v62  ;;  %v1543_v4 = vpop.f32.mrb[101].mxu1  ;;  %v1832_v6 = vpop.f32.mrb[101].mxu0 }
 0x1e8   : > { %v2503_v5 = vsel %vm1885_vm0, %v2391_v61, 0.0  ;;  %v1544_v7 = vpop.f32.mrb[102].mxu1  ;;  %v1833_v13 = vpop.f32.mrb[102].mxu0  ;;  %vm2136_vm11 = vcmp.lt.s32.totalorder %v2072_v58, 1330 }
 0x1e9   : > { %v2504_v9 = vadd.f32 %v2503_v5, %v2502_v0  ;;  %v1831_v10 = vadd.f32 %v1830_v3, %v1542_v2  ;;  %v1545_v11 = vadd.f32 %v4353_v29, %v1544_v7  ;;  %v1546_v14 = vpop.f32.mrb[103].mxu1  ;;  %v1835_v15 = vpop.f32.mrb[103].mxu0  ;;  %v2008_v3 = vadd.s32 448, %v4099_v12 }
 0x1eb   : > { %1936 = vst.msk [vmem:[%s4127_s18 + $0x190] sm:$0xff] %vm1885_vm0, %v1831_v10  ;;  %v2195_v18 = vsel %vm2131_vm6, %v1831_v10, 0.0  ;;  %v1834_v20 = vadd.f32 %v1833_v13, %v1545_v11  ;;  %v2009_v10 = vadd.s32 456, %v4099_v12  ;;  %v2073_v17 = vadd.s32 %v4107_v16, %v2008_v3 }
 0x1ec   : > { %v2308_v21 = vsel %vm1885_vm0, %v2195_v18, 0.0  ;;  %v2392_v22 = vmul.f32 %v2195_v18, %v2195_v18 }
 0x1ed   : > { %v2309_v23 = vadd.f32 %v2308_v21, %v2307_v1  ;;  %1937 = vst.msk [vmem:[%s4127_s18 + $0x198] sm:$0xff] %vm1885_vm0, %v1834_v20  ;;  %v2196_v24 = vsel %vm2132_vm7, %v1834_v20, 0.0  ;;  %vm2137_vm12 = vcmp.lt.s32.totalorder %v2073_v17, 1330 }
 0x1ee   : > { %v2505_v25 = vsel %vm1885_vm0, %v2392_v22, 0.0  ;;  %v2310_v26 = vsel %vm1885_vm0, %v2196_v24, 0.0  ;;  %v2393_v27 = vmul.f32 %v2196_v24, %v2196_v24  ;;  %v1549_v28 = vpop.f32.mrb[104].mxu1  ;;  %v1838_v34 = vpop.f32.mrb[104].mxu0  ;;  %v2074_v24 = vadd.s32 %v4107_v16, %v2009_v10 }
 0x1ef   : > { %v2506_v31 = vadd.f32 %v2505_v25, %v2504_v9  ;;  %v2311_v32 = vadd.f32 %v2310_v26, %v2309_v23  ;;  %v1550_v33 = vadd.f32 %v4353_v29, %v1549_v28  ;;  %v1551_v35 = vpop.f32.mrb[105].mxu1  ;;  %v1840_v37 = vpop.f32.mrb[105].mxu0 }
 0x1f0   : > { %v2507_v36 = vsel %vm1885_vm0, %v2393_v27, 0.0  ;;  %v1552_v38 = vpop.f32.mrb[106].mxu1  ;;  %v1841_v43 = vpop.f32.mrb[106].mxu0  ;;  %vm2138_vm13 = vcmp.lt.s32.totalorder %v2074_v24, 1330 }
 0x1f1   : > { %v2508_v40 = vadd.f32 %v2507_v36, %v2506_v31  ;;  %v1839_v41 = vadd.f32 %v1838_v34, %v1550_v33  ;;  %v1553_v42 = vadd.f32 %v4353_v29, %v1552_v38  ;;  %v1554_v44 = vpop.f32.mrb[107].mxu1  ;;  %v1843_v45 = vpop.f32.mrb[107].mxu0  ;;  %v2010_v34 = vadd.s32 464, %v4099_v12 }
 0x1f3   : > { %1938 = vst.msk [vmem:[%s4127_s18 + $0x1a0] sm:$0xff] %vm1885_vm0, %v1839_v41  ;;  %v2197_v47 = vsel %vm2133_vm8, %v1839_v41, 0.0  ;;  %v1842_v48 = vadd.f32 %v1841_v43, %v1553_v42  ;;  %v2011_v41 = vadd.s32 472, %v4099_v12  ;;  %v2075_v46 = vadd.s32 %v4107_v16, %v2010_v34 }
 0x1f4   : > { %v2312_v49 = vsel %vm1885_vm0, %v2197_v47, 0.0  ;;  %v2394_v50 = vmul.f32 %v2197_v47, %v2197_v47 }
 0x1f5   : > { %v2313_v52 = vadd.f32 %v2312_v49, %v2311_v32  ;;  %1939 = vst.msk [vmem:[%s4127_s18 + $0x1a8] sm:$0xff] %vm1885_vm0, %v1842_v48  ;;  %v2198_v53 = vsel %vm2134_vm9, %v1842_v48, 0.0  ;;  %vm2139_vm14 = vcmp.lt.s32.totalorder %v2075_v46, 1330 }
 0x1f6   : > { %v2509_v54 = vsel %vm1885_vm0, %v2394_v50, 0.0  ;;  %v2314_v55 = vsel %vm1885_vm0, %v2198_v53, 0.0  ;;  %v2395_v56 = vmul.f32 %v2198_v53, %v2198_v53  ;;  %v1557_v57 = vpop.f32.mrb[108].mxu1  ;;  %v1846_v62 = vpop.f32.mrb[108].mxu0  ;;  %v2076_v53 = vadd.s32 %v4107_v16, %v2011_v41 }
 0x1f7   : > { %v2510_v59 = vadd.f32 %v2509_v54, %v2508_v40  ;;  %v2315_v60 = vadd.f32 %v2314_v55, %v2313_v52  ;;  %v1558_v61 = vadd.f32 %v4353_v29, %v1557_v57  ;;  %v1559_v63 = vpop.f32.mrb[109].mxu1  ;;  %v1848_v1 = vpop.f32.mrb[109].mxu0 }
 0x1f8   : > { %v2511_v0 = vsel %vm1885_vm0, %v2395_v56, 0.0  ;;  %v1560_v2 = vpop.f32.mrb[110].mxu1  ;;  %v1849_v7 = vpop.f32.mrb[110].mxu0  ;;  %vm2140_vm15 = vcmp.lt.s32.totalorder %v2076_v53, 1330 }
 0x1f9   : > { %v2512_v4 = vadd.f32 %v2511_v0, %v2510_v59  ;;  %v1847_v5 = vadd.f32 %v1846_v62, %v1558_v61  ;;  %v1561_v6 = vadd.f32 %v4353_v29, %v1560_v2  ;;  %v1562_v8 = vpop.f32.mrb[111].mxu1  ;;  %v1851_v9 = vpop.f32.mrb[111].mxu0  ;;  %v2012_v62 = vadd.s32 480, %v4099_v12 }
 0x1fb   : > { %1940 = vst.msk [vmem:[%s4127_s18 + $0x1b0] sm:$0xff] %vm1885_vm0, %v1847_v5  ;;  %v2199_v11 = vsel %vm2135_vm10, %v1847_v5, 0.0  ;;  %v1850_v13 = vadd.f32 %v1849_v7, %v1561_v6  ;;  %v2013_v5 = vadd.s32 488, %v4099_v12  ;;  %v2077_v10 = vadd.s32 %v4107_v16, %v2012_v62 }
 0x1fc   : > { %v2316_v14 = vsel %vm1885_vm0, %v2199_v11, 0.0  ;;  %v2396_v15 = vmul.f32 %v2199_v11, %v2199_v11 }
 0x1fd   : > { %v2317_v18 = vadd.f32 %v2316_v14, %v2315_v60  ;;  %1941 = vst.msk [vmem:[%s4127_s18 + $0x1b8] sm:$0xff] %vm1885_vm0, %v1850_v13  ;;  %v2200_v20 = vsel %vm2136_vm11, %v1850_v13, 0.0  ;;  %vm2141_vm1 = vcmp.lt.s32.totalorder %v2077_v10, 1330 }
 0x1fe   : > { %v2513_v21 = vsel %vm1885_vm0, %v2396_v15, 0.0  ;;  %v2318_v22 = vsel %vm1885_vm0, %v2200_v20, 0.0  ;;  %v2397_v19 = vmul.f32 %v2200_v20, %v2200_v20  ;;  %v1565_v23 = vpop.f32.mrb[112].mxu1  ;;  %v1854_v28 = vpop.f32.mrb[112].mxu0  ;;  %v2078_v20 = vadd.s32 %v4107_v16, %v2013_v5 }
 0x1ff   : > { %v2514_v25 = vadd.f32 %v2513_v21, %v2512_v4  ;;  %v2319_v26 = vadd.f32 %v2318_v22, %v2317_v18  ;;  %v1566_v27 = vadd.f32 %v4353_v29, %v1565_v23  ;;  %v1567_v30 = vpop.f32.mrb[113].mxu1  ;;  %v1856_v32 = vpop.f32.mrb[113].mxu0 }
 0x200   : > { %v2515_v31 = vsel %vm1885_vm0, %v2397_v19, 0.0  ;;  %v1568_v33 = vpop.f32.mrb[114].mxu1  ;;  %v1857_v38 = vpop.f32.mrb[114].mxu0  ;;  %vm2142_vm2 = vcmp.lt.s32.totalorder %v2078_v20, 1330 }
 0x201   : > { %v2516_v35 = vadd.f32 %v2515_v31, %v2514_v25  ;;  %v1855_v36 = vadd.f32 %v1854_v28, %v1566_v27  ;;  %v1569_v37 = vadd.f32 %v4353_v29, %v1568_v33  ;;  %v1570_v39 = vpop.f32.mrb[115].mxu1  ;;  %v1859_v40 = vpop.f32.mrb[115].mxu0  ;;  %v2014_v28 = vadd.s32 496, %v4099_v12 }
 0x203   : > { %1942 = vst.msk [vmem:[%s4127_s18 + $0x1c0] sm:$0xff] %vm1885_vm0, %v1855_v36  ;;  %v2201_v42 = vsel %vm2137_vm12, %v1855_v36, 0.0  ;;  %v1858_v43 = vadd.f32 %v1857_v38, %v1569_v37  ;;  %v2015_v36 = vadd.s32 504, %v4099_v12  ;;  %v2079_v41 = vadd.s32 %v4107_v16, %v2014_v28 }
 0x204   : > { %v2320_v44 = vsel %vm1885_vm0, %v2201_v42, 0.0  ;;  %v2398_v45 = vmul.f32 %v2201_v42, %v2201_v42 }
 0x205   : > { %v2321_v47 = vadd.f32 %v2320_v44, %v2319_v26  ;;  %1943 = vst.msk [vmem:[%s4127_s18 + $0x1c8] sm:$0xff] %vm1885_vm0, %v1858_v43  ;;  %v2202_v48 = vsel %vm2138_vm13, %v1858_v43, 0.0  ;;  %v2080_v12 = vadd.s32 %v4107_v16, %v2015_v36  ;;  %vm2143_vm3 = vcmp.lt.s32.totalorder %v2079_v41, 1330 }
 0x206   : > { %v2517_v49 = vsel %vm1885_vm0, %v2398_v45, 0.0  ;;  %v2322_v50 = vsel %vm1885_vm0, %v2202_v48, 0.0  ;;  %v2399_v51 = vmul.f32 %v2202_v48, %v2202_v48  ;;  %v1573_v52 = vpop.f32.mrb[116].mxu1  ;;  %v1862_v57 = vpop.f32.mrb[116].mxu0 }
 0x207   : > { %v2518_v54 = vadd.f32 %v2517_v49, %v2516_v35  ;;  %v2323_v55 = vadd.f32 %v2322_v50, %v2321_v47  ;;  %v1574_v56 = vadd.f32 %v4353_v29, %v1573_v52  ;;  %v1575_v58 = vpop.f32.mrb[117].mxu1  ;;  %v1864_v60 = vpop.f32.mrb[117].mxu0  ;;  %v3705_v49 = vld [vmem:[%s4810_s2] ss:$0 sm:$0xff]  ;;  %vm2144_vm4 = vcmp.lt.s32.totalorder %v2080_v12, 1330 }
 0x208   : > { %v2519_v59 = vsel %vm1885_vm0, %v2399_v51, 0.0  ;;  %v1576_v61 = vpop.f32.mrb[118].mxu1  ;;  %v1865_v2 = vpop.f32.mrb[118].mxu0 }
 0x209   : > { %v2520_v63 = vadd.f32 %v2519_v59, %v2518_v54  ;;  %v1863_v0 = vadd.f32 %v1862_v57, %v1574_v56  ;;  %v1577_v1 = vadd.f32 %v4353_v29, %v1576_v61  ;;  %v1578_v3 = vpop.f32.mrb[119].mxu1  ;;  %v1867_v4 = vpop.f32.mrb[119].mxu0 }
 0x20b   : > { %1944 = vst.msk [vmem:[%s4127_s18 + $0x1d0] sm:$0xff] %vm1885_vm0, %v1863_v0  ;;  %v2203_v6 = vsel %vm2139_vm14, %v1863_v0, 0.0  ;;  %v1866_v7 = vadd.f32 %v1865_v2, %v1577_v1 }
 0x20c   : > { %v2324_v8 = vsel %vm1885_vm0, %v2203_v6, 0.0  ;;  %v2400_v9 = vmul.f32 %v2203_v6, %v2203_v6 }
 0x20d   : > { %v2325_v11 = vadd.f32 %v2324_v8, %v2323_v55  ;;  %1945 = vst.msk [vmem:[%s4127_s18 + $0x1d8] sm:$0xff] %vm1885_vm0, %v1866_v7  ;;  %v2204_v13 = vsel %vm2140_vm15, %v1866_v7, 0.0 }
 0x20e   : > { %v2521_v14 = vsel %vm1885_vm0, %v2400_v9, 0.0  ;;  %v2326_v15 = vsel %vm1885_vm0, %v2204_v13, 0.0  ;;  %v2401_v17 = vmul.f32 %v2204_v13, %v2204_v13  ;;  %v1581_v18 = vpop.f32.mrb[120].mxu1  ;;  %v1870_v23 = vpop.f32.mrb[120].mxu0 }
 0x20f   : > { %v2522_v21 = vadd.f32 %v2521_v14, %v2520_v63  ;;  %v2327_v22 = vadd.f32 %v2326_v15, %v2325_v11  ;;  %v1582_v19 = vadd.f32 %v4353_v29, %v1581_v18  ;;  %v1583_v24 = vpop.f32.mrb[121].mxu1  ;;  %v1872_v26 = vpop.f32.mrb[121].mxu0 }
 0x210   : > { %v2523_v25 = vsel %vm1885_vm0, %v2401_v17, 0.0  ;;  %v1584_v27 = vpop.f32.mrb[122].mxu1  ;;  %v1873_v33 = vpop.f32.mrb[122].mxu0 }
 0x211   : > { %v2524_v30 = vadd.f32 %v2523_v25, %v2522_v21  ;;  %v1871_v31 = vadd.f32 %v1870_v23, %v1582_v19  ;;  %v1585_v32 = vadd.f32 %v4353_v29, %v1584_v27  ;;  %v1586_v34 = vpop.f32.mrb[123].mxu1  ;;  %v1875_v35 = vpop.f32.mrb[123].mxu0 }
 0x213   : > { %1946 = vst.msk [vmem:[%s4127_s18 + $0x1e0] sm:$0xff] %vm1885_vm0, %v1871_v31  ;;  %v2205_v37 = vsel %vm2141_vm1, %v1871_v31, 0.0  ;;  %v1874_v38 = vadd.f32 %v1873_v33, %v1585_v32 }
 0x214   : > { %v2328_v39 = vsel %vm1885_vm0, %v2205_v37, 0.0  ;;  %v2402_v40 = vmul.f32 %v2205_v37, %v2205_v37 }
 0x215   : > { %v2329_v42 = vadd.f32 %v2328_v39, %v2327_v22  ;;  %1947 = vst.msk [vmem:[%s4127_s18 + $0x1e8] sm:$0xff] %vm1885_vm0, %v1874_v38  ;;  %v2206_v43 = vsel %vm2142_vm2, %v1874_v38, 0.0 }
 0x216   : > { %v2525_v29 = vsel %vm1885_vm0, %v2402_v40, 0.0  ;;  %v2330_v44 = vsel %vm1885_vm0, %v2206_v43, 0.0  ;;  %v2403_v45 = vmul.f32 %v2206_v43, %v2206_v43  ;;  %v1589_v46 = vpop.f32.mrb[124].mxu1  ;;  %v1878_v51 = vpop.f32.mrb[124].mxu0 }
 0x217   : > { %v2526_v47 = vadd.f32 %v2525_v29, %v2524_v30  ;;  %v2331_v48 = vadd.f32 %v2330_v44, %v2329_v42  ;;  %v1590_v50 = vadd.f32 %v3705_v49, %v1589_v46  ;;  %v1591_v52 = vpop.f32.mrb[125].mxu1  ;;  %v1880_v54 = vpop.f32.mrb[125].mxu0 }
 0x218   : > { %v2527_v53 = vsel %vm1885_vm0, %v2403_v45, 0.0  ;;  %v1592_v55 = vpop.f32.mrb[126].mxu1  ;;  %v1881_v16 = vpop.f32.mrb[126].mxu0 }
 0x219   : > { %v2528_v56 = vadd.f32 %v2527_v53, %v2526_v47  ;;  %v1879_v57 = vadd.f32 %v1878_v51, %v1590_v50  ;;  %v1593_v58 = vadd.f32 %v3705_v49, %v1592_v55  ;;  %v1594_v59 = vpop.f32.mrb[127].mxu1  ;;  %v1883_v60 = vpop.f32.mrb[127].mxu0 }
 0x21b   : > { %1948 = vst.msk [vmem:[%s4127_s18 + $0x1f0] sm:$0xff] %vm1885_vm0, %v1879_v57  ;;  %v2207_v61 = vsel %vm2143_vm3, %v1879_v57, 0.0  ;;  %v1882_v62 = vadd.f32 %v1881_v16, %v1593_v58 }
 0x21c   : > { %v2332_v63 = vsel %vm1885_vm0, %v2207_v61, 0.0  ;;  %v2404_v0 = vmul.f32 %v2207_v61, %v2207_v61 }
 0x21d   : > { %v2333_v1 = vadd.f32 %v2332_v63, %v2331_v48  ;;  %1949 = vst.msk [vmem:[%s4127_s18 + $0x1f8] sm:$0xff] %vm1885_vm0, %v1882_v62  ;;  %v2208_v2 = vsel %vm2144_vm4, %v1882_v62, 0.0 }
 0x21e   : > { %v2529_v3 = vsel %vm1885_vm0, %v2404_v0, 0.0  ;;  %v2334_v4 = vsel %vm1885_vm0, %v2208_v2, 0.0  ;;  %v2405_v5 = vmul.f32 %v2208_v2, %v2208_v2 }
 0x21f   : > { %v2530_v6 = vadd.f32 %v2529_v3, %v2528_v56  ;;  %v2335_v7 = vadd.f32 %v2334_v4, %v2333_v1 }
 0x220   : > { %v2531_v8 = vsel %vm1885_vm0, %v2405_v5, 0.0 }
 0x221   : > { %v2336_v9 = vrot.slane %v2335_v7, 4  ;;  %v2532_v10 = vadd.f32 %v2531_v8, %v2530_v6 }
 0x223   : > { %v2337_v11 = vadd.f32 %v2336_v9, %v2335_v7  ;;  %v2533_v13 = vrot.slane %v2532_v10, 4 }
 0x225   : > { %v2338_v14 = vrot.slane %v2337_v11, 2  ;;  %v2534_v15 = vadd.f32 %v2533_v13, %v2532_v10 }
 0x227   : > { %v2339_v17 = vadd.f32 %v2338_v14, %v2337_v11  ;;  %v2535_v18 = vrot.slane %v2534_v15, 2 }
 0x229   : > { %v2340_v20 = vrot.slane %v2339_v17, 1  ;;  %v2536_v21 = vadd.f32 %v2535_v18, %v2534_v15  ;;  %2555 = sbr.rel (!%p3850_p4) target bundleno = 632 (0x278), region = 36 }
 0x22b   : > { %v2341_v22 = vadd.f32 %v2340_v20, %v2339_v17  ;;  %v2537_v19 = vrot.slane %v2536_v21, 1 }
 0x22d   : > { %v2538_v23 = vadd.f32 %v2537_v19, %v2536_v21  ;;  %2539 = vst.msk [vmem:[%s270_s13] sm:$0xff] %vm1885_vm0, %v2341_v22 }
 0x22f   : > { %2540 = vst.msk [vmem:[%s274_s16] sm:$0xff] %vm1885_vm0, %v2538_v23 }
 0x230   : > { %s4824_s17 = smov (!%p2558_p9, %s2557_s17), 64 }
 0x231   : > { %s3244_s30 = sshll.u32 %s4824_s17, 7 }
 0x232   : > { %p3247_p10 = scmp.eq.s32.totalorder %s3244_s30, 0 }
 0x233   : > { %s4615_s29 = sshrl.u32 (!%p3247_p10), %s4824_s17, 6 }
 0x234   : > { %2566 = sbr.rel (%p3247_p10) target bundleno = 632 (0x278), region = 40  ;;  %p3248_p11 = scmp.le.s32.totalorder (!%p3247_p10), %s4615_s29, 0 }
 0x23b   : > { %3008 = sbr.rel (%p3248_p11) target bundleno = 611 (0x263), region = 140  ;;  %s4815_s21 = smov (!%p3248_p11), %s4609_s27 }
 0x23c   : > { %s4816_s26 = smov (!%p3248_p11), %s4127_s18  ;;  %s4624_s28 = smov (!%p3248_p11), 0  }
 0x23d   : > { %s4626_s20 = smov (!%p3248_p11), 0  }
 0x242 LB: >> { %v2754_v24 = vld [vmem:[%s3768_s26] sm:$0xff]  ;;  %v2756_v25 = vld [vmem:[%s3768_s26 + $0x8] sm:$0xff]  ;;  %v2758_v26 = vld [vmem:[%s3768_s26 + $0x10] sm:$0xff]  ;;  %s2882_s6 = sadd.s32 1, %s3772_s28  ;;  %s2748_s20 = sadd.s32 1, %s3776_s20   ;;  %s3776_s20 = sphi %s4626_s20, %s2748_s20   ;;  %s3772_s28 = sphi %s4624_s28, %s4819_s28   ;;  %s3768_s26 = sphi %s4816_s26, %s4818_s26   ;;  %s3764_s21 = sphi %s4815_s21, %s4817_s21  }
 0x243   : >> { %2755 = vst [vmem:[%s3764_s21] sm:$0xff] %v2754_v24  ;;  %2757 = vst [vmem:[%s3764_s21 + $0x8] sm:$0xff] %v2756_v25  ;;  %v2760_v27 = vld [vmem:[%s3768_s26 + $0x18] sm:$0xff]  ;;  %v2762_v28 = vld [vmem:[%s3768_s26 + $0x20] sm:$0xff]  ;;  %p2883_p12 = scmp.ge.s32.totalorder %s2882_s6, %s4615_s29  ;;  %p2747_p13 = scmp.ge.s32.totalorder %s2748_s20, %s4615_s29 }
 0x244   : >> { %2759 = vst [vmem:[%s3764_s21 + $0x10] sm:$0xff] %v2758_v26  ;;  %v2764_v30 = vld [vmem:[%s3768_s26 + $0x28] sm:$0xff]  ;;  %2761 = vst [vmem:[%s3764_s21 + $0x18] sm:$0xff] %v2760_v27  ;;  %v2766_v31 = vld [vmem:[%s3768_s26 + $0x30] sm:$0xff] }
 0x245   : >> { %2763 = vst [vmem:[%s3764_s21 + $0x20] sm:$0xff] %v2762_v28  ;;  %2765 = vst [vmem:[%s3764_s21 + $0x28] sm:$0xff] %v2764_v30  ;;  %v2768_v32 = vld [vmem:[%s3768_s26 + $0x38] sm:$0xff]  ;;  %v2770_v33 = vld [vmem:[%s3768_s26 + $0x40] sm:$0xff]  ;;  %s4826_s6 = smov (%p2883_p12, %s2882_s6), 0 }
 0x246   : >> { %2767 = vst [vmem:[%s3764_s21 + $0x30] sm:$0xff] %v2766_v31  ;;  %2769 = vst [vmem:[%s3764_s21 + $0x38] sm:$0xff] %v2768_v32  ;;  %v2772_v34 = vld [vmem:[%s3768_s26 + $0x48] sm:$0xff]  ;;  %v2774_v35 = vld [vmem:[%s3768_s26 + $0x50] sm:$0xff]  ;;  %s3249_s7 = sshll.u32 %s4826_s6, 9  ;;  %s4819_s28 = smov %s4826_s6 }
 0x247   : >> { %2771 = vst [vmem:[%s3764_s21 + $0x40] sm:$0xff] %v2770_v33  ;;  %v2776_v36 = vld [vmem:[%s3768_s26 + $0x58] sm:$0xff]  ;;  %2773 = vst [vmem:[%s3764_s21 + $0x48] sm:$0xff] %v2772_v34  ;;  %v2778_v37 = vld [vmem:[%s3768_s26 + $0x60] sm:$0xff]  ;;  %s4682_s8 = scalar_lea.vmem %s4127_s18, %s3249_s7 [#allocation2]   ;;  %s4685_s9 = scalar_lea.vmem %s4609_s27, %s3249_s7  }
 0x248   : >> { %2775 = vst [vmem:[%s3764_s21 + $0x50] sm:$0xff] %v2774_v35  ;;  %2777 = vst [vmem:[%s3764_s21 + $0x58] sm:$0xff] %v2776_v36  ;;  %v2780_v38 = vld [vmem:[%s3768_s26 + $0x68] sm:$0xff]  ;;  %v2782_v39 = vld [vmem:[%s3768_s26 + $0x70] sm:$0xff] }
 0x249   : >> { %2779 = vst [vmem:[%s3764_s21 + $0x60] sm:$0xff] %v2778_v37  ;;  %2781 = vst [vmem:[%s3764_s21 + $0x68] sm:$0xff] %v2780_v38  ;;  %v2784_v40 = vld [vmem:[%s3768_s26 + $0x78] sm:$0xff]  ;;  %v2786_v41 = vld [vmem:[%s3768_s26 + $0x80] sm:$0xff] }
 0x24a   : >> { %2783 = vst [vmem:[%s3764_s21 + $0x70] sm:$0xff] %v2782_v39  ;;  %v2788_v42 = vld [vmem:[%s3768_s26 + $0x88] sm:$0xff]  ;;  %2785 = vst [vmem:[%s3764_s21 + $0x78] sm:$0xff] %v2784_v40  ;;  %v2790_v43 = vld [vmem:[%s3768_s26 + $0x90] sm:$0xff] }
 0x24b   : >> { %2787 = vst [vmem:[%s3764_s21 + $0x80] sm:$0xff] %v2786_v41  ;;  %2789 = vst [vmem:[%s3764_s21 + $0x88] sm:$0xff] %v2788_v42  ;;  %v2792_v29 = vld [vmem:[%s3768_s26 + $0x98] sm:$0xff]  ;;  %v2794_v44 = vld [vmem:[%s3768_s26 + $0xa0] sm:$0xff] }
 0x24c   : >> { %2791 = vst [vmem:[%s3764_s21 + $0x90] sm:$0xff] %v2790_v43  ;;  %2793 = vst [vmem:[%s3764_s21 + $0x98] sm:$0xff] %v2792_v29  ;;  %v2796_v45 = vld [vmem:[%s3768_s26 + $0xa8] sm:$0xff]  ;;  %v2798_v46 = vld [vmem:[%s3768_s26 + $0xb0] sm:$0xff] }
 0x24d   : >> { %2795 = vst [vmem:[%s3764_s21 + $0xa0] sm:$0xff] %v2794_v44  ;;  %v2800_v12 = vld [vmem:[%s3768_s26 + $0xb8] sm:$0xff]  ;;  %2797 = vst [vmem:[%s3764_s21 + $0xa8] sm:$0xff] %v2796_v45  ;;  %v2802_v47 = vld [vmem:[%s3768_s26 + $0xc0] sm:$0xff] }
 0x24e   : >> { %2799 = vst [vmem:[%s3764_s21 + $0xb0] sm:$0xff] %v2798_v46  ;;  %2801 = vst [vmem:[%s3764_s21 + $0xb8] sm:$0xff] %v2800_v12  ;;  %v2804_v48 = vld [vmem:[%s3768_s26 + $0xc8] sm:$0xff]  ;;  %v2806_v49 = vld [vmem:[%s3768_s26 + $0xd0] sm:$0xff] }
 0x24f   : >> { %2803 = vst [vmem:[%s3764_s21 + $0xc0] sm:$0xff] %v2802_v47  ;;  %2805 = vst [vmem:[%s3764_s21 + $0xc8] sm:$0xff] %v2804_v48  ;;  %v2808_v50 = vld [vmem:[%s3768_s26 + $0xd8] sm:$0xff]  ;;  %v2810_v51 = vld [vmem:[%s3768_s26 + $0xe0] sm:$0xff] }
 0x250   : >> { %2807 = vst [vmem:[%s3764_s21 + $0xd0] sm:$0xff] %v2806_v49  ;;  %v2812_v52 = vld [vmem:[%s3768_s26 + $0xe8] sm:$0xff]  ;;  %2809 = vst [vmem:[%s3764_s21 + $0xd8] sm:$0xff] %v2808_v50  ;;  %v2814_v53 = vld [vmem:[%s3768_s26 + $0xf0] sm:$0xff] }
 0x251   : >> { %2811 = vst [vmem:[%s3764_s21 + $0xe0] sm:$0xff] %v2810_v51  ;;  %2813 = vst [vmem:[%s3764_s21 + $0xe8] sm:$0xff] %v2812_v52  ;;  %v2816_v54 = vld [vmem:[%s3768_s26 + $0xf8] sm:$0xff]  ;;  %v2818_v55 = vld [vmem:[%s3768_s26 + $0x100] sm:$0xff] }
 0x252   : >> { %2815 = vst [vmem:[%s3764_s21 + $0xf0] sm:$0xff] %v2814_v53  ;;  %2817 = vst [vmem:[%s3764_s21 + $0xf8] sm:$0xff] %v2816_v54  ;;  %v2820_v56 = vld [vmem:[%s3768_s26 + $0x108] sm:$0xff]  ;;  %v2822_v57 = vld [vmem:[%s3768_s26 + $0x110] sm:$0xff] }
 0x253   : >> { %2819 = vst [vmem:[%s3764_s21 + $0x100] sm:$0xff] %v2818_v55  ;;  %v2824_v58 = vld [vmem:[%s3768_s26 + $0x118] sm:$0xff]  ;;  %2821 = vst [vmem:[%s3764_s21 + $0x108] sm:$0xff] %v2820_v56  ;;  %v2826_v16 = vld [vmem:[%s3768_s26 + $0x120] sm:$0xff] }
 0x254   : >> { %2823 = vst [vmem:[%s3764_s21 + $0x110] sm:$0xff] %v2822_v57  ;;  %2825 = vst [vmem:[%s3764_s21 + $0x118] sm:$0xff] %v2824_v58  ;;  %v2828_v59 = vld [vmem:[%s3768_s26 + $0x128] sm:$0xff]  ;;  %v2830_v60 = vld [vmem:[%s3768_s26 + $0x130] sm:$0xff] }
 0x255   : >> { %2827 = vst [vmem:[%s3764_s21 + $0x120] sm:$0xff] %v2826_v16  ;;  %2829 = vst [vmem:[%s3764_s21 + $0x128] sm:$0xff] %v2828_v59  ;;  %v2832_v61 = vld [vmem:[%s3768_s26 + $0x138] sm:$0xff]  ;;  %v2834_v62 = vld [vmem:[%s3768_s26 + $0x140] sm:$0xff] }
 0x256   : >> { %2831 = vst [vmem:[%s3764_s21 + $0x130] sm:$0xff] %v2830_v60  ;;  %v2836_v63 = vld [vmem:[%s3768_s26 + $0x148] sm:$0xff]  ;;  %2833 = vst [vmem:[%s3764_s21 + $0x138] sm:$0xff] %v2832_v61  ;;  %v2838_v0 = vld [vmem:[%s3768_s26 + $0x150] sm:$0xff] }
 0x257   : >> { %2835 = vst [vmem:[%s3764_s21 + $0x140] sm:$0xff] %v2834_v62  ;;  %2837 = vst [vmem:[%s3764_s21 + $0x148] sm:$0xff] %v2836_v63  ;;  %v2840_v1 = vld [vmem:[%s3768_s26 + $0x158] sm:$0xff]  ;;  %v2842_v2 = vld [vmem:[%s3768_s26 + $0x160] sm:$0xff] }
 0x258   : >> { %2839 = vst [vmem:[%s3764_s21 + $0x150] sm:$0xff] %v2838_v0  ;;  %2841 = vst [vmem:[%s3764_s21 + $0x158] sm:$0xff] %v2840_v1  ;;  %v2844_v3 = vld [vmem:[%s3768_s26 + $0x168] sm:$0xff]  ;;  %v2846_v4 = vld [vmem:[%s3768_s26 + $0x170] sm:$0xff] }
 0x259   : >> { %2843 = vst [vmem:[%s3764_s21 + $0x160] sm:$0xff] %v2842_v2  ;;  %v2848_v5 = vld [vmem:[%s3768_s26 + $0x178] sm:$0xff]  ;;  %2845 = vst [vmem:[%s3764_s21 + $0x168] sm:$0xff] %v2844_v3  ;;  %v2850_v6 = vld [vmem:[%s3768_s26 + $0x180] sm:$0xff] }
 0x25a   : >> { %2847 = vst [vmem:[%s3764_s21 + $0x170] sm:$0xff] %v2846_v4  ;;  %2849 = vst [vmem:[%s3764_s21 + $0x178] sm:$0xff] %v2848_v5  ;;  %v2852_v7 = vld [vmem:[%s3768_s26 + $0x188] sm:$0xff]  ;;  %v2854_v8 = vld [vmem:[%s3768_s26 + $0x190] sm:$0xff] }
 0x25b   : >> { %2851 = vst [vmem:[%s3764_s21 + $0x180] sm:$0xff] %v2850_v6  ;;  %2853 = vst [vmem:[%s3764_s21 + $0x188] sm:$0xff] %v2852_v7  ;;  %v2856_v9 = vld [vmem:[%s3768_s26 + $0x198] sm:$0xff]  ;;  %v2858_v10 = vld [vmem:[%s3768_s26 + $0x1a0] sm:$0xff] }
 0x25c   : >> { %2855 = vst [vmem:[%s3764_s21 + $0x190] sm:$0xff] %v2854_v8  ;;  %v2860_v11 = vld [vmem:[%s3768_s26 + $0x1a8] sm:$0xff]  ;;  %2857 = vst [vmem:[%s3764_s21 + $0x198] sm:$0xff] %v2856_v9  ;;  %v2862_v13 = vld [vmem:[%s3768_s26 + $0x1b0] sm:$0xff]  ;;  %2750 = sbr.rel (!%p2747_p13) target bundleno = 578 (0x242), region = 146 }
 0x25d   : >> { %2859 = vst [vmem:[%s3764_s21 + $0x1a0] sm:$0xff] %v2858_v10  ;;  %2861 = vst [vmem:[%s3764_s21 + $0x1a8] sm:$0xff] %v2860_v11  ;;  %v2864_v14 = vld [vmem:[%s3768_s26 + $0x1b8] sm:$0xff]  ;;  %v2866_v15 = vld [vmem:[%s3768_s26 + $0x1c0] sm:$0xff] }
 0x25e   : >> { %2863 = vst [vmem:[%s3764_s21 + $0x1b0] sm:$0xff] %v2862_v13  ;;  %2865 = vst [vmem:[%s3764_s21 + $0x1b8] sm:$0xff] %v2864_v14  ;;  %v2868_v17 = vld [vmem:[%s3768_s26 + $0x1c8] sm:$0xff]  ;;  %v2870_v18 = vld [vmem:[%s3768_s26 + $0x1d0] sm:$0xff] }
 0x25f   : >> { %2867 = vst [vmem:[%s3764_s21 + $0x1c0] sm:$0xff] %v2866_v15  ;;  %v2872_v20 = vld [vmem:[%s3768_s26 + $0x1d8] sm:$0xff]  ;;  %2869 = vst [vmem:[%s3764_s21 + $0x1c8] sm:$0xff] %v2868_v17  ;;  %v2874_v21 = vld [vmem:[%s3768_s26 + $0x1e0] sm:$0xff] }
 0x260   : >> { %2871 = vst [vmem:[%s3764_s21 + $0x1d0] sm:$0xff] %v2870_v18  ;;  %2873 = vst [vmem:[%s3764_s21 + $0x1d8] sm:$0xff] %v2872_v20  ;;  %v2876_v22 = vld [vmem:[%s3768_s26 + $0x1e8] sm:$0xff]  ;;  %v2878_v19 = vld [vmem:[%s3768_s26 + $0x1f0] sm:$0xff] }
 0x261   : >> { %2875 = vst [vmem:[%s3764_s21 + $0x1e0] sm:$0xff] %v2874_v21  ;;  %2877 = vst [vmem:[%s3764_s21 + $0x1e8] sm:$0xff] %v2876_v22  ;;  %v2880_v23 = vld [vmem:[%s3768_s26 + $0x1f8] sm:$0xff]  ;;  %s4818_s26 = smov %s4682_s8 }
 0x262   : >> { %2879 = vst [vmem:[%s3764_s21 + $0x1f0] sm:$0xff] %v2878_v19  ;;  %2881 = vst [vmem:[%s3764_s21 + $0x1f8] sm:$0xff] %v2880_v23  ;;  %s4817_s21 = smov %s4685_s9 }
 0x263 PF: > { %s4790_s10 = sand.u32 63, %s4824_s17   ;;  %s3261_s11 = sshll.u32 %s4615_s29, 9 }
 0x264   : > { %s2893_s12 = scalar_lea.vmem %s4127_s18, %s3261_s11 [#allocation2]   ;;  %s2895_s13 = scalar_lea.vmem %s4609_s27, %s3261_s11  }
 0x265   : > { %p3254_p0 = scmp.le.s32.totalorder %s4790_s10, 0 }
 0x266   : > { %s3778_s14 = smov (!%p3254_p0), %s2895_s13   ;;  %s3782_s15 = smov (!%p3254_p0), %s2893_s12  }
 0x267   : > { %3022 = sbr.rel (%p3254_p0) target bundleno = 632 (0x278), region = 151  ;;  %s3786_s16 = smov (!%p3254_p0), 0  }
 0x268   : > { %s3790_s23 = smov (!%p3254_p0), 0  }
 0x26e LB: >> { %v2905_v24 = vld [vmem:[%s3784_s15] sm:$0xff]  ;;  %s2907_s17 = sadd.s32 1, %s3788_s16  ;;  %s2899_s23 = sadd.s32 1, %s3792_s23   ;;  %s3792_s23 = sphi %s3790_s23, %s2899_s23   ;;  %s3788_s16 = sphi %s3786_s16, %s3787_s16   ;;  %s3784_s15 = sphi %s3782_s15, %s2912_s15   ;;  %s3780_s14 = sphi %s3778_s14, %s2913_s14  }
 0x26f   : >> { %2906 = vst [vmem:[%s3780_s14] sm:$0xff] %v2905_v24  ;;  %p2908_p1 = scmp.ge.s32.totalorder %s2907_s17, %s4790_s10  ;;  %p2898_p2 = scmp.ge.s32.totalorder %s2899_s23, %s4790_s10 }
 0x271   : >> { %s4828_s17 = smov (%p2908_p1, %s2907_s17), 0  ;;  %2901 = sbr.rel (!%p2898_p2) target bundleno = 622 (0x26e), region = 157 }
 0x272   : >> { %s3255_s18 = sshll.u32 %s4828_s17, 3  ;;  %s3787_s16 = smov %s4828_s17  }
 0x273   : >> { %s2912_s15 = scalar_lea.vmem %s2893_s12, %s3255_s18 [#allocation2]   ;;  %s2913_s14 = scalar_lea.vmem %s2895_s13, %s3255_s18  }
 0x278 PF: > { %p13_p3 = scmp.ge.s32.totalorder %s3840_s22, 5   ;;  %s4820_s18 = smov %s3756_s19 }
 0x279   : > { %s4821_s19 = smov %s3848_s25  ;;  %s4822_s20 = smov %s3840_s22 }
 0x27a   :  { %15 = sbr.rel (!%p13_p3) target bundleno = 2 (0x2), region = 168 }

// kernel: small_cnn_forward.13
= control target key start
LH: loop header
LB: loop body
LE: loop exit
PB: predicated region body
PF: predicated region fallthrough
CT: control target
= control target key end

     0   :  { %s1034_s12 = smov 0   ;;  %s1036_s13 = smov 0   ;;  %s1293_s0 = inlined_call_operand.vmem [shape: f32[2,19,35,64], index: 0, kind: input, shape index: {}]   ;;  %s1294_s1 = inlined_call_operand.vmem [shape: f32[1,64], index: 1, kind: input, shape index: {}]   ;;  %s1295_s2 = inlined_call_operand.vmem [shape: f32[1,64], index: 2, kind: input, shape index: {}]   ;;  %s1296_s3 = inlined_call_operand.vmem [shape: bf16[2,9,17,64], index: 3, kind: output, shape index: {}]  }
   0x1   :  { %s1038_s14 = smov 0   ;;  %s1040_s15 = smov 0  }
   0x2   :  { %s1042_s16 = smov 0   ;;  %s1044_s17 = smov 0  }
   0x3   :  { %s1046_s18 = smov 0  }
   0x4 LB: > { %s22_s19 = sadd.s32 1, %s968_s16  ;;  %s25_s20 = sadd.s32 1, %s972_s17  ;;  %s976_s18 = sphi %s1046_s18, %s13_s18   ;;  %s972_s17 = sphi %s1044_s17, %s1306_s17   ;;  %s968_s16 = sphi %s1042_s16, %s1305_s16   ;;  %s964_s15 = sphi %s1040_s15, %s1304_s15   ;;  %s960_s14 = sphi %s1038_s14, %s1303_s14   ;;  %s956_s13 = sphi %s1036_s13, %s1302_s13   ;;  %s952_s12 = sphi %s1034_s12, %s1301_s12  }
   0x5   : > { %p23_p0 = scmp.ge.s32.totalorder %s22_s19, 2  ;;  %s701_s21 = sadd.s32 4294967295, %s976_s18  }
   0x6   : > { %p114_p1 = scmp.ne.s32.totalorder %s956_s13, %s952_s12  ;;  %p115_p2 = scmp.eq.s32.totalorder %s701_s21, 3 }
   0x7   : > { %s1308_s19 = smov (%p23_p0, %s22_s19), 0  ;;  %s1310_s20 = smov (!%p23_p0, %s25_s20), %s972_s17 }
   0x8   : > { %s100_s22 = ssub.s32 %s968_s16, %s1308_s19  ;;  %p27_p3 = scmp.ge.s32.totalorder %s1310_s20, 2 }
   0x9   : > { %p705_p4 = scmp.ge.s32.totalorder %s976_s18, 1  ;;  %p1080_p5 = por %p115_p2, %p114_p1 }
   0xa   : > { %p169_p6 = scmp.lt.s32.totalorder %s976_s18, 5  ;;  %s1312_s20 = smov (%p27_p3, %s1310_s20), 0 }
   0xb   : > { %s99_s24 = ssub.s32 %s972_s17, %s1312_s20  ;;  %s104_s26 = sadd.s32 1, %s956_s13 }
   0xc   : > { %p170_p7 = pnand %p705_p4, %p169_p6  ;;  %s101_s25 = sor.u32 %s100_s22, %s99_s24 }
   0xd   : > { %p102_p8 = scmp.eq.s32.totalorder %s101_s25, 0  ;;  %s199_s28 = sand.u32 (!%p170_p7), 1, %s952_s12   ;;  %v1098_v0 = vld [vmem:[%s1294_s1] ss:$0 sm:$0xff] (!%p170_p7) }
   0xe   : > { %173 = sbr.rel (%p170_p7) target bundleno = 139 (0x8b), region = 32  ;;  %s706_s29 = sshll.u32 (!%p170_p7), %s960_s14, 4  ;;  %v1103_v1 = vld [vmem:[%s1295_s2] ss:$0 sm:$0xff] (!%p170_p7) }
   0xf   : > { %s1091_s27 = scalar_select %p102_p8, %s956_s13, %s104_s26  }
  0x10   : > { %s748_s7 = smul.u32 (!%p170_p7), 96, %s199_s28  ;;  %p208_p9 = scmp.lt.s32.totalorder (!%p170_p7), %s964_s15, 1 }
  0x11   : > { %p210_p10 = scmp.lt.s32.totalorder (!%p170_p7), %s706_s29, 18  ;;  %s1114_s26 = smov (!%p170_p7), 0  }
  0x12   : > { %s1112_s25 = scalar_lea.vmem (!%p170_p7), [#allocation2], %s748_s7  }
  0x15   : > { %s209_s8 = scalar_select %p208_p9, %s964_s15, 1 }
  0x16   : > { %s1314_s29 = smov (!%p210_p10, %s706_s29), 18 }
  0x17   : > { %s750_s9 = smul.u32 95, %s209_s8 }
  0x18   : > { %s749_s10 = smul.u32 5, %s1314_s29 }
  0x1a   : > { %s214_s11 = sadd.s32 %s750_s9, %s749_s10 }
  0x1b   : > { %s707_s12 = sshll.u32 %s214_s11, 3 }
  0x1c   : > { %s1110_s24 = scalar_lea.vmem %s1293_s0, %s707_s12 }
  0x1d LB: >> { %s709_s28 = smul.u32 80, %s980_s26  ;;  %vm338_vm0 = vcmask 519168   ;;  %vm341_vm1 = vcmask 516096   ;;  %vm342_vm2 = vsmask.f32 256  ;;  %s980_s26 = sphi %s1114_s26, %s236_s26  }
  0x1e   : >> { %s747_s30 = smul.u32 12, %s980_s26  ;;  %vm343_vm3 = vmand %vm341_vm1, %vm342_vm2  ;;  %s236_s26 = sadd.s32 1, %s980_s26  }
  0x1f   : >> { %s1121_s29 = scalar_lea.vmem %s1110_s24, %s709_s28  ;;  %p233_p11 = scmp.ge.s32.totalorder %s236_s26, 8  }
  0x20   : >> { %v240_v2 = vld [vmem:[%s1121_s29] ss:$2 sm:$0xff]  ;;  %v714_v3 = vld [vmem:[%s1121_s29 + $0x1] ss:$2 sm:$0xff]  ;;  %v710_v9 = vld [vmem:[%s1121_s29 + $0x10] ss:$2 sm:$0xff]  ;;  %s337_s4 = scalar_lea.vmem %s1112_s25, %s747_s30 [#allocation2] }
  0x21   : >> { %v719_v4 = vld [vmem:[%s1121_s29 + $0x28] ss:$2 sm:$0xff]  ;;  %v251_v5 = vmul.f32 %v1098_v0, %v240_v2  ;;  %v272_v6 = vmul.f32 %v714_v3, %v1098_v0  ;;  %v722_v8 = vld [vmem:[%s1121_s29 + $0x29] ss:$2 sm:$0xff]  ;;  %v252_v12 = vmul.f32 %v1098_v0, %v710_v9  ;;  %v720_v14 = vld [vmem:[%s1121_s29 + $0x38] ss:$2 sm:$0xff] }
  0x22   : >> { %v292_v7 = vmul.f32 %v719_v4, %v1098_v0  ;;  %v715_v10 = vld [vmem:[%s1121_s29 + $0x11] ss:$2 sm:$0xff]  ;;  %v307_v11 = vmul.f32 %v722_v8, %v1098_v0  ;;  %v293_v19 = vmul.f32 %v720_v14, %v1098_v0  ;;  %v711_v24 = vld [vmem:[%s1121_s29 + $0x20] ss:$2 sm:$0x1] }
  0x23   : >> { %v273_v13 = vmul.f32 %v715_v10, %v1098_v0  ;;  %v723_v15 = vld [vmem:[%s1121_s29 + $0x39] ss:$2 sm:$0xff]  ;;  %v260_v16 = vadd.f32 %v1103_v1, %v251_v5  ;;  %v275_v17 = vadd.f32 %v1103_v1, %v272_v6  ;;  %v261_v21 = vadd.f32 %v1103_v1, %v252_v12  ;;  %v721_v30 = vld [vmem:[%s1121_s29 + $0x48] ss:$2 sm:$0x1] }
  0x24   : >> { %v295_v18 = vadd.f32 %v1103_v1, %v292_v7  ;;  %v310_v20 = vadd.f32 %v1103_v1, %v307_v11  ;;  %v308_v23 = vmul.f32 %v723_v15, %v1098_v0  ;;  %v716_v25 = vld [vmem:[%s1121_s29 + $0x21] ss:$2 sm:$0x1]  ;;  %v296_v29 = vadd.f32 %v1103_v1, %v293_v19  ;;  %v724_v35 = vld [vmem:[%s1121_s29 + $0x49] ss:$2 sm:$0x1] }
  0x25   : >> { %v276_v22 = vadd.f32 %v1103_v1, %v273_v13  ;;  %v263_v26 = vmax.f32 %v260_v16, 0.0  ;;  %v278_v27 = vmax.f32 %v275_v17, 0.0  ;;  %v264_v32 = vmax.f32 %v261_v21, 0.0  ;;  %v344_v61 = vld [vmem:[%s337_s4 + $0x8] sm:$0x1] }
  0x26   : >> { %v298_v28 = vmax.f32 %v295_v18, 0.0  ;;  %v313_v31 = vmax.f32 %v310_v20, 0.0  ;;  %v311_v34 = vadd.f32 %v1103_v1, %v308_v23  ;;  %v299_v37 = vmax.f32 %v296_v29, 0.0 }
  0x27   : >> { %v279_v33 = vmax.f32 %v276_v22, 0.0  ;;  %v281_v36 = vmax.f32 %v263_v26, %v278_v27  ;;  %v253_v38 = vmul.f32 %v1098_v0, %v711_v24  ;;  %v274_v39 = vmul.f32 %v716_v25, %v1098_v0 }
  0x28   : >> { %v316_v40 = vmax.f32 %v298_v28, %v313_v31  ;;  %v314_v42 = vmax.f32 %v311_v34, 0.0  ;;  %v294_v43 = vmul.f32 %v721_v30, %v1098_v0  ;;  %v309_v46 = vmul.f32 %v724_v35, %v1098_v0 }
  0x29   : >> { %v282_v41 = vmax.f32 %v264_v32, %v279_v33  ;;  %v262_v44 = vadd.f32 %v1103_v1, %v253_v38  ;;  %v277_v45 = vadd.f32 %v1103_v1, %v274_v39 }
  0x2a   : >> { %v319_v47 = vmax.f32 %v281_v36, %v316_v40  ;;  %v317_v48 = vmax.f32 %v299_v37, %v314_v42  ;;  %v297_v49 = vadd.f32 %v1103_v1, %v294_v43  ;;  %v312_v52 = vadd.f32 %v1103_v1, %v309_v46 }
  0x2b   : >> { %v265_v50 = vmax.f32 %v262_v44, 0.0  ;;  %v280_v51 = vmax.f32 %v277_v45, 0.0 }
  0x2c   : >> { %v744_v53 = vpack.c.bf16 %v319_v47, %v319_v47  ;;  %v320_v54 = vmax.f32 %v282_v41, %v317_v48  ;;  %v300_v55 = vmax.f32 %v297_v49, 0.0  ;;  %v315_v57 = vmax.f32 %v312_v52, 0.0 }
  0x2d   : >> { %v283_v56 = vmax.f32 %v265_v50, %v280_v51 }
  0x2e   : >> { %339 = vst.msk [vmem:[%s337_s4] sm:$0xf] %vm338_vm0, %v744_v53  ;;  %v745_v58 = vpack.c.bf16 %v320_v54, %v320_v54  ;;  %v318_v59 = vmax.f32 %v300_v55, %v315_v57 }
  0x2f   : > { %235 = sbr.rel (!%p233_p11) target bundleno = 29 (0x1d), region = 138 }
  0x30   : >> { %340 = vst.msk [vmem:[%s337_s4 + $0x4] sm:$0xf] %vm338_vm0, %v745_v58  ;;  %v321_v60 = vmax.f32 %v283_v56, %v318_v59 }
  0x32   : >> { %v746_v62 = vpack.c.bf16 %v321_v60, %v321_v60 }
  0x34   : >> { %v345_v63 = vsel %vm343_vm3, %v746_v62, %v344_v61 }
  0x35   : >> { %346 = vst [vmem:[%s337_s4 + $0x8] sm:$0x1] %v345_v63 }
  0x36   : > { %353 = sbr.rel (!%p1080_p5) target bundleno = 139 (0x8b), region = 43  ;;  %s729_s5 = sshll.u32 (%p1080_p5), %s960_s14, 3 }
  0x37   : > { %s751_s6 = smul.u32 (%p1080_p5), 24, %s960_s14  ;;  %s355_s7 = ssub.s32 (%p1080_p5), 9, %s729_s5 }
  0x38   : > { %s752_s8 = smul.u32 (%p1080_p5), 27, %s964_s15  ;;  %p356_p12 = scmp.lt.s32.totalorder (%p1080_p5), %s355_s7, 8 }
  0x3a   : > { %s363_s9 = sadd.s32 (%p1080_p5), %s752_s8, %s751_s6 }
  0x3b   : > { %s734_s10 = sshll.u32 (%p1080_p5), %s363_s9, 2 }
  0x3c   : > { %s1175_s23 = scalar_lea.vmem (%p1080_p5), %s1296_s3, %s734_s10  }
  0x3d   : > { %s1316_s7 = smov (!%p356_p12, %s355_s7), 8 }
  0x3e   : > { %s731_s11 = smul.u32 192, %s1316_s7 }
  0x3f   : > { %s366_s22 = smul.u32 3, %s1316_s7 }
  0x40   : > { %p735_p13 = scmp.eq.s32.totalorder %s731_s11, 0 }
  0x41   : > { %882 = sdivrem.u32 (!%p735_p13), %s366_s22, 24 }
  0x42   : > { %369 = sbr.rel (%p735_p13) target bundleno = 139 (0x8b), region = 47 }
  0x4a   : > { %s1180_s14 = spop.drf %882 }
  0x4b   : > { %p736_p0 = scmp.le.s32.totalorder %s1180_s14, 0 }
  0x4c   : > { %s1298_s15 = smov (!%p736_p0), %s1175_s23  ;;  %s1299_s24 = smov (!%p736_p0), %s1112_s25 }
  0x4d   : > { %646 = sbr.rel (%p736_p0) target bundleno = 110 (0x6e), region = 143  ;;  %s1189_s26 = smov (!%p736_p0), 0  }
  0x4e   : > { %s1191_s28 = smov (!%p736_p0), 0  }
  0x54 LB: >> { %v386_v0 = vld [vmem:[%s988_s24] sm:$0xf]  ;;  %v388_v1 = vld [vmem:[%s988_s24 + $0x4] sm:$0xf]  ;;  %v390_v2 = vld [vmem:[%s988_s24 + $0x8] sm:$0xf]  ;;  %s996_s28 = sphi %s1191_s28, %s380_s28   ;;  %s992_s26 = sphi %s1189_s26, %s1300_s26   ;;  %s988_s24 = sphi %s1299_s24, %s439_s24   ;;  %s984_s15 = sphi %s1298_s15, %s440_s15  }
  0x55   : >> { %387 = vst [vmem:[%s984_s15] sm:$0xf] %v386_v0  ;;  %389 = vst [vmem:[%s984_s15 + $0x4] sm:$0xf] %v388_v1  ;;  %v392_v3 = vld [vmem:[%s988_s24 + $0xc] sm:$0xf]  ;;  %s434_s29 = sadd.s32 1, %s992_s26 }
  0x56   : >> { %391 = vst [vmem:[%s984_s15 + $0x8] sm:$0xf] %v390_v2  ;;  %v394_v4 = vld [vmem:[%s988_s24 + $0x10] sm:$0xf]  ;;  %v396_v5 = vld [vmem:[%s988_s24 + $0x14] sm:$0xf]  ;;  %p435_p1 = scmp.ge.s32.totalorder %s434_s29, %s1180_s14 }
  0x57   : >> { %393 = vst [vmem:[%s984_s15 + $0xc] sm:$0xf] %v392_v3  ;;  %395 = vst [vmem:[%s984_s15 + $0x10] sm:$0xf] %v394_v4  ;;  %v398_v6 = vld [vmem:[%s988_s24 + $0x18] sm:$0xf] }
  0x58   : >> { %397 = vst [vmem:[%s984_s15 + $0x14] sm:$0xf] %v396_v5  ;;  %v400_v7 = vld [vmem:[%s988_s24 + $0x1c] sm:$0xf]  ;;  %v402_v8 = vld [vmem:[%s988_s24 + $0x20] sm:$0xf] }
  0x59   : >> { %399 = vst [vmem:[%s984_s15 + $0x18] sm:$0xf] %v398_v6  ;;  %401 = vst [vmem:[%s984_s15 + $0x1c] sm:$0xf] %v400_v7  ;;  %v404_v9 = vld [vmem:[%s988_s24 + $0x24] sm:$0xf] }
  0x5a   : >> { %403 = vst [vmem:[%s984_s15 + $0x20] sm:$0xf] %v402_v8  ;;  %v406_v10 = vld [vmem:[%s988_s24 + $0x28] sm:$0xf]  ;;  %v408_v11 = vld [vmem:[%s988_s24 + $0x2c] sm:$0xf] }
  0x5b   : >> { %405 = vst [vmem:[%s984_s15 + $0x24] sm:$0xf] %v404_v9  ;;  %407 = vst [vmem:[%s984_s15 + $0x28] sm:$0xf] %v406_v10  ;;  %v410_v12 = vld [vmem:[%s988_s24 + $0x30] sm:$0xf] }
  0x5c   : >> { %409 = vst [vmem:[%s984_s15 + $0x2c] sm:$0xf] %v408_v11  ;;  %v412_v13 = vld [vmem:[%s988_s24 + $0x34] sm:$0xf]  ;;  %v414_v14 = vld [vmem:[%s988_s24 + $0x38] sm:$0xf] }
  0x5d   : >> { %411 = vst [vmem:[%s984_s15 + $0x30] sm:$0xf] %v410_v12  ;;  %413 = vst [vmem:[%s984_s15 + $0x34] sm:$0xf] %v412_v13  ;;  %v416_v15 = vld [vmem:[%s988_s24 + $0x3c] sm:$0xf] }
  0x5e   : >> { %415 = vst [vmem:[%s984_s15 + $0x38] sm:$0xf] %v414_v14  ;;  %v418_v16 = vld [vmem:[%s988_s24 + $0x40] sm:$0xf]  ;;  %v420_v17 = vld [vmem:[%s988_s24 + $0x44] sm:$0xf] }
  0x5f   : >> { %417 = vst [vmem:[%s984_s15 + $0x3c] sm:$0xf] %v416_v15  ;;  %419 = vst [vmem:[%s984_s15 + $0x40] sm:$0xf] %v418_v16  ;;  %v422_v18 = vld [vmem:[%s988_s24 + $0x48] sm:$0xf] }
  0x60   : >> { %421 = vst [vmem:[%s984_s15 + $0x44] sm:$0xf] %v420_v17  ;;  %v424_v19 = vld [vmem:[%s988_s24 + $0x4c] sm:$0xf]  ;;  %v426_v20 = vld [vmem:[%s988_s24 + $0x50] sm:$0xf] }
  0x61   : >> { %423 = vst [vmem:[%s984_s15 + $0x48] sm:$0xf] %v422_v18  ;;  %425 = vst [vmem:[%s984_s15 + $0x4c] sm:$0xf] %v424_v19  ;;  %v428_v21 = vld [vmem:[%s988_s24 + $0x54] sm:$0xf] }
  0x62   : >> { %427 = vst [vmem:[%s984_s15 + $0x50] sm:$0xf] %v426_v20  ;;  %v430_v22 = vld [vmem:[%s988_s24 + $0x58] sm:$0xf]  ;;  %v432_v23 = vld [vmem:[%s988_s24 + $0x5c] sm:$0xf] }
  0x63   : >> { %429 = vst [vmem:[%s984_s15 + $0x54] sm:$0xf] %v428_v21  ;;  %431 = vst [vmem:[%s984_s15 + $0x58] sm:$0xf] %v430_v22  ;;  %s1318_s29 = smov (%p435_p1, %s434_s29), 0  ;;  %s380_s28 = sadd.s32 1, %s996_s28  }
  0x64   : >> { %433 = vst [vmem:[%s984_s15 + $0x5c] sm:$0xf] %v432_v23  ;;  %s437_s30 = smul.u32 96, %s1318_s29  ;;  %p379_p2 = scmp.ge.s32.totalorder %s380_s28, %s1180_s14 }
  0x65   : >> { %s1300_s26 = smov %s1318_s29 }
  0x66   : >> { %s439_s24 = scalar_lea.vmem %s1112_s25, %s437_s30 [#allocation2]   ;;  %s440_s15 = scalar_lea.vmem %s1175_s23, %s437_s30  }
  0x67   : > { %382 = sbr.rel (!%p379_p2) target bundleno = 84 (0x54), region = 149 }
  0x6e PF: > { %884 = sdivrem.u32 %s366_s22, 24 }
  0x6f   : > { %s737_s4 = smul.u32 96, %s1180_s14 }
  0x71   : > { %s445_s5 = scalar_lea.vmem %s1112_s25, %s737_s4 [#allocation2]   ;;  %s447_s6 = scalar_lea.vmem %s1175_s23, %s737_s4  }
  0x77   : > { %s885_s8 = spop.drf %884 }
  0x78   : > { %p739_p3 = scmp.le.s32.totalorder %s885_s8, 0 }
  0x79   : > { %s998_s9 = smov (!%p739_p3), %s447_s6   ;;  %s1002_s10 = smov (!%p739_p3), %s445_s5  }
  0x7a   : > { %660 = sbr.rel (%p739_p3) target bundleno = 139 (0x8b), region = 154  ;;  %s1006_s11 = smov (!%p739_p3), 0  }
  0x7b   : > { %s1010_s12 = smov (!%p739_p3), 0  }
  0x81 LB: >> { %v457_v24 = vld [vmem:[%s1004_s10] sm:$0xf]  ;;  %s459_s7 = sadd.s32 1, %s1008_s11  ;;  %s451_s12 = sadd.s32 1, %s1012_s12   ;;  %s1012_s12 = sphi %s1010_s12, %s451_s12   ;;  %s1008_s11 = sphi %s1006_s11, %s1007_s11   ;;  %s1004_s10 = sphi %s1002_s10, %s464_s10   ;;  %s1000_s9 = sphi %s998_s9, %s465_s9  }
  0x82   : >> { %458 = vst [vmem:[%s1000_s9] sm:$0xf] %v457_v24  ;;  %p460_p4 = scmp.ge.s32.totalorder %s459_s7, %s885_s8  ;;  %p450_p5 = scmp.ge.s32.totalorder %s451_s12, %s885_s8 }
  0x84   : >> { %s1320_s7 = smov (%p460_p4, %s459_s7), 0  ;;  %453 = sbr.rel (!%p450_p5) target bundleno = 129 (0x81), region = 160 }
  0x85   : >> { %s740_s25 = sshll.u32 %s1320_s7, 2  ;;  %s1007_s11 = smov %s1320_s7  }
  0x86   : >> { %s464_s10 = scalar_lea.vmem %s445_s5, %s740_s25 [#allocation2]   ;;  %s465_s9 = scalar_lea.vmem %s447_s6, %s740_s25  }
  0x8b PF: > { %s13_s18 = sadd.s32 1, %s976_s18   ;;  %s1301_s12 = smov %s956_s13 }
  0x8c   : > { %p10_p6 = scmp.ge.s32.totalorder %s13_s18, 6   ;;  %s1302_s13 = smov %s1091_s27 }
  0x8d   : > { %s1303_s14 = smov %s968_s16  ;;  %s1304_s15 = smov %s972_s17 }
  0x8e   : > { %s1305_s16 = smov %s1308_s19  ;;  %s1306_s17 = smov %s1312_s20 }
  0x8f   :  { %12 = sbr.rel (!%p10_p6) target bundleno = 4 (0x4), region = 171 }

// kernel: small_cnn_forward.15
= control target key start
LH: loop header
LB: loop body
LE: loop exit
PB: predicated region body
PF: predicated region fallthrough
CT: control target
= control target key end

     0   :  { %s523_s12 = smov 0   ;;  %s525_s13 = smov 0   ;;  %s578_s0 = inlined_call_operand.vmem [shape: f32[2,12,20,128], index: 0, kind: input, shape index: {}]   ;;  %s579_s1 = inlined_call_operand.vmem [shape: f32[1,128], index: 1, kind: input, shape index: {}]   ;;  %s580_s2 = inlined_call_operand.vmem [shape: f32[1,128], index: 2, kind: input, shape index: {}]   ;;  %s581_s3 = inlined_call_operand.vmem [shape: bf16[2,6,10,128], index: 3, kind: output, shape index: {}]  }
   0x1   :  { %s527_s14 = smov 0  }
   0x2 LB: > { %s25_s15 = sadd.s32 1, %s493_s13  ;;  %p413_p0 = scmp.ge.s32.totalorder %s497_s14, 1  ;;  %s497_s14 = sphi %s527_s14, %s13_s14   ;;  %s493_s13 = sphi %s525_s13, %s583_s13   ;;  %s489_s12 = sphi %s523_s12, %s582_s12  }
   0x3   : > { %p27_p1 = scmp.ge.s32.totalorder %s25_s15, 2  ;;  %p159_p2 = scmp.lt.s32.totalorder %s497_s14, 3 }
   0x5   : > { %s585_s15 = smov (%p27_p1, %s25_s15), 0  ;;  %p160_p3 = pnand %p413_p0, %p159_p2 }
   0x6   : > { %p194_p4 = scmp.lt.s32.totalorder (!%p160_p3), %s489_s12, 1  ;;  %v419_v0 = vld [vmem:[%s579_s1] ss:$0 sm:$0xff] (!%p160_p3)  ;;  %s557_s28 = smov (!%p160_p3), 0  }
   0x7   : > { %163 = sbr.rel (%p160_p3) target bundleno = 39 (0x27), region = 32  ;;  %v420_v1 = vld [vmem:[%s580_s2] ss:$0 sm:$0xff] (!%p160_p3) }
   0xe   : > { %s587_s12 = smov (!%p194_p4, %s489_s12), 1 }
   0xf   : > { %s437_s20 = smul.u32 288, %s587_s12 }
  0x10   : > { %s438_s21 = smul.u32 48, %s587_s12 }
  0x11   : > { %s550_s24 = scalar_lea.vmem %s578_s0, %s437_s20 }
  0x12   : > { %s555_s27 = scalar_lea.vmem %s581_s3, %s438_s21 }
  0x13 LB: >> { %s417_s29 = smul.u32 48, %s501_s28  ;;  %s436_s4 = sshll.u32 %s501_s28, 3  ;;  %s501_s28 = sphi %s557_s28, %s222_s28  }
  0x14   : >> { %s294_s5 = scalar_lea.vmem %s555_s27, %s436_s4  ;;  %s222_s28 = sadd.s32 1, %s501_s28  }
  0x15   : >> { %s225_s30 = scalar_lea.vmem %s550_s24, %s417_s29  ;;  %p219_p5 = scmp.ge.s32.totalorder %s222_s28, 6  }
  0x16   : >> { %v226_v2 = vld [vmem:[%s225_s30] ss:$2 sm:$0xff]  ;;  %v421_v3 = vld [vmem:[%s225_s30 + $0x1] ss:$2 sm:$0xff] }
  0x17   : >> { %v425_v4 = vld [vmem:[%s225_s30 + $0x18] ss:$2 sm:$0xff]  ;;  %v235_v5 = vmul.f32 %v419_v0, %v226_v2  ;;  %v251_v6 = vmul.f32 %v421_v3, %v419_v0  ;;  %v427_v8 = vld [vmem:[%s225_s30 + $0x19] ss:$2 sm:$0xff] }
  0x18   : >> { %v265_v7 = vmul.f32 %v425_v4, %v419_v0  ;;  %v418_v9 = vld [vmem:[%s225_s30 + $0x10] ss:$2 sm:$0x3]  ;;  %v275_v10 = vmul.f32 %v427_v8, %v419_v0  ;;  %v422_v12 = vld [vmem:[%s225_s30 + $0x11] ss:$2 sm:$0x3] }
  0x19   : >> { %v236_v11 = vmul.f32 %v419_v0, %v418_v9  ;;  %v426_v13 = vld [vmem:[%s225_s30 + $0x28] ss:$2 sm:$0x3]  ;;  %v243_v14 = vadd.f32 %v420_v1, %v235_v5  ;;  %v253_v15 = vadd.f32 %v420_v1, %v251_v6  ;;  %v252_v17 = vmul.f32 %v422_v12, %v419_v0  ;;  %v428_v18 = vld [vmem:[%s225_s30 + $0x29] ss:$2 sm:$0x3] }
  0x1a   : >> { %v267_v16 = vadd.f32 %v420_v1, %v265_v7  ;;  %v277_v19 = vadd.f32 %v420_v1, %v275_v10  ;;  %v266_v21 = vmul.f32 %v426_v13, %v419_v0  ;;  %v276_v22 = vmul.f32 %v428_v18, %v419_v0 }
  0x1b   : >> { %v244_v20 = vadd.f32 %v420_v1, %v236_v11  ;;  %v245_v23 = vmax.f32 %v243_v14, 0.0  ;;  %v255_v24 = vmax.f32 %v253_v15, 0.0  ;;  %v254_v26 = vadd.f32 %v420_v1, %v252_v17 }
  0x1c   : >> { %v269_v25 = vmax.f32 %v267_v16, 0.0  ;;  %v279_v27 = vmax.f32 %v277_v19, 0.0  ;;  %v268_v29 = vadd.f32 %v420_v1, %v266_v21  ;;  %v278_v30 = vadd.f32 %v420_v1, %v276_v22 }
  0x1d   : >> { %v246_v28 = vmax.f32 %v244_v20, 0.0  ;;  %v257_v31 = vmax.f32 %v245_v23, %v255_v24  ;;  %v256_v32 = vmax.f32 %v254_v26, 0.0 }
  0x1e   : >> { %v281_v33 = vmax.f32 %v269_v25, %v279_v27  ;;  %v270_v34 = vmax.f32 %v268_v29, 0.0  ;;  %v280_v35 = vmax.f32 %v278_v30, 0.0 }
  0x1f   : >> { %v258_v36 = vmax.f32 %v246_v28, %v256_v32 }
  0x20   : >> { %v283_v37 = vmax.f32 %v257_v31, %v281_v33  ;;  %v282_v38 = vmax.f32 %v270_v34, %v280_v35  ;;  %221 = sbr.rel (!%p219_p5) target bundleno = 19 (0x13), region = 78 }
  0x22   : >> { %v434_v39 = vpack.c.bf16 %v283_v37, %v283_v37  ;;  %v284_v40 = vmax.f32 %v258_v36, %v282_v38 }
  0x24   : >> { %295 = vst [vmem:[%s294_s5] sm:$0xf] %v434_v39  ;;  %v435_v41 = vpack.c.bf16 %v284_v40, %v284_v40 }
  0x26   : >> { %296 = vst [vmem:[%s294_s5 + $0x4] sm:$0x1] %v435_v41 }
  0x27 PF: > { %s13_s14 = sadd.s32 1, %s497_s14   ;;  %s582_s12 = smov %s493_s13 }
  0x28   : > { %p10_p6 = scmp.ge.s32.totalorder %s13_s14, 4   ;;  %s583_s13 = smov %s585_s15 }
  0x2a   :  { %12 = sbr.rel (!%p10_p6) target bundleno = 2 (0x2), region = 89 }

// kernel: small_cnn_forward.14
= control target key start
LH: loop header
LB: loop body
LE: loop exit
PB: predicated region body
PF: predicated region fallthrough
CT: control target
= control target key end

     0   :  { %v1509_v0 = vmov 0   ;;  %s2231_s1 = inlined_call_operand.vmem [shape: bf16[256,128], index: 1, kind: input, shape index: {}]   ;;  %s2232_s0 = inlined_call_operand.vmem [shape: bf16[480,256], index: 0, kind: input, shape index: {}]   ;;  %s2233_s2 = inlined_call_operand.vmem [shape: f32[1,128], index: 2, kind: input, shape index: {}]   ;;  %s2234_s3 = inlined_call_operand.vmem [shape: f32[480,128], index: 3, kind: output, shape index: {0}]   ;;  %s2235_s4 = inlined_call_operand.vmem [shape: f32[8,128], index: 4, kind: output, shape index: {1}]   ;;  %s2236_s5 = inlined_call_operand.vmem [shape: f32[8,128], index: 5, kind: output, shape index: {2}]  }
   0x1   :  { %513 = vmatprep.subr.bf16.mxu0 %v1509_v0  ;;  %v1403_v1 = vld [vmem:[%s2231_s1] sm:$0xff]   ;;  %1370 = vmatprep.subr.bf16.mxu1 %v1509_v0  ;;  %v1404_v2 = vld [vmem:[%s2231_s1 + $0x8] sm:$0xff]   ;;  %v1405_v3 = vld [vmem:[%s2231_s1 + $0x10] sm:$0xff]  }
   0x2   :  { %514 = vmatpush1.bf16.msra.mxu0 %v1403_v1  ;;  %1386 = vmatpush1.bf16.msra.mxu1 %v1403_v1  ;;  %v1406_v4 = vld [vmem:[%s2231_s1 + $0x18] sm:$0xff]   ;;  %v1407_v5 = vld [vmem:[%s2231_s1 + $0x20] sm:$0xff]   ;;  %v1408_v7 = vld [vmem:[%s2231_s1 + $0x28] sm:$0xff]  }
   0x3   :  { %515 = vmatprep.subr.bf16.mxu0 %v1509_v0  ;;  %1371 = vmatprep.subr.bf16.mxu1 %v1509_v0  ;;  %v1421_v6 = vld [vmem:[%s2232_s0 + $0x4] ss:$8 sps:$4 sm:$0xff]   ;;  %v1409_v8 = vld [vmem:[%s2231_s1 + $0x30] sm:$0xff]   ;;  %v1410_v9 = vld [vmem:[%s2231_s1 + $0x38] sm:$0xff]  }
   0x4   :  { %545 = vmatprep.mubr.bf16.mxu0 %v1421_v6  ;;  %v1445_v10 = vld [vmem:[%s2232_s0 + $0xf4] ss:$8 sps:$4 sm:$0xff]   ;;  %v1411_v11 = vld [vmem:[%s2231_s1 + $0x40] sm:$0xff]   ;;  %v1412_v12 = vld [vmem:[%s2231_s1 + $0x48] sm:$0xff]  }
   0x5   :  { %665 = vmatprep.mubr.bf16.mxu1 %v1445_v10  ;;  %v1413_v13 = vld [vmem:[%s2231_s1 + $0x50] sm:$0xff]   ;;  %v1414_v14 = vld [vmem:[%s2231_s1 + $0x58] sm:$0xff]   ;;  %v1415_v15 = vld [vmem:[%s2231_s1 + $0x60] sm:$0xff]  }
   0x6   :  { %516 = vmatpush1.bf16.msra.mxu0 %v1404_v2  ;;  %1387 = vmatpush1.bf16.msra.mxu1 %v1404_v2  ;;  %v1416_v16 = vld [vmem:[%s2231_s1 + $0x68] sm:$0xff]   ;;  %v1417_v17 = vld [vmem:[%s2231_s1 + $0x70] sm:$0xff]   ;;  %v1418_v18 = vld [vmem:[%s2231_s1 + $0x78] sm:$0xff]  }
   0x7   :  { %517 = vmatprep.subr.bf16.mxu0 %v1509_v0  ;;  %1372 = vmatprep.subr.bf16.mxu1 %v1509_v0  ;;  %v1419_v19 = vld [vmem:[%s2232_s0] ss:$8 sps:$4 sm:$0xff]   ;;  %v1443_v20 = vld [vmem:[%s2232_s0 + $0xf0] ss:$8 sps:$4 sm:$0xff]   ;;  %v1422_v21 = vld [vmem:[%s2232_s0 + $0x14] ss:$8 sps:$4 sm:$0xff]  }
   0x8   :  { %v1449_v22 = vld [vmem:[%s2232_s0 + $0x104] ss:$8 sps:$4 sm:$0xff]   ;;  %v1424_v23 = vld [vmem:[%s2232_s0 + $0x10] ss:$8 sps:$4 sm:$0xff]   ;;  %v1451_v24 = vld [vmem:[%s2232_s0 + $0x100] ss:$8 sps:$4 sm:$0xff]  }
   0x9   :  { %v1425_v25 = vld [vmem:[%s2232_s0 + $0x24] ss:$8 sps:$4 sm:$0xff]   ;;  %v1455_v26 = vld [vmem:[%s2232_s0 + $0x114] ss:$8 sps:$4 sm:$0xff]   ;;  %v1427_v27 = vld [vmem:[%s2232_s0 + $0x20] ss:$8 sps:$4 sm:$0xff]  }
   0xa   :  { %518 = vmatpush1.bf16.msra.mxu0 %v1405_v3  ;;  %1388 = vmatpush1.bf16.msra.mxu1 %v1405_v3  ;;  %v1457_v28 = vld [vmem:[%s2232_s0 + $0x110] ss:$8 sps:$4 sm:$0xff]   ;;  %v1428_v29 = vld [vmem:[%s2232_s0 + $0x34] ss:$8 sps:$4 sm:$0xff]   ;;  %v1461_v30 = vld [vmem:[%s2232_s0 + $0x124] ss:$8 sps:$4 sm:$0xff]  }
   0xb   :  { %519 = vmatprep.subr.bf16.mxu0 %v1509_v0  ;;  %1373 = vmatprep.subr.bf16.mxu1 %v1509_v0  ;;  %v1430_v31 = vld [vmem:[%s2232_s0 + $0x30] ss:$8 sps:$4 sm:$0xff]   ;;  %v1463_v32 = vld [vmem:[%s2232_s0 + $0x120] ss:$8 sps:$4 sm:$0xff]   ;;  %v1431_v33 = vld [vmem:[%s2232_s0 + $0x44] ss:$8 sps:$4 sm:$0xff]  }
   0xc   :  { %v1467_v34 = vld [vmem:[%s2232_s0 + $0x134] ss:$8 sps:$4 sm:$0xff]   ;;  %v1433_v35 = vld [vmem:[%s2232_s0 + $0x40] ss:$8 sps:$4 sm:$0xff]   ;;  %v1469_v36 = vld [vmem:[%s2232_s0 + $0x130] ss:$8 sps:$4 sm:$0xff]  }
   0xd   :  { %v1434_v37 = vld [vmem:[%s2232_s0 + $0x54] ss:$8 sps:$4 sm:$0xff]   ;;  %v1473_v38 = vld [vmem:[%s2232_s0 + $0x144] ss:$8 sps:$4 sm:$0xff]   ;;  %v1436_v39 = vld [vmem:[%s2232_s0 + $0x50] ss:$8 sps:$4 sm:$0xff]  }
   0xe   :  { %520 = vmatpush1.bf16.msra.mxu0 %v1406_v4  ;;  %1389 = vmatpush1.bf16.msra.mxu1 %v1406_v4  ;;  %v1475_v40 = vld [vmem:[%s2232_s0 + $0x140] ss:$8 sps:$4 sm:$0xff]   ;;  %v1437_v41 = vld [vmem:[%s2232_s0 + $0x64] ss:$8 sps:$4 sm:$0xff]   ;;  %v1479_v42 = vld [vmem:[%s2232_s0 + $0x154] ss:$8 sps:$4 sm:$0xff]  }
   0xf   :  { %521 = vmatprep.subr.bf16.mxu0 %v1509_v0  ;;  %1374 = vmatprep.subr.bf16.mxu1 %v1509_v0  ;;  %v1439_v43 = vld [vmem:[%s2232_s0 + $0x60] ss:$8 sps:$4 sm:$0xff]   ;;  %v1481_v44 = vld [vmem:[%s2232_s0 + $0x150] ss:$8 sps:$4 sm:$0xff]   ;;  %v1440_v45 = vld [vmem:[%s2232_s0 + $0x74] ss:$8 sps:$4 sm:$0xff]  }
  0x10   :  { %v1485_v46 = vld [vmem:[%s2232_s0 + $0x164] ss:$8 sps:$4 sm:$0xff]   ;;  %v1442_v47 = vld [vmem:[%s2232_s0 + $0x70] ss:$8 sps:$4 sm:$0xff]   ;;  %v1487_v48 = vld [vmem:[%s2232_s0 + $0x160] ss:$8 sps:$4 sm:$0xff]  }
  0x11   :  { %v1446_v49 = vld [vmem:[%s2232_s0 + $0x84] ss:$8 sps:$4 sm:$0xff]   ;;  %v1488_v50 = vld [vmem:[%s2232_s0 + $0x174] ss:$8 sps:$4 sm:$0xff]   ;;  %v1448_v51 = vld [vmem:[%s2232_s0 + $0x80] ss:$8 sps:$4 sm:$0xff]  }
  0x12   :  { %522 = vmatpush1.bf16.msra.mxu0 %v1407_v5  ;;  %1390 = vmatpush1.bf16.msra.mxu1 %v1407_v5  ;;  %v1490_v52 = vld [vmem:[%s2232_s0 + $0x170] ss:$8 sps:$4 sm:$0xff]   ;;  %v1452_v53 = vld [vmem:[%s2232_s0 + $0x94] ss:$8 sps:$4 sm:$0xff]   ;;  %v1491_v54 = vld [vmem:[%s2232_s0 + $0x184] ss:$8 sps:$4 sm:$0xff]  }
  0x13   :  { %523 = vmatprep.subr.bf16.mxu0 %v1509_v0  ;;  %1375 = vmatprep.subr.bf16.mxu1 %v1509_v0  ;;  %v1454_v55 = vld [vmem:[%s2232_s0 + $0x90] ss:$8 sps:$4 sm:$0xff]   ;;  %v1493_v56 = vld [vmem:[%s2232_s0 + $0x180] ss:$8 sps:$4 sm:$0xff]   ;;  %v1458_v57 = vld [vmem:[%s2232_s0 + $0xa4] ss:$8 sps:$4 sm:$0xff]  }
  0x14   :  { %v1494_v58 = vld [vmem:[%s2232_s0 + $0x194] ss:$8 sps:$4 sm:$0xff]   ;;  %v1460_v59 = vld [vmem:[%s2232_s0 + $0xa0] ss:$8 sps:$4 sm:$0xff]   ;;  %v1496_v60 = vld [vmem:[%s2232_s0 + $0x190] ss:$8 sps:$4 sm:$0xff]  }
  0x15   :  { %v1464_v61 = vld [vmem:[%s2232_s0 + $0xb4] ss:$8 sps:$4 sm:$0xff]   ;;  %v1497_v62 = vld [vmem:[%s2232_s0 + $0x1a4] ss:$8 sps:$4 sm:$0xff]   ;;  %v1466_v63 = vld [vmem:[%s2232_s0 + $0xb0] ss:$8 sps:$4 sm:$0xff]  }
  0x16   :  { %524 = vmatpush1.bf16.msra.mxu0 %v1408_v7  ;;  %1391 = vmatpush1.bf16.msra.mxu1 %v1408_v7  ;;  %v1470_v1 = vld [vmem:[%s2232_s0 + $0xc4] ss:$8 sps:$4 sm:$0xff]   ;;  %v1500_v2 = vld [vmem:[%s2232_s0 + $0x1b4] ss:$8 sps:$4 sm:$0xff]   ;;  %v1472_v3 = vld [vmem:[%s2232_s0 + $0xc0] ss:$8 sps:$4 sm:$0xff]  }
  0x17   :  { %525 = vmatprep.subr.bf16.mxu0 %v1509_v0  ;;  %1376 = vmatprep.subr.bf16.mxu1 %v1509_v0  ;;  %v1502_v4 = vld [vmem:[%s2232_s0 + $0x1b0] ss:$8 sps:$4 sm:$0xff]   ;;  %v1476_v5 = vld [vmem:[%s2232_s0 + $0xd4] ss:$8 sps:$4 sm:$0xff]   ;;  %v1503_v6 = vld [vmem:[%s2232_s0 + $0x1c4] ss:$8 sps:$4 sm:$0xff]  }
  0x18   :  { %v1478_v7 = vld [vmem:[%s2232_s0 + $0xd0] ss:$8 sps:$4 sm:$0xff]   ;;  %v1506_v10 = vld [vmem:[%s2232_s0 + $0x1d4] ss:$8 sps:$4 sm:$0xff]  }
  0x1a   :  { %526 = vmatpush1.bf16.msra.mxu0 %v1409_v8  ;;  %1392 = vmatpush1.bf16.msra.mxu1 %v1409_v8  ;;  %v1505_v8 = vld [vmem:[%s2232_s0 + $0x1c0] ss:$8 sps:$4 sm:$0xff]  }
  0x1b   :  { %527 = vmatprep.subr.bf16.mxu0 %v1509_v0  ;;  %1377 = vmatprep.subr.bf16.mxu1 %v1509_v0 }
  0x1e   :  { %528 = vmatpush1.bf16.msra.mxu0 %v1410_v9  ;;  %1393 = vmatpush1.bf16.msra.mxu1 %v1410_v9  ;;  %v1482_v9 = vld [vmem:[%s2232_s0 + $0xe4] ss:$8 sps:$4 sm:$0xff]  }
  0x1f   :  { %529 = vmatprep.subr.bf16.mxu0 %v1509_v0  ;;  %1378 = vmatprep.subr.bf16.mxu1 %v1509_v0 }
  0x22   :  { %530 = vmatpush1.bf16.msra.mxu0 %v1411_v11  ;;  %1394 = vmatpush1.bf16.msra.mxu1 %v1411_v11  ;;  %v1484_v11 = vld [vmem:[%s2232_s0 + $0xe0] ss:$8 sps:$4 sm:$0xff]  }
  0x23   :  { %531 = vmatprep.subr.bf16.mxu0 %v1509_v0  ;;  %1379 = vmatprep.subr.bf16.mxu1 %v1509_v0 }
  0x26   :  { %532 = vmatpush1.bf16.msra.mxu0 %v1412_v12  ;;  %1395 = vmatpush1.bf16.msra.mxu1 %v1412_v12  ;;  %v1508_v12 = vld [vmem:[%s2232_s0 + $0x1d0] ss:$8 sps:$4 sm:$0xff]  }
  0x27   :  { %533 = vmatprep.subr.bf16.mxu0 %v1509_v0  ;;  %1380 = vmatprep.subr.bf16.mxu1 %v1509_v0 }
  0x2a   :  { %534 = vmatpush1.bf16.msra.mxu0 %v1413_v13  ;;  %1396 = vmatpush1.bf16.msra.mxu1 %v1413_v13  ;;  %v1803_v13 = vld [vmem:[%s2233_s2] ss:$0 sm:$0xff] }
  0x2b   :  { %535 = vmatprep.subr.bf16.mxu0 %v1509_v0  ;;  %1381 = vmatprep.subr.bf16.mxu1 %v1509_v0 }
  0x2e   :  { %536 = vmatpush1.bf16.msra.mxu0 %v1414_v14  ;;  %1397 = vmatpush1.bf16.msra.mxu1 %v1414_v14 }
  0x2f   :  { %537 = vmatprep.subr.bf16.mxu0 %v1509_v0  ;;  %1382 = vmatprep.subr.bf16.mxu1 %v1509_v0 }
  0x32   :  { %538 = vmatpush1.bf16.msra.mxu0 %v1415_v15  ;;  %1398 = vmatpush1.bf16.msra.mxu1 %v1415_v15 }
  0x33   :  { %539 = vmatprep.subr.bf16.mxu0 %v1509_v0  ;;  %1383 = vmatprep.subr.bf16.mxu1 %v1509_v0 }
  0x36   :  { %540 = vmatpush1.bf16.msra.mxu0 %v1416_v16  ;;  %1399 = vmatpush1.bf16.msra.mxu1 %v1416_v16 }
  0x37   :  { %541 = vmatprep.subr.bf16.mxu0 %v1509_v0  ;;  %1384 = vmatprep.subr.bf16.mxu1 %v1509_v0 }
  0x3a   :  { %542 = vmatpush1.bf16.msra.mxu0 %v1417_v17  ;;  %1400 = vmatpush1.bf16.msra.mxu1 %v1417_v17 }
  0x3b   :  { %543 = vmatprep.subr.bf16.mxu0 %v1509_v0  ;;  %1385 = vmatprep.subr.bf16.mxu1 %v1509_v0  ;;  %v1499_v0 = vld [vmem:[%s2232_s0 + $0x1a0] ss:$8 sps:$4 sm:$0xff]  }
  0x3e   :  { %544 = vmatpush1.bf16.msra.mxu0 %v1418_v18  ;;  %1401 = vmatpush1.bf16.msra.mxu1 %v1418_v18 }
  0x41   :  { %546 = vmatmul.mubr.bf16.vlgmr.msra.gmra.mrb[0].mxu0 %v1419_v19  ;;  %666 = vmatmul.mubr.bf16.vlgmr.msra.gmra.mrb[0].mxu1 %v1443_v20 }
  0x42   :  { %553 = vmatprep.mubr.bf16.mxu0 %v1422_v21  ;;  %673 = vmatprep.mubr.bf16.mxu1 %v1449_v22 }
  0x49   :  { %554 = vmatmul.mubr.bf16.gmra.mrb[4].mxu0 %v1424_v23  ;;  %674 = vmatmul.mubr.bf16.gmra.mrb[4].mxu1 %v1451_v24 }
  0x4a   :  { %561 = vmatprep.mubr.bf16.mxu0 %v1425_v25  ;;  %681 = vmatprep.mubr.bf16.mxu1 %v1455_v26 }
  0x51   :  { %562 = vmatmul.mubr.bf16.gmra.mrb[8].mxu0 %v1427_v27  ;;  %682 = vmatmul.mubr.bf16.gmra.mrb[8].mxu1 %v1457_v28 }
  0x52   :  { %569 = vmatprep.mubr.bf16.mxu0 %v1428_v29  ;;  %689 = vmatprep.mubr.bf16.mxu1 %v1461_v30 }
  0x59   :  { %570 = vmatmul.mubr.bf16.gmra.mrb[12].mxu0 %v1430_v31  ;;  %690 = vmatmul.mubr.bf16.gmra.mrb[12].mxu1 %v1463_v32 }
  0x5a   :  { %577 = vmatprep.mubr.bf16.mxu0 %v1431_v33  ;;  %697 = vmatprep.mubr.bf16.mxu1 %v1467_v34 }
  0x61   :  { %578 = vmatmul.mubr.bf16.gmra.mrb[16].mxu0 %v1433_v35  ;;  %698 = vmatmul.mubr.bf16.gmra.mrb[16].mxu1 %v1469_v36 }
  0x62   :  { %585 = vmatprep.mubr.bf16.mxu0 %v1434_v37  ;;  %705 = vmatprep.mubr.bf16.mxu1 %v1473_v38 }
  0x69   :  { %586 = vmatmul.mubr.bf16.gmra.mrb[20].mxu0 %v1436_v39  ;;  %706 = vmatmul.mubr.bf16.gmra.mrb[20].mxu1 %v1475_v40 }
  0x6a   :  { %593 = vmatprep.mubr.bf16.mxu0 %v1437_v41  ;;  %713 = vmatprep.mubr.bf16.mxu1 %v1479_v42 }
  0x71   :  { %594 = vmatmul.mubr.bf16.gmra.mrb[24].mxu0 %v1439_v43  ;;  %714 = vmatmul.mubr.bf16.gmra.mrb[24].mxu1 %v1481_v44 }
  0x72   :  { %601 = vmatprep.mubr.bf16.mxu0 %v1440_v45  ;;  %721 = vmatprep.mubr.bf16.mxu1 %v1485_v46 }
  0x79   :  { %602 = vmatmul.mubr.bf16.gmra.mrb[28].mxu0 %v1442_v47  ;;  %722 = vmatmul.mubr.bf16.gmra.mrb[28].mxu1 %v1487_v48 }
  0x7a   :  { %609 = vmatprep.mubr.bf16.mxu0 %v1446_v49  ;;  %729 = vmatprep.mubr.bf16.mxu1 %v1488_v50 }
  0x81   :  { %610 = vmatmul.mubr.bf16.gmra.mrb[32].mxu0 %v1448_v51  ;;  %730 = vmatmul.mubr.bf16.gmra.mrb[32].mxu1 %v1490_v52 }
  0x82   :  { %617 = vmatprep.mubr.bf16.mxu0 %v1452_v53  ;;  %737 = vmatprep.mubr.bf16.mxu1 %v1491_v54 }
  0x89   :  { %618 = vmatmul.mubr.bf16.gmra.mrb[36].mxu0 %v1454_v55  ;;  %738 = vmatmul.mubr.bf16.gmra.mrb[36].mxu1 %v1493_v56 }
  0x8a   :  { %625 = vmatprep.mubr.bf16.mxu0 %v1458_v57  ;;  %745 = vmatprep.mubr.bf16.mxu1 %v1494_v58 }
  0x91   :  { %626 = vmatmul.mubr.bf16.gmra.mrb[40].mxu0 %v1460_v59  ;;  %746 = vmatmul.mubr.bf16.gmra.mrb[40].mxu1 %v1496_v60 }
  0x92   :  { %633 = vmatprep.mubr.bf16.mxu0 %v1464_v61  ;;  %753 = vmatprep.mubr.bf16.mxu1 %v1497_v62 }
  0x99   :  { %634 = vmatmul.mubr.bf16.gmra.mrb[44].mxu0 %v1466_v63  ;;  %754 = vmatmul.mubr.bf16.gmra.mrb[44].mxu1 %v1499_v0 }
  0x9a   :  { %641 = vmatprep.mubr.bf16.mxu0 %v1470_v1  ;;  %761 = vmatprep.mubr.bf16.mxu1 %v1500_v2 }
  0xa1   :  { %642 = vmatmul.mubr.bf16.gmra.mrb[48].mxu0 %v1472_v3  ;;  %762 = vmatmul.mubr.bf16.gmra.mrb[48].mxu1 %v1502_v4 }
  0xa2   :  { %649 = vmatprep.mubr.bf16.mxu0 %v1476_v5  ;;  %769 = vmatprep.mubr.bf16.mxu1 %v1503_v6 }
  0xa9   :  { %650 = vmatmul.mubr.bf16.gmra.mrb[52].mxu0 %v1478_v7  ;;  %770 = vmatmul.mubr.bf16.gmra.mrb[52].mxu1 %v1505_v8 }
  0xaa   :  { %657 = vmatprep.mubr.bf16.mxu0 %v1482_v9  ;;  %777 = vmatprep.mubr.bf16.mxu1 %v1506_v10 }
  0xb1   :  { %658 = vmatmul.mubr.bf16.gmra.mrb[56].mxu0 %v1484_v11  ;;  %778 = vmatmul.mubr.bf16.gmra.mrb[56].mxu1 %v1508_v12 }
 0x114   :  { %v547_v14 = vpop.f32.mrb[0].mxu0  ;;  %v667_v15 = vpop.f32.mrb[0].mxu1 }
 0x115   :  { %v548_v16 = vadd.f32 %v1803_v13, %v547_v14  ;;  %v549_v17 = vpop.f32.mrb[1].mxu0  ;;  %v1807_v18 = vadd.f32 %v1803_v13, %v667_v15  ;;  %v669_v19 = vpop.f32.mrb[1].mxu1 }
 0x116   :  { %v550_v20 = vpop.f32.mrb[2].mxu0  ;;  %v670_v21 = vpop.f32.mrb[2].mxu1 }
 0x117   :  { %786 = vst [vmem:[%s2234_s3] sm:$0xff] %v548_v16  ;;  %v551_v22 = vadd.f32 %v1803_v13, %v550_v20  ;;  %v552_v23 = vpop.f32.mrb[3].mxu0  ;;  %816 = vst [vmem:[%s2234_s3 + $0xf0] sm:$0xff] %v1807_v18  ;;  %v1818_v24 = vadd.f32 %v1803_v13, %v670_v21  ;;  %v672_v25 = vpop.f32.mrb[3].mxu1  ;;  %v1154_v26 = vmul.f32 %v548_v16, %v548_v16 }
 0x119   :  { %787 = vst [vmem:[%s2234_s3 + $0x8] sm:$0xff] %v551_v22  ;;  %v1089_v27 = vadd.f32 %v551_v22, %v548_v16  ;;  %v1155_v28 = vmul.f32 %v551_v22, %v551_v22  ;;  %817 = vst [vmem:[%s2234_s3 + $0xf8] sm:$0xff] %v1818_v24 }
 0x11b   :  { %v1214_v29 = vadd.f32 %v1155_v28, %v1154_v26 }
 0x11c   :  { %v555_v30 = vpop.f32.mrb[4].mxu0  ;;  %v675_v31 = vpop.f32.mrb[4].mxu1 }
 0x11d   :  { %v556_v32 = vadd.f32 %v1803_v13, %v555_v30  ;;  %v557_v33 = vpop.f32.mrb[5].mxu0  ;;  %v1829_v34 = vadd.f32 %v1803_v13, %v675_v31  ;;  %v677_v35 = vpop.f32.mrb[5].mxu1 }
 0x11e   :  { %v558_v36 = vpop.f32.mrb[6].mxu0  ;;  %v678_v37 = vpop.f32.mrb[6].mxu1 }
 0x11f   :  { %788 = vst [vmem:[%s2234_s3 + $0x10] sm:$0xff] %v556_v32  ;;  %v1090_v38 = vadd.f32 %v1089_v27, %v556_v32  ;;  %v1156_v39 = vmul.f32 %v556_v32, %v556_v32  ;;  %v559_v40 = vadd.f32 %v1803_v13, %v558_v36  ;;  %v560_v41 = vpop.f32.mrb[7].mxu0  ;;  %818 = vst [vmem:[%s2234_s3 + $0x100] sm:$0xff] %v1829_v34  ;;  %v680_v42 = vpop.f32.mrb[7].mxu1 }
 0x120   :  { %v1840_v43 = vadd.f32 %v1803_v13, %v678_v37 }
 0x121   :  { %v1215_v44 = vadd.f32 %v1214_v29, %v1156_v39  ;;  %789 = vst [vmem:[%s2234_s3 + $0x18] sm:$0xff] %v559_v40  ;;  %v1091_v45 = vadd.f32 %v1090_v38, %v559_v40  ;;  %v1157_v46 = vmul.f32 %v559_v40, %v559_v40 }
 0x122   :  { %819 = vst [vmem:[%s2234_s3 + $0x108] sm:$0xff] %v1840_v43 }
 0x123   :  { %v1216_v47 = vadd.f32 %v1215_v44, %v1157_v46 }
 0x124   :  { %v563_v48 = vpop.f32.mrb[8].mxu0  ;;  %v683_v49 = vpop.f32.mrb[8].mxu1 }
 0x125   :  { %v564_v50 = vadd.f32 %v1803_v13, %v563_v48  ;;  %v565_v51 = vpop.f32.mrb[9].mxu0  ;;  %v1851_v52 = vadd.f32 %v1803_v13, %v683_v49  ;;  %v685_v53 = vpop.f32.mrb[9].mxu1 }
 0x126   :  { %v566_v54 = vpop.f32.mrb[10].mxu0  ;;  %v686_v55 = vpop.f32.mrb[10].mxu1 }
 0x127   :  { %790 = vst [vmem:[%s2234_s3 + $0x20] sm:$0xff] %v564_v50  ;;  %v1092_v56 = vadd.f32 %v1091_v45, %v564_v50  ;;  %v1158_v57 = vmul.f32 %v564_v50, %v564_v50  ;;  %v567_v58 = vadd.f32 %v1803_v13, %v566_v54  ;;  %v568_v59 = vpop.f32.mrb[11].mxu0  ;;  %820 = vst [vmem:[%s2234_s3 + $0x110] sm:$0xff] %v1851_v52  ;;  %v688_v60 = vpop.f32.mrb[11].mxu1 }
 0x128   :  { %v1862_v61 = vadd.f32 %v1803_v13, %v686_v55 }
 0x129   :  { %v1217_v62 = vadd.f32 %v1216_v47, %v1158_v57  ;;  %791 = vst [vmem:[%s2234_s3 + $0x28] sm:$0xff] %v567_v58  ;;  %v1093_v63 = vadd.f32 %v1092_v56, %v567_v58  ;;  %v1159_v0 = vmul.f32 %v567_v58, %v567_v58 }
 0x12a   :  { %821 = vst [vmem:[%s2234_s3 + $0x118] sm:$0xff] %v1862_v61 }
 0x12b   :  { %v1218_v1 = vadd.f32 %v1217_v62, %v1159_v0 }
 0x12c   :  { %v571_v2 = vpop.f32.mrb[12].mxu0  ;;  %v691_v3 = vpop.f32.mrb[12].mxu1 }
 0x12d   :  { %v572_v4 = vadd.f32 %v1803_v13, %v571_v2  ;;  %v573_v5 = vpop.f32.mrb[13].mxu0  ;;  %v1873_v6 = vadd.f32 %v1803_v13, %v691_v3  ;;  %v693_v7 = vpop.f32.mrb[13].mxu1 }
 0x12e   :  { %v574_v8 = vpop.f32.mrb[14].mxu0  ;;  %v694_v9 = vpop.f32.mrb[14].mxu1 }
 0x12f   :  { %792 = vst [vmem:[%s2234_s3 + $0x30] sm:$0xff] %v572_v4  ;;  %v1094_v10 = vadd.f32 %v1093_v63, %v572_v4  ;;  %v1160_v11 = vmul.f32 %v572_v4, %v572_v4  ;;  %v575_v12 = vadd.f32 %v1803_v13, %v574_v8  ;;  %v576_v14 = vpop.f32.mrb[15].mxu0  ;;  %822 = vst [vmem:[%s2234_s3 + $0x120] sm:$0xff] %v1873_v6  ;;  %v696_v15 = vpop.f32.mrb[15].mxu1 }
 0x130   :  { %v1884_v16 = vadd.f32 %v1803_v13, %v694_v9 }
 0x131   :  { %v1219_v17 = vadd.f32 %v1218_v1, %v1160_v11  ;;  %793 = vst [vmem:[%s2234_s3 + $0x38] sm:$0xff] %v575_v12  ;;  %v1095_v19 = vadd.f32 %v1094_v10, %v575_v12  ;;  %v1161_v20 = vmul.f32 %v575_v12, %v575_v12 }
 0x132   :  { %823 = vst [vmem:[%s2234_s3 + $0x128] sm:$0xff] %v1884_v16 }
 0x133   :  { %v1220_v21 = vadd.f32 %v1219_v17, %v1161_v20 }
 0x134   :  { %v579_v22 = vpop.f32.mrb[16].mxu0  ;;  %v699_v23 = vpop.f32.mrb[16].mxu1 }
 0x135   :  { %v580_v25 = vadd.f32 %v1803_v13, %v579_v22  ;;  %v581_v26 = vpop.f32.mrb[17].mxu0  ;;  %v1895_v27 = vadd.f32 %v1803_v13, %v699_v23  ;;  %v701_v28 = vpop.f32.mrb[17].mxu1 }
 0x136   :  { %v582_v29 = vpop.f32.mrb[18].mxu0  ;;  %v702_v30 = vpop.f32.mrb[18].mxu1 }
 0x137   :  { %794 = vst [vmem:[%s2234_s3 + $0x40] sm:$0xff] %v580_v25  ;;  %v1096_v31 = vadd.f32 %v1095_v19, %v580_v25  ;;  %v1162_v32 = vmul.f32 %v580_v25, %v580_v25  ;;  %v583_v33 = vadd.f32 %v1803_v13, %v582_v29  ;;  %v584_v35 = vpop.f32.mrb[19].mxu0  ;;  %824 = vst [vmem:[%s2234_s3 + $0x130] sm:$0xff] %v1895_v27  ;;  %v704_v36 = vpop.f32.mrb[19].mxu1 }
 0x138   :  { %v1906_v37 = vadd.f32 %v1803_v13, %v702_v30 }
 0x139   :  { %v1221_v38 = vadd.f32 %v1220_v21, %v1162_v32  ;;  %795 = vst [vmem:[%s2234_s3 + $0x48] sm:$0xff] %v583_v33  ;;  %v1097_v39 = vadd.f32 %v1096_v31, %v583_v33  ;;  %v1163_v40 = vmul.f32 %v583_v33, %v583_v33 }
 0x13a   :  { %825 = vst [vmem:[%s2234_s3 + $0x138] sm:$0xff] %v1906_v37 }
 0x13b   :  { %v1222_v41 = vadd.f32 %v1221_v38, %v1163_v40 }
 0x13c   :  { %v587_v42 = vpop.f32.mrb[20].mxu0  ;;  %v707_v44 = vpop.f32.mrb[20].mxu1 }
 0x13d   :  { %v588_v45 = vadd.f32 %v1803_v13, %v587_v42  ;;  %v589_v46 = vpop.f32.mrb[21].mxu0  ;;  %v1917_v47 = vadd.f32 %v1803_v13, %v707_v44  ;;  %v709_v48 = vpop.f32.mrb[21].mxu1 }
 0x13e   :  { %v590_v49 = vpop.f32.mrb[22].mxu0  ;;  %v710_v50 = vpop.f32.mrb[22].mxu1 }
 0x13f   :  { %796 = vst [vmem:[%s2234_s3 + $0x50] sm:$0xff] %v588_v45  ;;  %v1098_v51 = vadd.f32 %v1097_v39, %v588_v45  ;;  %v1164_v53 = vmul.f32 %v588_v45, %v588_v45  ;;  %v591_v54 = vadd.f32 %v1803_v13, %v590_v49  ;;  %v592_v55 = vpop.f32.mrb[23].mxu0  ;;  %826 = vst [vmem:[%s2234_s3 + $0x140] sm:$0xff] %v1917_v47  ;;  %v712_v56 = vpop.f32.mrb[23].mxu1 }
 0x140   :  { %v1928_v57 = vadd.f32 %v1803_v13, %v710_v50 }
 0x141   :  { %v1223_v58 = vadd.f32 %v1222_v41, %v1164_v53  ;;  %797 = vst [vmem:[%s2234_s3 + $0x58] sm:$0xff] %v591_v54  ;;  %v1099_v59 = vadd.f32 %v1098_v51, %v591_v54  ;;  %v1165_v60 = vmul.f32 %v591_v54, %v591_v54 }
 0x142   :  { %827 = vst [vmem:[%s2234_s3 + $0x148] sm:$0xff] %v1928_v57 }
 0x143   :  { %v1224_v62 = vadd.f32 %v1223_v58, %v1165_v60 }
 0x144   :  { %v595_v63 = vpop.f32.mrb[24].mxu0  ;;  %v715_v0 = vpop.f32.mrb[24].mxu1 }
 0x145   :  { %v596_v1 = vadd.f32 %v1803_v13, %v595_v63  ;;  %v597_v2 = vpop.f32.mrb[25].mxu0  ;;  %v1939_v3 = vadd.f32 %v1803_v13, %v715_v0  ;;  %v717_v4 = vpop.f32.mrb[25].mxu1 }
 0x146   :  { %v598_v5 = vpop.f32.mrb[26].mxu0  ;;  %v718_v7 = vpop.f32.mrb[26].mxu1 }
 0x147   :  { %798 = vst [vmem:[%s2234_s3 + $0x60] sm:$0xff] %v596_v1  ;;  %v1100_v8 = vadd.f32 %v1099_v59, %v596_v1  ;;  %v1166_v9 = vmul.f32 %v596_v1, %v596_v1  ;;  %v599_v10 = vadd.f32 %v1803_v13, %v598_v5  ;;  %v600_v11 = vpop.f32.mrb[27].mxu0  ;;  %828 = vst [vmem:[%s2234_s3 + $0x150] sm:$0xff] %v1939_v3  ;;  %v720_v12 = vpop.f32.mrb[27].mxu1 }
 0x148   :  { %v1950_v14 = vadd.f32 %v1803_v13, %v718_v7 }
 0x149   :  { %v1225_v15 = vadd.f32 %v1224_v62, %v1166_v9  ;;  %799 = vst [vmem:[%s2234_s3 + $0x68] sm:$0xff] %v599_v10  ;;  %v1101_v17 = vadd.f32 %v1100_v8, %v599_v10  ;;  %v1167_v19 = vmul.f32 %v599_v10, %v599_v10 }
 0x14a   :  { %829 = vst [vmem:[%s2234_s3 + $0x158] sm:$0xff] %v1950_v14 }
 0x14b   :  { %v1226_v20 = vadd.f32 %v1225_v15, %v1167_v19 }
 0x14c   :  { %v603_v21 = vpop.f32.mrb[28].mxu0  ;;  %v723_v22 = vpop.f32.mrb[28].mxu1 }
 0x14d   :  { %v604_v23 = vadd.f32 %v1803_v13, %v603_v21  ;;  %v605_v25 = vpop.f32.mrb[29].mxu0  ;;  %v1961_v26 = vadd.f32 %v1803_v13, %v723_v22  ;;  %v725_v28 = vpop.f32.mrb[29].mxu1 }
 0x14e   :  { %v606_v29 = vpop.f32.mrb[30].mxu0  ;;  %v726_v30 = vpop.f32.mrb[30].mxu1 }
 0x14f   :  { %800 = vst [vmem:[%s2234_s3 + $0x70] sm:$0xff] %v604_v23  ;;  %v1102_v31 = vadd.f32 %v1101_v17, %v604_v23  ;;  %v1168_v32 = vmul.f32 %v604_v23, %v604_v23  ;;  %v607_v33 = vadd.f32 %v1803_v13, %v606_v29  ;;  %v608_v35 = vpop.f32.mrb[31].mxu0  ;;  %830 = vst [vmem:[%s2234_s3 + $0x160] sm:$0xff] %v1961_v26  ;;  %v728_v36 = vpop.f32.mrb[31].mxu1 }
 0x150   :  { %v1972_v38 = vadd.f32 %v1803_v13, %v726_v30 }
 0x151   :  { %v1227_v39 = vadd.f32 %v1226_v20, %v1168_v32  ;;  %801 = vst [vmem:[%s2234_s3 + $0x78] sm:$0xff] %v607_v33  ;;  %v1103_v40 = vadd.f32 %v1102_v31, %v607_v33  ;;  %v1169_v41 = vmul.f32 %v607_v33, %v607_v33 }
 0x152   :  { %831 = vst [vmem:[%s2234_s3 + $0x168] sm:$0xff] %v1972_v38 }
 0x153   :  { %v1228_v42 = vadd.f32 %v1227_v39, %v1169_v41 }
 0x154   :  { %v611_v44 = vpop.f32.mrb[32].mxu0  ;;  %v731_v45 = vpop.f32.mrb[32].mxu1 }
 0x155   :  { %v612_v46 = vadd.f32 %v1803_v13, %v611_v44  ;;  %v613_v48 = vpop.f32.mrb[33].mxu0  ;;  %v1983_v49 = vadd.f32 %v1803_v13, %v731_v45  ;;  %v733_v50 = vpop.f32.mrb[33].mxu1 }
 0x156   :  { %v614_v51 = vpop.f32.mrb[34].mxu0  ;;  %v734_v53 = vpop.f32.mrb[34].mxu1 }
 0x157   :  { %802 = vst [vmem:[%s2234_s3 + $0x80] sm:$0xff] %v612_v46  ;;  %v1104_v54 = vadd.f32 %v1103_v40, %v612_v46  ;;  %v1170_v55 = vmul.f32 %v612_v46, %v612_v46  ;;  %v615_v56 = vadd.f32 %v1803_v13, %v614_v51  ;;  %v616_v58 = vpop.f32.mrb[35].mxu0  ;;  %832 = vst [vmem:[%s2234_s3 + $0x170] sm:$0xff] %v1983_v49  ;;  %v736_v59 = vpop.f32.mrb[35].mxu1 }
 0x158   :  { %v1994_v60 = vadd.f32 %v1803_v13, %v734_v53 }
 0x159   :  { %v1229_v62 = vadd.f32 %v1228_v42, %v1170_v55  ;;  %803 = vst [vmem:[%s2234_s3 + $0x88] sm:$0xff] %v615_v56  ;;  %v1105_v63 = vadd.f32 %v1104_v54, %v615_v56  ;;  %v1171_v0 = vmul.f32 %v615_v56, %v615_v56 }
 0x15a   :  { %833 = vst [vmem:[%s2234_s3 + $0x178] sm:$0xff] %v1994_v60 }
 0x15b   :  { %v1230_v1 = vadd.f32 %v1229_v62, %v1171_v0 }
 0x15c   :  { %v619_v2 = vpop.f32.mrb[36].mxu0  ;;  %v739_v4 = vpop.f32.mrb[36].mxu1 }
 0x15d   :  { %v620_v5 = vadd.f32 %v1803_v13, %v619_v2  ;;  %v621_v7 = vpop.f32.mrb[37].mxu0  ;;  %v2005_v8 = vadd.f32 %v1803_v13, %v739_v4  ;;  %v741_v9 = vpop.f32.mrb[37].mxu1 }
 0x15e   :  { %v622_v10 = vpop.f32.mrb[38].mxu0  ;;  %v742_v11 = vpop.f32.mrb[38].mxu1 }
 0x15f   :  { %804 = vst [vmem:[%s2234_s3 + $0x90] sm:$0xff] %v620_v5  ;;  %v1106_v12 = vadd.f32 %v1105_v63, %v620_v5  ;;  %v1172_v15 = vmul.f32 %v620_v5, %v620_v5  ;;  %v623_v17 = vadd.f32 %v1803_v13, %v622_v10  ;;  %v624_v19 = vpop.f32.mrb[39].mxu0  ;;  %834 = vst [vmem:[%s2234_s3 + $0x180] sm:$0xff] %v2005_v8  ;;  %v744_v20 = vpop.f32.mrb[39].mxu1 }
 0x160   :  { %v2016_v21 = vadd.f32 %v1803_v13, %v742_v11 }
 0x161   :  { %v1231_v22 = vadd.f32 %v1230_v1, %v1172_v15  ;;  %805 = vst [vmem:[%s2234_s3 + $0x98] sm:$0xff] %v623_v17  ;;  %v1107_v23 = vadd.f32 %v1106_v12, %v623_v17  ;;  %v1173_v25 = vmul.f32 %v623_v17, %v623_v17 }
 0x162   :  { %835 = vst [vmem:[%s2234_s3 + $0x188] sm:$0xff] %v2016_v21 }
 0x163   :  { %v1232_v28 = vadd.f32 %v1231_v22, %v1173_v25 }
 0x164   :  { %v627_v29 = vpop.f32.mrb[40].mxu0  ;;  %v747_v30 = vpop.f32.mrb[40].mxu1 }
 0x165   :  { %v628_v31 = vadd.f32 %v1803_v13, %v627_v29  ;;  %v629_v32 = vpop.f32.mrb[41].mxu0  ;;  %v2027_v33 = vadd.f32 %v1803_v13, %v747_v30  ;;  %v749_v35 = vpop.f32.mrb[41].mxu1 }
 0x166   :  { %v630_v36 = vpop.f32.mrb[42].mxu0  ;;  %v750_v39 = vpop.f32.mrb[42].mxu1 }
 0x167   :  { %806 = vst [vmem:[%s2234_s3 + $0xa0] sm:$0xff] %v628_v31  ;;  %v1108_v40 = vadd.f32 %v1107_v23, %v628_v31  ;;  %v1174_v41 = vmul.f32 %v628_v31, %v628_v31  ;;  %v631_v42 = vadd.f32 %v1803_v13, %v630_v36  ;;  %v632_v44 = vpop.f32.mrb[43].mxu0  ;;  %836 = vst [vmem:[%s2234_s3 + $0x190] sm:$0xff] %v2027_v33  ;;  %v752_v45 = vpop.f32.mrb[43].mxu1 }
 0x168   :  { %v2038_v46 = vadd.f32 %v1803_v13, %v750_v39 }
 0x169   :  { %v1233_v48 = vadd.f32 %v1232_v28, %v1174_v41  ;;  %807 = vst [vmem:[%s2234_s3 + $0xa8] sm:$0xff] %v631_v42  ;;  %v1109_v50 = vadd.f32 %v1108_v40, %v631_v42  ;;  %v1175_v51 = vmul.f32 %v631_v42, %v631_v42 }
 0x16a   :  { %837 = vst [vmem:[%s2234_s3 + $0x198] sm:$0xff] %v2038_v46 }
 0x16b   :  { %v1234_v53 = vadd.f32 %v1233_v48, %v1175_v51 }
 0x16c   :  { %v635_v54 = vpop.f32.mrb[44].mxu0  ;;  %v755_v55 = vpop.f32.mrb[44].mxu1 }
 0x16d   :  { %v636_v56 = vadd.f32 %v1803_v13, %v635_v54  ;;  %v637_v58 = vpop.f32.mrb[45].mxu0  ;;  %v2049_v59 = vadd.f32 %v1803_v13, %v755_v55  ;;  %v757_v62 = vpop.f32.mrb[45].mxu1 }
 0x16e   :  { %v638_v63 = vpop.f32.mrb[46].mxu0  ;;  %v758_v0 = vpop.f32.mrb[46].mxu1 }
 0x16f   :  { %808 = vst [vmem:[%s2234_s3 + $0xb0] sm:$0xff] %v636_v56  ;;  %v1110_v1 = vadd.f32 %v1109_v50, %v636_v56  ;;  %v1176_v2 = vmul.f32 %v636_v56, %v636_v56  ;;  %v639_v4 = vadd.f32 %v1803_v13, %v638_v63  ;;  %v640_v5 = vpop.f32.mrb[47].mxu0  ;;  %838 = vst [vmem:[%s2234_s3 + $0x1a0] sm:$0xff] %v2049_v59  ;;  %v760_v7 = vpop.f32.mrb[47].mxu1 }
 0x170   :  { %v2060_v9 = vadd.f32 %v1803_v13, %v758_v0 }
 0x171   :  { %v1235_v10 = vadd.f32 %v1234_v53, %v1176_v2  ;;  %809 = vst [vmem:[%s2234_s3 + $0xb8] sm:$0xff] %v639_v4  ;;  %v1111_v11 = vadd.f32 %v1110_v1, %v639_v4  ;;  %v1177_v12 = vmul.f32 %v639_v4, %v639_v4 }
 0x172   :  { %839 = vst [vmem:[%s2234_s3 + $0x1a8] sm:$0xff] %v2060_v9 }
 0x173   :  { %v1236_v15 = vadd.f32 %v1235_v10, %v1177_v12 }
 0x174   :  { %v643_v17 = vpop.f32.mrb[48].mxu0  ;;  %v763_v19 = vpop.f32.mrb[48].mxu1 }
 0x175   :  { %v644_v20 = vadd.f32 %v1803_v13, %v643_v17  ;;  %v645_v22 = vpop.f32.mrb[49].mxu0  ;;  %v2071_v23 = vadd.f32 %v1803_v13, %v763_v19  ;;  %v765_v25 = vpop.f32.mrb[49].mxu1 }
 0x176   :  { %v646_v28 = vpop.f32.mrb[50].mxu0  ;;  %v766_v29 = vpop.f32.mrb[50].mxu1 }
 0x177   :  { %810 = vst [vmem:[%s2234_s3 + $0xc0] sm:$0xff] %v644_v20  ;;  %v1112_v30 = vadd.f32 %v1111_v11, %v644_v20  ;;  %v1178_v31 = vmul.f32 %v644_v20, %v644_v20  ;;  %v647_v32 = vadd.f32 %v1803_v13, %v646_v28  ;;  %v648_v35 = vpop.f32.mrb[51].mxu0  ;;  %840 = vst [vmem:[%s2234_s3 + $0x1b0] sm:$0xff] %v2071_v23  ;;  %v768_v36 = vpop.f32.mrb[51].mxu1 }
 0x178   :  { %v2082_v39 = vadd.f32 %v1803_v13, %v766_v29 }
 0x179   :  { %v1237_v40 = vadd.f32 %v1236_v15, %v1178_v31  ;;  %811 = vst [vmem:[%s2234_s3 + $0xc8] sm:$0xff] %v647_v32  ;;  %v1113_v41 = vadd.f32 %v1112_v30, %v647_v32  ;;  %v1179_v42 = vmul.f32 %v647_v32, %v647_v32 }
 0x17a   :  { %841 = vst [vmem:[%s2234_s3 + $0x1b8] sm:$0xff] %v2082_v39 }
 0x17b   :  { %v1238_v44 = vadd.f32 %v1237_v40, %v1179_v42  ;;  %v1184_v42 = vmul.f32 %v1807_v18, %v1807_v18 }
 0x17c   :  { %v651_v45 = vpop.f32.mrb[52].mxu0  ;;  %v771_v48 = vpop.f32.mrb[52].mxu1 }
 0x17d   :  { %v652_v50 = vadd.f32 %v1803_v13, %v651_v45  ;;  %v653_v51 = vpop.f32.mrb[53].mxu0  ;;  %v2093_v53 = vadd.f32 %v1803_v13, %v771_v48  ;;  %v773_v54 = vpop.f32.mrb[53].mxu1 }
 0x17e   :  { %v654_v55 = vpop.f32.mrb[54].mxu0  ;;  %v774_v56 = vpop.f32.mrb[54].mxu1  ;;  %v1186_v51 = vmul.f32 %v1829_v34, %v1829_v34 }
 0x17f   :  { %812 = vst [vmem:[%s2234_s3 + $0xd0] sm:$0xff] %v652_v50  ;;  %v1114_v58 = vadd.f32 %v1113_v41, %v652_v50  ;;  %v1180_v62 = vmul.f32 %v652_v50, %v652_v50  ;;  %v655_v63 = vadd.f32 %v1803_v13, %v654_v55  ;;  %v656_v0 = vpop.f32.mrb[55].mxu0  ;;  %842 = vst [vmem:[%s2234_s3 + $0x1c0] sm:$0xff] %v2093_v53  ;;  %v776_v1 = vpop.f32.mrb[55].mxu1 }
 0x180   :  { %v2104_v2 = vadd.f32 %v1803_v13, %v774_v56  ;;  %v1187_v56 = vmul.f32 %v1840_v43, %v1840_v43 }
 0x181   :  { %v1239_v4 = vadd.f32 %v1238_v44, %v1180_v62  ;;  %813 = vst [vmem:[%s2234_s3 + $0xd8] sm:$0xff] %v655_v63  ;;  %v1115_v5 = vadd.f32 %v1114_v58, %v655_v63  ;;  %v1181_v7 = vmul.f32 %v655_v63, %v655_v63 }
 0x182   :  { %843 = vst [vmem:[%s2234_s3 + $0x1c8] sm:$0xff] %v2104_v2 }
 0x183   :  { %v1240_v10 = vadd.f32 %v1239_v4, %v1181_v7 }
 0x184   :  { %v659_v11 = vpop.f32.mrb[56].mxu0  ;;  %v779_v12 = vpop.f32.mrb[56].mxu1 }
 0x185   :  { %v660_v15 = vadd.f32 %v1803_v13, %v659_v11  ;;  %v661_v17 = vpop.f32.mrb[57].mxu0  ;;  %v2115_v19 = vadd.f32 %v1803_v13, %v779_v12  ;;  %v781_v20 = vpop.f32.mrb[57].mxu1 }
 0x186   :  { %v662_v22 = vpop.f32.mrb[58].mxu0  ;;  %v782_v25 = vpop.f32.mrb[58].mxu1 }
 0x187   :  { %814 = vst [vmem:[%s2234_s3 + $0xe0] sm:$0xff] %v660_v15  ;;  %v1116_v28 = vadd.f32 %v1115_v5, %v660_v15  ;;  %v1182_v29 = vmul.f32 %v660_v15, %v660_v15  ;;  %v663_v30 = vadd.f32 %v1803_v13, %v662_v22  ;;  %v664_v31 = vpop.f32.mrb[59].mxu0  ;;  %844 = vst [vmem:[%s2234_s3 + $0x1d0] sm:$0xff] %v2115_v19  ;;  %v784_v32 = vpop.f32.mrb[59].mxu1 }
 0x188   :  { %v2126_v35 = vadd.f32 %v1803_v13, %v782_v25  ;;  %v1185_v13 = vmul.f32 %v1818_v24, %v1818_v24 }
 0x189   :  { %v1241_v36 = vadd.f32 %v1240_v10, %v1182_v29  ;;  %815 = vst [vmem:[%s2234_s3 + $0xe8] sm:$0xff] %v663_v30  ;;  %v1117_v40 = vadd.f32 %v1116_v28, %v663_v30  ;;  %v1183_v41 = vmul.f32 %v663_v30, %v663_v30 }
 0x18a   :  { %845 = vst [vmem:[%s2234_s3 + $0x1d8] sm:$0xff] %v2126_v35 }
 0x18b   :  { %v1118_v44 = vadd.f32 %v1117_v40, %v1807_v18  ;;  %v1242_v45 = vadd.f32 %v1241_v36, %v1183_v41  ;;  %v1188_v18 = vmul.f32 %v1851_v52, %v1851_v52 }
 0x18d   :  { %v1119_v48 = vadd.f32 %v1118_v44, %v1818_v24  ;;  %v1243_v50 = vadd.f32 %v1242_v45, %v1184_v42  ;;  %v1189_v24 = vmul.f32 %v1862_v61, %v1862_v61  ;;  %v1199_v42 = vmul.f32 %v1972_v38, %v1972_v38 }
 0x18f   :  { %v1120_v54 = vadd.f32 %v1119_v48, %v1829_v34  ;;  %v1244_v55 = vadd.f32 %v1243_v50, %v1185_v13  ;;  %v1190_v34 = vmul.f32 %v1873_v6, %v1873_v6  ;;  %v1200_v13 = vmul.f32 %v1983_v49, %v1983_v49 }
 0x190   :  { %v1201_v50 = vmul.f32 %v1994_v60, %v1994_v60 }
 0x191   :  { %v1121_v58 = vadd.f32 %v1120_v54, %v1840_v43  ;;  %v1245_v62 = vadd.f32 %v1244_v55, %v1186_v51  ;;  %v1191_v43 = vmul.f32 %v1884_v16, %v1884_v16  ;;  %v1202_v54 = vmul.f32 %v2005_v8, %v2005_v8 }
 0x193   :  { %v1122_v63 = vadd.f32 %v1121_v58, %v1851_v52  ;;  %v1246_v0 = vadd.f32 %v1245_v62, %v1187_v56  ;;  %v1192_v52 = vmul.f32 %v1895_v27, %v1895_v27  ;;  %v1203_v56 = vmul.f32 %v2016_v21, %v2016_v21 }
 0x194   :  { %v1204_v62 = vmul.f32 %v2027_v33, %v2027_v33 }
 0x195   :  { %v1123_v1 = vadd.f32 %v1122_v63, %v1862_v61  ;;  %v1247_v4 = vadd.f32 %v1246_v0, %v1188_v18  ;;  %v1193_v61 = vmul.f32 %v1906_v37, %v1906_v37  ;;  %v1205_v63 = vmul.f32 %v2038_v46, %v2038_v46 }
 0x197   :  { %v1124_v5 = vadd.f32 %v1123_v1, %v1873_v6  ;;  %v1248_v7 = vadd.f32 %v1247_v4, %v1189_v24  ;;  %v1194_v6 = vmul.f32 %v1917_v47, %v1917_v47  ;;  %v1206_v24 = vmul.f32 %v2049_v59, %v2049_v59 }
 0x198   :  { %v1207_v4 = vmul.f32 %v2060_v9, %v2060_v9 }
 0x199   :  { %v1249_v10 = vadd.f32 %v1248_v7, %v1190_v34  ;;  %v1125_v11 = vadd.f32 %v1124_v5, %v1884_v16  ;;  %v1195_v16 = vmul.f32 %v1928_v57, %v1928_v57  ;;  %v1208_v5 = vmul.f32 %v2071_v23, %v2071_v23 }
 0x19b   :  { %v1126_v12 = vadd.f32 %v1125_v11, %v1895_v27  ;;  %v1250_v15 = vadd.f32 %v1249_v10, %v1191_v43  ;;  %v1196_v27 = vmul.f32 %v1939_v3, %v1939_v3  ;;  %v1209_v43 = vmul.f32 %v2082_v39, %v2082_v39 }
 0x19c   :  { %v1210_v11 = vmul.f32 %v2093_v53, %v2093_v53 }
 0x19d   :  { %v1127_v17 = vadd.f32 %v1126_v12, %v1906_v37  ;;  %v1251_v20 = vadd.f32 %v1250_v15, %v1192_v52  ;;  %v1197_v37 = vmul.f32 %v1950_v14, %v1950_v14  ;;  %v1211_v12 = vmul.f32 %v2104_v2, %v2104_v2 }
 0x19f   :  { %v1128_v22 = vadd.f32 %v1127_v17, %v1917_v47  ;;  %v1252_v25 = vadd.f32 %v1251_v20, %v1193_v61  ;;  %v1198_v47 = vmul.f32 %v1961_v26, %v1961_v26  ;;  %v1213_v20 = vmul.f32 %v2126_v35, %v2126_v35 }
 0x1a1   :  { %v1129_v28 = vadd.f32 %v1128_v22, %v1928_v57  ;;  %v1253_v29 = vadd.f32 %v1252_v25, %v1194_v6 }
 0x1a3   :  { %v1130_v30 = vadd.f32 %v1129_v28, %v1939_v3  ;;  %v1254_v31 = vadd.f32 %v1253_v29, %v1195_v16 }
 0x1a5   :  { %v1131_v32 = vadd.f32 %v1130_v30, %v1950_v14  ;;  %v1255_v36 = vadd.f32 %v1254_v31, %v1196_v27 }
 0x1a7   :  { %v1132_v40 = vadd.f32 %v1131_v32, %v1961_v26  ;;  %v1256_v41 = vadd.f32 %v1255_v36, %v1197_v37 }
 0x1a9   :  { %v1133_v57 = vadd.f32 %v1132_v40, %v1972_v38  ;;  %v1257_v44 = vadd.f32 %v1256_v41, %v1198_v47 }
 0x1ab   :  { %v1258_v3 = vadd.f32 %v1257_v44, %v1199_v42  ;;  %v1134_v45 = vadd.f32 %v1133_v57, %v1983_v49 }
 0x1ad   :  { %v1259_v14 = vadd.f32 %v1258_v3, %v1200_v13  ;;  %v1135_v48 = vadd.f32 %v1134_v45, %v1994_v60 }
 0x1af   :  { %v1260_v26 = vadd.f32 %v1259_v14, %v1201_v50  ;;  %v1136_v51 = vadd.f32 %v1135_v48, %v2005_v8 }
 0x1b1   :  { %v1261_v38 = vadd.f32 %v1260_v26, %v1202_v54  ;;  %v1137_v55 = vadd.f32 %v1136_v51, %v2016_v21 }
 0x1b3   :  { %v1262_v58 = vadd.f32 %v1261_v38, %v1203_v56  ;;  %v1138_v49 = vadd.f32 %v1137_v55, %v2027_v33 }
 0x1b5   :  { %v1263_v18 = vadd.f32 %v1262_v58, %v1204_v62  ;;  %v1139_v60 = vadd.f32 %v1138_v49, %v2038_v46 }
 0x1b7   :  { %v1264_v0 = vadd.f32 %v1263_v18, %v1205_v63  ;;  %v1140_v8 = vadd.f32 %v1139_v60, %v2049_v59 }
 0x1b9   :  { %v1265_v1 = vadd.f32 %v1264_v0, %v1206_v24  ;;  %v1141_v21 = vadd.f32 %v1140_v8, %v2060_v9 }
 0x1bb   :  { %v1266_v34 = vadd.f32 %v1265_v1, %v1207_v4  ;;  %v1142_v33 = vadd.f32 %v1141_v21, %v2071_v23  ;;  %v1212_v23 = vmul.f32 %v2115_v19, %v2115_v19 }
 0x1bd   :  { %v1267_v7 = vadd.f32 %v1266_v34, %v1208_v5  ;;  %v1143_v46 = vadd.f32 %v1142_v33, %v2082_v39 }
 0x1bf   :  { %v1268_v10 = vadd.f32 %v1267_v7, %v1209_v43  ;;  %v1144_v59 = vadd.f32 %v1143_v46, %v2093_v53 }
 0x1c1   :  { %v1269_v52 = vadd.f32 %v1268_v10, %v1210_v11  ;;  %v1145_v9 = vadd.f32 %v1144_v59, %v2104_v2 }
 0x1c3   :  { %v1270_v15 = vadd.f32 %v1269_v52, %v1211_v12  ;;  %v1146_v61 = vadd.f32 %v1145_v9, %v2115_v19 }
 0x1c5   :  { %v1271_v17 = vadd.f32 %v1270_v15, %v1212_v23  ;;  %v1147_v39 = vadd.f32 %v1146_v61, %v2126_v35 }
 0x1c7   :  { %v1148_v6 = vrot.slane %v1147_v39, 4  ;;  %v1272_v53 = vadd.f32 %v1271_v17, %v1213_v20 }
 0x1c9   :  { %v1149_v22 = vadd.f32 %v1148_v6, %v1147_v39  ;;  %v1273_v25 = vrot.slane %v1272_v53, 4 }
 0x1cb   :  { %v1150_v16 = vrot.slane %v1149_v22, 2  ;;  %v1274_v28 = vadd.f32 %v1273_v25, %v1272_v53 }
 0x1cd   :  { %v1151_v29 = vadd.f32 %v1150_v16, %v1149_v22  ;;  %v1275_v2 = vrot.slane %v1274_v28, 2 }
 0x1cf   :  { %v1152_v27 = vrot.slane %v1151_v29, 1  ;;  %v1276_v30 = vadd.f32 %v1275_v2, %v1274_v28 }
 0x1d1   :  { %v1153_v31 = vadd.f32 %v1152_v27, %v1151_v29  ;;  %v1277_v37 = vrot.slane %v1276_v30, 1 }
 0x1d3   :  { %v1278_v32 = vadd.f32 %v1277_v37, %v1276_v30  ;;  %1279 = vst [vmem:[%s2235_s4] sm:$0xff] %v1153_v31 }
 0x1d5   :  { %1280 = vst [vmem:[%s2236_s5] sm:$0xff] %v1278_v32 }

// kernel: small_cnn_forward.17
= control target key start
LH: loop header
LB: loop body
LE: loop exit
PB: predicated region body
PF: predicated region fallthrough
CT: control target
= control target key end

     0   :  { %v183_v0 = vmov 0.0   ;;  %vm184_vm0 = vmmov 0   ;;  %vm129_vm1 = vcmask 7168   ;;  %s238_s1 = inlined_call_operand.vmem [shape: bf16[128,1], index: 1, kind: input, shape index: {}]   ;;  %s239_s2 = inlined_call_operand.<no memory space> [shape: f32[1,1], index: 2, kind: input, shape index: {}]   ;;  %s240_s0 = inlined_call_operand.vmem [shape: bf16[8,128], index: 0, kind: input, shape index: {}]   ;;  %s241_s3 = inlined_call_operand.vmem [shape: f32[8,1], index: 3, kind: output, shape index: {}]  }
   0x1   :  { %153 = vmatprep.subr.bf16.mxu0 %v183_v0  ;;  %v175_v1 = vld [vmem:[%s238_s1] sm:$0xff]   ;;  %169 = vmatprep.mubr.msk.bf16.mxu0 %vm184_vm0, %v183_v0  ;;  %v8_v2 = vstv %s239_s2  ;;  %v176_v3 = vld [vmem:[%s238_s1 + $0x8] sm:$0xff]   ;;  %v177_v4 = vld [vmem:[%s238_s1 + $0x10] sm:$0xff]  }
   0x2   :  { %9 = vst [vmem:[#allocation2] sm:$0x1] %v8_v2  ;;  %154 = vmatpush3.bf16.msra.mxu0 %v175_v1  ;;  %v178_v5 = vld [vmem:[%s238_s1 + $0x18] sm:$0xff]   ;;  %v179_v6 = vld [vmem:[%s238_s1 + $0x20] sm:$0xff]   ;;  %v180_v7 = vld [vmem:[%s238_s1 + $0x28] sm:$0xff]  }
   0x3   :  { %155 = vmatprep.subr.bf16.mxu0 %v183_v0  ;;  %v181_v8 = vld [vmem:[%s238_s1 + $0x30] sm:$0xff]   ;;  %v182_v9 = vld [vmem:[%s238_s1 + $0x38] sm:$0xff]   ;;  %v17_v10 = vld [vmem:[%s240_s0] sm:$0xf] }
   0x6   :  { %156 = vmatpush3.bf16.msra.mxu0 %v176_v3 }
   0x7   :  { %157 = vmatprep.subr.bf16.mxu0 %v183_v0 }
   0x9   :  { %v135_v11 = vld [vmem:[#allocation2] ss:$0 sm:$0xff] }
   0xa   :  { %158 = vmatpush3.bf16.msra.mxu0 %v177_v4 }
   0xb   :  { %159 = vmatprep.subr.bf16.mxu0 %v183_v0 }
   0xe   :  { %160 = vmatpush3.bf16.msra.mxu0 %v178_v5 }
   0xf   :  { %161 = vmatprep.subr.bf16.mxu0 %v183_v0 }
  0x12   :  { %162 = vmatpush3.bf16.msra.mxu0 %v179_v6 }
  0x13   :  { %163 = vmatprep.subr.bf16.mxu0 %v183_v0 }
  0x16   :  { %164 = vmatpush3.bf16.msra.mxu0 %v180_v7 }
  0x17   :  { %165 = vmatprep.subr.bf16.mxu0 %v183_v0 }
  0x1a   :  { %166 = vmatpush3.bf16.msra.mxu0 %v181_v8 }
  0x1b   :  { %167 = vmatprep.subr.bf16.mxu0 %v183_v0 }
  0x1e   :  { %168 = vmatpush3.bf16.msra.mxu0 %v182_v9 }
  0x21   :  { %170 = vmatmul.mubr.bf16.vlgmr.msra.gmra.mrb[0].mxu0 %v17_v10 }
  0xf4   :  { %v123_v12 = vpop.f32.mrb[0].mxu0 }
  0xf5   :  { %v124_v13 = vadd.f32 %v135_v11, %v123_v12  ;;  %v171_v14 = vpop.f32.mrb[1].mxu0 }
  0xf6   :  { %v126_v15 = vpop.f32.mrb[2].mxu0 }
  0xf7   :  { %130 = vst.msk [vmem:[%s241_s3] sm:$0xff] %vm129_vm1, %v124_v13  ;;  %v172_v16 = vpop.f32.mrb[3].mxu0 }

// kernel: small_cnn_forward.16
= control target key start
LH: loop header
LB: loop body
LE: loop exit
PB: predicated region body
PF: predicated region fallthrough
CT: control target
= control target key end

     0   :  { %s8625_s1 = inlined_call_operand.vmem [shape: bf16[7680,128], index: 1, kind: input, shape index: {}]   ;;  %s8626_s0 = inlined_call_operand.vmem [shape: bf16[8,7680], index: 0, kind: input, shape index: {}]   ;;  %s8627_s2 = inlined_call_operand.vmem [shape: f32[1,128], index: 2, kind: input, shape index: {}]   ;;  %s8628_s3 = inlined_call_operand.vmem [shape: f32[8,128], index: 3, kind: output, shape index: {}]  }
   0x1   :  { %v6508_v0 = vld [vmem:[%s8625_s1 + $0x40] sm:$0xff]   ;;  %v6512_v4 = vld [vmem:[%s8625_s1 + $0x48] sm:$0xff]   ;;  %v6516_v8 = vld [vmem:[%s8625_s1 + $0x50] sm:$0xff]  }
   0x2   :  { %v6509_v1 = vld [vmem:[%s8625_s1 + $0xc0] sm:$0xff]   ;;  %5848 = vmatprep.subr.bf16.mxu0 %v6508_v0  ;;  %v6513_v5 = vld [vmem:[%s8625_s1 + $0xc8] sm:$0xff]   ;;  %v6517_v9 = vld [vmem:[%s8625_s1 + $0xd0] sm:$0xff]  }
   0x3   :  { %v6510_v2 = vld [vmem:[%s8625_s1] sm:$0xff]   ;;  %5870 = vmatprep.subr.bf16.mxu1 %v6509_v1  ;;  %v6514_v6 = vld [vmem:[%s8625_s1 + $0x8] sm:$0xff]   ;;  %v6518_v10 = vld [vmem:[%s8625_s1 + $0x10] sm:$0xff]  }
   0x4   :  { %v6511_v3 = vld [vmem:[%s8625_s1 + $0x80] sm:$0xff]   ;;  %5849 = vmatpush3.bf16.msra.mxu0 %v6510_v2  ;;  %v6515_v7 = vld [vmem:[%s8625_s1 + $0x88] sm:$0xff]   ;;  %v6519_v11 = vld [vmem:[%s8625_s1 + $0x90] sm:$0xff]  }
   0x5   :  { %5871 = vmatpush3.bf16.msra.mxu1 %v6511_v3  ;;  %5850 = vmatprep.subr.bf16.mxu0 %v6512_v4  ;;  %v6520_v12 = vld [vmem:[%s8625_s1 + $0x58] sm:$0xff]   ;;  %v6524_v16 = vld [vmem:[%s8625_s1 + $0x60] sm:$0xff]   ;;  %v6528_v20 = vld [vmem:[%s8625_s1 + $0x68] sm:$0xff]  }
   0x6   :  { %5872 = vmatprep.subr.bf16.mxu1 %v6513_v5  ;;  %v6521_v13 = vld [vmem:[%s8625_s1 + $0xd8] sm:$0xff]   ;;  %v6525_v17 = vld [vmem:[%s8625_s1 + $0xe0] sm:$0xff]   ;;  %v6529_v21 = vld [vmem:[%s8625_s1 + $0xe8] sm:$0xff]  }
   0x7   :  { %v6522_v14 = vld [vmem:[%s8625_s1 + $0x18] sm:$0xff]   ;;  %v6526_v18 = vld [vmem:[%s8625_s1 + $0x20] sm:$0xff]   ;;  %v6530_v22 = vld [vmem:[%s8625_s1 + $0x28] sm:$0xff]  }
   0x8   :  { %5851 = vmatpush3.bf16.msra.mxu0 %v6514_v6  ;;  %v6523_v15 = vld [vmem:[%s8625_s1 + $0x98] sm:$0xff]   ;;  %v6527_v19 = vld [vmem:[%s8625_s1 + $0xa0] sm:$0xff]   ;;  %v6531_v23 = vld [vmem:[%s8625_s1 + $0xa8] sm:$0xff]  }
   0x9   :  { %5873 = vmatpush3.bf16.msra.mxu1 %v6515_v7  ;;  %5852 = vmatprep.subr.bf16.mxu0 %v6516_v8  ;;  %v6532_v24 = vld [vmem:[%s8625_s1 + $0x70] sm:$0xff]   ;;  %v6536_v28 = vld [vmem:[%s8625_s1 + $0x78] sm:$0xff]   ;;  %v15_v32 = vld [vmem:[%s8626_s0] sm:$0xff] }
   0xa   :  { %5874 = vmatprep.subr.bf16.mxu1 %v6517_v9  ;;  %v6533_v25 = vld [vmem:[%s8625_s1 + $0xf0] sm:$0xff]   ;;  %v6537_v29 = vld [vmem:[%s8625_s1 + $0xf8] sm:$0xff]   ;;  %v16_v33 = vld [vmem:[%s8626_s0 + $0x8] sm:$0xff]  ;;  %v5308_v34 = vcombine.low %v15_v32, %v15_v32  ;;  %v5309_v35 = vcombine.high %v15_v32, %v15_v32 }
   0xb   :  { %v6534_v26 = vld [vmem:[%s8625_s1 + $0x30] sm:$0xff]   ;;  %v6538_v30 = vld [vmem:[%s8625_s1 + $0x38] sm:$0xff]   ;;  %v5310_v36 = vcombine.low %v16_v33, %v16_v33  ;;  %v5311_v37 = vcombine.high %v16_v33, %v16_v33  ;;  %v6544_v38 = vld [vmem:[%s8625_s1 + $0x140] sm:$0xff]  }
   0xc   :  { %5853 = vmatpush3.bf16.msra.mxu0 %v6518_v10  ;;  %v6535_v27 = vld [vmem:[%s8625_s1 + $0xb0] sm:$0xff]   ;;  %v6539_v31 = vld [vmem:[%s8625_s1 + $0xb8] sm:$0xff]   ;;  %v6545_v39 = vld [vmem:[%s8625_s1 + $0x1c0] sm:$0xff]   ;;  %4134 = vmatprep.mubr.bf16.mxu0 %v5309_v35 }
   0xd   :  { %5875 = vmatpush3.bf16.msra.mxu1 %v6519_v11  ;;  %5854 = vmatprep.subr.bf16.mxu0 %v6520_v12  ;;  %v6546_v40 = vld [vmem:[%s8625_s1 + $0x100] sm:$0xff]   ;;  %v6548_v42 = vld [vmem:[%s8625_s1 + $0x148] sm:$0xff]   ;;  %v6552_v46 = vld [vmem:[%s8625_s1 + $0x150] sm:$0xff]  }
   0xe   :  { %5876 = vmatprep.subr.bf16.mxu1 %v6521_v13  ;;  %4174 = vmatprep.mubr.bf16.mxu1 %v5311_v37  ;;  %v6547_v41 = vld [vmem:[%s8625_s1 + $0x180] sm:$0xff]   ;;  %v6549_v43 = vld [vmem:[%s8625_s1 + $0x1c8] sm:$0xff]   ;;  %v6553_v47 = vld [vmem:[%s8625_s1 + $0x1d0] sm:$0xff]  }
   0xf   :  { %v6550_v44 = vld [vmem:[%s8625_s1 + $0x108] sm:$0xff]   ;;  %v6554_v48 = vld [vmem:[%s8625_s1 + $0x110] sm:$0xff]   ;;  %v6556_v50 = vld [vmem:[%s8625_s1 + $0x158] sm:$0xff]  }
  0x10   :  { %5855 = vmatpush3.bf16.msra.mxu0 %v6522_v14  ;;  %v6551_v45 = vld [vmem:[%s8625_s1 + $0x188] sm:$0xff]   ;;  %v6555_v49 = vld [vmem:[%s8625_s1 + $0x190] sm:$0xff]   ;;  %v6557_v51 = vld [vmem:[%s8625_s1 + $0x1d8] sm:$0xff]  }
  0x11   :  { %5877 = vmatpush3.bf16.msra.mxu1 %v6523_v15  ;;  %5856 = vmatprep.subr.bf16.mxu0 %v6524_v16  ;;  %v6558_v52 = vld [vmem:[%s8625_s1 + $0x118] sm:$0xff]   ;;  %v6560_v54 = vld [vmem:[%s8625_s1 + $0x160] sm:$0xff]   ;;  %v6564_v58 = vld [vmem:[%s8625_s1 + $0x168] sm:$0xff]  }
  0x12   :  { %5878 = vmatprep.subr.bf16.mxu1 %v6525_v17  ;;  %v6559_v53 = vld [vmem:[%s8625_s1 + $0x198] sm:$0xff]   ;;  %v6561_v55 = vld [vmem:[%s8625_s1 + $0x1e0] sm:$0xff]   ;;  %v6565_v59 = vld [vmem:[%s8625_s1 + $0x1e8] sm:$0xff]  }
  0x13   :  { %v6562_v56 = vld [vmem:[%s8625_s1 + $0x120] sm:$0xff]   ;;  %v6566_v60 = vld [vmem:[%s8625_s1 + $0x128] sm:$0xff]   ;;  %v6568_v62 = vld [vmem:[%s8625_s1 + $0x170] sm:$0xff]  }
  0x14   :  { %5857 = vmatpush3.bf16.msra.mxu0 %v6526_v18  ;;  %v6563_v57 = vld [vmem:[%s8625_s1 + $0x1a0] sm:$0xff]   ;;  %v6567_v61 = vld [vmem:[%s8625_s1 + $0x1a8] sm:$0xff]   ;;  %v6569_v63 = vld [vmem:[%s8625_s1 + $0x1f0] sm:$0xff]  }
  0x15   :  { %5879 = vmatpush3.bf16.msra.mxu1 %v6527_v19  ;;  %5858 = vmatprep.subr.bf16.mxu0 %v6528_v20  ;;  %v6570_v0 = vld [vmem:[%s8625_s1 + $0x130] sm:$0xff]   ;;  %v6572_v2 = vld [vmem:[%s8625_s1 + $0x178] sm:$0xff]   ;;  %v6580_v12 = vld [vmem:[%s8625_s1 + $0x240] sm:$0xff]  }
  0x16   :  { %5880 = vmatprep.subr.bf16.mxu1 %v6529_v21  ;;  %v6571_v1 = vld [vmem:[%s8625_s1 + $0x1b0] sm:$0xff]   ;;  %v6573_v3 = vld [vmem:[%s8625_s1 + $0x1f8] sm:$0xff]   ;;  %v6581_v13 = vld [vmem:[%s8625_s1 + $0x2c0] sm:$0xff]  }
  0x17   :  { %v6574_v4 = vld [vmem:[%s8625_s1 + $0x138] sm:$0xff]   ;;  %v17_v6 = vld [vmem:[%s8626_s0 + $0x10] sm:$0xff]  ;;  %v6582_v14 = vld [vmem:[%s8625_s1 + $0x200] sm:$0xff]  }
  0x18   :  { %5859 = vmatpush3.bf16.msra.mxu0 %v6530_v22  ;;  %v6575_v5 = vld [vmem:[%s8625_s1 + $0x1b8] sm:$0xff]   ;;  %v5312_v7 = vcombine.low %v17_v6, %v17_v6  ;;  %v5313_v8 = vcombine.high %v17_v6, %v17_v6  ;;  %v6583_v15 = vld [vmem:[%s8625_s1 + $0x280] sm:$0xff]   ;;  %v6584_v16 = vld [vmem:[%s8625_s1 + $0x248] sm:$0xff]  }
  0x19   :  { %5881 = vmatpush3.bf16.msra.mxu1 %v6531_v23  ;;  %5860 = vmatprep.subr.bf16.mxu0 %v6532_v24  ;;  %v18_v9 = vld [vmem:[%s8626_s0 + $0x18] sm:$0xff]  ;;  %v6585_v17 = vld [vmem:[%s8625_s1 + $0x2c8] sm:$0xff]   ;;  %v6588_v20 = vld [vmem:[%s8625_s1 + $0x250] sm:$0xff]  }
  0x1a   :  { %5882 = vmatprep.subr.bf16.mxu1 %v6533_v25  ;;  %v5314_v10 = vcombine.low %v18_v9, %v18_v9  ;;  %v5315_v11 = vcombine.high %v18_v9, %v18_v9  ;;  %v6586_v18 = vld [vmem:[%s8625_s1 + $0x208] sm:$0xff]   ;;  %v6589_v21 = vld [vmem:[%s8625_s1 + $0x2d0] sm:$0xff]   ;;  %v6592_v24 = vld [vmem:[%s8625_s1 + $0x258] sm:$0xff]  }
  0x1b   :  { %v6587_v19 = vld [vmem:[%s8625_s1 + $0x288] sm:$0xff]   ;;  %v6590_v22 = vld [vmem:[%s8625_s1 + $0x210] sm:$0xff]   ;;  %v6593_v25 = vld [vmem:[%s8625_s1 + $0x2d8] sm:$0xff]  }
  0x1c   :  { %5861 = vmatpush3.bf16.msra.mxu0 %v6534_v26  ;;  %v6591_v23 = vld [vmem:[%s8625_s1 + $0x290] sm:$0xff]   ;;  %v6594_v26 = vld [vmem:[%s8625_s1 + $0x218] sm:$0xff]   ;;  %v6600_v32 = vld [vmem:[%s8625_s1 + $0x268] sm:$0xff]  }
  0x1d   :  { %5883 = vmatpush3.bf16.msra.mxu1 %v6535_v27  ;;  %5862 = vmatprep.subr.bf16.mxu0 %v6536_v28  ;;  %v6595_v27 = vld [vmem:[%s8625_s1 + $0x298] sm:$0xff]   ;;  %v6596_v28 = vld [vmem:[%s8625_s1 + $0x260] sm:$0xff]   ;;  %v6601_v33 = vld [vmem:[%s8625_s1 + $0x2e8] sm:$0xff]  }
  0x1e   :  { %5884 = vmatprep.subr.bf16.mxu1 %v6537_v29  ;;  %v6597_v29 = vld [vmem:[%s8625_s1 + $0x2e0] sm:$0xff]   ;;  %v6603_v35 = vld [vmem:[%s8625_s1 + $0x2a8] sm:$0xff]   ;;  %v6605_v37 = vld [vmem:[%s8625_s1 + $0x2f0] sm:$0xff]  }
  0x1f   :  { %v6636_v6 = vld [vmem:[%s8625_s1 + $0x368] sm:$0xff]  }
  0x20   :  { %5863 = vmatpush3.bf16.msra.mxu0 %v6538_v30  ;;  %v6598_v30 = vld [vmem:[%s8625_s1 + $0x220] sm:$0xff]   ;;  %v6639_v9 = vld [vmem:[%s8625_s1 + $0x3a8] sm:$0xff]  }
  0x21   :  { %5885 = vmatpush3.bf16.msra.mxu1 %v6539_v31  ;;  %5892 = vmatprep.subr.bf16.mxu0 %v6544_v38  ;;  %v6599_v31 = vld [vmem:[%s8625_s1 + $0x2a0] sm:$0xff]   ;;  %v6606_v38 = vld [vmem:[%s8625_s1 + $0x230] sm:$0xff]  }
  0x22   :  { %5914 = vmatprep.subr.bf16.mxu1 %v6545_v39  ;;  %v6607_v39 = vld [vmem:[%s8625_s1 + $0x2b0] sm:$0xff]  }
  0x23   :  { %4135 = vmatmul.mubr.bf16.vlgmr.msra.gmra.mrb[0].mxu0 %v5308_v34  ;;  %v6602_v34 = vld [vmem:[%s8625_s1 + $0x228] sm:$0xff]  }
  0x24   :  { %4175 = vmatmul.mubr.bf16.vlgmr.msra.gmra.mrb[0].mxu1 %v5310_v36  ;;  %5893 = vmatpush3.bf16.msra.mxu0 %v6546_v40  ;;  %v6604_v36 = vld [vmem:[%s8625_s1 + $0x270] sm:$0xff]   ;;  %v6608_v40 = vld [vmem:[%s8625_s1 + $0x278] sm:$0xff]  }
  0x25   :  { %5915 = vmatpush3.bf16.msra.mxu1 %v6547_v41  ;;  %5894 = vmatprep.subr.bf16.mxu0 %v6548_v42  ;;  %v6609_v41 = vld [vmem:[%s8625_s1 + $0x2f8] sm:$0xff]  }
  0x26   :  { %5916 = vmatprep.subr.bf16.mxu1 %v6549_v43  ;;  %4214 = vmatprep.mubr.bf16.mxu0 %v5313_v8  ;;  %v6610_v42 = vld [vmem:[%s8625_s1 + $0x238] sm:$0xff]   ;;  %v6638_v8 = vld [vmem:[%s8625_s1 + $0x328] sm:$0xff]  }
  0x27   :  { %4254 = vmatprep.mubr.bf16.mxu1 %v5315_v11  ;;  %v6611_v43 = vld [vmem:[%s8625_s1 + $0x2b8] sm:$0xff]   ;;  %v6641_v11 = vld [vmem:[%s8625_s1 + $0x3f0] sm:$0xff]  }
  0x28   :  { %5895 = vmatpush3.bf16.msra.mxu0 %v6550_v44  ;;  %v19_v44 = vld [vmem:[%s8626_s0 + $0x20] sm:$0xff] }
  0x29   :  { %5917 = vmatpush3.bf16.msra.mxu1 %v6551_v45  ;;  %5896 = vmatprep.subr.bf16.mxu0 %v6552_v46  ;;  %v20_v45 = vld [vmem:[%s8626_s0 + $0x28] sm:$0xff]  ;;  %v5316_v46 = vcombine.low %v19_v44, %v19_v44 }
  0x2a   :  { %5918 = vmatprep.subr.bf16.mxu1 %v6553_v47  ;;  %v5317_v47 = vcombine.high %v19_v44, %v19_v44  ;;  %v6672_v44 = vld [vmem:[%s8625_s1 + $0x468] sm:$0xff]  }
  0x2c   :  { %5897 = vmatpush3.bf16.msra.mxu0 %v6554_v48  ;;  %v5318_v48 = vcombine.low %v20_v45, %v20_v45 }
  0x2d   :  { %5919 = vmatpush3.bf16.msra.mxu1 %v6555_v49  ;;  %5898 = vmatprep.subr.bf16.mxu0 %v6556_v50  ;;  %v5319_v49 = vcombine.high %v20_v45, %v20_v45  ;;  %v6616_v50 = vld [vmem:[%s8625_s1 + $0x340] sm:$0xff]   ;;  %v6673_v45 = vld [vmem:[%s8625_s1 + $0x4e8] sm:$0xff]  }
  0x2e   :  { %5920 = vmatprep.subr.bf16.mxu1 %v6557_v51  ;;  %v6617_v51 = vld [vmem:[%s8625_s1 + $0x3c0] sm:$0xff]  }
  0x30   :  { %5899 = vmatpush3.bf16.msra.mxu0 %v6558_v52  ;;  %v6618_v52 = vld [vmem:[%s8625_s1 + $0x300] sm:$0xff]  }
  0x31   :  { %5921 = vmatpush3.bf16.msra.mxu1 %v6559_v53  ;;  %5900 = vmatprep.subr.bf16.mxu0 %v6560_v54  ;;  %v6619_v53 = vld [vmem:[%s8625_s1 + $0x380] sm:$0xff]   ;;  %v6620_v54 = vld [vmem:[%s8625_s1 + $0x348] sm:$0xff]  }
  0x32   :  { %5922 = vmatprep.subr.bf16.mxu1 %v6561_v55  ;;  %v6621_v55 = vld [vmem:[%s8625_s1 + $0x3c8] sm:$0xff]  }
  0x34   :  { %5901 = vmatpush3.bf16.msra.mxu0 %v6562_v56  ;;  %v6622_v56 = vld [vmem:[%s8625_s1 + $0x308] sm:$0xff]  }
  0x35   :  { %5923 = vmatpush3.bf16.msra.mxu1 %v6563_v57  ;;  %5902 = vmatprep.subr.bf16.mxu0 %v6564_v58  ;;  %v6623_v57 = vld [vmem:[%s8625_s1 + $0x388] sm:$0xff]   ;;  %v6624_v58 = vld [vmem:[%s8625_s1 + $0x350] sm:$0xff]  }
  0x36   :  { %5924 = vmatprep.subr.bf16.mxu1 %v6565_v59  ;;  %v6625_v59 = vld [vmem:[%s8625_s1 + $0x3d0] sm:$0xff]  }
  0x38   :  { %5903 = vmatpush3.bf16.msra.mxu0 %v6566_v60  ;;  %v6626_v60 = vld [vmem:[%s8625_s1 + $0x310] sm:$0xff]  }
  0x39   :  { %5925 = vmatpush3.bf16.msra.mxu1 %v6567_v61  ;;  %5904 = vmatprep.subr.bf16.mxu0 %v6568_v62  ;;  %v6627_v61 = vld [vmem:[%s8625_s1 + $0x390] sm:$0xff]   ;;  %v6628_v62 = vld [vmem:[%s8625_s1 + $0x358] sm:$0xff]  }
  0x3a   :  { %5926 = vmatprep.subr.bf16.mxu1 %v6569_v63  ;;  %v6629_v63 = vld [vmem:[%s8625_s1 + $0x3d8] sm:$0xff]  }
  0x3c   :  { %5905 = vmatpush3.bf16.msra.mxu0 %v6570_v0  ;;  %v6630_v0 = vld [vmem:[%s8625_s1 + $0x318] sm:$0xff]  }
  0x3d   :  { %5927 = vmatpush3.bf16.msra.mxu1 %v6571_v1  ;;  %5906 = vmatprep.subr.bf16.mxu0 %v6572_v2  ;;  %v6631_v1 = vld [vmem:[%s8625_s1 + $0x398] sm:$0xff]   ;;  %v6632_v2 = vld [vmem:[%s8625_s1 + $0x360] sm:$0xff]  }
  0x3e   :  { %5928 = vmatprep.subr.bf16.mxu1 %v6573_v3  ;;  %v6633_v3 = vld [vmem:[%s8625_s1 + $0x3e0] sm:$0xff]  }
  0x40   :  { %5907 = vmatpush3.bf16.msra.mxu0 %v6574_v4  ;;  %v6634_v4 = vld [vmem:[%s8625_s1 + $0x320] sm:$0xff]  }
  0x41   :  { %5929 = vmatpush3.bf16.msra.mxu1 %v6575_v5  ;;  %5936 = vmatprep.subr.bf16.mxu0 %v6580_v12  ;;  %v6635_v5 = vld [vmem:[%s8625_s1 + $0x3a0] sm:$0xff]   ;;  %v6642_v12 = vld [vmem:[%s8625_s1 + $0x330] sm:$0xff]  }
  0x42   :  { %5958 = vmatprep.subr.bf16.mxu1 %v6581_v13  ;;  %v6643_v13 = vld [vmem:[%s8625_s1 + $0x3b0] sm:$0xff]  }
  0x43   :  { %4215 = vmatmul.mubr.bf16.vlgmr.msra.gmra.mrb[4].mxu0 %v5312_v7  ;;  %v6637_v7 = vld [vmem:[%s8625_s1 + $0x3e8] sm:$0xff]  }
  0x44   :  { %4255 = vmatmul.mubr.bf16.vlgmr.msra.gmra.mrb[4].mxu1 %v5314_v10  ;;  %5937 = vmatpush3.bf16.msra.mxu0 %v6582_v14  ;;  %v6640_v10 = vld [vmem:[%s8625_s1 + $0x370] sm:$0xff]   ;;  %v6644_v14 = vld [vmem:[%s8625_s1 + $0x378] sm:$0xff]  }
  0x45   :  { %5959 = vmatpush3.bf16.msra.mxu1 %v6583_v15  ;;  %5938 = vmatprep.subr.bf16.mxu0 %v6584_v16  ;;  %v6645_v15 = vld [vmem:[%s8625_s1 + $0x3f8] sm:$0xff]  }
  0x46   :  { %5960 = vmatprep.subr.bf16.mxu1 %v6585_v17  ;;  %4294 = vmatprep.mubr.bf16.mxu0 %v5317_v47  ;;  %v6646_v16 = vld [vmem:[%s8625_s1 + $0x338] sm:$0xff]   ;;  %v6675_v47 = vld [vmem:[%s8625_s1 + $0x4a8] sm:$0xff]  }
  0x47   :  { %4334 = vmatprep.mubr.bf16.mxu1 %v5319_v49  ;;  %v6647_v17 = vld [vmem:[%s8625_s1 + $0x3b8] sm:$0xff]   ;;  %v6677_v49 = vld [vmem:[%s8625_s1 + $0x4f0] sm:$0xff]  }
  0x48   :  { %5939 = vmatpush3.bf16.msra.mxu0 %v6586_v18  ;;  %v21_v18 = vld [vmem:[%s8626_s0 + $0x30] sm:$0xff] }
  0x49   :  { %5961 = vmatpush3.bf16.msra.mxu1 %v6587_v19  ;;  %5940 = vmatprep.subr.bf16.mxu0 %v6588_v20  ;;  %v22_v19 = vld [vmem:[%s8626_s0 + $0x38] sm:$0xff]  ;;  %v5320_v20 = vcombine.low %v21_v18, %v21_v18 }
  0x4a   :  { %5962 = vmatprep.subr.bf16.mxu1 %v6589_v21  ;;  %v5321_v21 = vcombine.high %v21_v18, %v21_v18  ;;  %v6708_v18 = vld [vmem:[%s8625_s1 + $0x568] sm:$0xff]  }
  0x4c   :  { %5941 = vmatpush3.bf16.msra.mxu0 %v6590_v22  ;;  %v5322_v22 = vcombine.low %v22_v19, %v22_v19 }
  0x4d   :  { %5963 = vmatpush3.bf16.msra.mxu1 %v6591_v23  ;;  %5942 = vmatprep.subr.bf16.mxu0 %v6592_v24  ;;  %v6652_v23 = vld [vmem:[%s8625_s1 + $0x440] sm:$0xff]   ;;  %v5323_v24 = vcombine.high %v22_v19, %v22_v19  ;;  %v6709_v19 = vld [vmem:[%s8625_s1 + $0x5e8] sm:$0xff]  }
  0x4e   :  { %5964 = vmatprep.subr.bf16.mxu1 %v6593_v25  ;;  %v6653_v25 = vld [vmem:[%s8625_s1 + $0x4c0] sm:$0xff]  }
  0x50   :  { %5943 = vmatpush3.bf16.msra.mxu0 %v6594_v26  ;;  %v6654_v26 = vld [vmem:[%s8625_s1 + $0x400] sm:$0xff]  }
  0x51   :  { %5965 = vmatpush3.bf16.msra.mxu1 %v6595_v27  ;;  %5944 = vmatprep.subr.bf16.mxu0 %v6596_v28  ;;  %v6655_v27 = vld [vmem:[%s8625_s1 + $0x480] sm:$0xff]   ;;  %v6656_v28 = vld [vmem:[%s8625_s1 + $0x448] sm:$0xff]  }
  0x52   :  { %5966 = vmatprep.subr.bf16.mxu1 %v6597_v29  ;;  %v6657_v29 = vld [vmem:[%s8625_s1 + $0x4c8] sm:$0xff]  }
  0x54   :  { %5945 = vmatpush3.bf16.msra.mxu0 %v6598_v30  ;;  %v6658_v30 = vld [vmem:[%s8625_s1 + $0x408] sm:$0xff]  }
  0x55   :  { %5967 = vmatpush3.bf16.msra.mxu1 %v6599_v31  ;;  %5946 = vmatprep.subr.bf16.mxu0 %v6600_v32  ;;  %v6659_v31 = vld [vmem:[%s8625_s1 + $0x488] sm:$0xff]   ;;  %v6660_v32 = vld [vmem:[%s8625_s1 + $0x450] sm:$0xff]  }
  0x56   :  { %5968 = vmatprep.subr.bf16.mxu1 %v6601_v33  ;;  %v6661_v33 = vld [vmem:[%s8625_s1 + $0x4d0] sm:$0xff]  }
  0x58   :  { %5947 = vmatpush3.bf16.msra.mxu0 %v6602_v34  ;;  %v6662_v34 = vld [vmem:[%s8625_s1 + $0x410] sm:$0xff]  }
  0x59   :  { %5969 = vmatpush3.bf16.msra.mxu1 %v6603_v35  ;;  %5948 = vmatprep.subr.bf16.mxu0 %v6604_v36  ;;  %v6663_v35 = vld [vmem:[%s8625_s1 + $0x490] sm:$0xff]   ;;  %v6664_v36 = vld [vmem:[%s8625_s1 + $0x458] sm:$0xff]  }
  0x5a   :  { %5970 = vmatprep.subr.bf16.mxu1 %v6605_v37  ;;  %v6665_v37 = vld [vmem:[%s8625_s1 + $0x4d8] sm:$0xff]  }
  0x5c   :  { %5949 = vmatpush3.bf16.msra.mxu0 %v6606_v38  ;;  %v6666_v38 = vld [vmem:[%s8625_s1 + $0x418] sm:$0xff]  }
  0x5d   :  { %5971 = vmatpush3.bf16.msra.mxu1 %v6607_v39  ;;  %5950 = vmatprep.subr.bf16.mxu0 %v6608_v40  ;;  %v6667_v39 = vld [vmem:[%s8625_s1 + $0x498] sm:$0xff]   ;;  %v6668_v40 = vld [vmem:[%s8625_s1 + $0x460] sm:$0xff]  }
  0x5e   :  { %5972 = vmatprep.subr.bf16.mxu1 %v6609_v41  ;;  %v6669_v41 = vld [vmem:[%s8625_s1 + $0x4e0] sm:$0xff]  }
  0x60   :  { %5951 = vmatpush3.bf16.msra.mxu0 %v6610_v42  ;;  %v6670_v42 = vld [vmem:[%s8625_s1 + $0x420] sm:$0xff]  }
  0x61   :  { %5973 = vmatpush3.bf16.msra.mxu1 %v6611_v43  ;;  %5980 = vmatprep.subr.bf16.mxu0 %v6616_v50  ;;  %v6671_v43 = vld [vmem:[%s8625_s1 + $0x4a0] sm:$0xff]   ;;  %v6678_v50 = vld [vmem:[%s8625_s1 + $0x430] sm:$0xff]  }
  0x62   :  { %6002 = vmatprep.subr.bf16.mxu1 %v6617_v51  ;;  %v6679_v51 = vld [vmem:[%s8625_s1 + $0x4b0] sm:$0xff]  }
  0x63   :  { %4295 = vmatmul.mubr.bf16.vlgmr.msra.gmra.mrb[8].mxu0 %v5316_v46  ;;  %v6674_v46 = vld [vmem:[%s8625_s1 + $0x428] sm:$0xff]  }
  0x64   :  { %4335 = vmatmul.mubr.bf16.vlgmr.msra.gmra.mrb[8].mxu1 %v5318_v48  ;;  %5981 = vmatpush3.bf16.msra.mxu0 %v6618_v52  ;;  %v6676_v48 = vld [vmem:[%s8625_s1 + $0x470] sm:$0xff]   ;;  %v6680_v52 = vld [vmem:[%s8625_s1 + $0x478] sm:$0xff]  }
  0x65   :  { %6003 = vmatpush3.bf16.msra.mxu1 %v6619_v53  ;;  %5982 = vmatprep.subr.bf16.mxu0 %v6620_v54  ;;  %v6681_v53 = vld [vmem:[%s8625_s1 + $0x4f8] sm:$0xff]  }
  0x66   :  { %6004 = vmatprep.subr.bf16.mxu1 %v6621_v55  ;;  %4374 = vmatprep.mubr.bf16.mxu0 %v5321_v21  ;;  %v6682_v54 = vld [vmem:[%s8625_s1 + $0x438] sm:$0xff]   ;;  %v6711_v21 = vld [vmem:[%s8625_s1 + $0x5a8] sm:$0xff]  }
  0x67   :  { %4414 = vmatprep.mubr.bf16.mxu1 %v5323_v24  ;;  %v6683_v55 = vld [vmem:[%s8625_s1 + $0x4b8] sm:$0xff]   ;;  %v6714_v24 = vld [vmem:[%s8625_s1 + $0x530] sm:$0xff]  }
  0x68   :  { %5983 = vmatpush3.bf16.msra.mxu0 %v6622_v56  ;;  %v23_v56 = vld [vmem:[%s8626_s0 + $0x40] sm:$0xff] }
  0x69   :  { %6005 = vmatpush3.bf16.msra.mxu1 %v6623_v57  ;;  %5984 = vmatprep.subr.bf16.mxu0 %v6624_v58  ;;  %v5324_v57 = vcombine.low %v23_v56, %v23_v56  ;;  %v5325_v58 = vcombine.high %v23_v56, %v23_v56  ;;  %v6744_v56 = vld [vmem:[%s8625_s1 + $0x668] sm:$0xff]  }
  0x6a   :  { %6006 = vmatprep.subr.bf16.mxu1 %v6625_v59  ;;  %v24_v59 = vld [vmem:[%s8626_s0 + $0x48] sm:$0xff] }
  0x6c   :  { %5985 = vmatpush3.bf16.msra.mxu0 %v6626_v60  ;;  %v5326_v60 = vcombine.low %v24_v59, %v24_v59 }
  0x6d   :  { %6007 = vmatpush3.bf16.msra.mxu1 %v6627_v61  ;;  %5986 = vmatprep.subr.bf16.mxu0 %v6628_v62  ;;  %v5327_v61 = vcombine.high %v24_v59, %v24_v59  ;;  %v6688_v62 = vld [vmem:[%s8625_s1 + $0x540] sm:$0xff]   ;;  %v6747_v59 = vld [vmem:[%s8625_s1 + $0x6a8] sm:$0xff]  }
  0x6e   :  { %6008 = vmatprep.subr.bf16.mxu1 %v6629_v63  ;;  %v6689_v63 = vld [vmem:[%s8625_s1 + $0x5c0] sm:$0xff]  }
  0x70   :  { %5987 = vmatpush3.bf16.msra.mxu0 %v6630_v0  ;;  %v6690_v0 = vld [vmem:[%s8625_s1 + $0x500] sm:$0xff]  }
  0x71   :  { %6009 = vmatpush3.bf16.msra.mxu1 %v6631_v1  ;;  %5988 = vmatprep.subr.bf16.mxu0 %v6632_v2  ;;  %v6691_v1 = vld [vmem:[%s8625_s1 + $0x580] sm:$0xff]   ;;  %v6692_v2 = vld [vmem:[%s8625_s1 + $0x548] sm:$0xff]  }
  0x72   :  { %6010 = vmatprep.subr.bf16.mxu1 %v6633_v3  ;;  %v6693_v3 = vld [vmem:[%s8625_s1 + $0x5c8] sm:$0xff]  }
  0x74   :  { %5989 = vmatpush3.bf16.msra.mxu0 %v6634_v4  ;;  %v6694_v4 = vld [vmem:[%s8625_s1 + $0x508] sm:$0xff]  }
  0x75   :  { %6011 = vmatpush3.bf16.msra.mxu1 %v6635_v5  ;;  %5990 = vmatprep.subr.bf16.mxu0 %v6636_v6  ;;  %v6695_v5 = vld [vmem:[%s8625_s1 + $0x588] sm:$0xff]   ;;  %v6696_v6 = vld [vmem:[%s8625_s1 + $0x550] sm:$0xff]  }
  0x76   :  { %6012 = vmatprep.subr.bf16.mxu1 %v6637_v7  ;;  %v6697_v7 = vld [vmem:[%s8625_s1 + $0x5d0] sm:$0xff]  }
  0x78   :  { %5991 = vmatpush3.bf16.msra.mxu0 %v6638_v8  ;;  %v6698_v8 = vld [vmem:[%s8625_s1 + $0x510] sm:$0xff]  }
  0x79   :  { %6013 = vmatpush3.bf16.msra.mxu1 %v6639_v9  ;;  %5992 = vmatprep.subr.bf16.mxu0 %v6640_v10  ;;  %v6699_v9 = vld [vmem:[%s8625_s1 + $0x590] sm:$0xff]   ;;  %v6700_v10 = vld [vmem:[%s8625_s1 + $0x558] sm:$0xff]  }
  0x7a   :  { %6014 = vmatprep.subr.bf16.mxu1 %v6641_v11  ;;  %v6701_v11 = vld [vmem:[%s8625_s1 + $0x5d8] sm:$0xff]  }
  0x7c   :  { %5993 = vmatpush3.bf16.msra.mxu0 %v6642_v12  ;;  %v6702_v12 = vld [vmem:[%s8625_s1 + $0x518] sm:$0xff]  }
  0x7d   :  { %6015 = vmatpush3.bf16.msra.mxu1 %v6643_v13  ;;  %5994 = vmatprep.subr.bf16.mxu0 %v6644_v14  ;;  %v6703_v13 = vld [vmem:[%s8625_s1 + $0x598] sm:$0xff]   ;;  %v6704_v14 = vld [vmem:[%s8625_s1 + $0x560] sm:$0xff]  }
  0x7e   :  { %6016 = vmatprep.subr.bf16.mxu1 %v6645_v15  ;;  %v6705_v15 = vld [vmem:[%s8625_s1 + $0x5e0] sm:$0xff]  }
  0x80   :  { %5995 = vmatpush3.bf16.msra.mxu0 %v6646_v16  ;;  %v6706_v16 = vld [vmem:[%s8625_s1 + $0x520] sm:$0xff]  }
  0x81   :  { %6017 = vmatpush3.bf16.msra.mxu1 %v6647_v17  ;;  %6024 = vmatprep.subr.bf16.mxu0 %v6652_v23  ;;  %v6707_v17 = vld [vmem:[%s8625_s1 + $0x5a0] sm:$0xff]   ;;  %v6713_v23 = vld [vmem:[%s8625_s1 + $0x5f0] sm:$0xff]  }
  0x82   :  { %6046 = vmatprep.subr.bf16.mxu1 %v6653_v25  ;;  %v6715_v25 = vld [vmem:[%s8625_s1 + $0x5b0] sm:$0xff]  }
  0x83   :  { %4375 = vmatmul.mubr.bf16.vlgmr.msra.gmra.mrb[12].mxu0 %v5320_v20  ;;  %v6710_v20 = vld [vmem:[%s8625_s1 + $0x528] sm:$0xff]  }
  0x84   :  { %4415 = vmatmul.mubr.bf16.vlgmr.msra.gmra.mrb[12].mxu1 %v5322_v22  ;;  %6025 = vmatpush3.bf16.msra.mxu0 %v6654_v26  ;;  %v6712_v22 = vld [vmem:[%s8625_s1 + $0x570] sm:$0xff]   ;;  %v6716_v26 = vld [vmem:[%s8625_s1 + $0x578] sm:$0xff]  }
  0x85   :  { %6047 = vmatpush3.bf16.msra.mxu1 %v6655_v27  ;;  %6026 = vmatprep.subr.bf16.mxu0 %v6656_v28  ;;  %v6717_v27 = vld [vmem:[%s8625_s1 + $0x5f8] sm:$0xff]  }
  0x86   :  { %6048 = vmatprep.subr.bf16.mxu1 %v6657_v29  ;;  %4454 = vmatprep.mubr.bf16.mxu0 %v5325_v58  ;;  %v6718_v28 = vld [vmem:[%s8625_s1 + $0x538] sm:$0xff]   ;;  %v6746_v58 = vld [vmem:[%s8625_s1 + $0x628] sm:$0xff]  }
  0x87   :  { %4494 = vmatprep.mubr.bf16.mxu1 %v5327_v61  ;;  %v6719_v29 = vld [vmem:[%s8625_s1 + $0x5b8] sm:$0xff]   ;;  %v6749_v61 = vld [vmem:[%s8625_s1 + $0x6f0] sm:$0xff]  }
  0x88   :  { %6027 = vmatpush3.bf16.msra.mxu0 %v6658_v30  ;;  %v25_v30 = vld [vmem:[%s8626_s0 + $0x50] sm:$0xff] }
  0x89   :  { %6049 = vmatpush3.bf16.msra.mxu1 %v6659_v31  ;;  %6028 = vmatprep.subr.bf16.mxu0 %v6660_v32  ;;  %v26_v31 = vld [vmem:[%s8626_s0 + $0x58] sm:$0xff]  ;;  %v5328_v32 = vcombine.low %v25_v30, %v25_v30 }
  0x8a   :  { %6050 = vmatprep.subr.bf16.mxu1 %v6661_v33  ;;  %v5329_v33 = vcombine.high %v25_v30, %v25_v30  ;;  %v6779_v30 = vld [vmem:[%s8625_s1 + $0x7a0] sm:$0xff]  }
  0x8c   :  { %6029 = vmatpush3.bf16.msra.mxu0 %v6662_v34  ;;  %v5330_v34 = vcombine.low %v26_v31, %v26_v31 }
  0x8d   :  { %6051 = vmatpush3.bf16.msra.mxu1 %v6663_v35  ;;  %6030 = vmatprep.subr.bf16.mxu0 %v6664_v36  ;;  %v5331_v35 = vcombine.high %v26_v31, %v26_v31  ;;  %v6724_v36 = vld [vmem:[%s8625_s1 + $0x640] sm:$0xff]  }
  0x8e   :  { %6052 = vmatprep.subr.bf16.mxu1 %v6665_v37  ;;  %v6725_v37 = vld [vmem:[%s8625_s1 + $0x6c0] sm:$0xff]  }
  0x90   :  { %6031 = vmatpush3.bf16.msra.mxu0 %v6666_v38  ;;  %v6726_v38 = vld [vmem:[%s8625_s1 + $0x600] sm:$0xff]  }
  0x91   :  { %6053 = vmatpush3.bf16.msra.mxu1 %v6667_v39  ;;  %6032 = vmatprep.subr.bf16.mxu0 %v6668_v40  ;;  %v6727_v39 = vld [vmem:[%s8625_s1 + $0x680] sm:$0xff]   ;;  %v6728_v40 = vld [vmem:[%s8625_s1 + $0x648] sm:$0xff]  }
  0x92   :  { %6054 = vmatprep.subr.bf16.mxu1 %v6669_v41  ;;  %v6729_v41 = vld [vmem:[%s8625_s1 + $0x6c8] sm:$0xff]  }
  0x94   :  { %6033 = vmatpush3.bf16.msra.mxu0 %v6670_v42  ;;  %v6730_v42 = vld [vmem:[%s8625_s1 + $0x608] sm:$0xff]  }
  0x95   :  { %6055 = vmatpush3.bf16.msra.mxu1 %v6671_v43  ;;  %6034 = vmatprep.subr.bf16.mxu0 %v6672_v44  ;;  %v6731_v43 = vld [vmem:[%s8625_s1 + $0x688] sm:$0xff]   ;;  %v6732_v44 = vld [vmem:[%s8625_s1 + $0x650] sm:$0xff]  }
  0x96   :  { %6056 = vmatprep.subr.bf16.mxu1 %v6673_v45  ;;  %v6733_v45 = vld [vmem:[%s8625_s1 + $0x6d0] sm:$0xff]  }
  0x98   :  { %6035 = vmatpush3.bf16.msra.mxu0 %v6674_v46  ;;  %v6734_v46 = vld [vmem:[%s8625_s1 + $0x610] sm:$0xff]  }
  0x99   :  { %6057 = vmatpush3.bf16.msra.mxu1 %v6675_v47  ;;  %6036 = vmatprep.subr.bf16.mxu0 %v6676_v48  ;;  %v6735_v47 = vld [vmem:[%s8625_s1 + $0x690] sm:$0xff]   ;;  %v6736_v48 = vld [vmem:[%s8625_s1 + $0x658] sm:$0xff]  }
  0x9a   :  { %6058 = vmatprep.subr.bf16.mxu1 %v6677_v49  ;;  %v6737_v49 = vld [vmem:[%s8625_s1 + $0x6d8] sm:$0xff]  }
  0x9c   :  { %6037 = vmatpush3.bf16.msra.mxu0 %v6678_v50  ;;  %v6738_v50 = vld [vmem:[%s8625_s1 + $0x618] sm:$0xff]  }
  0x9d   :  { %6059 = vmatpush3.bf16.msra.mxu1 %v6679_v51  ;;  %6038 = vmatprep.subr.bf16.mxu0 %v6680_v52  ;;  %v6739_v51 = vld [vmem:[%s8625_s1 + $0x698] sm:$0xff]   ;;  %v6740_v52 = vld [vmem:[%s8625_s1 + $0x660] sm:$0xff]  }
  0x9e   :  { %6060 = vmatprep.subr.bf16.mxu1 %v6681_v53  ;;  %v6741_v53 = vld [vmem:[%s8625_s1 + $0x6e0] sm:$0xff]  }
  0xa0   :  { %6039 = vmatpush3.bf16.msra.mxu0 %v6682_v54  ;;  %v6742_v54 = vld [vmem:[%s8625_s1 + $0x620] sm:$0xff]  }
  0xa1   :  { %6061 = vmatpush3.bf16.msra.mxu1 %v6683_v55  ;;  %6068 = vmatprep.subr.bf16.mxu0 %v6688_v62  ;;  %v6743_v55 = vld [vmem:[%s8625_s1 + $0x6a0] sm:$0xff]   ;;  %v6750_v62 = vld [vmem:[%s8625_s1 + $0x630] sm:$0xff]  }
  0xa2   :  { %6090 = vmatprep.subr.bf16.mxu1 %v6689_v63  ;;  %v6751_v63 = vld [vmem:[%s8625_s1 + $0x6b0] sm:$0xff]  }
  0xa3   :  { %4455 = vmatmul.mubr.bf16.vlgmr.msra.gmra.mrb[16].mxu0 %v5324_v57  ;;  %v6745_v57 = vld [vmem:[%s8625_s1 + $0x6e8] sm:$0xff]  }
  0xa4   :  { %4495 = vmatmul.mubr.bf16.vlgmr.msra.gmra.mrb[16].mxu1 %v5326_v60  ;;  %6069 = vmatpush3.bf16.msra.mxu0 %v6690_v0  ;;  %v6748_v60 = vld [vmem:[%s8625_s1 + $0x670] sm:$0xff]   ;;  %v6752_v0 = vld [vmem:[%s8625_s1 + $0x678] sm:$0xff]  }
  0xa5   :  { %6091 = vmatpush3.bf16.msra.mxu1 %v6691_v1  ;;  %6070 = vmatprep.subr.bf16.mxu0 %v6692_v2  ;;  %v6753_v1 = vld [vmem:[%s8625_s1 + $0x6f8] sm:$0xff]  }
  0xa6   :  { %6092 = vmatprep.subr.bf16.mxu1 %v6693_v3  ;;  %4534 = vmatprep.mubr.bf16.mxu0 %v5329_v33  ;;  %v6754_v2 = vld [vmem:[%s8625_s1 + $0x638] sm:$0xff]  }
  0xa7   :  { %4574 = vmatprep.mubr.bf16.mxu1 %v5331_v35  ;;  %v6755_v3 = vld [vmem:[%s8625_s1 + $0x6b8] sm:$0xff]  }
  0xa8   :  { %6071 = vmatpush3.bf16.msra.mxu0 %v6694_v4  ;;  %v27_v4 = vld [vmem:[%s8626_s0 + $0x60] sm:$0xff] }
  0xa9   :  { %6093 = vmatpush3.bf16.msra.mxu1 %v6695_v5  ;;  %6072 = vmatprep.subr.bf16.mxu0 %v6696_v6  ;;  %v28_v5 = vld [vmem:[%s8626_s0 + $0x68] sm:$0xff]  ;;  %v5332_v6 = vcombine.low %v27_v4, %v27_v4 }
  0xaa   :  { %6094 = vmatprep.subr.bf16.mxu1 %v6697_v7  ;;  %v5333_v7 = vcombine.high %v27_v4, %v27_v4  ;;  %v6803_v4 = vld [vmem:[%s8625_s1 + $0x888] sm:$0xff]  }
  0xac   :  { %6073 = vmatpush3.bf16.msra.mxu0 %v6698_v8  ;;  %v5334_v8 = vcombine.low %v28_v5, %v28_v5 }
  0xad   :  { %6095 = vmatpush3.bf16.msra.mxu1 %v6699_v9  ;;  %6074 = vmatprep.subr.bf16.mxu0 %v6700_v10  ;;  %v6760_v9 = vld [vmem:[%s8625_s1 + $0x740] sm:$0xff]   ;;  %v5335_v10 = vcombine.high %v28_v5, %v28_v5  ;;  %v6804_v5 = vld [vmem:[%s8625_s1 + $0x850] sm:$0xff]  }
  0xae   :  { %6096 = vmatprep.subr.bf16.mxu1 %v6701_v11  ;;  %v6761_v11 = vld [vmem:[%s8625_s1 + $0x7c0] sm:$0xff]  }
  0xb0   :  { %6075 = vmatpush3.bf16.msra.mxu0 %v6702_v12  ;;  %v6762_v12 = vld [vmem:[%s8625_s1 + $0x700] sm:$0xff]  }
  0xb1   :  { %6097 = vmatpush3.bf16.msra.mxu1 %v6703_v13  ;;  %6076 = vmatprep.subr.bf16.mxu0 %v6704_v14  ;;  %v6763_v13 = vld [vmem:[%s8625_s1 + $0x780] sm:$0xff]   ;;  %v6764_v14 = vld [vmem:[%s8625_s1 + $0x748] sm:$0xff]  }
  0xb2   :  { %6098 = vmatprep.subr.bf16.mxu1 %v6705_v15  ;;  %v6765_v15 = vld [vmem:[%s8625_s1 + $0x7c8] sm:$0xff]  }
  0xb4   :  { %6077 = vmatpush3.bf16.msra.mxu0 %v6706_v16  ;;  %v6766_v16 = vld [vmem:[%s8625_s1 + $0x708] sm:$0xff]  }
  0xb5   :  { %6099 = vmatpush3.bf16.msra.mxu1 %v6707_v17  ;;  %6078 = vmatprep.subr.bf16.mxu0 %v6708_v18  ;;  %v6767_v17 = vld [vmem:[%s8625_s1 + $0x788] sm:$0xff]   ;;  %v6768_v18 = vld [vmem:[%s8625_s1 + $0x750] sm:$0xff]  }
  0xb6   :  { %6100 = vmatprep.subr.bf16.mxu1 %v6709_v19  ;;  %v6769_v19 = vld [vmem:[%s8625_s1 + $0x7d0] sm:$0xff]  }
  0xb8   :  { %6079 = vmatpush3.bf16.msra.mxu0 %v6710_v20  ;;  %v6770_v20 = vld [vmem:[%s8625_s1 + $0x710] sm:$0xff]  }
  0xb9   :  { %6101 = vmatpush3.bf16.msra.mxu1 %v6711_v21  ;;  %6080 = vmatprep.subr.bf16.mxu0 %v6712_v22  ;;  %v6771_v21 = vld [vmem:[%s8625_s1 + $0x790] sm:$0xff]   ;;  %v6772_v22 = vld [vmem:[%s8625_s1 + $0x758] sm:$0xff]  }
  0xba   :  { %6102 = vmatprep.subr.bf16.mxu1 %v6713_v23  ;;  %v6773_v23 = vld [vmem:[%s8625_s1 + $0x7d8] sm:$0xff]  }
  0xbc   :  { %6081 = vmatpush3.bf16.msra.mxu0 %v6714_v24  ;;  %v6774_v24 = vld [vmem:[%s8625_s1 + $0x718] sm:$0xff]  }
  0xbd   :  { %6103 = vmatpush3.bf16.msra.mxu1 %v6715_v25  ;;  %6082 = vmatprep.subr.bf16.mxu0 %v6716_v26  ;;  %v6775_v25 = vld [vmem:[%s8625_s1 + $0x798] sm:$0xff]   ;;  %v6776_v26 = vld [vmem:[%s8625_s1 + $0x760] sm:$0xff]  }
  0xbe   :  { %6104 = vmatprep.subr.bf16.mxu1 %v6717_v27  ;;  %v6777_v27 = vld [vmem:[%s8625_s1 + $0x7e0] sm:$0xff]  }
  0xc0   :  { %6083 = vmatpush3.bf16.msra.mxu0 %v6718_v28  ;;  %v6778_v28 = vld [vmem:[%s8625_s1 + $0x720] sm:$0xff]  }
  0xc1   :  { %6105 = vmatpush3.bf16.msra.mxu1 %v6719_v29  ;;  %6112 = vmatprep.subr.bf16.mxu0 %v6724_v36 }
  0xc2   :  { %6134 = vmatprep.subr.bf16.mxu1 %v6725_v37  ;;  %v6780_v37 = vld [vmem:[%s8625_s1 + $0x768] sm:$0xff]  }
  0xc3   :  { %4535 = vmatmul.mubr.bf16.vlgmr.msra.gmra.mrb[20].mxu0 %v5328_v32  ;;  %v5307_v32 = vld [vmem:[%s8627_s2] ss:$0 sm:$0xff] }
  0xc4   :  { %4575 = vmatmul.mubr.bf16.vlgmr.msra.gmra.mrb[20].mxu1 %v5330_v34  ;;  %6113 = vmatpush3.bf16.msra.mxu0 %v6726_v38 }
  0xc5   :  { %6135 = vmatpush3.bf16.msra.mxu1 %v6727_v39  ;;  %6114 = vmatprep.subr.bf16.mxu0 %v6728_v40  ;;  %v6781_v39 = vld [vmem:[%s8625_s1 + $0x7e8] sm:$0xff]  }
  0xc6   :  { %6136 = vmatprep.subr.bf16.mxu1 %v6729_v41  ;;  %4614 = vmatprep.mubr.bf16.mxu0 %v5333_v7  ;;  %v6806_v7 = vld [vmem:[%s8625_s1 + $0x810] sm:$0xff]  }
  0xc7   :  { %4654 = vmatprep.mubr.bf16.mxu1 %v5335_v10  ;;  %v6809_v10 = vld [vmem:[%s8625_s1 + $0x8d8] sm:$0xff]  }
  0xc8   :  { %6115 = vmatpush3.bf16.msra.mxu0 %v6730_v42  ;;  %v6782_v42 = vld [vmem:[%s8625_s1 + $0x728] sm:$0xff]  }
  0xc9   :  { %6137 = vmatpush3.bf16.msra.mxu1 %v6731_v43  ;;  %6116 = vmatprep.subr.bf16.mxu0 %v6732_v44  ;;  %v6783_v44 = vld [vmem:[%s8625_s1 + $0x7a8] sm:$0xff]  }
  0xca   :  { %6138 = vmatprep.subr.bf16.mxu1 %v6733_v45 }
  0xcc   :  { %6117 = vmatpush3.bf16.msra.mxu0 %v6734_v46 }
  0xcd   :  { %6139 = vmatpush3.bf16.msra.mxu1 %v6735_v47  ;;  %6118 = vmatprep.subr.bf16.mxu0 %v6736_v48  ;;  %v6784_v47 = vld [vmem:[%s8625_s1 + $0x770] sm:$0xff]  }
  0xce   :  { %6140 = vmatprep.subr.bf16.mxu1 %v6737_v49  ;;  %v6785_v48 = vld [vmem:[%s8625_s1 + $0x7f0] sm:$0xff]  }
  0xcf   :  { %v6786_v49 = vld [vmem:[%s8625_s1 + $0x730] sm:$0xff]  }
  0xd0   :  { %6119 = vmatpush3.bf16.msra.mxu0 %v6738_v50  ;;  %v6787_v50 = vld [vmem:[%s8625_s1 + $0x7b0] sm:$0xff]  }
  0xd1   :  { %6141 = vmatpush3.bf16.msra.mxu1 %v6739_v51  ;;  %6120 = vmatprep.subr.bf16.mxu0 %v6740_v52  ;;  %v6788_v51 = vld [vmem:[%s8625_s1 + $0x778] sm:$0xff]  }
  0xd2   :  { %6142 = vmatprep.subr.bf16.mxu1 %v6741_v53  ;;  %v6789_v52 = vld [vmem:[%s8625_s1 + $0x7f8] sm:$0xff]  }
  0xd3   :  { %v6790_v53 = vld [vmem:[%s8625_s1 + $0x738] sm:$0xff]  }
  0xd4   :  { %6121 = vmatpush3.bf16.msra.mxu0 %v6742_v54  ;;  %v6791_v54 = vld [vmem:[%s8625_s1 + $0x7b8] sm:$0xff]  }
  0xd5   :  { %6143 = vmatpush3.bf16.msra.mxu1 %v6743_v55  ;;  %6122 = vmatprep.subr.bf16.mxu0 %v6744_v56  ;;  %v29_v55 = vld [vmem:[%s8626_s0 + $0x70] sm:$0xff]  ;;  %v30_v56 = vld [vmem:[%s8626_s0 + $0x78] sm:$0xff] }
  0xd6   :  { %6144 = vmatprep.subr.bf16.mxu1 %v6745_v57  ;;  %v5336_v57 = vcombine.low %v29_v55, %v29_v55 }
  0xd8   :  { %6123 = vmatpush3.bf16.msra.mxu0 %v6746_v58  ;;  %v5337_v58 = vcombine.high %v29_v55, %v29_v55  ;;  %v6840_v55 = vld [vmem:[%s8625_s1 + $0x950] sm:$0xff]  }
  0xd9   :  { %6145 = vmatpush3.bf16.msra.mxu1 %v6747_v59  ;;  %6124 = vmatprep.subr.bf16.mxu0 %v6748_v60  ;;  %v5338_v59 = vcombine.low %v30_v56, %v30_v56  ;;  %v5339_v60 = vcombine.high %v30_v56, %v30_v56  ;;  %v6841_v56 = vld [vmem:[%s8625_s1 + $0x9d0] sm:$0xff]  }
  0xda   :  { %6146 = vmatprep.subr.bf16.mxu1 %v6749_v61  ;;  %v6796_v61 = vld [vmem:[%s8625_s1 + $0x840] sm:$0xff]  }
  0xdc   :  { %6125 = vmatpush3.bf16.msra.mxu0 %v6750_v62  ;;  %v6797_v62 = vld [vmem:[%s8625_s1 + $0x8c0] sm:$0xff]  }
  0xdd   :  { %6147 = vmatpush3.bf16.msra.mxu1 %v6751_v63  ;;  %6126 = vmatprep.subr.bf16.mxu0 %v6752_v0  ;;  %v6798_v63 = vld [vmem:[%s8625_s1 + $0x800] sm:$0xff]  }
  0xde   :  { %6148 = vmatprep.subr.bf16.mxu1 %v6753_v1  ;;  %v6799_v0 = vld [vmem:[%s8625_s1 + $0x880] sm:$0xff]   ;;  %v6800_v1 = vld [vmem:[%s8625_s1 + $0x848] sm:$0xff]  }
  0xe0   :  { %6127 = vmatpush3.bf16.msra.mxu0 %v6754_v2  ;;  %v6801_v2 = vld [vmem:[%s8625_s1 + $0x8c8] sm:$0xff]  }
  0xe1   :  { %6149 = vmatpush3.bf16.msra.mxu1 %v6755_v3  ;;  %6156 = vmatprep.subr.bf16.mxu0 %v6760_v9  ;;  %v6802_v3 = vld [vmem:[%s8625_s1 + $0x808] sm:$0xff]   ;;  %v6808_v9 = vld [vmem:[%s8625_s1 + $0x858] sm:$0xff]  }
  0xe2   :  { %6178 = vmatprep.subr.bf16.mxu1 %v6761_v11  ;;  %v6810_v11 = vld [vmem:[%s8625_s1 + $0x818] sm:$0xff]  }
  0xe3   :  { %4615 = vmatmul.mubr.bf16.vlgmr.msra.gmra.mrb[24].mxu0 %v5332_v6  ;;  %v6805_v6 = vld [vmem:[%s8625_s1 + $0x8d0] sm:$0xff]  }
  0xe4   :  { %4655 = vmatmul.mubr.bf16.vlgmr.msra.gmra.mrb[24].mxu1 %v5334_v8  ;;  %6157 = vmatpush3.bf16.msra.mxu0 %v6762_v12  ;;  %v6807_v8 = vld [vmem:[%s8625_s1 + $0x890] sm:$0xff]   ;;  %v6811_v12 = vld [vmem:[%s8625_s1 + $0x898] sm:$0xff]  }
  0xe5   :  { %6179 = vmatpush3.bf16.msra.mxu1 %v6763_v13  ;;  %6158 = vmatprep.subr.bf16.mxu0 %v6764_v14  ;;  %v6812_v13 = vld [vmem:[%s8625_s1 + $0x860] sm:$0xff]  }
  0xe6   :  { %6180 = vmatprep.subr.bf16.mxu1 %v6765_v15  ;;  %4694 = vmatprep.mubr.bf16.mxu0 %v5337_v58  ;;  %v6813_v14 = vld [vmem:[%s8625_s1 + $0x8e0] sm:$0xff]   ;;  %v6843_v58 = vld [vmem:[%s8625_s1 + $0x990] sm:$0xff]  }
  0xe7   :  { %4734 = vmatprep.mubr.bf16.mxu1 %v5339_v60  ;;  %v6814_v15 = vld [vmem:[%s8625_s1 + $0x820] sm:$0xff]   ;;  %v6845_v60 = vld [vmem:[%s8625_s1 + $0x9d8] sm:$0xff]  }
  0xe8   :  { %6159 = vmatpush3.bf16.msra.mxu0 %v6766_v16 }
  0xe9   :  { %6181 = vmatpush3.bf16.msra.mxu1 %v6767_v17  ;;  %6160 = vmatprep.subr.bf16.mxu0 %v6768_v18  ;;  %v6815_v17 = vld [vmem:[%s8625_s1 + $0x8a0] sm:$0xff]  }
  0xea   :  { %6182 = vmatprep.subr.bf16.mxu1 %v6769_v19 }
  0xec   :  { %6161 = vmatpush3.bf16.msra.mxu0 %v6770_v20 }
  0xed   :  { %6183 = vmatpush3.bf16.msra.mxu1 %v6771_v21  ;;  %6162 = vmatprep.subr.bf16.mxu0 %v6772_v22 }
  0xee   :  { %6184 = vmatprep.subr.bf16.mxu1 %v6773_v23  ;;  %v6816_v23 = vld [vmem:[%s8625_s1 + $0x868] sm:$0xff]  }
  0xf0   :  { %6163 = vmatpush3.bf16.msra.mxu0 %v6774_v24 }
  0xf1   :  { %6185 = vmatpush3.bf16.msra.mxu1 %v6775_v25  ;;  %6164 = vmatprep.subr.bf16.mxu0 %v6776_v26  ;;  %v6817_v25 = vld [vmem:[%s8625_s1 + $0x8e8] sm:$0xff]  }
  0xf2   :  { %6186 = vmatprep.subr.bf16.mxu1 %v6777_v27 }
  0xf4   :  { %6165 = vmatpush3.bf16.msra.mxu0 %v6778_v28  ;;  %v6818_v28 = vld [vmem:[%s8625_s1 + $0x828] sm:$0xff]  }
  0xf5   :  { %6187 = vmatpush3.bf16.msra.mxu1 %v6779_v30  ;;  %6166 = vmatprep.subr.bf16.mxu0 %v6780_v37  ;;  %v6819_v30 = vld [vmem:[%s8625_s1 + $0x8a8] sm:$0xff]   ;;  %v6824_v37 = vld [vmem:[%s8625_s1 + $0x878] sm:$0xff]  }
  0xf6   :  { %v5864_v29 = vpop.f32.mrb[0].mxu0  ;;  %6188 = vmatprep.subr.bf16.mxu1 %v6781_v39  ;;  %v6826_v39 = vld [vmem:[%s8625_s1 + $0x838] sm:$0xff]  }
  0xf7   :  { %v5886_v31 = vpop.f32.mrb[0].mxu1  ;;  %v5865_v33 = vpop.f32.mrb[1].mxu0 }
  0xf8   :  { %v5887_v34 = vpop.f32.mrb[1].mxu1  ;;  %v5866_v35 = vadd.f32 %v5865_v33, %v5864_v29  ;;  %v5867_v38 = vpop.f32.mrb[2].mxu0  ;;  %6167 = vmatpush3.bf16.msra.mxu0 %v6782_v42  ;;  %v6820_v33 = vld [vmem:[%s8625_s1 + $0x870] sm:$0xff]   ;;  %v32_v42 = vld [vmem:[%s8626_s0 + $0x88] sm:$0xff] }
  0xf9   :  { %v5888_v36 = vadd.f32 %v5887_v34, %v5886_v31  ;;  %v5889_v40 = vpop.f32.mrb[2].mxu1  ;;  %v5868_v43 = vpop.f32.mrb[3].mxu0  ;;  %6189 = vmatpush3.bf16.msra.mxu1 %v6783_v44  ;;  %6168 = vmatprep.subr.bf16.mxu0 %v6784_v47  ;;  %v6821_v34 = vld [vmem:[%s8625_s1 + $0x8f0] sm:$0xff]   ;;  %v6825_v38 = vld [vmem:[%s8625_s1 + $0x8f8] sm:$0xff]   ;;  %v6832_v47 = vld [vmem:[%s8625_s1 + $0x940] sm:$0xff]  }
  0xfa   :  { %v4137_v41 = vadd.f32 %v5866_v35, %v5307_v32  ;;  %v5890_v45 = vpop.f32.mrb[3].mxu1  ;;  %6190 = vmatprep.subr.bf16.mxu1 %v6785_v48  ;;  %v6822_v35 = vld [vmem:[%s8625_s1 + $0x830] sm:$0xff]   ;;  %v6827_v40 = vld [vmem:[%s8625_s1 + $0x8b8] sm:$0xff]   ;;  %v6833_v48 = vld [vmem:[%s8625_s1 + $0x9c0] sm:$0xff]  }
  0xfb   :  { %v5342_v45 = vcombine.low %v32_v42, %v32_v42 }
  0xfc   :  { %v7857_v46 = vadd.f32 %v5888_v36, %v4137_v41  ;;  %6169 = vmatpush3.bf16.msra.mxu0 %v6786_v49  ;;  %v6823_v36 = vld [vmem:[%s8625_s1 + $0x8b0] sm:$0xff]   ;;  %v31_v41 = vld [vmem:[%s8626_s0 + $0x80] sm:$0xff] }
  0xfd   :  { %6191 = vmatpush3.bf16.msra.mxu1 %v6787_v50  ;;  %6170 = vmatprep.subr.bf16.mxu0 %v6788_v51  ;;  %v5340_v43 = vcombine.low %v31_v41, %v31_v41  ;;  %v5341_v44 = vcombine.high %v31_v41, %v31_v41  ;;  %v6834_v49 = vld [vmem:[%s8625_s1 + $0x900] sm:$0xff]   ;;  %v6836_v51 = vld [vmem:[%s8625_s1 + $0x948] sm:$0xff]   ;;  %v6876_v41 = vld [vmem:[%s8625_s1 + $0xa50] sm:$0xff]  }
  0xfe   :  { %6192 = vmatprep.subr.bf16.mxu1 %v6789_v52  ;;  %v6835_v50 = vld [vmem:[%s8625_s1 + $0x980] sm:$0xff]   ;;  %v6837_v52 = vld [vmem:[%s8625_s1 + $0x9c8] sm:$0xff]  }
 0x100   :  { %6171 = vmatpush3.bf16.msra.mxu0 %v6790_v53  ;;  %v6838_v53 = vld [vmem:[%s8625_s1 + $0x908] sm:$0xff]  }
 0x101   :  { %6193 = vmatpush3.bf16.msra.mxu1 %v6791_v54  ;;  %6200 = vmatprep.subr.bf16.mxu0 %v6796_v61  ;;  %v6839_v54 = vld [vmem:[%s8625_s1 + $0x988] sm:$0xff]   ;;  %v6846_v61 = vld [vmem:[%s8625_s1 + $0x918] sm:$0xff]  }
 0x102   :  { %6222 = vmatprep.subr.bf16.mxu1 %v6797_v62  ;;  %v6847_v62 = vld [vmem:[%s8625_s1 + $0x998] sm:$0xff]  }
 0x103   :  { %4695 = vmatmul.mubr.bf16.vlgmr.msra.gmra.mrb[28].mxu0 %v5336_v57  ;;  %v6842_v57 = vld [vmem:[%s8625_s1 + $0x910] sm:$0xff]  }
 0x104   :  { %4735 = vmatmul.mubr.bf16.vlgmr.msra.gmra.mrb[28].mxu1 %v5338_v59  ;;  %6201 = vmatpush3.bf16.msra.mxu0 %v6798_v63  ;;  %v6844_v59 = vld [vmem:[%s8625_s1 + $0x958] sm:$0xff]   ;;  %v6848_v63 = vld [vmem:[%s8625_s1 + $0x960] sm:$0xff]  }
 0x105   :  { %6223 = vmatpush3.bf16.msra.mxu1 %v6799_v0  ;;  %6202 = vmatprep.subr.bf16.mxu0 %v6800_v1  ;;  %v6849_v0 = vld [vmem:[%s8625_s1 + $0x9e0] sm:$0xff]  }
 0x106   :  { %6224 = vmatprep.subr.bf16.mxu1 %v6801_v2  ;;  %4774 = vmatprep.mubr.bf16.mxu0 %v5341_v44  ;;  %v6850_v2 = vld [vmem:[%s8625_s1 + $0x920] sm:$0xff]   ;;  %v6879_v44 = vld [vmem:[%s8625_s1 + $0xa90] sm:$0xff]  }
 0x108   :  { %6203 = vmatpush3.bf16.msra.mxu0 %v6802_v3 }
 0x109   :  { %6225 = vmatpush3.bf16.msra.mxu1 %v6803_v4  ;;  %6204 = vmatprep.subr.bf16.mxu0 %v6804_v5  ;;  %v6851_v4 = vld [vmem:[%s8625_s1 + $0x9a0] sm:$0xff]  }
 0x10a   :  { %6226 = vmatprep.subr.bf16.mxu1 %v6805_v6 }
 0x10c   :  { %6205 = vmatpush3.bf16.msra.mxu0 %v6806_v7 }
 0x10d   :  { %6227 = vmatpush3.bf16.msra.mxu1 %v6807_v8  ;;  %6206 = vmatprep.subr.bf16.mxu0 %v6808_v9  ;;  %v6852_v8 = vld [vmem:[%s8625_s1 + $0x968] sm:$0xff]  }
 0x10e   :  { %6228 = vmatprep.subr.bf16.mxu1 %v6809_v10  ;;  %v6853_v10 = vld [vmem:[%s8625_s1 + $0x9e8] sm:$0xff]  }
 0x110   :  { %6207 = vmatpush3.bf16.msra.mxu0 %v6810_v11 }
 0x111   :  { %6229 = vmatpush3.bf16.msra.mxu1 %v6811_v12  ;;  %6208 = vmatprep.subr.bf16.mxu0 %v6812_v13 }
 0x112   :  { %6230 = vmatprep.subr.bf16.mxu1 %v6813_v14  ;;  %v6854_v14 = vld [vmem:[%s8625_s1 + $0x928] sm:$0xff]  }
 0x114   :  { %6209 = vmatpush3.bf16.msra.mxu0 %v6814_v15  ;;  %v6855_v15 = vld [vmem:[%s8625_s1 + $0x9a8] sm:$0xff]  }
 0x115   :  { %6231 = vmatpush3.bf16.msra.mxu1 %v6815_v17  ;;  %6210 = vmatprep.subr.bf16.mxu0 %v6816_v23  ;;  %v6860_v23 = vld [vmem:[%s8625_s1 + $0x978] sm:$0xff]  }
 0x116   :  { %v5908_v16 = vpop.f32.mrb[4].mxu0  ;;  %6232 = vmatprep.subr.bf16.mxu1 %v6817_v25  ;;  %v6862_v25 = vld [vmem:[%s8625_s1 + $0x938] sm:$0xff]  }
 0x117   :  { %v5930_v18 = vpop.f32.mrb[4].mxu1  ;;  %v5909_v19 = vpop.f32.mrb[5].mxu0 }
 0x118   :  { %v5931_v20 = vpop.f32.mrb[5].mxu1  ;;  %v5910_v21 = vadd.f32 %v5909_v19, %v5908_v16  ;;  %v5911_v24 = vpop.f32.mrb[6].mxu0  ;;  %6211 = vmatpush3.bf16.msra.mxu0 %v6818_v28  ;;  %v6856_v19 = vld [vmem:[%s8625_s1 + $0x970] sm:$0xff]   ;;  %v34_v28 = vld [vmem:[%s8626_s0 + $0x98] sm:$0xff] }
 0x119   :  { %v5932_v22 = vadd.f32 %v5931_v20, %v5930_v18  ;;  %v5933_v26 = vpop.f32.mrb[6].mxu1  ;;  %v5912_v29 = vpop.f32.mrb[7].mxu0  ;;  %6233 = vmatpush3.bf16.msra.mxu1 %v6819_v30  ;;  %6212 = vmatprep.subr.bf16.mxu0 %v6820_v33  ;;  %v6857_v20 = vld [vmem:[%s8625_s1 + $0x9f0] sm:$0xff]   ;;  %v6861_v24 = vld [vmem:[%s8625_s1 + $0x9f8] sm:$0xff]   ;;  %v5347_v33 = vcombine.high %v34_v28, %v34_v28 }
 0x11a   :  { %v4217_v27 = vadd.f32 %v5910_v21, %v7857_v46  ;;  %v5934_v31 = vpop.f32.mrb[7].mxu1  ;;  %6234 = vmatprep.subr.bf16.mxu1 %v6821_v34  ;;  %v5343_v46 = vcombine.high %v32_v42, %v32_v42  ;;  %v6858_v21 = vld [vmem:[%s8625_s1 + $0x930] sm:$0xff]   ;;  %v6863_v26 = vld [vmem:[%s8625_s1 + $0x9b8] sm:$0xff]   ;;  %v6869_v34 = vld [vmem:[%s8625_s1 + $0xac0] sm:$0xff]  }
 0x11b   :  { %v5346_v31 = vcombine.low %v34_v28, %v34_v28  ;;  %v6877_v42 = vld [vmem:[%s8625_s1 + $0xad0] sm:$0xff]  }
 0x11c   :  { %v7962_v32 = vadd.f32 %v5932_v22, %v4217_v27  ;;  %6213 = vmatpush3.bf16.msra.mxu0 %v6822_v35  ;;  %4814 = vmatprep.mubr.bf16.mxu1 %v5343_v46  ;;  %v6859_v22 = vld [vmem:[%s8625_s1 + $0x9b0] sm:$0xff]   ;;  %v6870_v35 = vld [vmem:[%s8625_s1 + $0xa00] sm:$0xff]   ;;  %v6881_v46 = vld [vmem:[%s8625_s1 + $0xad8] sm:$0xff]  }
 0x11d   :  { %6235 = vmatpush3.bf16.msra.mxu1 %v6823_v36  ;;  %6214 = vmatprep.subr.bf16.mxu0 %v6824_v37  ;;  %v33_v27 = vld [vmem:[%s8626_s0 + $0x90] sm:$0xff]  ;;  %v6871_v36 = vld [vmem:[%s8625_s1 + $0xa80] sm:$0xff]   ;;  %v6872_v37 = vld [vmem:[%s8625_s1 + $0xa48] sm:$0xff]  }
 0x11e   :  { %6236 = vmatprep.subr.bf16.mxu1 %v6825_v38  ;;  %v5344_v29 = vcombine.low %v33_v27, %v33_v27  ;;  %v5345_v30 = vcombine.high %v33_v27, %v33_v27  ;;  %v6873_v38 = vld [vmem:[%s8625_s1 + $0xac8] sm:$0xff]   ;;  %v6912_v27 = vld [vmem:[%s8625_s1 + $0xb50] sm:$0xff]  }
 0x11f   :  { %v6913_v28 = vld [vmem:[%s8625_s1 + $0xbd0] sm:$0xff]  }
 0x120   :  { %6215 = vmatpush3.bf16.msra.mxu0 %v6826_v39  ;;  %v6874_v39 = vld [vmem:[%s8625_s1 + $0xa08] sm:$0xff]  }
 0x121   :  { %6237 = vmatpush3.bf16.msra.mxu1 %v6827_v40  ;;  %6244 = vmatprep.subr.bf16.mxu0 %v6832_v47  ;;  %v6875_v40 = vld [vmem:[%s8625_s1 + $0xa88] sm:$0xff]   ;;  %v6882_v47 = vld [vmem:[%s8625_s1 + $0xa18] sm:$0xff]  }
 0x122   :  { %6266 = vmatprep.subr.bf16.mxu1 %v6833_v48  ;;  %v6883_v48 = vld [vmem:[%s8625_s1 + $0xa98] sm:$0xff]  }
 0x123   :  { %4775 = vmatmul.mubr.bf16.vlgmr.msra.gmra.mrb[32].mxu0 %v5340_v43  ;;  %v6878_v43 = vld [vmem:[%s8625_s1 + $0xa10] sm:$0xff]  }
 0x124   :  { %4815 = vmatmul.mubr.bf16.vlgmr.msra.gmra.mrb[32].mxu1 %v5342_v45  ;;  %6245 = vmatpush3.bf16.msra.mxu0 %v6834_v49  ;;  %v6880_v45 = vld [vmem:[%s8625_s1 + $0xa58] sm:$0xff]   ;;  %v6884_v49 = vld [vmem:[%s8625_s1 + $0xa60] sm:$0xff]  }
 0x125   :  { %6267 = vmatpush3.bf16.msra.mxu1 %v6835_v50  ;;  %6246 = vmatprep.subr.bf16.mxu0 %v6836_v51  ;;  %v6885_v50 = vld [vmem:[%s8625_s1 + $0xae0] sm:$0xff]  }
 0x126   :  { %6268 = vmatprep.subr.bf16.mxu1 %v6837_v52  ;;  %4854 = vmatprep.mubr.bf16.mxu0 %v5345_v30  ;;  %v6886_v52 = vld [vmem:[%s8625_s1 + $0xa20] sm:$0xff]   ;;  %v6915_v30 = vld [vmem:[%s8625_s1 + $0xb90] sm:$0xff]  }
 0x127   :  { %4894 = vmatprep.mubr.bf16.mxu1 %v5347_v33  ;;  %v6918_v33 = vld [vmem:[%s8625_s1 + $0xb18] sm:$0xff]  }
 0x128   :  { %6247 = vmatpush3.bf16.msra.mxu0 %v6838_v53 }
 0x129   :  { %6269 = vmatpush3.bf16.msra.mxu1 %v6839_v54  ;;  %6248 = vmatprep.subr.bf16.mxu0 %v6840_v55  ;;  %v6887_v54 = vld [vmem:[%s8625_s1 + $0xaa0] sm:$0xff]  }
 0x12a   :  { %6270 = vmatprep.subr.bf16.mxu1 %v6841_v56 }
 0x12c   :  { %6249 = vmatpush3.bf16.msra.mxu0 %v6842_v57  ;;  %v6888_v57 = vld [vmem:[%s8625_s1 + $0xa68] sm:$0xff]  }
 0x12d   :  { %6271 = vmatpush3.bf16.msra.mxu1 %v6843_v58  ;;  %6250 = vmatprep.subr.bf16.mxu0 %v6844_v59 }
 0x12e   :  { %6272 = vmatprep.subr.bf16.mxu1 %v6845_v60  ;;  %v6889_v60 = vld [vmem:[%s8625_s1 + $0xae8] sm:$0xff]  }
 0x130   :  { %6251 = vmatpush3.bf16.msra.mxu0 %v6846_v61 }
 0x131   :  { %6273 = vmatpush3.bf16.msra.mxu1 %v6847_v62  ;;  %6252 = vmatprep.subr.bf16.mxu0 %v6848_v63  ;;  %v6890_v63 = vld [vmem:[%s8625_s1 + $0xa28] sm:$0xff]  }
 0x132   :  { %6274 = vmatprep.subr.bf16.mxu1 %v6849_v0 }
 0x134   :  { %6253 = vmatpush3.bf16.msra.mxu0 %v6850_v2 }
 0x135   :  { %6275 = vmatpush3.bf16.msra.mxu1 %v6851_v4  ;;  %6254 = vmatprep.subr.bf16.mxu0 %v6852_v8  ;;  %v6892_v4 = vld [vmem:[%s8625_s1 + $0xa70] sm:$0xff]  }
 0x136   :  { %v5952_v1 = vpop.f32.mrb[8].mxu0  ;;  %6276 = vmatprep.subr.bf16.mxu1 %v6853_v10  ;;  %v6895_v8 = vld [vmem:[%s8625_s1 + $0xab0] sm:$0xff]   ;;  %v6897_v10 = vld [vmem:[%s8625_s1 + $0xaf8] sm:$0xff]  }
 0x137   :  { %v5974_v3 = vpop.f32.mrb[8].mxu1  ;;  %v5953_v5 = vpop.f32.mrb[9].mxu0 }
 0x138   :  { %v5954_v6 = vadd.f32 %v5953_v5, %v5952_v1  ;;  %v5975_v7 = vpop.f32.mrb[9].mxu1  ;;  %v5955_v11 = vpop.f32.mrb[10].mxu0  ;;  %6255 = vmatpush3.bf16.msra.mxu0 %v6854_v14  ;;  %v6891_v1 = vld [vmem:[%s8625_s1 + $0xaa8] sm:$0xff]  }
 0x139   :  { %v5976_v9 = vadd.f32 %v5975_v7, %v5974_v3  ;;  %v5977_v13 = vpop.f32.mrb[10].mxu1  ;;  %v5956_v16 = vpop.f32.mrb[11].mxu0  ;;  %6277 = vmatpush3.bf16.msra.mxu1 %v6855_v15  ;;  %6256 = vmatprep.subr.bf16.mxu0 %v6856_v19  ;;  %v6894_v7 = vld [vmem:[%s8625_s1 + $0xa30] sm:$0xff]   ;;  %v6898_v11 = vld [vmem:[%s8625_s1 + $0xa38] sm:$0xff]   ;;  %v6904_v19 = vld [vmem:[%s8625_s1 + $0xb40] sm:$0xff]  }
 0x13a   :  { %v4297_v12 = vadd.f32 %v5954_v6, %v7962_v32  ;;  %v5978_v18 = vpop.f32.mrb[11].mxu1  ;;  %6278 = vmatprep.subr.bf16.mxu1 %v6857_v20  ;;  %v6868_v32 = vld [vmem:[%s8625_s1 + $0xa40] sm:$0xff]   ;;  %v6893_v6 = vld [vmem:[%s8625_s1 + $0xaf0] sm:$0xff]   ;;  %v36_v16 = vld [vmem:[%s8626_s0 + $0xa8] sm:$0xff] }
 0x13b   :  { %v35_v13 = vld [vmem:[%s8626_s0 + $0xa0] sm:$0xff]  ;;  %v5351_v18 = vcombine.high %v36_v16, %v36_v16 }
 0x13c   :  { %v8067_v17 = vadd.f32 %v5976_v9, %v4297_v12  ;;  %6257 = vmatpush3.bf16.msra.mxu0 %v6858_v21  ;;  %v6896_v9 = vld [vmem:[%s8625_s1 + $0xa78] sm:$0xff]   ;;  %v5348_v14 = vcombine.low %v35_v13, %v35_v13  ;;  %v5349_v15 = vcombine.high %v35_v13, %v35_v13  ;;  %v6905_v20 = vld [vmem:[%s8625_s1 + $0xbc0] sm:$0xff]   ;;  %v6948_v13 = vld [vmem:[%s8625_s1 + $0xc50] sm:$0xff]  }
 0x13d   :  { %6279 = vmatpush3.bf16.msra.mxu1 %v6859_v22  ;;  %6258 = vmatprep.subr.bf16.mxu0 %v6860_v23  ;;  %v6899_v12 = vld [vmem:[%s8625_s1 + $0xab8] sm:$0xff]   ;;  %v6906_v21 = vld [vmem:[%s8625_s1 + $0xb00] sm:$0xff]   ;;  %v6908_v23 = vld [vmem:[%s8625_s1 + $0xb48] sm:$0xff]  }
 0x13e   :  { %6280 = vmatprep.subr.bf16.mxu1 %v6861_v24  ;;  %v6907_v22 = vld [vmem:[%s8625_s1 + $0xb80] sm:$0xff]   ;;  %v6909_v24 = vld [vmem:[%s8625_s1 + $0xbc8] sm:$0xff]  }
 0x140   :  { %6259 = vmatpush3.bf16.msra.mxu0 %v6862_v25  ;;  %v6910_v25 = vld [vmem:[%s8625_s1 + $0xb08] sm:$0xff]  }
 0x141   :  { %6281 = vmatpush3.bf16.msra.mxu1 %v6863_v26  ;;  %6288 = vmatprep.subr.bf16.mxu0 %v6868_v32  ;;  %v6911_v26 = vld [vmem:[%s8625_s1 + $0xb88] sm:$0xff]   ;;  %v6917_v32 = vld [vmem:[%s8625_s1 + $0xbd8] sm:$0xff]  }
 0x142   :  { %6310 = vmatprep.subr.bf16.mxu1 %v6869_v34  ;;  %v6919_v34 = vld [vmem:[%s8625_s1 + $0xb98] sm:$0xff]  }
 0x143   :  { %4855 = vmatmul.mubr.bf16.vlgmr.msra.gmra.mrb[36].mxu0 %v5344_v29  ;;  %v6914_v29 = vld [vmem:[%s8625_s1 + $0xb10] sm:$0xff]  }
 0x144   :  { %4895 = vmatmul.mubr.bf16.vlgmr.msra.gmra.mrb[36].mxu1 %v5346_v31  ;;  %6289 = vmatpush3.bf16.msra.mxu0 %v6870_v35  ;;  %v6916_v31 = vld [vmem:[%s8625_s1 + $0xb58] sm:$0xff]   ;;  %v6920_v35 = vld [vmem:[%s8625_s1 + $0xb60] sm:$0xff]  }
 0x145   :  { %6311 = vmatpush3.bf16.msra.mxu1 %v6871_v36  ;;  %6290 = vmatprep.subr.bf16.mxu0 %v6872_v37  ;;  %v6921_v36 = vld [vmem:[%s8625_s1 + $0xbe0] sm:$0xff]  }
 0x146   :  { %6312 = vmatprep.subr.bf16.mxu1 %v6873_v38  ;;  %4934 = vmatprep.mubr.bf16.mxu0 %v5349_v15  ;;  %v6922_v38 = vld [vmem:[%s8625_s1 + $0xb20] sm:$0xff]   ;;  %v6950_v15 = vld [vmem:[%s8625_s1 + $0xc10] sm:$0xff]  }
 0x147   :  { %4974 = vmatprep.mubr.bf16.mxu1 %v5351_v18  ;;  %v6953_v18 = vld [vmem:[%s8625_s1 + $0xcd8] sm:$0xff]  }
 0x148   :  { %6291 = vmatpush3.bf16.msra.mxu0 %v6874_v39 }
 0x149   :  { %6313 = vmatpush3.bf16.msra.mxu1 %v6875_v40  ;;  %6292 = vmatprep.subr.bf16.mxu0 %v6876_v41  ;;  %v6923_v40 = vld [vmem:[%s8625_s1 + $0xba0] sm:$0xff]  }
 0x14a   :  { %6314 = vmatprep.subr.bf16.mxu1 %v6877_v42 }
 0x14c   :  { %6293 = vmatpush3.bf16.msra.mxu0 %v6878_v43  ;;  %v6924_v43 = vld [vmem:[%s8625_s1 + $0xb68] sm:$0xff]  }
 0x14d   :  { %6315 = vmatpush3.bf16.msra.mxu1 %v6879_v44  ;;  %6294 = vmatprep.subr.bf16.mxu0 %v6880_v45 }
 0x14e   :  { %6316 = vmatprep.subr.bf16.mxu1 %v6881_v46  ;;  %v6925_v46 = vld [vmem:[%s8625_s1 + $0xbe8] sm:$0xff]  }
 0x150   :  { %6295 = vmatpush3.bf16.msra.mxu0 %v6882_v47 }
 0x151   :  { %6317 = vmatpush3.bf16.msra.mxu1 %v6883_v48  ;;  %6296 = vmatprep.subr.bf16.mxu0 %v6884_v49  ;;  %v6926_v49 = vld [vmem:[%s8625_s1 + $0xb28] sm:$0xff]  }
 0x152   :  { %6318 = vmatprep.subr.bf16.mxu1 %v6885_v50 }
 0x154   :  { %6297 = vmatpush3.bf16.msra.mxu0 %v6886_v52 }
 0x155   :  { %6319 = vmatpush3.bf16.msra.mxu1 %v6887_v54  ;;  %6298 = vmatprep.subr.bf16.mxu0 %v6888_v57  ;;  %v6928_v54 = vld [vmem:[%s8625_s1 + $0xb70] sm:$0xff]  }
 0x156   :  { %v5996_v51 = vpop.f32.mrb[12].mxu0  ;;  %6320 = vmatprep.subr.bf16.mxu1 %v6889_v60  ;;  %v6930_v57 = vld [vmem:[%s8625_s1 + $0xb30] sm:$0xff]   ;;  %v6933_v60 = vld [vmem:[%s8625_s1 + $0xbf8] sm:$0xff]  }
 0x157   :  { %v6018_v53 = vpop.f32.mrb[12].mxu1  ;;  %v5997_v55 = vpop.f32.mrb[13].mxu0 }
 0x158   :  { %v6019_v56 = vpop.f32.mrb[13].mxu1  ;;  %v5998_v58 = vadd.f32 %v5997_v55, %v5996_v51  ;;  %v5999_v61 = vpop.f32.mrb[14].mxu0  ;;  %6299 = vmatpush3.bf16.msra.mxu0 %v6890_v63  ;;  %v6927_v51 = vld [vmem:[%s8625_s1 + $0xba8] sm:$0xff]   ;;  %v37_v63 = vld [vmem:[%s8626_s0 + $0xb0] sm:$0xff] }
 0x159   :  { %v6020_v59 = vadd.f32 %v6019_v56, %v6018_v53  ;;  %v6021_v62 = vpop.f32.mrb[14].mxu1  ;;  %v6000_v2 = vpop.f32.mrb[15].mxu0  ;;  %6321 = vmatpush3.bf16.msra.mxu1 %v6891_v1  ;;  %6300 = vmatprep.subr.bf16.mxu0 %v6892_v4  ;;  %v6929_v56 = vld [vmem:[%s8625_s1 + $0xbf0] sm:$0xff]   ;;  %v6934_v61 = vld [vmem:[%s8625_s1 + $0xb38] sm:$0xff]   ;;  %v5352_v1 = vcombine.low %v37_v63, %v37_v63 }
 0x15a   :  { %v4377_v0 = vadd.f32 %v5998_v58, %v8067_v17  ;;  %v6022_v3 = vpop.f32.mrb[15].mxu1  ;;  %6322 = vmatprep.subr.bf16.mxu1 %v6893_v6  ;;  %v5350_v17 = vcombine.low %v36_v16, %v36_v16  ;;  %v6931_v58 = vld [vmem:[%s8625_s1 + $0xbb0] sm:$0xff]   ;;  %v6935_v62 = vld [vmem:[%s8625_s1 + $0xbb8] sm:$0xff]   ;;  %v5353_v2 = vcombine.high %v37_v63, %v37_v63  ;;  %v6941_v6 = vld [vmem:[%s8625_s1 + $0xcc0] sm:$0xff]  }
 0x15b   :  { %v6951_v16 = vld [vmem:[%s8625_s1 + $0xc90] sm:$0xff]  }
 0x15c   :  { %v8175_v5 = vadd.f32 %v6020_v59, %v4377_v0  ;;  %6301 = vmatpush3.bf16.msra.mxu0 %v6894_v7  ;;  %v6932_v59 = vld [vmem:[%s8625_s1 + $0xb78] sm:$0xff]   ;;  %v6942_v7 = vld [vmem:[%s8625_s1 + $0xc00] sm:$0xff]   ;;  %v6984_v63 = vld [vmem:[%s8625_s1 + $0xd50] sm:$0xff]  }
 0x15d   :  { %6323 = vmatpush3.bf16.msra.mxu1 %v6895_v8  ;;  %6302 = vmatprep.subr.bf16.mxu0 %v6896_v9  ;;  %v38_v0 = vld [vmem:[%s8626_s0 + $0xb8] sm:$0xff]  ;;  %v6943_v8 = vld [vmem:[%s8625_s1 + $0xc80] sm:$0xff]   ;;  %v6944_v9 = vld [vmem:[%s8625_s1 + $0xc48] sm:$0xff]  }
 0x15e   :  { %6324 = vmatprep.subr.bf16.mxu1 %v6897_v10  ;;  %v5354_v3 = vcombine.low %v38_v0, %v38_v0  ;;  %v5355_v4 = vcombine.high %v38_v0, %v38_v0  ;;  %v6945_v10 = vld [vmem:[%s8625_s1 + $0xcc8] sm:$0xff]   ;;  %v6985_v0 = vld [vmem:[%s8625_s1 + $0xdd0] sm:$0xff]  }
 0x160   :  { %6303 = vmatpush3.bf16.msra.mxu0 %v6898_v11  ;;  %v6946_v11 = vld [vmem:[%s8625_s1 + $0xc08] sm:$0xff]  }
 0x161   :  { %6325 = vmatpush3.bf16.msra.mxu1 %v6899_v12  ;;  %6332 = vmatprep.subr.bf16.mxu0 %v6904_v19  ;;  %v6947_v12 = vld [vmem:[%s8625_s1 + $0xc88] sm:$0xff]   ;;  %v6954_v19 = vld [vmem:[%s8625_s1 + $0xc18] sm:$0xff]  }
 0x162   :  { %6354 = vmatprep.subr.bf16.mxu1 %v6905_v20  ;;  %v6955_v20 = vld [vmem:[%s8625_s1 + $0xc98] sm:$0xff]  }
 0x163   :  { %4935 = vmatmul.mubr.bf16.vlgmr.msra.gmra.mrb[40].mxu0 %v5348_v14  ;;  %v6949_v14 = vld [vmem:[%s8625_s1 + $0xcd0] sm:$0xff]  }
 0x164   :  { %4975 = vmatmul.mubr.bf16.vlgmr.msra.gmra.mrb[40].mxu1 %v5350_v17  ;;  %6333 = vmatpush3.bf16.msra.mxu0 %v6906_v21  ;;  %v6952_v17 = vld [vmem:[%s8625_s1 + $0xc58] sm:$0xff]   ;;  %v6956_v21 = vld [vmem:[%s8625_s1 + $0xc60] sm:$0xff]  }
 0x165   :  { %6355 = vmatpush3.bf16.msra.mxu1 %v6907_v22  ;;  %6334 = vmatprep.subr.bf16.mxu0 %v6908_v23  ;;  %v6957_v22 = vld [vmem:[%s8625_s1 + $0xce0] sm:$0xff]  }
 0x166   :  { %6356 = vmatprep.subr.bf16.mxu1 %v6909_v24  ;;  %5014 = vmatprep.mubr.bf16.mxu0 %v5353_v2  ;;  %v6958_v24 = vld [vmem:[%s8625_s1 + $0xc20] sm:$0xff]   ;;  %v6987_v2 = vld [vmem:[%s8625_s1 + $0xd90] sm:$0xff]  }
 0x167   :  { %5054 = vmatprep.mubr.bf16.mxu1 %v5355_v4  ;;  %v6989_v4 = vld [vmem:[%s8625_s1 + $0xdd8] sm:$0xff]  }
 0x168   :  { %6335 = vmatpush3.bf16.msra.mxu0 %v6910_v25 }
 0x169   :  { %6357 = vmatpush3.bf16.msra.mxu1 %v6911_v26  ;;  %6336 = vmatprep.subr.bf16.mxu0 %v6912_v27  ;;  %v6959_v26 = vld [vmem:[%s8625_s1 + $0xca0] sm:$0xff]  }
 0x16a   :  { %6358 = vmatprep.subr.bf16.mxu1 %v6913_v28 }
 0x16c   :  { %6337 = vmatpush3.bf16.msra.mxu0 %v6914_v29 }
 0x16d   :  { %6359 = vmatpush3.bf16.msra.mxu1 %v6915_v30  ;;  %6338 = vmatprep.subr.bf16.mxu0 %v6916_v31  ;;  %v6960_v30 = vld [vmem:[%s8625_s1 + $0xc68] sm:$0xff]  }
 0x16e   :  { %6360 = vmatprep.subr.bf16.mxu1 %v6917_v32  ;;  %v6961_v32 = vld [vmem:[%s8625_s1 + $0xce8] sm:$0xff]  }
 0x170   :  { %6339 = vmatpush3.bf16.msra.mxu0 %v6918_v33 }
 0x171   :  { %6361 = vmatpush3.bf16.msra.mxu1 %v6919_v34  ;;  %6340 = vmatprep.subr.bf16.mxu0 %v6920_v35 }
 0x172   :  { %6362 = vmatprep.subr.bf16.mxu1 %v6921_v36  ;;  %v6962_v36 = vld [vmem:[%s8625_s1 + $0xc28] sm:$0xff]  }
 0x174   :  { %6341 = vmatpush3.bf16.msra.mxu0 %v6922_v38 }
 0x175   :  { %6363 = vmatpush3.bf16.msra.mxu1 %v6923_v40  ;;  %6342 = vmatprep.subr.bf16.mxu0 %v6924_v43  ;;  %v6966_v43 = vld [vmem:[%s8625_s1 + $0xc30] sm:$0xff]  }
 0x176   :  { %v6040_v37 = vpop.f32.mrb[16].mxu0  ;;  %6364 = vmatprep.subr.bf16.mxu1 %v6925_v46  ;;  %v6969_v46 = vld [vmem:[%s8625_s1 + $0xcf8] sm:$0xff]  }
 0x177   :  { %v6062_v39 = vpop.f32.mrb[16].mxu1  ;;  %v6041_v41 = vpop.f32.mrb[17].mxu0 }
 0x178   :  { %v6063_v42 = vpop.f32.mrb[17].mxu1  ;;  %v6042_v44 = vadd.f32 %v6041_v41, %v6040_v37  ;;  %v6043_v47 = vpop.f32.mrb[18].mxu0  ;;  %6343 = vmatpush3.bf16.msra.mxu0 %v6926_v49  ;;  %v6963_v37 = vld [vmem:[%s8625_s1 + $0xca8] sm:$0xff]   ;;  %v6964_v41 = vld [vmem:[%s8625_s1 + $0xc70] sm:$0xff]   ;;  %v39_v49 = vld [vmem:[%s8626_s0 + $0xc0] sm:$0xff] }
 0x179   :  { %v6064_v45 = vadd.f32 %v6063_v42, %v6062_v39  ;;  %v6065_v48 = vpop.f32.mrb[18].mxu1  ;;  %v6044_v52 = vpop.f32.mrb[19].mxu0  ;;  %6365 = vmatpush3.bf16.msra.mxu1 %v6927_v51  ;;  %6344 = vmatprep.subr.bf16.mxu0 %v6928_v54  ;;  %v6965_v42 = vld [vmem:[%s8625_s1 + $0xcf0] sm:$0xff]   ;;  %v6970_v47 = vld [vmem:[%s8625_s1 + $0xc38] sm:$0xff]   ;;  %v5356_v51 = vcombine.low %v39_v49, %v39_v49  ;;  %v6976_v54 = vld [vmem:[%s8625_s1 + $0xd40] sm:$0xff]  }
 0x17a   :  { %v4457_v50 = vadd.f32 %v6042_v44, %v8175_v5  ;;  %v6066_v53 = vpop.f32.mrb[19].mxu1  ;;  %6366 = vmatprep.subr.bf16.mxu1 %v6929_v56  ;;  %v6940_v5 = vld [vmem:[%s8625_s1 + $0xc40] sm:$0xff]   ;;  %v6967_v44 = vld [vmem:[%s8625_s1 + $0xcb0] sm:$0xff]   ;;  %v6971_v48 = vld [vmem:[%s8625_s1 + $0xcb8] sm:$0xff]   ;;  %v5357_v52 = vcombine.high %v39_v49, %v39_v49 }
 0x17b   :  { %v6977_v56 = vld [vmem:[%s8625_s1 + $0xdc0] sm:$0xff]   ;;  %v7020_v49 = vld [vmem:[%s8625_s1 + $0xe50] sm:$0xff]  }
 0x17c   :  { %v8280_v55 = vadd.f32 %v6064_v45, %v4457_v50  ;;  %6345 = vmatpush3.bf16.msra.mxu0 %v6930_v57  ;;  %v6968_v45 = vld [vmem:[%s8625_s1 + $0xc78] sm:$0xff]   ;;  %v40_v50 = vld [vmem:[%s8626_s0 + $0xc8] sm:$0xff]  ;;  %v6978_v57 = vld [vmem:[%s8625_s1 + $0xd00] sm:$0xff]  }
 0x17d   :  { %6367 = vmatpush3.bf16.msra.mxu1 %v6931_v58  ;;  %6346 = vmatprep.subr.bf16.mxu0 %v6932_v59  ;;  %v5358_v53 = vcombine.low %v40_v50, %v40_v50  ;;  %v6979_v58 = vld [vmem:[%s8625_s1 + $0xd80] sm:$0xff]   ;;  %v6980_v59 = vld [vmem:[%s8625_s1 + $0xd48] sm:$0xff]  }
 0x17e   :  { %6368 = vmatprep.subr.bf16.mxu1 %v6933_v60  ;;  %v6981_v60 = vld [vmem:[%s8625_s1 + $0xdc8] sm:$0xff]  }
 0x180   :  { %6347 = vmatpush3.bf16.msra.mxu0 %v6934_v61  ;;  %v6982_v61 = vld [vmem:[%s8625_s1 + $0xd08] sm:$0xff]  }
 0x181   :  { %6369 = vmatpush3.bf16.msra.mxu1 %v6935_v62  ;;  %6376 = vmatprep.subr.bf16.mxu0 %v6940_v5  ;;  %v6983_v62 = vld [vmem:[%s8625_s1 + $0xd88] sm:$0xff]   ;;  %v6990_v5 = vld [vmem:[%s8625_s1 + $0xd18] sm:$0xff]  }
 0x182   :  { %6398 = vmatprep.subr.bf16.mxu1 %v6941_v6  ;;  %v6991_v6 = vld [vmem:[%s8625_s1 + $0xd98] sm:$0xff]  }
 0x183   :  { %5015 = vmatmul.mubr.bf16.vlgmr.msra.gmra.mrb[44].mxu0 %v5352_v1  ;;  %v6986_v1 = vld [vmem:[%s8625_s1 + $0xd10] sm:$0xff]  }
 0x184   :  { %5055 = vmatmul.mubr.bf16.vlgmr.msra.gmra.mrb[44].mxu1 %v5354_v3  ;;  %6377 = vmatpush3.bf16.msra.mxu0 %v6942_v7  ;;  %v6988_v3 = vld [vmem:[%s8625_s1 + $0xd58] sm:$0xff]   ;;  %v6992_v7 = vld [vmem:[%s8625_s1 + $0xd60] sm:$0xff]  }
 0x185   :  { %6399 = vmatpush3.bf16.msra.mxu1 %v6943_v8  ;;  %6378 = vmatprep.subr.bf16.mxu0 %v6944_v9  ;;  %v6993_v8 = vld [vmem:[%s8625_s1 + $0xde0] sm:$0xff]  }
 0x186   :  { %6400 = vmatprep.subr.bf16.mxu1 %v6945_v10  ;;  %5094 = vmatprep.mubr.bf16.mxu0 %v5357_v52  ;;  %v6994_v10 = vld [vmem:[%s8625_s1 + $0xd20] sm:$0xff]   ;;  %v7023_v52 = vld [vmem:[%s8625_s1 + $0xe90] sm:$0xff]  }
 0x188   :  { %6379 = vmatpush3.bf16.msra.mxu0 %v6946_v11 }
 0x189   :  { %6401 = vmatpush3.bf16.msra.mxu1 %v6947_v12  ;;  %6380 = vmatprep.subr.bf16.mxu0 %v6948_v13  ;;  %v6995_v12 = vld [vmem:[%s8625_s1 + $0xda0] sm:$0xff]  }
 0x18a   :  { %6402 = vmatprep.subr.bf16.mxu1 %v6949_v14 }
 0x18c   :  { %6381 = vmatpush3.bf16.msra.mxu0 %v6950_v15  ;;  %v6996_v15 = vld [vmem:[%s8625_s1 + $0xd68] sm:$0xff]  }
 0x18d   :  { %6403 = vmatpush3.bf16.msra.mxu1 %v6951_v16  ;;  %6382 = vmatprep.subr.bf16.mxu0 %v6952_v17 }
 0x18e   :  { %6404 = vmatprep.subr.bf16.mxu1 %v6953_v18  ;;  %v6997_v18 = vld [vmem:[%s8625_s1 + $0xde8] sm:$0xff]  }
 0x190   :  { %6383 = vmatpush3.bf16.msra.mxu0 %v6954_v19 }
 0x191   :  { %6405 = vmatpush3.bf16.msra.mxu1 %v6955_v20  ;;  %6384 = vmatprep.subr.bf16.mxu0 %v6956_v21  ;;  %v6998_v21 = vld [vmem:[%s8625_s1 + $0xd28] sm:$0xff]  }
 0x192   :  { %6406 = vmatprep.subr.bf16.mxu1 %v6957_v22 }
 0x194   :  { %6385 = vmatpush3.bf16.msra.mxu0 %v6958_v24 }
 0x195   :  { %6407 = vmatpush3.bf16.msra.mxu1 %v6959_v26  ;;  %6386 = vmatprep.subr.bf16.mxu0 %v6960_v30  ;;  %v7000_v26 = vld [vmem:[%s8625_s1 + $0xd70] sm:$0xff]  }
 0x196   :  { %v6084_v23 = vpop.f32.mrb[20].mxu0  ;;  %6408 = vmatprep.subr.bf16.mxu1 %v6961_v32  ;;  %v7003_v30 = vld [vmem:[%s8625_s1 + $0xdb0] sm:$0xff]   ;;  %v7005_v32 = vld [vmem:[%s8625_s1 + $0xdf8] sm:$0xff]  }
 0x197   :  { %v6106_v25 = vpop.f32.mrb[20].mxu1  ;;  %v6085_v27 = vpop.f32.mrb[21].mxu0 }
 0x198   :  { %v6086_v28 = vadd.f32 %v6085_v27, %v6084_v23  ;;  %v6107_v29 = vpop.f32.mrb[21].mxu1  ;;  %v6087_v33 = vpop.f32.mrb[22].mxu0  ;;  %6387 = vmatpush3.bf16.msra.mxu0 %v6962_v36  ;;  %v6999_v23 = vld [vmem:[%s8625_s1 + $0xda8] sm:$0xff]  }
 0x199   :  { %v6108_v31 = vadd.f32 %v6107_v29, %v6106_v25  ;;  %v6109_v35 = vpop.f32.mrb[22].mxu1  ;;  %v6088_v38 = vpop.f32.mrb[23].mxu0  ;;  %6409 = vmatpush3.bf16.msra.mxu1 %v6963_v37  ;;  %6388 = vmatprep.subr.bf16.mxu0 %v6964_v41  ;;  %v7002_v29 = vld [vmem:[%s8625_s1 + $0xd30] sm:$0xff]   ;;  %v7006_v33 = vld [vmem:[%s8625_s1 + $0xd38] sm:$0xff]   ;;  %v7012_v41 = vld [vmem:[%s8625_s1 + $0xe40] sm:$0xff]  }
 0x19a   :  { %v4537_v34 = vadd.f32 %v6086_v28, %v8280_v55  ;;  %v6110_v40 = vpop.f32.mrb[23].mxu1  ;;  %6410 = vmatprep.subr.bf16.mxu1 %v6965_v42  ;;  %v5359_v55 = vcombine.high %v40_v50, %v40_v50  ;;  %v7001_v28 = vld [vmem:[%s8625_s1 + $0xdf0] sm:$0xff]   ;;  %v42_v38 = vld [vmem:[%s8626_s0 + $0xd8] sm:$0xff]  ;;  %v7013_v42 = vld [vmem:[%s8625_s1 + $0xec0] sm:$0xff]  }
 0x19b   :  { %v41_v35 = vld [vmem:[%s8626_s0 + $0xd0] sm:$0xff]  ;;  %v5363_v40 = vcombine.high %v42_v38, %v42_v38 }
 0x19c   :  { %v8382_v39 = vadd.f32 %v6108_v31, %v4537_v34  ;;  %6389 = vmatpush3.bf16.msra.mxu0 %v6966_v43  ;;  %5134 = vmatprep.mubr.bf16.mxu1 %v5359_v55  ;;  %v7004_v31 = vld [vmem:[%s8625_s1 + $0xd78] sm:$0xff]   ;;  %v5360_v36 = vcombine.low %v41_v35, %v41_v35  ;;  %v5361_v37 = vcombine.high %v41_v35, %v41_v35  ;;  %v7014_v43 = vld [vmem:[%s8625_s1 + $0xe00] sm:$0xff]   ;;  %v7021_v50 = vld [vmem:[%s8625_s1 + $0xed0] sm:$0xff]  }
 0x19d   :  { %6411 = vmatpush3.bf16.msra.mxu1 %v6967_v44  ;;  %6390 = vmatprep.subr.bf16.mxu0 %v6968_v45  ;;  %v7007_v34 = vld [vmem:[%s8625_s1 + $0xdb8] sm:$0xff]   ;;  %v7015_v44 = vld [vmem:[%s8625_s1 + $0xe80] sm:$0xff]   ;;  %v7016_v45 = vld [vmem:[%s8625_s1 + $0xe48] sm:$0xff]  }
 0x19e   :  { %6412 = vmatprep.subr.bf16.mxu1 %v6969_v46  ;;  %v7017_v46 = vld [vmem:[%s8625_s1 + $0xec8] sm:$0xff]   ;;  %v7026_v55 = vld [vmem:[%s8625_s1 + $0xe18] sm:$0xff]  }
 0x1a0   :  { %6391 = vmatpush3.bf16.msra.mxu0 %v6970_v47  ;;  %v7018_v47 = vld [vmem:[%s8625_s1 + $0xe08] sm:$0xff]  }
 0x1a1   :  { %6413 = vmatpush3.bf16.msra.mxu1 %v6971_v48  ;;  %6420 = vmatprep.subr.bf16.mxu0 %v6976_v54  ;;  %v7019_v48 = vld [vmem:[%s8625_s1 + $0xe88] sm:$0xff]   ;;  %v7025_v54 = vld [vmem:[%s8625_s1 + $0xed8] sm:$0xff]  }
 0x1a2   :  { %6442 = vmatprep.subr.bf16.mxu1 %v6977_v56  ;;  %v7027_v56 = vld [vmem:[%s8625_s1 + $0xe98] sm:$0xff]  }
 0x1a3   :  { %5095 = vmatmul.mubr.bf16.vlgmr.msra.gmra.mrb[48].mxu0 %v5356_v51  ;;  %v7022_v51 = vld [vmem:[%s8625_s1 + $0xe10] sm:$0xff]  }
 0x1a4   :  { %5135 = vmatmul.mubr.bf16.vlgmr.msra.gmra.mrb[48].mxu1 %v5358_v53  ;;  %6421 = vmatpush3.bf16.msra.mxu0 %v6978_v57  ;;  %v7024_v53 = vld [vmem:[%s8625_s1 + $0xe58] sm:$0xff]   ;;  %v7028_v57 = vld [vmem:[%s8625_s1 + $0xe60] sm:$0xff]  }
 0x1a5   :  { %6443 = vmatpush3.bf16.msra.mxu1 %v6979_v58  ;;  %6422 = vmatprep.subr.bf16.mxu0 %v6980_v59  ;;  %v7029_v58 = vld [vmem:[%s8625_s1 + $0xee0] sm:$0xff]  }
 0x1a6   :  { %6444 = vmatprep.subr.bf16.mxu1 %v6981_v60  ;;  %5174 = vmatprep.mubr.bf16.mxu0 %v5361_v37  ;;  %v7030_v60 = vld [vmem:[%s8625_s1 + $0xe20] sm:$0xff]  }
 0x1a7   :  { %5214 = vmatprep.mubr.bf16.mxu1 %v5363_v40 }
 0x1a8   :  { %6423 = vmatpush3.bf16.msra.mxu0 %v6982_v61 }
 0x1a9   :  { %6445 = vmatpush3.bf16.msra.mxu1 %v6983_v62  ;;  %6424 = vmatprep.subr.bf16.mxu0 %v6984_v63  ;;  %v7031_v62 = vld [vmem:[%s8625_s1 + $0xea0] sm:$0xff]  }
 0x1aa   :  { %6446 = vmatprep.subr.bf16.mxu1 %v6985_v0 }
 0x1ac   :  { %6425 = vmatpush3.bf16.msra.mxu0 %v6986_v1  ;;  %v7032_v1 = vld [vmem:[%s8625_s1 + $0xe68] sm:$0xff]  }
 0x1ad   :  { %6447 = vmatpush3.bf16.msra.mxu1 %v6987_v2  ;;  %6426 = vmatprep.subr.bf16.mxu0 %v6988_v3 }
 0x1ae   :  { %6448 = vmatprep.subr.bf16.mxu1 %v6989_v4  ;;  %v7033_v4 = vld [vmem:[%s8625_s1 + $0xee8] sm:$0xff]  }
 0x1b0   :  { %6427 = vmatpush3.bf16.msra.mxu0 %v6990_v5 }
 0x1b1   :  { %6449 = vmatpush3.bf16.msra.mxu1 %v6991_v6  ;;  %6428 = vmatprep.subr.bf16.mxu0 %v6992_v7  ;;  %v7034_v7 = vld [vmem:[%s8625_s1 + $0xe28] sm:$0xff]  }
 0x1b2   :  { %6450 = vmatprep.subr.bf16.mxu1 %v6993_v8 }
 0x1b4   :  { %6429 = vmatpush3.bf16.msra.mxu0 %v6994_v10 }
 0x1b5   :  { %6451 = vmatpush3.bf16.msra.mxu1 %v6995_v12  ;;  %6430 = vmatprep.subr.bf16.mxu0 %v6996_v15  ;;  %v7036_v12 = vld [vmem:[%s8625_s1 + $0xe70] sm:$0xff]  }
 0x1b6   :  { %v6128_v9 = vpop.f32.mrb[24].mxu0  ;;  %6452 = vmatprep.subr.bf16.mxu1 %v6997_v18  ;;  %v7038_v15 = vld [vmem:[%s8625_s1 + $0xe30] sm:$0xff]   ;;  %v7041_v18 = vld [vmem:[%s8625_s1 + $0xef8] sm:$0xff]  }
 0x1b7   :  { %v6150_v11 = vpop.f32.mrb[24].mxu1  ;;  %v6129_v13 = vpop.f32.mrb[25].mxu0 }
 0x1b8   :  { %v6151_v14 = vpop.f32.mrb[25].mxu1  ;;  %v6130_v16 = vadd.f32 %v6129_v13, %v6128_v9  ;;  %v6131_v19 = vpop.f32.mrb[26].mxu0  ;;  %6431 = vmatpush3.bf16.msra.mxu0 %v6998_v21  ;;  %v7035_v9 = vld [vmem:[%s8625_s1 + $0xea8] sm:$0xff]   ;;  %v43_v21 = vld [vmem:[%s8626_s0 + $0xe0] sm:$0xff] }
 0x1b9   :  { %v6152_v17 = vadd.f32 %v6151_v14, %v6150_v11  ;;  %v6153_v20 = vpop.f32.mrb[26].mxu1  ;;  %v6132_v24 = vpop.f32.mrb[27].mxu0  ;;  %6453 = vmatpush3.bf16.msra.mxu1 %v6999_v23  ;;  %6432 = vmatprep.subr.bf16.mxu0 %v7000_v26  ;;  %v7037_v14 = vld [vmem:[%s8625_s1 + $0xef0] sm:$0xff]   ;;  %v7042_v19 = vld [vmem:[%s8625_s1 + $0xe38] sm:$0xff]   ;;  %v5364_v23 = vcombine.low %v43_v21, %v43_v21 }
 0x1ba   :  { %v4617_v22 = vadd.f32 %v6130_v16, %v8382_v39  ;;  %v6154_v25 = vpop.f32.mrb[27].mxu1  ;;  %6454 = vmatprep.subr.bf16.mxu1 %v7001_v28  ;;  %v5362_v39 = vcombine.low %v42_v38, %v42_v38  ;;  %v7039_v16 = vld [vmem:[%s8625_s1 + $0xeb0] sm:$0xff]   ;;  %v7043_v20 = vld [vmem:[%s8625_s1 + $0xeb8] sm:$0xff]   ;;  %v5365_v24 = vcombine.high %v43_v21, %v43_v21 }
 0x1bc   :  { %v8490_v27 = vadd.f32 %v6152_v17, %v4617_v22  ;;  %6433 = vmatpush3.bf16.msra.mxu0 %v7002_v29  ;;  %v7040_v17 = vld [vmem:[%s8625_s1 + $0xe78] sm:$0xff]   ;;  %v44_v22 = vld [vmem:[%s8626_s0 + $0xe8] sm:$0xff] }
 0x1bd   :  { %6455 = vmatpush3.bf16.msra.mxu1 %v7003_v30  ;;  %6434 = vmatprep.subr.bf16.mxu0 %v7004_v31  ;;  %v5366_v25 = vcombine.low %v44_v22, %v44_v22  ;;  %v5367_v26 = vcombine.high %v44_v22, %v44_v22 }
 0x1be   :  { %6456 = vmatprep.subr.bf16.mxu1 %v7005_v32 }
 0x1c0   :  { %6435 = vmatpush3.bf16.msra.mxu0 %v7006_v33 }
 0x1c1   :  { %6457 = vmatpush3.bf16.msra.mxu1 %v7007_v34  ;;  %6464 = vmatprep.subr.bf16.mxu0 %v7012_v41 }
 0x1c2   :  { %6486 = vmatprep.subr.bf16.mxu1 %v7013_v42 }
 0x1c3   :  { %5175 = vmatmul.mubr.bf16.vlgmr.msra.gmra.mrb[52].mxu0 %v5360_v36 }
 0x1c4   :  { %5215 = vmatmul.mubr.bf16.vlgmr.msra.gmra.mrb[52].mxu1 %v5362_v39  ;;  %6465 = vmatpush3.bf16.msra.mxu0 %v7014_v43 }
 0x1c5   :  { %6487 = vmatpush3.bf16.msra.mxu1 %v7015_v44  ;;  %6466 = vmatprep.subr.bf16.mxu0 %v7016_v45 }
 0x1c6   :  { %6488 = vmatprep.subr.bf16.mxu1 %v7017_v46  ;;  %5254 = vmatprep.mubr.bf16.mxu0 %v5365_v24 }
 0x1c7   :  { %5294 = vmatprep.mubr.bf16.mxu1 %v5367_v26 }
 0x1c8   :  { %6467 = vmatpush3.bf16.msra.mxu0 %v7018_v47 }
 0x1c9   :  { %6489 = vmatpush3.bf16.msra.mxu1 %v7019_v48  ;;  %6468 = vmatprep.subr.bf16.mxu0 %v7020_v49 }
 0x1ca   :  { %6490 = vmatprep.subr.bf16.mxu1 %v7021_v50 }
 0x1cc   :  { %6469 = vmatpush3.bf16.msra.mxu0 %v7022_v51 }
 0x1cd   :  { %6491 = vmatpush3.bf16.msra.mxu1 %v7023_v52  ;;  %6470 = vmatprep.subr.bf16.mxu0 %v7024_v53 }
 0x1ce   :  { %6492 = vmatprep.subr.bf16.mxu1 %v7025_v54 }
 0x1d0   :  { %6471 = vmatpush3.bf16.msra.mxu0 %v7026_v55 }
 0x1d1   :  { %6493 = vmatpush3.bf16.msra.mxu1 %v7027_v56  ;;  %6472 = vmatprep.subr.bf16.mxu0 %v7028_v57 }
 0x1d2   :  { %6494 = vmatprep.subr.bf16.mxu1 %v7029_v58 }
 0x1d4   :  { %6473 = vmatpush3.bf16.msra.mxu0 %v7030_v60 }
 0x1d5   :  { %6495 = vmatpush3.bf16.msra.mxu1 %v7031_v62  ;;  %6474 = vmatprep.subr.bf16.mxu0 %v7032_v1 }
 0x1d6   :  { %v6172_v59 = vpop.f32.mrb[28].mxu0  ;;  %6496 = vmatprep.subr.bf16.mxu1 %v7033_v4 }
 0x1d7   :  { %v6194_v61 = vpop.f32.mrb[28].mxu1  ;;  %v6173_v63 = vpop.f32.mrb[29].mxu0 }
 0x1d8   :  { %v6195_v0 = vpop.f32.mrb[29].mxu1  ;;  %v6174_v2 = vadd.f32 %v6173_v63, %v6172_v59  ;;  %v6175_v5 = vpop.f32.mrb[30].mxu0  ;;  %6475 = vmatpush3.bf16.msra.mxu0 %v7034_v7 }
 0x1d9   :  { %v6196_v3 = vadd.f32 %v6195_v0, %v6194_v61  ;;  %v6197_v6 = vpop.f32.mrb[30].mxu1  ;;  %v6176_v10 = vpop.f32.mrb[31].mxu0  ;;  %6497 = vmatpush3.bf16.msra.mxu1 %v7035_v9  ;;  %6476 = vmatprep.subr.bf16.mxu0 %v7036_v12 }
 0x1da   :  { %v4697_v8 = vadd.f32 %v6174_v2, %v8490_v27  ;;  %v6198_v11 = vpop.f32.mrb[31].mxu1  ;;  %6498 = vmatprep.subr.bf16.mxu1 %v7037_v14 }
 0x1dc   :  { %v4737_v13 = vadd.f32 %v6196_v3, %v4697_v8  ;;  %6477 = vmatpush3.bf16.msra.mxu0 %v7038_v15 }
 0x1dd   :  { %6499 = vmatpush3.bf16.msra.mxu1 %v7039_v16  ;;  %6478 = vmatprep.subr.bf16.mxu0 %v7040_v17 }
 0x1de   :  { %6500 = vmatprep.subr.bf16.mxu1 %v7041_v18 }
 0x1e0   :  { %6479 = vmatpush3.bf16.msra.mxu0 %v7042_v19 }
 0x1e1   :  { %6501 = vmatpush3.bf16.msra.mxu1 %v7043_v20 }
 0x1e3   :  { %5255 = vmatmul.mubr.bf16.vlgmr.msra.gmra.mrb[56].mxu0 %v5364_v23 }
 0x1e4   :  { %5295 = vmatmul.mubr.bf16.vlgmr.msra.gmra.mrb[56].mxu1 %v5366_v25 }
 0x1f6   :  { %v6216_v27 = vpop.f32.mrb[32].mxu0 }
 0x1f7   :  { %v6238_v28 = vpop.f32.mrb[32].mxu1  ;;  %v6217_v29 = vpop.f32.mrb[33].mxu0 }
 0x1f8   :  { %v6218_v30 = vadd.f32 %v6217_v29, %v6216_v27  ;;  %v6239_v31 = vpop.f32.mrb[33].mxu1  ;;  %v6219_v32 = vpop.f32.mrb[34].mxu0 }
 0x1f9   :  { %v6240_v33 = vadd.f32 %v6239_v31, %v6238_v28  ;;  %v6241_v34 = vpop.f32.mrb[34].mxu1  ;;  %v6220_v35 = vpop.f32.mrb[35].mxu0 }
 0x1fa   :  { %v4777_v36 = vadd.f32 %v6218_v30, %v4737_v13  ;;  %v6242_v37 = vpop.f32.mrb[35].mxu1 }
 0x1fc   :  { %v4817_v38 = vadd.f32 %v6240_v33, %v4777_v36 }
 0x216   :  { %v6260_v39 = vpop.f32.mrb[36].mxu0 }
 0x217   :  { %v6282_v40 = vpop.f32.mrb[36].mxu1  ;;  %v6261_v41 = vpop.f32.mrb[37].mxu0 }
 0x218   :  { %v6262_v42 = vadd.f32 %v6261_v41, %v6260_v39  ;;  %v6283_v43 = vpop.f32.mrb[37].mxu1  ;;  %v6263_v44 = vpop.f32.mrb[38].mxu0 }
 0x219   :  { %v6284_v45 = vadd.f32 %v6283_v43, %v6282_v40  ;;  %v6285_v46 = vpop.f32.mrb[38].mxu1  ;;  %v6264_v47 = vpop.f32.mrb[39].mxu0 }
 0x21a   :  { %v4857_v48 = vadd.f32 %v6262_v42, %v4817_v38  ;;  %v6286_v49 = vpop.f32.mrb[39].mxu1 }
 0x21c   :  { %v4897_v50 = vadd.f32 %v6284_v45, %v4857_v48 }
 0x236   :  { %v6304_v51 = vpop.f32.mrb[40].mxu0 }
 0x237   :  { %v6326_v52 = vpop.f32.mrb[40].mxu1  ;;  %v6305_v53 = vpop.f32.mrb[41].mxu0 }
 0x238   :  { %v6327_v54 = vpop.f32.mrb[41].mxu1  ;;  %v6306_v55 = vadd.f32 %v6305_v53, %v6304_v51  ;;  %v6307_v57 = vpop.f32.mrb[42].mxu0 }
 0x239   :  { %v6328_v56 = vadd.f32 %v6327_v54, %v6326_v52  ;;  %v6329_v58 = vpop.f32.mrb[42].mxu1  ;;  %v6308_v59 = vpop.f32.mrb[43].mxu0 }
 0x23a   :  { %v6330_v60 = vpop.f32.mrb[43].mxu1  ;;  %v4937_v61 = vadd.f32 %v6306_v55, %v4897_v50 }
 0x23c   :  { %v4977_v62 = vadd.f32 %v6328_v56, %v4937_v61 }
 0x256   :  { %v6348_v63 = vpop.f32.mrb[44].mxu0 }
 0x257   :  { %v6370_v0 = vpop.f32.mrb[44].mxu1  ;;  %v6349_v1 = vpop.f32.mrb[45].mxu0 }
 0x258   :  { %v6350_v2 = vadd.f32 %v6349_v1, %v6348_v63  ;;  %v6371_v3 = vpop.f32.mrb[45].mxu1  ;;  %v6351_v4 = vpop.f32.mrb[46].mxu0 }
 0x259   :  { %v6372_v5 = vadd.f32 %v6371_v3, %v6370_v0  ;;  %v6373_v6 = vpop.f32.mrb[46].mxu1  ;;  %v6352_v7 = vpop.f32.mrb[47].mxu0 }
 0x25a   :  { %v5017_v8 = vadd.f32 %v6350_v2, %v4977_v62  ;;  %v6374_v9 = vpop.f32.mrb[47].mxu1 }
 0x25c   :  { %v5057_v10 = vadd.f32 %v6372_v5, %v5017_v8 }
 0x276   :  { %v6392_v11 = vpop.f32.mrb[48].mxu0 }
 0x277   :  { %v6414_v12 = vpop.f32.mrb[48].mxu1  ;;  %v6393_v13 = vpop.f32.mrb[49].mxu0 }
 0x278   :  { %v6394_v14 = vadd.f32 %v6393_v13, %v6392_v11  ;;  %v6415_v15 = vpop.f32.mrb[49].mxu1  ;;  %v6395_v16 = vpop.f32.mrb[50].mxu0 }
 0x279   :  { %v6416_v17 = vadd.f32 %v6415_v15, %v6414_v12  ;;  %v6417_v18 = vpop.f32.mrb[50].mxu1  ;;  %v6396_v19 = vpop.f32.mrb[51].mxu0 }
 0x27a   :  { %v5097_v20 = vadd.f32 %v6394_v14, %v5057_v10  ;;  %v6418_v21 = vpop.f32.mrb[51].mxu1 }
 0x27c   :  { %v5137_v22 = vadd.f32 %v6416_v17, %v5097_v20 }
 0x296   :  { %v6436_v23 = vpop.f32.mrb[52].mxu0 }
 0x297   :  { %v6458_v24 = vpop.f32.mrb[52].mxu1  ;;  %v6437_v25 = vpop.f32.mrb[53].mxu0 }
 0x298   :  { %v6459_v26 = vpop.f32.mrb[53].mxu1  ;;  %v6438_v27 = vadd.f32 %v6437_v25, %v6436_v23  ;;  %v6439_v29 = vpop.f32.mrb[54].mxu0 }
 0x299   :  { %v6460_v28 = vadd.f32 %v6459_v26, %v6458_v24  ;;  %v6461_v30 = vpop.f32.mrb[54].mxu1  ;;  %v6440_v31 = vpop.f32.mrb[55].mxu0 }
 0x29a   :  { %v6462_v32 = vpop.f32.mrb[55].mxu1  ;;  %v5177_v33 = vadd.f32 %v6438_v27, %v5137_v22 }
 0x29c   :  { %v5217_v34 = vadd.f32 %v6460_v28, %v5177_v33 }
 0x2b6   :  { %v6480_v35 = vpop.f32.mrb[56].mxu0 }
 0x2b7   :  { %v6502_v36 = vpop.f32.mrb[56].mxu1  ;;  %v6481_v37 = vpop.f32.mrb[57].mxu0 }
 0x2b8   :  { %v6482_v38 = vadd.f32 %v6481_v37, %v6480_v35  ;;  %v6503_v39 = vpop.f32.mrb[57].mxu1  ;;  %v6483_v40 = vpop.f32.mrb[58].mxu0 }
 0x2b9   :  { %v6504_v41 = vadd.f32 %v6503_v39, %v6502_v36  ;;  %v6505_v42 = vpop.f32.mrb[58].mxu1  ;;  %v6484_v43 = vpop.f32.mrb[59].mxu0 }
 0x2ba   :  { %v5257_v44 = vadd.f32 %v6482_v38, %v5217_v34  ;;  %v6506_v45 = vpop.f32.mrb[59].mxu1 }
 0x2bc   :  { %v5297_v46 = vadd.f32 %v6504_v41, %v5257_v44 }
 0x2be   :  { %5302 = vst [vmem:[%s8628_s3] sm:$0xff] %v5297_v46 }

</bundles_post_ra>
